<compile_context>
chip_gen: v5e
topology: v5e:2x2
jax: 0.10.0
libtpu: 0.0.40
codegen_flags: <defaults>
</compile_context>

<pallas_src>
import functools

import jax
import jax.numpy as jnp
import numpy as np
from jax.experimental import pallas as pl
from jax.experimental.pallas import tpu as pltpu

LEAKY_SLOPE = 0.01   # nn.LeakyReLU default
LN_EPS = 1e-5        # nn.LayerNorm default
LANE = 128


def _round_up(x, m):
    return (x + m - 1) // m * m


def _num_tensorcores():
    """Batch tiles per chip: 2 on v7x (2 TensorCores), 1 on v5e/v6e (single TC)."""
    try:
        kind = jax.devices()[0].device_kind.lower()
    except Exception:
        return 1
    return 2 if "v7" in kind else 1


def _hidden_block(x, w, b, *, h_real, matmul_dtype):
    """Linear -> LeakyReLU -> LayerNorm (no affine: gamma/beta folded into next linear)."""
    h_pad = w.shape[-1]
    # Linear: MXU matmul in matmul_dtype with f32 accumulation; bias add in f32.
    h = jnp.dot(x.astype(matmul_dtype), w.astype(matmul_dtype),
                preferred_element_type=jnp.float32) + b
    # LeakyReLU in f32 (VPU).
    h = jnp.where(h >= 0, h, LEAKY_SLOPE * h)
    # Padded weight cols / bias lanes are exactly zero, so padded h lanes are zero and
    # the full-lane sum already equals the real-width sum.  Mask the centered values so
    # the variance only sees real columns, and divide by the real width.
    lane = jax.lax.broadcasted_iota(jnp.int32, (1, h_pad), 1)
    mask = lane < h_real
    inv_n = 1.0 / float(h_real)
    mu = jnp.sum(h, axis=-1, keepdims=True) * inv_n
    d = jnp.where(mask, h - mu, 0.0)
    var = jnp.sum(d * d, axis=-1, keepdims=True) * inv_n
    return d * jax.lax.rsqrt(var + LN_EPS)      # padded lanes stay exactly 0


def mlp_kernel(x_ref, w1_ref, b1_ref, w2_ref, b2_ref, wo_ref, bo_ref, o_ref, *,
               h1_real, h2_real, matmul_dtype):
    h = _hidden_block(x_ref[...], w1_ref[...], b1_ref[...],
                      h_real=h1_real, matmul_dtype=matmul_dtype)
    h = _hidden_block(h, w2_ref[...], b2_ref[...],
                      h_real=h2_real, matmul_dtype=matmul_dtype)
    out = jnp.dot(h.astype(matmul_dtype), wo_ref[...].astype(matmul_dtype),
                  preferred_element_type=jnp.float32) + bo_ref[...]
    o_ref[...] = out.astype(o_ref.dtype)        # lane-dense store (padded out dim % 128 == 0)


def prepare_params(raw, *, matmul_dtype=jnp.bfloat16):
    """Fold LN affine into downstream linears, zero-pad feature dims to 128 lanes, cast
    matmul weights to matmul_dtype.  One-time offline transform (exact, done in f32).

    NOTE: the in-kernel LayerNorm mean trick relies on padded bias lanes and padded
    weight columns being exactly zero -- guaranteed by jnp.pad below; don't bypass it.
    """
    in_dim, h1 = raw["w1"].shape
    h2 = raw["w2"].shape[1]
    out_dim = raw["wo"].shape[1]
    in_p = _round_up(in_dim, LANE)
    h1p, h2p, op = _round_up(h1, LANE), _round_up(h2, LANE), _round_up(out_dim, LANE)

    # (hn * g + be) @ W + b  ==  hn @ (g^T * W) + (be @ W + b)
    w2 = raw["g1"].reshape(h1, 1) * raw["w2"]
    b2 = raw["be1"] @ raw["w2"] + raw["b2"]
    wo = raw["g2"].reshape(h2, 1) * raw["wo"]
    bo = raw["be2"] @ raw["wo"] + raw["bo"]

    def pad2(a, rows, cols):
        return jnp.pad(a, ((0, rows - a.shape[0]), (0, cols - a.shape[1])))

    p = dict(
        w1=pad2(raw["w1"], in_p, h1p).astype(matmul_dtype), b1=pad2(raw["b1"], 1, h1p),
        w2=pad2(w2, h1p, h2p).astype(matmul_dtype),         b2=pad2(b2, 1, h2p),
        wo=pad2(wo, h2p, op).astype(matmul_dtype),          bo=pad2(bo, 1, op),
    )
    dims = dict(in_dim=in_dim, h1=h1, h2=h2, out_dim=out_dim,
                in_p=in_p, h1p=h1p, h2p=h2p, op=op)
    return p, dims


def mlp_forward(x, p, dims, *, num_cores=None, max_tile=1024,
                matmul_dtype=jnp.bfloat16, out_dtype=jnp.float32):
    """x: (B, in_dim) f32.  p, dims from prepare_params.  Returns (B, out_dim) out_dtype."""
    B, in_dim = x.shape
    assert in_dim == dims["in_dim"]
    in_p, h1p, h2p, op = dims["in_p"], dims["h1p"], dims["h2p"], dims["op"]

    # One batch tile per TensorCore; split further only if a per-core tile would exceed
    # max_tile rows (keeps VMEM well under the 16 MiB v5e scoped default for huge B).
    if num_cores is None:
        num_cores = _num_tensorcores()
    n_tiles = num_cores * pl.cdiv(pl.cdiv(B, num_cores), max_tile)
    tb = _round_up(pl.cdiv(B, n_tiles), 8)      # <= 7 wasted rows for odd B
    B_pad = n_tiles * tb
    if B_pad != B or in_p != in_dim:
        x = jnp.pad(x, ((0, B_pad - B), (0, in_p - in_dim)))
    x = x.astype(matmul_dtype)                  # bf16 halves the dominant x HBM read

    kernel = functools.partial(mlp_kernel, h1_real=dims["h1"], h2_real=dims["h2"],
                               matmul_dtype=matmul_dtype)
    args = (x, p["w1"], p["b1"], p["w2"], p["b2"], p["wo"], p["bo"])

    def build(resident_mode):
        def full(shape):  # constant block index -> resident in VMEM across grid steps
            if resident_mode is None:
                return pl.BlockSpec(shape, lambda i: (0, 0))
            return pl.BlockSpec(shape, lambda i: (0, 0), pipeline_mode=resident_mode)
        return pl.pallas_call(
            kernel,
            out_shape=jax.ShapeDtypeStruct((B_pad, op), out_dtype),
            grid_spec=pl.GridSpec(
                grid=(n_tiles,),
                in_specs=[
                    pl.BlockSpec((tb, in_p), lambda i: (i, 0)),   # x tile streams over batch
                    full((in_p, h1p)), full((1, h1p)),
                    full((h1p, h2p)), full((1, h2p)),
                    full((h2p, op)), full((1, op)),
                ],
                out_specs=pl.BlockSpec((tb, op), lambda i: (i, 0)),  # lane-dense output
            ),
            compiler_params=pltpu.CompilerParams(
                dimension_semantics=("parallel",)),               # batch tiles shard across TCs
        )

    try:
        # Resident params never change block index -> a single buffer is enough.
        out = build(pl.Buffered(1))(*args)
    except Exception:
        # Fallback for jax versions that only support the default double-buffered path.
        out = build(None)(*args)
    return out[:B, :dims["out_dim"]]


def init_params(key, in_dim, hidden, out_dim, *, random_ln_affine=False):
    """Deterministic synthetic init (PyTorch-style kaiming-uniform range)."""
    ks = jax.random.split(key, 4)
    h1, h2 = hidden

    def lin(k, fan_in, fan_out):
        bound = 1.0 / np.sqrt(fan_in)
        kw, kb = jax.random.split(k)
        w = jax.random.uniform(kw, (fan_in, fan_out), jnp.float32, -bound, bound)
        b = jax.random.uniform(kb, (1, fan_out), jnp.float32, -bound, bound)
        return w, b

    w1, b1 = lin(ks[0], in_dim, h1)
    w2, b2 = lin(ks[1], h1, h2)
    wo, bo = lin(ks[2], h2, out_dim)
    if random_ln_affine:   # non-default LN affine -> exercises the offline gamma/beta fold
        k1, k2, k3, k4 = jax.random.split(ks[3], 4)
        g1 = jax.random.uniform(k1, (1, h1), jnp.float32, 0.5, 1.5)
        be1 = jax.random.uniform(k2, (1, h1), jnp.float32, -0.2, 0.2)
        g2 = jax.random.uniform(k3, (1, h2), jnp.float32, 0.5, 1.5)
        be2 = jax.random.uniform(k4, (1, h2), jnp.float32, -0.2, 0.2)
    else:                  # PyTorch nn.LayerNorm default init (ones / zeros)
        g1, be1 = jnp.ones((1, h1), jnp.float32), jnp.zeros((1, h1), jnp.float32)
        g2, be2 = jnp.ones((1, h2), jnp.float32), jnp.zeros((1, h2), jnp.float32)
    return dict(w1=w1, b1=b1, g1=g1, be1=be1,
                w2=w2, b2=b2, g2=g2, be2=be2, wo=wo, bo=bo)


def mlp_reference(x, raw):
    """Plain-JAX f32 reference of the PyTorch forward (unfused, unpadded params)."""
    def hid(x, w, b, g, be):
        h = x @ w + b
        h = jnp.where(h >= 0, h, LEAKY_SLOPE * h)
        mu = h.mean(-1, keepdims=True)
        var = ((h - mu) ** 2).mean(-1, keepdims=True)
        return (h - mu) * jax.lax.rsqrt(var + LN_EPS) * g + be

    h = hid(x, raw["w1"], raw["b1"], raw["g1"], raw["be1"])
    h = hid(h, raw["w2"], raw["b2"], raw["g2"], raw["be2"])
    return h @ raw["wo"] + raw["bo"]


if __name__ == "__main__":
    key = jax.random.PRNGKey(0)
    kx, kp, kx2, kp2 = jax.random.split(key, 4)

    # Module defaults: in_dim=784, hidden=[32, 32], out_dim=10.
    B, in_dim, hidden, out_dim = 256, 784, [32, 32], 10
    x = jax.random.normal(kx, (B, in_dim), jnp.float32)
    raw = init_params(kp, in_dim, hidden, out_dim)          # PyTorch-default LN affine
    ref = mlp_reference(x, raw)

    # 1) Exact-f32 matmul path (bit-accuracy comparisons).
    p_f32, dims = prepare_params(raw, matmul_dtype=jnp.float32)
    out_f32 = jax.block_until_ready(mlp_forward(x, p_f32, dims, matmul_dtype=jnp.float32))
    np.testing.assert_allclose(np.asarray(out_f32), np.asarray(ref), rtol=1e-4, atol=1e-4)

    # 2) Default bf16-matmul path (recommended on v5e / v6e / v7x).
    p_bf16, _ = prepare_params(raw, matmul_dtype=jnp.bfloat16)
    out_bf16 = jax.block_until_ready(mlp_forward(x, p_bf16, dims))
    np.testing.assert_allclose(np.asarray(out_bf16), np.asarray(ref), rtol=5e-2, atol=5e-2)

    # 3) Ragged batch + non-default LN affine: exercises the minimal-waste batch tiling
    #    (at most 7 junk rows) and the offline gamma/beta fold into the next linear.
    B2 = 52
    x2 = jax.random.normal(kx2, (B2, in_dim), jnp.float32)
    raw2 = init_params(kp2, in_dim, hidden, out_dim, random_ln_affine=True)
    p2, dims2 = prepare_params(raw2, matmul_dtype=jnp.bfloat16)
    out2 = jax.block_until_ready(mlp_forward(x2, p2, dims2))
    np.testing.assert_allclose(np.asarray(out2), np.asarray(mlp_reference(x2, raw2)),
                               rtol=5e-2, atol=5e-2)

    print("KERNEL_OK")
</pallas_src>

<mosaic_0001>
module attributes {stable_mosaic.version = 11 : i64} {
  func.func @mlp_kernel(%arg0: i32, %arg1: memref<256x896xf32, #tpu.memory_space<vmem>>, %arg2: memref<896x128xf32, #tpu.memory_space<vmem>>, %arg3: memref<1x128xf32, #tpu.memory_space<vmem>>, %arg4: memref<128x128xf32, #tpu.memory_space<vmem>>, %arg5: memref<1x128xf32, #tpu.memory_space<vmem>>, %arg6: memref<128x128xf32, #tpu.memory_space<vmem>>, %arg7: memref<1x128xf32, #tpu.memory_space<vmem>>, %arg8: memref<256x128xf32, #tpu.memory_space<vmem>>) attributes {dimension_semantics = [#tpu.dimension_semantics<parallel>], iteration_bounds = array<i64: 1>, scalar_prefetch = 0 : i64, scratch_operands = 0 : i64, tpu.core_type = #tpu.core_type<tc>, window_params = [{transform_indices = @transform_0, window_bounds = array<i64: 256, 896>}, {pipeline_mode = #tpu.pipeline_mode<synchronous>, transform_indices = @transform_1, window_bounds = array<i64: 896, 128>}, {pipeline_mode = #tpu.pipeline_mode<synchronous>, transform_indices = @transform_2, window_bounds = array<i64: 1, 128>}, {pipeline_mode = #tpu.pipeline_mode<synchronous>, transform_indices = @transform_3, window_bounds = array<i64: 128, 128>}, {pipeline_mode = #tpu.pipeline_mode<synchronous>, transform_indices = @transform_4, window_bounds = array<i64: 1, 128>}, {pipeline_mode = #tpu.pipeline_mode<synchronous>, transform_indices = @transform_5, window_bounds = array<i64: 128, 128>}, {pipeline_mode = #tpu.pipeline_mode<synchronous>, transform_indices = @transform_6, window_bounds = array<i64: 1, 128>}, {transform_indices = @transform_7, window_bounds = array<i64: 256, 128>}]} {
    %c0 = arith.constant 0 : index
    %c0_0 = arith.constant 0 : index
    %0 = vector.load %arg1[%c0, %c0_0] : memref<256x896xf32, #tpu.memory_space<vmem>>, vector<256x896xf32>
    %c0_1 = arith.constant 0 : index
    %c0_2 = arith.constant 0 : index
    %1 = vector.load %arg2[%c0_1, %c0_2] : memref<896x128xf32, #tpu.memory_space<vmem>>, vector<896x128xf32>
    %c0_3 = arith.constant 0 : index
    %c0_4 = arith.constant 0 : index
    %2 = vector.load %arg3[%c0_3, %c0_4] : memref<1x128xf32, #tpu.memory_space<vmem>>, vector<1x128xf32>
    %cst = arith.constant dense<0.000000e+00> : vector<256x128xf32>
    %3 = tpu.matmul %0, %1, %cst {dimension_numbers = #tpu.dot_dimension_numbers<[1], [0], [0], [1], [0, 0, 1, 1], [], []>} : vector<256x896xf32>, vector<896x128xf32>, vector<256x128xf32> -> vector<256x128xf32>
    %4 = vector.broadcast %2 : vector<1x128xf32> to vector<256x128xf32>
    %5 = arith.addf %3, %4 : vector<256x128xf32>
    %cst_5 = arith.constant 0.000000e+00 : f32
    %6 = vector.broadcast %cst_5 : f32 to vector<256x128xf32>
    %7 = arith.cmpf oge, %5, %6 : vector<256x128xf32>
    %cst_6 = arith.constant 0.00999999977 : f32
    %8 = vector.broadcast %cst_6 : f32 to vector<256x128xf32>
    %9 = arith.mulf %8, %5 : vector<256x128xf32>
    %10 = arith.select %7, %5, %9 : vector<256x128xi1>, vector<256x128xf32>
    %11 = tpu.iota {dimensions = array<i32: 1>} : vector<1x128xi32>
    %c32_i32 = arith.constant 32 : i32
    %12 = vector.broadcast %c32_i32 : i32 to vector<1x128xi32>
    %13 = arith.cmpi slt, %11, %12 : vector<1x128xi32>
    %cst_7 = arith.constant dense<0.000000e+00> : vector<256xf32>
    %14 = vector.multi_reduction <add>, %10, %cst_7 [1] : vector<256x128xf32> to vector<256xf32>
    %15 = vector.shape_cast %14 : vector<256xf32> to vector<256x1xf32>
    %cst_8 = arith.constant 3.125000e-02 : f32
    %16 = vector.broadcast %cst_8 : f32 to vector<256x1xf32>
    %17 = arith.mulf %15, %16 : vector<256x1xf32>
    %18 = vector.broadcast %17 : vector<256x1xf32> to vector<256x128xf32>
    %19 = arith.subf %10, %18 : vector<256x128xf32>
    %cst_9 = arith.constant 0.000000e+00 : f32
    %20 = vector.shape_cast %13 : vector<1x128xi1> to vector<1x128xi1>
    %21 = vector.broadcast %20 : vector<1x128xi1> to vector<256x128xi1>
    %22 = vector.broadcast %cst_9 : f32 to vector<256x128xf32>
    %23 = arith.select %21, %19, %22 : vector<256x128xi1>, vector<256x128xf32>
    %24 = arith.mulf %23, %23 : vector<256x128xf32>
    %cst_10 = arith.constant dense<0.000000e+00> : vector<256xf32>
    %25 = vector.multi_reduction <add>, %24, %cst_10 [1] : vector<256x128xf32> to vector<256xf32>
    %26 = vector.shape_cast %25 : vector<256xf32> to vector<256x1xf32>
    %cst_11 = arith.constant 3.125000e-02 : f32
    %27 = vector.broadcast %cst_11 : f32 to vector<256x1xf32>
    %28 = arith.mulf %26, %27 : vector<256x1xf32>
    %cst_12 = arith.constant 9.99999974E-6 : f32
    %29 = vector.broadcast %cst_12 : f32 to vector<256x1xf32>
    %30 = arith.addf %28, %29 : vector<256x1xf32>
    %31 = math.rsqrt %30 : vector<256x1xf32>
    %32 = vector.broadcast %31 : vector<256x1xf32> to vector<256x128xf32>
    %33 = arith.mulf %23, %32 : vector<256x128xf32>
    %c0_13 = arith.constant 0 : index
    %c0_14 = arith.constant 0 : index
    %34 = vector.load %arg4[%c0_13, %c0_14] : memref<128x128xf32, #tpu.memory_space<vmem>>, vector<128x128xf32>
    %c0_15 = arith.constant 0 : index
    %c0_16 = arith.constant 0 : index
    %35 = vector.load %arg5[%c0_15, %c0_16] : memref<1x128xf32, #tpu.memory_space<vmem>>, vector<1x128xf32>
    %cst_17 = arith.constant dense<0.000000e+00> : vector<256x128xf32>
    %36 = tpu.matmul %33, %34, %cst_17 {dimension_numbers = #tpu.dot_dimension_numbers<[1], [0], [0], [1], [0, 0, 1, 1], [], []>} : vector<256x128xf32>, vector<128x128xf32>, vector<256x128xf32> -> vector<256x128xf32>
    %37 = vector.broadcast %35 : vector<1x128xf32> to vector<256x128xf32>
    %38 = arith.addf %36, %37 : vector<256x128xf32>
    %cst_18 = arith.constant 0.000000e+00 : f32
    %39 = vector.broadcast %cst_18 : f32 to vector<256x128xf32>
    %40 = arith.cmpf oge, %38, %39 : vector<256x128xf32>
    %cst_19 = arith.constant 0.00999999977 : f32
    %41 = vector.broadcast %cst_19 : f32 to vector<256x128xf32>
    %42 = arith.mulf %41, %38 : vector<256x128xf32>
    %43 = arith.select %40, %38, %42 : vector<256x128xi1>, vector<256x128xf32>
    %44 = tpu.iota {dimensions = array<i32: 1>} : vector<1x128xi32>
    %c32_i32_20 = arith.constant 32 : i32
    %45 = vector.broadcast %c32_i32_20 : i32 to vector<1x128xi32>
    %46 = arith.cmpi slt, %44, %45 : vector<1x128xi32>
    %cst_21 = arith.constant dense<0.000000e+00> : vector<256xf32>
    %47 = vector.multi_reduction <add>, %43, %cst_21 [1] : vector<256x128xf32> to vector<256xf32>
    %48 = vector.shape_cast %47 : vector<256xf32> to vector<256x1xf32>
    %cst_22 = arith.constant 3.125000e-02 : f32
    %49 = vector.broadcast %cst_22 : f32 to vector<256x1xf32>
    %50 = arith.mulf %48, %49 : vector<256x1xf32>
    %51 = vector.broadcast %50 : vector<256x1xf32> to vector<256x128xf32>
    %52 = arith.subf %43, %51 : vector<256x128xf32>
    %cst_23 = arith.constant 0.000000e+00 : f32
    %53 = vector.shape_cast %46 : vector<1x128xi1> to vector<1x128xi1>
    %54 = vector.broadcast %53 : vector<1x128xi1> to vector<256x128xi1>
    %55 = vector.broadcast %cst_23 : f32 to vector<256x128xf32>
    %56 = arith.select %54, %52, %55 : vector<256x128xi1>, vector<256x128xf32>
    %57 = arith.mulf %56, %56 : vector<256x128xf32>
    %cst_24 = arith.constant dense<0.000000e+00> : vector<256xf32>
    %58 = vector.multi_reduction <add>, %57, %cst_24 [1] : vector<256x128xf32> to vector<256xf32>
    %59 = vector.shape_cast %58 : vector<256xf32> to vector<256x1xf32>
    %cst_25 = arith.constant 3.125000e-02 : f32
    %60 = vector.broadcast %cst_25 : f32 to vector<256x1xf32>
    %61 = arith.mulf %59, %60 : vector<256x1xf32>
    %cst_26 = arith.constant 9.99999974E-6 : f32
    %62 = vector.broadcast %cst_26 : f32 to vector<256x1xf32>
    %63 = arith.addf %61, %62 : vector<256x1xf32>
    %64 = math.rsqrt %63 : vector<256x1xf32>
    %65 = vector.broadcast %64 : vector<256x1xf32> to vector<256x128xf32>
    %66 = arith.mulf %56, %65 : vector<256x128xf32>
    %c0_27 = arith.constant 0 : index
    %c0_28 = arith.constant 0 : index
    %67 = vector.load %arg6[%c0_27, %c0_28] : memref<128x128xf32, #tpu.memory_space<vmem>>, vector<128x128xf32>
    %cst_29 = arith.constant dense<0.000000e+00> : vector<256x128xf32>
    %68 = tpu.matmul %66, %67, %cst_29 {dimension_numbers = #tpu.dot_dimension_numbers<[1], [0], [0], [1], [0, 0, 1, 1], [], []>} : vector<256x128xf32>, vector<128x128xf32>, vector<256x128xf32> -> vector<256x128xf32>
    %c0_30 = arith.constant 0 : index
    %c0_31 = arith.constant 0 : index
    %69 = vector.load %arg7[%c0_30, %c0_31] : memref<1x128xf32, #tpu.memory_space<vmem>>, vector<1x128xf32>
    %70 = vector.broadcast %69 : vector<1x128xf32> to vector<256x128xf32>
    %71 = arith.addf %68, %70 : vector<256x128xf32>
    %c0_32 = arith.constant 0 : index
    %c0_33 = arith.constant 0 : index
    %72 = vector.load %arg8[%c0_32, %c0_33] : memref<256x128xf32, #tpu.memory_space<vmem>>, vector<256x128xf32>
    tpu.vector_store %arg8[%c0_32, %c0_33], %71 {strides = array<i32>} : memref<256x128xf32, #tpu.memory_space<vmem>>, vector<256x128xf32>,
    return
  }
  func.func @transform_0(%arg0: i32) -> (i32, i32) {
    %c0_i32 = arith.constant 0 : i32
    %c0_i32_0 = arith.constant 0 : i32
    return %arg0, %c0_i32 : i32, i32
  }
  func.func @transform_1(%arg0: i32) -> (i32, i32) {
    %c0_i32 = arith.constant 0 : i32
    %c0_i32_0 = arith.constant 0 : i32
    %c0_i32_1 = arith.constant 0 : i32
    return %c0_i32, %c0_i32_0 : i32, i32
  }
  func.func @transform_2(%arg0: i32) -> (i32, i32) {
    %c0_i32 = arith.constant 0 : i32
    %c0_i32_0 = arith.constant 0 : i32
    %c0_i32_1 = arith.constant 0 : i32
    return %c0_i32, %c0_i32_0 : i32, i32
  }
  func.func @transform_3(%arg0: i32) -> (i32, i32) {
    %c0_i32 = arith.constant 0 : i32
    %c0_i32_0 = arith.constant 0 : i32
    %c0_i32_1 = arith.constant 0 : i32
    return %c0_i32, %c0_i32_0 : i32, i32
  }
  func.func @transform_4(%arg0: i32) -> (i32, i32) {
    %c0_i32 = arith.constant 0 : i32
    %c0_i32_0 = arith.constant 0 : i32
    %c0_i32_1 = arith.constant 0 : i32
    return %c0_i32, %c0_i32_0 : i32, i32
  }
  func.func @transform_5(%arg0: i32) -> (i32, i32) {
    %c0_i32 = arith.constant 0 : i32
    %c0_i32_0 = arith.constant 0 : i32
    %c0_i32_1 = arith.constant 0 : i32
    return %c0_i32, %c0_i32_0 : i32, i32
  }
  func.func @transform_6(%arg0: i32) -> (i32, i32) {
    %c0_i32 = arith.constant 0 : i32
    %c0_i32_0 = arith.constant 0 : i32
    %c0_i32_1 = arith.constant 0 : i32
    return %c0_i32, %c0_i32_0 : i32, i32
  }
  func.func @transform_7(%arg0: i32) -> (i32, i32) {
    %c0_i32 = arith.constant 0 : i32
    %c0_i32_0 = arith.constant 0 : i32
    return %arg0, %c0_i32 : i32, i32
  }
}

module attributes {stable_mosaic.version = 11 : i64} {
  func.func @mlp_kernel(%arg0: i32, %arg1: memref<256x896xf32, #tpu.memory_space<vmem>>, %arg2: memref<896x128xf32, #tpu.memory_space<vmem>>, %arg3: memref<1x128xf32, #tpu.memory_space<vmem>>, %arg4: memref<128x128xf32, #tpu.memory_space<vmem>>, %arg5: memref<1x128xf32, #tpu.memory_space<vmem>>, %arg6: memref<128x128xf32, #tpu.memory_space<vmem>>, %arg7: memref<1x128xf32, #tpu.memory_space<vmem>>, %arg8: memref<256x128xf32, #tpu.memory_space<vmem>>) attributes {dimension_semantics = [#tpu.dimension_semantics<parallel>], iteration_bounds = array<i64: 1>, scalar_prefetch = 0 : i64, scratch_operands = 0 : i64, tpu.core_type = #tpu.core_type<tc>, window_params = [{transform_indices = @transform_0, window_bounds = array<i64: 256, 896>}, {pipeline_mode = #tpu.pipeline_mode<synchronous>, transform_indices = @transform_1, window_bounds = array<i64: 896, 128>}, {pipeline_mode = #tpu.pipeline_mode<synchronous>, transform_indices = @transform_2, window_bounds = array<i64: 1, 128>}, {pipeline_mode = #tpu.pipeline_mode<synchronous>, transform_indices = @transform_3, window_bounds = array<i64: 128, 128>}, {pipeline_mode = #tpu.pipeline_mode<synchronous>, transform_indices = @transform_4, window_bounds = array<i64: 1, 128>}, {pipeline_mode = #tpu.pipeline_mode<synchronous>, transform_indices = @transform_5, window_bounds = array<i64: 128, 128>}, {pipeline_mode = #tpu.pipeline_mode<synchronous>, transform_indices = @transform_6, window_bounds = array<i64: 1, 128>}, {transform_indices = @transform_7, window_bounds = array<i64: 256, 128>}]} {
    %c0 = arith.constant 0 : index
    %c0_0 = arith.constant 0 : index
    %0 = vector.load %arg1[%c0, %c0_0] : memref<256x896xf32, #tpu.memory_space<vmem>>, vector<256x896xf32>
    %c0_1 = arith.constant 0 : index
    %c0_2 = arith.constant 0 : index
    %1 = vector.load %arg2[%c0_1, %c0_2] : memref<896x128xf32, #tpu.memory_space<vmem>>, vector<896x128xf32>
    %c0_3 = arith.constant 0 : index
    %c0_4 = arith.constant 0 : index
    %2 = vector.load %arg3[%c0_3, %c0_4] : memref<1x128xf32, #tpu.memory_space<vmem>>, vector<1x128xf32>
    %cst = arith.constant dense<0.000000e+00> : vector<256x128xf32>
    %3 = tpu.matmul %0, %1, %cst {dimension_numbers = #tpu.dot_dimension_numbers<[1], [0], [0], [1], [0, 0, 1, 1], [], []>} : vector<256x896xf32>, vector<896x128xf32>, vector<256x128xf32> -> vector<256x128xf32>
    %4 = vector.broadcast %2 : vector<1x128xf32> to vector<256x128xf32>
    %5 = arith.addf %3, %4 : vector<256x128xf32>
    %cst_5 = arith.constant 0.000000e+00 : f32
    %6 = vector.broadcast %cst_5 : f32 to vector<256x128xf32>
    %7 = arith.cmpf oge, %5, %6 : vector<256x128xf32>
    %cst_6 = arith.constant 0.00999999977 : f32
    %8 = vector.broadcast %cst_6 : f32 to vector<256x128xf32>
    %9 = arith.mulf %8, %5 : vector<256x128xf32>
    %10 = arith.select %7, %5, %9 : vector<256x128xi1>, vector<256x128xf32>
    %11 = tpu.iota {dimensions = array<i32: 1>} : vector<1x128xi32>
    %c32_i32 = arith.constant 32 : i32
    %12 = vector.broadcast %c32_i32 : i32 to vector<1x128xi32>
    %13 = arith.cmpi slt, %11, %12 : vector<1x128xi32>
    %cst_7 = arith.constant dense<0.000000e+00> : vector<256xf32>
    %14 = vector.multi_reduction <add>, %10, %cst_7 [1] : vector<256x128xf32> to vector<256xf32>
    %15 = vector.shape_cast %14 : vector<256xf32> to vector<256x1xf32>
    %cst_8 = arith.constant 3.125000e-02 : f32
    %16 = vector.broadcast %cst_8 : f32 to vector<256x1xf32>
    %17 = arith.mulf %15, %16 : vector<256x1xf32>
    %18 = vector.broadcast %17 : vector<256x1xf32> to vector<256x128xf32>
    %19 = arith.subf %10, %18 : vector<256x128xf32>
    %cst_9 = arith.constant 0.000000e+00 : f32
    %20 = vector.shape_cast %13 : vector<1x128xi1> to vector<1x128xi1>
    %21 = vector.broadcast %20 : vector<1x128xi1> to vector<256x128xi1>
    %22 = vector.broadcast %cst_9 : f32 to vector<256x128xf32>
    %23 = arith.select %21, %19, %22 : vector<256x128xi1>, vector<256x128xf32>
    %24 = arith.mulf %23, %23 : vector<256x128xf32>
    %cst_10 = arith.constant dense<0.000000e+00> : vector<256xf32>
    %25 = vector.multi_reduction <add>, %24, %cst_10 [1] : vector<256x128xf32> to vector<256xf32>
    %26 = vector.shape_cast %25 : vector<256xf32> to vector<256x1xf32>
    %cst_11 = arith.constant 3.125000e-02 : f32
    %27 = vector.broadcast %cst_11 : f32 to vector<256x1xf32>
    %28 = arith.mulf %26, %27 : vector<256x1xf32>
    %cst_12 = arith.constant 9.99999974E-6 : f32
    %29 = vector.broadcast %cst_12 : f32 to vector<256x1xf32>
    %30 = arith.addf %28, %29 : vector<256x1xf32>
    %31 = math.rsqrt %30 : vector<256x1xf32>
    %32 = vector.broadcast %31 : vector<256x1xf32> to vector<256x128xf32>
    %33 = arith.mulf %23, %32 : vector<256x128xf32>
    %c0_13 = arith.constant 0 : index
    %c0_14 = arith.constant 0 : index
    %34 = vector.load %arg4[%c0_13, %c0_14] : memref<128x128xf32, #tpu.memory_space<vmem>>, vector<128x128xf32>
    %c0_15 = arith.constant 0 : index
    %c0_16 = arith.constant 0 : index
    %35 = vector.load %arg5[%c0_15, %c0_16] : memref<1x128xf32, #tpu.memory_space<vmem>>, vector<1x128xf32>
    %cst_17 = arith.constant dense<0.000000e+00> : vector<256x128xf32>
    %36 = tpu.matmul %33, %34, %cst_17 {dimension_numbers = #tpu.dot_dimension_numbers<[1], [0], [0], [1], [0, 0, 1, 1], [], []>} : vector<256x128xf32>, vector<128x128xf32>, vector<256x128xf32> -> vector<256x128xf32>
    %37 = vector.broadcast %35 : vector<1x128xf32> to vector<256x128xf32>
    %38 = arith.addf %36, %37 : vector<256x128xf32>
    %cst_18 = arith.constant 0.000000e+00 : f32
    %39 = vector.broadcast %cst_18 : f32 to vector<256x128xf32>
    %40 = arith.cmpf oge, %38, %39 : vector<256x128xf32>
    %cst_19 = arith.constant 0.00999999977 : f32
    %41 = vector.broadcast %cst_19 : f32 to vector<256x128xf32>
    %42 = arith.mulf %41, %38 : vector<256x128xf32>
    %43 = arith.select %40, %38, %42 : vector<256x128xi1>, vector<256x128xf32>
    %44 = tpu.iota {dimensions = array<i32: 1>} : vector<1x128xi32>
    %c32_i32_20 = arith.constant 32 : i32
    %45 = vector.broadcast %c32_i32_20 : i32 to vector<1x128xi32>
    %46 = arith.cmpi slt, %44, %45 : vector<1x128xi32>
    %cst_21 = arith.constant dense<0.000000e+00> : vector<256xf32>
    %47 = vector.multi_reduction <add>, %43, %cst_21 [1] : vector<256x128xf32> to vector<256xf32>
    %48 = vector.shape_cast %47 : vector<256xf32> to vector<256x1xf32>
    %cst_22 = arith.constant 3.125000e-02 : f32
    %49 = vector.broadcast %cst_22 : f32 to vector<256x1xf32>
    %50 = arith.mulf %48, %49 : vector<256x1xf32>
    %51 = vector.broadcast %50 : vector<256x1xf32> to vector<256x128xf32>
    %52 = arith.subf %43, %51 : vector<256x128xf32>
    %cst_23 = arith.constant 0.000000e+00 : f32
    %53 = vector.shape_cast %46 : vector<1x128xi1> to vector<1x128xi1>
    %54 = vector.broadcast %53 : vector<1x128xi1> to vector<256x128xi1>
    %55 = vector.broadcast %cst_23 : f32 to vector<256x128xf32>
    %56 = arith.select %54, %52, %55 : vector<256x128xi1>, vector<256x128xf32>
    %57 = arith.mulf %56, %56 : vector<256x128xf32>
    %cst_24 = arith.constant dense<0.000000e+00> : vector<256xf32>
    %58 = vector.multi_reduction <add>, %57, %cst_24 [1] : vector<256x128xf32> to vector<256xf32>
    %59 = vector.shape_cast %58 : vector<256xf32> to vector<256x1xf32>
    %cst_25 = arith.constant 3.125000e-02 : f32
    %60 = vector.broadcast %cst_25 : f32 to vector<256x1xf32>
    %61 = arith.mulf %59, %60 : vector<256x1xf32>
    %cst_26 = arith.constant 9.99999974E-6 : f32
    %62 = vector.broadcast %cst_26 : f32 to vector<256x1xf32>
    %63 = arith.addf %61, %62 : vector<256x1xf32>
    %64 = math.rsqrt %63 : vector<256x1xf32>
    %65 = vector.broadcast %64 : vector<256x1xf32> to vector<256x128xf32>
    %66 = arith.mulf %56, %65 : vector<256x128xf32>
    %c0_27 = arith.constant 0 : index
    %c0_28 = arith.constant 0 : index
    %67 = vector.load %arg6[%c0_27, %c0_28] : memref<128x128xf32, #tpu.memory_space<vmem>>, vector<128x128xf32>
    %cst_29 = arith.constant dense<0.000000e+00> : vector<256x128xf32>
    %68 = tpu.matmul %66, %67, %cst_29 {dimension_numbers = #tpu.dot_dimension_numbers<[1], [0], [0], [1], [0, 0, 1, 1], [], []>} : vector<256x128xf32>, vector<128x128xf32>, vector<256x128xf32> -> vector<256x128xf32>
    %c0_30 = arith.constant 0 : index
    %c0_31 = arith.constant 0 : index
    %69 = vector.load %arg7[%c0_30, %c0_31] : memref<1x128xf32, #tpu.memory_space<vmem>>, vector<1x128xf32>
    %70 = vector.broadcast %69 : vector<1x128xf32> to vector<256x128xf32>
    %71 = arith.addf %68, %70 : vector<256x128xf32>
    %c0_32 = arith.constant 0 : index
    %c0_33 = arith.constant 0 : index
    %72 = vector.load %arg8[%c0_32, %c0_33] : memref<256x128xf32, #tpu.memory_space<vmem>>, vector<256x128xf32>
    tpu.vector_store %arg8[%c0_32, %c0_33], %71 {strides = array<i32>} : memref<256x128xf32, #tpu.memory_space<vmem>>, vector<256x128xf32>,
    return
  }
  func.func @transform_0(%arg0: i32) -> (i32, i32) {
    %c0_i32 = arith.constant 0 : i32
    %c0_i32_0 = arith.constant 0 : i32
    return %arg0, %c0_i32 : i32, i32
  }
  func.func @transform_1(%arg0: i32) -> (i32, i32) {
    %c0_i32 = arith.constant 0 : i32
    %c0_i32_0 = arith.constant 0 : i32
    %c0_i32_1 = arith.constant 0 : i32
    return %c0_i32, %c0_i32_0 : i32, i32
  }
  func.func @transform_2(%arg0: i32) -> (i32, i32) {
    %c0_i32 = arith.constant 0 : i32
    %c0_i32_0 = arith.constant 0 : i32
    %c0_i32_1 = arith.constant 0 : i32
    return %c0_i32, %c0_i32_0 : i32, i32
  }
  func.func @transform_3(%arg0: i32) -> (i32, i32) {
    %c0_i32 = arith.constant 0 : i32
    %c0_i32_0 = arith.constant 0 : i32
    %c0_i32_1 = arith.constant 0 : i32
    return %c0_i32, %c0_i32_0 : i32, i32
  }
  func.func @transform_4(%arg0: i32) -> (i32, i32) {
    %c0_i32 = arith.constant 0 : i32
    %c0_i32_0 = arith.constant 0 : i32
    %c0_i32_1 = arith.constant 0 : i32
    return %c0_i32, %c0_i32_0 : i32, i32
  }
  func.func @transform_5(%arg0: i32) -> (i32, i32) {
    %c0_i32 = arith.constant 0 : i32
    %c0_i32_0 = arith.constant 0 : i32
    %c0_i32_1 = arith.constant 0 : i32
    return %c0_i32, %c0_i32_0 : i32, i32
  }
  func.func @transform_6(%arg0: i32) -> (i32, i32) {
    %c0_i32 = arith.constant 0 : i32
    %c0_i32_0 = arith.constant 0 : i32
    %c0_i32_1 = arith.constant 0 : i32
    return %c0_i32, %c0_i32_0 : i32, i32
  }
  func.func @transform_7(%arg0: i32) -> (i32, i32) {
    %c0_i32 = arith.constant 0 : i32
    %c0_i32_0 = arith.constant 0 : i32
    return %arg0, %c0_i32 : i32, i32
  }
}

</mosaic_0001>

<bundles_post_ra>
// kernel: tpu_custom_call.1
= control target key start
LH: loop header
LB: loop body
LE: loop exit
PB: predicated region body
PF: predicated region fallthrough
CT: control target
= control target key end

     0   :  { %12 = vsyncpa [#allocation3], 0  ;;  %s4652_s0 = inlined_call_operand.hbm [shape: f32[256,896], index: 0, kind: input, shape index: {}]   ;;  %s4653_s1 = inlined_call_operand.hbm [shape: f32[896,128], index: 1, kind: input, shape index: {}]   ;;  %s4654_s2 = inlined_call_operand.vmem [shape: f32[1,128], index: 2, kind: input, shape index: {}]   ;;  %s4655_s3 = inlined_call_operand.hbm [shape: f32[128,128], index: 3, kind: input, shape index: {}]   ;;  %s4656_s4 = inlined_call_operand.vmem [shape: f32[1,128], index: 4, kind: input, shape index: {}]   ;;  %s4657_s5 = inlined_call_operand.hbm [shape: f32[128,128], index: 5, kind: input, shape index: {}]   ;;  %s4658_s6 = inlined_call_operand.vmem [shape: f32[1,128], index: 6, kind: input, shape index: {}]   ;;  %s4659_s7 = inlined_call_operand.hbm [shape: f32[256,128], index: 7, kind: output, shape index: {}]  }
   0x1   :  { %13 = vsyncpa [#allocation6], 0 }
   0x2   :  { %14 = vsyncpa [#allocation9], 0  ;;  %s33_s26 = sshll.u32 %s4653_s1, 4  ;;  %s34_s26 = int_to_ptr.hbm [resolvable:$true] %s33_s26 }
   0x3   :  { %15 = vsyncpa [#allocation4], 0  ;;  %s3399_s27 = smov [#allocation5]   ;;  %s20_s8 = sshll.u32 %s4652_s0, 4  ;;  %s21_s8 = int_to_ptr.hbm [resolvable:$true] %s20_s8 }
   0x4   :  { %s35_s28 = sshll.u32 %s3399_s27, 4  ;;  %s3400_s9 = smov 128   ;;  %s36_s28 = int_to_ptr.vmem [resolvable:$true] %s35_s28 }
   0x5   :  { %s3401_s10 = smov 8   ;;  %s3402_s11 = smov [#allocation2]  }
   0x6   :  { %41 = dma.hbm_to_vmem [thread:$0]  %s34_s26, 14336, %s36_s28, [#allocation6], %s3400_s9, %s3400_s9, %s3401_s10  }
   0x7   :  { %s22_s12 = sshll.u32 %s3402_s11, 4  ;;  %s3403_s1 = smov 896   ;;  %s23_s12 = int_to_ptr.vmem [resolvable:$true] %s22_s12 }
   0x8   :  { %s3404_s13 = smov 56   ;;  %s48_s16 = sshll.u32 %s4655_s3, 4  ;;  %s49_s16 = int_to_ptr.hbm [resolvable:$true] %s48_s16 }
   0x9   :  { %28 = dma.hbm_to_vmem [thread:$0]  %s21_s8, 28672, %s23_s12, [#allocation3], %s3403_s1, %s3403_s1, %s3404_s13  }
   0xa   :  { %s3405_s17 = smov [#allocation7]   ;;  %s63_s20 = sshll.u32 %s4657_s5, 4  ;;  %s64_s20 = int_to_ptr.hbm [resolvable:$true] %s63_s20 }
   0xb   :  { %s50_s0 = sshll.u32 %s3405_s17, 4  ;;  %s3406_s21 = smov [#allocation8]   ;;  %s51_s0 = int_to_ptr.vmem [resolvable:$true] %s50_s0 }
   0xc   :  { %56 = dma.hbm_to_vmem [thread:$0]  %s49_s16, 2048, %s51_s0, [#allocation6], %s3400_s9, %s3400_s9, %s3401_s10  }
   0xd   :  { %s65_s22 = sshll.u32 %s3406_s21, 4  ;;  %s66_s22 = int_to_ptr.vmem [resolvable:$true] %s65_s22 }
   0xe   :  { %71 = dma.hbm_to_vmem [thread:$0]  %s64_s20, 2048, %s66_s22, [#allocation9], %s3400_s9, %s3400_s9, %s3401_s10  }
   0xf   :  { %3391 = dma.done.wait [#allocation3], 28672  }
  0x10   :  { %3392 = vsyncadd [#allocation3], 4294938624 }
  0x11   :  { %3393 = dma.done.wait [#allocation6], 16384  }
  0x12   :  { %3394 = vsyncadd [#allocation6], 4294950912 }
  0x13   :  { %3395 = dma.done.wait [#allocation9], 2048  }
  0x14   :  { %3396 = vsyncadd [#allocation9], 4294965248  ;;  %v329_v0 = vld [vmem:[#allocation5 + $0x78] sm:$0xff]  ;;  %v328_v1 = vld [vmem:[#allocation5 + $0x70] sm:$0xff]  ;;  %s3066_s11 = sshll.u32 %s4659_s7, 4  ;;  %s3067_s11 = int_to_ptr.hbm [resolvable:$true] %s3066_s11 }
  0x15   :  { %3081 = vmatpush.msra.mxu1 %v329_v0  ;;  %3082 = vmatpush.msra.mxu2 %v329_v0  ;;  %v327_v2 = vld [vmem:[#allocation5 + $0x68] sm:$0xff]  ;;  %v326_v3 = vld [vmem:[#allocation5 + $0x60] sm:$0xff]  ;;  %v325_v4 = vld [vmem:[#allocation5 + $0x58] sm:$0xff] }
  0x16   :  { %3083 = vmatpush.msra.mxu3 %v329_v0  ;;  %430 = vmatpush.msra.mxu0 %v329_v0  ;;  %v324_v5 = vld [vmem:[#allocation5 + $0x50] sm:$0xff]  ;;  %v323_v6 = vld [vmem:[#allocation5 + $0x48] sm:$0xff]  ;;  %v322_v7 = vld [vmem:[#allocation5 + $0x40] sm:$0xff] }
  0x17   :  { %3084 = vmatpush.msra.mxu1 %v328_v1  ;;  %3085 = vmatpush.msra.mxu2 %v328_v1  ;;  %v321_v8 = vld [vmem:[#allocation5 + $0x38] sm:$0xff]  ;;  %v320_v9 = vld [vmem:[#allocation5 + $0x30] sm:$0xff]  ;;  %v319_v10 = vld [vmem:[#allocation5 + $0x28] sm:$0xff] }
  0x18   :  { %3086 = vmatpush.msra.mxu3 %v328_v1  ;;  %431 = vmatpush.msra.mxu0 %v328_v1  ;;  %v318_v11 = vld [vmem:[#allocation5 + $0x20] sm:$0xff]  ;;  %v317_v12 = vld [vmem:[#allocation5 + $0x18] sm:$0xff]  ;;  %v316_v13 = vld [vmem:[#allocation5 + $0x10] sm:$0xff] }
  0x19   :  { %3087 = vmatpush.msra.mxu1 %v327_v2  ;;  %3088 = vmatpush.msra.mxu2 %v327_v2  ;;  %v315_v14 = vld [vmem:[#allocation5 + $0x8] sm:$0xff]  ;;  %v314_v15 = vld [vmem:[#allocation5] sm:$0xff]  ;;  %v361_v18 = vld [vmem:[#allocation5 + $0x178] sm:$0xff] }
  0x1a   :  { %3089 = vmatpush.msra.mxu3 %v327_v2  ;;  %432 = vmatpush.msra.mxu0 %v327_v2  ;;  %v146_v16 = vld [vmem:[#allocation2 + $0x1c0] sm:$0xff]  ;;  %v345_v20 = vld [vmem:[#allocation5 + $0xf8] sm:$0xff]  ;;  %v360_v21 = vld [vmem:[#allocation5 + $0x170] sm:$0xff] }
  0x1b   :  { %3090 = vmatpush.msra.mxu1 %v326_v3  ;;  %3091 = vmatpush.msra.mxu2 %v326_v3  ;;  %v202_v17 = vld [vmem:[#allocation2 + $0x380] sm:$0xff]  ;;  %v344_v22 = vld [vmem:[#allocation5 + $0xf0] sm:$0xff]  ;;  %v359_v24 = vld [vmem:[#allocation5 + $0x168] sm:$0xff] }
  0x1c   :  { %3092 = vmatpush.msra.mxu3 %v326_v3  ;;  %433 = vmatpush.msra.mxu0 %v326_v3  ;;  %v258_v19 = vld [vmem:[#allocation2 + $0x540] sm:$0xff]  ;;  %v377_v25 = vld [vmem:[#allocation5 + $0x1f8] sm:$0xff]  ;;  %v343_v26 = vld [vmem:[#allocation5 + $0xe8] sm:$0xff] }
  0x1d   :  { %3093 = vmatpush.msra.mxu1 %v325_v4  ;;  %3094 = vmatpush.msra.mxu2 %v325_v4  ;;  %v90_v23 = vld [vmem:[#allocation2] sm:$0xff]  ;;  %v376_v28 = vld [vmem:[#allocation5 + $0x1f0] sm:$0xff]  ;;  %v153_v29 = vld [vmem:[#allocation2 + $0x1f8] sm:$0xff] }
  0x1e   :  { %3095 = vmatpush.msra.mxu3 %v325_v4  ;;  %434 = vmatpush.msra.mxu0 %v325_v4  ;;  %v358_v27 = vld [vmem:[#allocation5 + $0x160] sm:$0xff]  ;;  %v209_v30 = vld [vmem:[#allocation2 + $0x3b8] sm:$0xff]  ;;  %v356_v35 = vld [vmem:[#allocation5 + $0x150] sm:$0xff] }
  0x1f   :  { %3096 = vmatpush.msra.mxu1 %v324_v5  ;;  %3097 = vmatpush.msra.mxu2 %v324_v5  ;;  %v342_v31 = vld [vmem:[#allocation5 + $0xe0] sm:$0xff]  ;;  %v357_v32 = vld [vmem:[#allocation5 + $0x158] sm:$0xff]  ;;  %v375_v37 = vld [vmem:[#allocation5 + $0x1e8] sm:$0xff] }
  0x20   :  { %3098 = vmatpush.msra.mxu3 %v324_v5  ;;  %435 = vmatpush.msra.mxu0 %v324_v5  ;;  %v265_v33 = vld [vmem:[#allocation2 + $0x578] sm:$0xff]  ;;  %v340_v38 = vld [vmem:[#allocation5 + $0xd0] sm:$0xff]  ;;  %v355_v39 = vld [vmem:[#allocation5 + $0x148] sm:$0xff] }
  0x21   :  { %3099 = vmatpush.msra.mxu1 %v323_v6  ;;  %3100 = vmatpush.msra.mxu2 %v323_v6  ;;  %v341_v34 = vld [vmem:[#allocation5 + $0xd8] sm:$0xff]  ;;  %v374_v40 = vld [vmem:[#allocation5 + $0x1e0] sm:$0xff]  ;;  %v339_v42 = vld [vmem:[#allocation5 + $0xc8] sm:$0xff] }
  0x22   :  { %3101 = vmatpush.msra.mxu3 %v323_v6  ;;  %436 = vmatpush.msra.mxu0 %v323_v6  ;;  %v97_v36 = vld [vmem:[#allocation2 + $0x38] sm:$0xff]  ;;  %v354_v43 = vld [vmem:[#allocation5 + $0x140] sm:$0xff]  ;;  %v160_v44 = vld [vmem:[#allocation2 + $0x230] sm:$0xff] }
  0x23   :  { %3102 = vmatpush.msra.mxu1 %v322_v7  ;;  %3103 = vmatpush.msra.mxu2 %v322_v7  ;;  %v393_v41 = vld [vmem:[#allocation5 + $0x278] sm:$0xff]  ;;  %v216_v45 = vld [vmem:[#allocation2 + $0x3f0] sm:$0xff]  ;;  %v338_v46 = vld [vmem:[#allocation5 + $0xc0] sm:$0xff] }
  0x24   :  { %3104 = vmatpush.msra.mxu3 %v322_v7  ;;  %437 = vmatpush.msra.mxu0 %v322_v7  ;;  %v353_v47 = vld [vmem:[#allocation5 + $0x138] sm:$0xff]  ;;  %v272_v48 = vld [vmem:[#allocation2 + $0x5b0] sm:$0xff]  ;;  %v351_v55 = vld [vmem:[#allocation5 + $0x128] sm:$0xff] }
  0x25   :  { %3105 = vmatpush.msra.mxu1 %v321_v8  ;;  %3106 = vmatpush.msra.mxu2 %v321_v8  ;;  %v392_v49 = vld [vmem:[#allocation5 + $0x270] sm:$0xff]  ;;  %v337_v50 = vld [vmem:[#allocation5 + $0xb8] sm:$0xff]  ;;  %v391_v57 = vld [vmem:[#allocation5 + $0x268] sm:$0xff] }
  0x26   :  { %3107 = vmatpush.msra.mxu3 %v321_v8  ;;  %438 = vmatpush.msra.mxu0 %v321_v8  ;;  %v352_v51 = vld [vmem:[#allocation5 + $0x130] sm:$0xff]  ;;  %v373_v53 = vld [vmem:[#allocation5 + $0x1d8] sm:$0xff]  ;;  %v335_v58 = vld [vmem:[#allocation5 + $0xa8] sm:$0xff] }
  0x27   :  { %3108 = vmatpush.msra.mxu1 %v320_v9  ;;  %3109 = vmatpush.msra.mxu2 %v320_v9  ;;  %v104_v52 = vld [vmem:[#allocation2 + $0x70] sm:$0xff]  ;;  %v350_v59 = vld [vmem:[#allocation5 + $0x120] sm:$0xff]  ;;  %v167_v60 = vld [vmem:[#allocation2 + $0x268] sm:$0xff] }
  0x28   :  { %3110 = vmatpush.msra.mxu3 %v320_v9  ;;  %439 = vmatpush.msra.mxu0 %v320_v9  ;;  %v336_v54 = vld [vmem:[#allocation5 + $0xb0] sm:$0xff]  ;;  %v223_v61 = vld [vmem:[#allocation2 + $0x428] sm:$0xff]  ;;  %v334_v63 = vld [vmem:[#allocation5 + $0xa0] sm:$0xff] }
  0x29   :  { %3111 = vmatpush.msra.mxu1 %v319_v10  ;;  %3112 = vmatpush.msra.mxu2 %v319_v10  ;;  %v372_v56 = vld [vmem:[#allocation5 + $0x1d0] sm:$0xff]  ;;  %v371_v62 = vld [vmem:[#allocation5 + $0x1c8] sm:$0xff]  ;;  %v349_v1 = vld [vmem:[#allocation5 + $0x118] sm:$0xff] }
  0x2a   :  { %3113 = vmatpush.msra.mxu3 %v319_v10  ;;  %440 = vmatpush.msra.mxu0 %v319_v10  ;;  %v279_v0 = vld [vmem:[#allocation2 + $0x5e8] sm:$0xff]  ;;  %v370_v2 = vld [vmem:[#allocation5 + $0x1c0] sm:$0xff]  ;;  %v333_v5 = vld [vmem:[#allocation5 + $0x98] sm:$0xff] }
  0x2b   :  { %3114 = vmatpush.msra.mxu1 %v318_v11  ;;  %3115 = vmatpush.msra.mxu2 %v318_v11  ;;  %v390_v3 = vld [vmem:[#allocation5 + $0x260] sm:$0xff]  ;;  %v111_v4 = vld [vmem:[#allocation2 + $0xa8] sm:$0xff]  ;;  %v369_v6 = vld [vmem:[#allocation5 + $0x1b8] sm:$0xff] }
  0x2c   :  { %3116 = vmatpush.msra.mxu3 %v318_v11  ;;  %441 = vmatpush.msra.mxu0 %v318_v11  ;;  %v389_v7 = vld [vmem:[#allocation5 + $0x258] sm:$0xff]  ;;  %v348_v8 = vld [vmem:[#allocation5 + $0x110] sm:$0xff] }
  0x2d   :  { %3117 = vmatpush.msra.mxu1 %v317_v12  ;;  %3118 = vmatpush.msra.mxu2 %v317_v12  ;;  %v332_v9 = vld [vmem:[#allocation5 + $0x90] sm:$0xff] }
  0x2e   :  { %3119 = vmatpush.msra.mxu3 %v317_v12  ;;  %442 = vmatpush.msra.mxu0 %v317_v12  ;;  %v368_v10 = vld [vmem:[#allocation5 + $0x1b0] sm:$0xff]  ;;  %v174_v12 = vld [vmem:[#allocation2 + $0x2a0] sm:$0xff] }
  0x2f   :  { %3120 = vmatpush.msra.mxu1 %v316_v13  ;;  %3121 = vmatpush.msra.mxu2 %v316_v13  ;;  %v388_v11 = vld [vmem:[#allocation5 + $0x250] sm:$0xff] }
  0x30   :  { %3122 = vmatpush.msra.mxu3 %v316_v13  ;;  %443 = vmatpush.msra.mxu0 %v316_v13  ;;  %v230_v13 = vld [vmem:[#allocation2 + $0x460] sm:$0xff] }
  0x31   :  { %3123 = vmatpush.msra.mxu1 %v315_v14  ;;  %3124 = vmatpush.msra.mxu2 %v315_v14 }
  0x32   :  { %3125 = vmatpush.msra.mxu3 %v315_v14  ;;  %444 = vmatpush.msra.mxu0 %v315_v14  ;;  %v367_v14 = vld [vmem:[#allocation5 + $0x1a8] sm:$0xff] }
  0x33   :  { %3126 = vmatpush.msra.mxu1 %v314_v15  ;;  %3127 = vmatpush.msra.mxu2 %v314_v15 }
  0x34   :  { %470 = vmatmul.f32.vlgmr.msra.gmra.mxu1 %v146_v16  ;;  %494 = vmatmul.f32.vlgmr.msra.gmra.mxu2 %v202_v17  ;;  %v286_v16 = vld [vmem:[#allocation2 + $0x620] sm:$0xff]  ;;  %v347_v17 = vld [vmem:[#allocation5 + $0x108] sm:$0xff] }
  0x35   :  { %656 = vmatpush.msrb.mxu2 %v361_v18  ;;  %3128 = vmatpush.msra.mxu3 %v314_v15  ;;  %v366_v18 = vld [vmem:[#allocation5 + $0x1a0] sm:$0xff] }
  0x36   :  { %518 = vmatmul.f32.vlgmr.msra.gmra.mxu3 %v258_v19  ;;  %543 = vmatpush.msrb.mxu1 %v345_v20  ;;  %v386_v19 = vld [vmem:[#allocation5 + $0x240] sm:$0xff] }
  0x37   :  { %657 = vmatpush.msrb.mxu2 %v360_v21  ;;  %445 = vmatpush.msra.mxu0 %v314_v15  ;;  %v387_v15 = vld [vmem:[#allocation5 + $0x248] sm:$0xff]  ;;  %v118_v20 = vld [vmem:[#allocation2 + $0xe0] sm:$0xff] }
  0x38   :  { %544 = vmatpush.msrb.mxu1 %v344_v22  ;;  %446 = vmatmul.f32.vlgmr.msra.gmra.mxu0 %v90_v23  ;;  %v331_v21 = vld [vmem:[#allocation5 + $0x88] sm:$0xff]  ;;  %v365_v22 = vld [vmem:[#allocation5 + $0x198] sm:$0xff] }
  0x39   :  { %658 = vmatpush.msrb.mxu2 %v359_v24  ;;  %769 = vmatpush.msrb.mxu3 %v377_v25  ;;  %v385_v23 = vld [vmem:[#allocation5 + $0x238] sm:$0xff]  ;;  %v346_v24 = vld [vmem:[#allocation5 + $0x100] sm:$0xff] }
  0x3a   :  { %545 = vmatpush.msrb.mxu1 %v343_v26  ;;  %882 = vmatpush.msrb.mxu0 %v393_v41  ;;  %v330_v25 = vld [vmem:[#allocation5 + $0x80] sm:$0xff]  ;;  %v364_v26 = vld [vmem:[#allocation5 + $0x190] sm:$0xff] }
  0x3b   :  { %659 = vmatpush.msrb.mxu2 %v358_v27  ;;  %770 = vmatpush.msrb.mxu3 %v376_v28  ;;  %v384_v27 = vld [vmem:[#allocation5 + $0x230] sm:$0xff]  ;;  %v181_v28 = vld [vmem:[#allocation2 + $0x2d8] sm:$0xff] }
  0x3c   :  { %473 = vmatmul.f32.gmra.mxu1 %v153_v29  ;;  %497 = vmatmul.f32.gmra.mxu2 %v209_v30  ;;  %v237_v29 = vld [vmem:[#allocation2 + $0x498] sm:$0xff]  ;;  %v363_v30 = vld [vmem:[#allocation5 + $0x188] sm:$0xff]  ;;  %v244_v41 = vld [vmem:[#allocation2 + $0x4d0] sm:$0xff] }
  0x3d   :  { %546 = vmatpush.msrb.mxu1 %v342_v31  ;;  %660 = vmatpush.msrb.mxu2 %v357_v32  ;;  %v383_v31 = vld [vmem:[#allocation5 + $0x228] sm:$0xff]  ;;  %v293_v32 = vld [vmem:[#allocation2 + $0x658] sm:$0xff] }
  0x3e   :  { %521 = vmatmul.f32.gmra.mxu3 %v265_v33  ;;  %883 = vmatpush.msrb.mxu0 %v392_v49  ;;  %v425_v33 = vld [vmem:[#allocation5 + $0x378] sm:$0xff]  ;;  %v251_v49 = vld [vmem:[#allocation2 + $0x508] sm:$0xff] }
  0x3f   :  { %547 = vmatpush.msrb.mxu1 %v341_v34  ;;  %661 = vmatpush.msrb.mxu2 %v356_v35  ;;  %v362_v34 = vld [vmem:[#allocation5 + $0x180] sm:$0xff] }
  0x40   :  { %449 = vmatmul.f32.gmra.mxu0 %v97_v36  ;;  %771 = vmatpush.msrb.mxu3 %v375_v37  ;;  %v382_v35 = vld [vmem:[#allocation5 + $0x220] sm:$0xff]  ;;  %v125_v36 = vld [vmem:[#allocation2 + $0x118] sm:$0xff] }
  0x41   :  { %548 = vmatpush.msrb.mxu1 %v340_v38  ;;  %662 = vmatpush.msrb.mxu2 %v355_v39  ;;  %v409_v37 = vld [vmem:[#allocation5 + $0x2f8] sm:$0xff]  ;;  %v380_v39 = vld [vmem:[#allocation5 + $0x210] sm:$0xff] }
  0x42   :  { %772 = vmatpush.msrb.mxu3 %v374_v40  ;;  %884 = vmatpush.msrb.mxu0 %v391_v57  ;;  %v381_v38 = vld [vmem:[#allocation5 + $0x218] sm:$0xff]  ;;  %v188_v40 = vld [vmem:[#allocation2 + $0x310] sm:$0xff]  ;;  %v407_v57 = vld [vmem:[#allocation5 + $0x2e8] sm:$0xff] }
  0x43   :  { %549 = vmatpush.msrb.mxu1 %v339_v42  ;;  %663 = vmatpush.msrb.mxu2 %v354_v43  ;;  %v379_v42 = vld [vmem:[#allocation5 + $0x208] sm:$0xff]  ;;  %v300_v43 = vld [vmem:[#allocation2 + $0x690] sm:$0xff] }
  0x44   :  { %476 = vmatmul.f32.gmra.mxu1 %v160_v44  ;;  %500 = vmatmul.f32.gmra.mxu2 %v216_v45  ;;  %v378_v44 = vld [vmem:[#allocation5 + $0x200] sm:$0xff]  ;;  %v424_v45 = vld [vmem:[#allocation5 + $0x370] sm:$0xff] }
  0x45   :  { %550 = vmatpush.msrb.mxu1 %v338_v46  ;;  %664 = vmatpush.msrb.mxu2 %v353_v47  ;;  %v132_v46 = vld [vmem:[#allocation2 + $0x150] sm:$0xff] }
  0x46   :  { %524 = vmatmul.f32.gmra.mxu3 %v272_v48  ;;  %885 = vmatpush.msrb.mxu0 %v390_v3  ;;  %v408_v47 = vld [vmem:[#allocation5 + $0x2f0] sm:$0xff]  ;;  %v195_v48 = vld [vmem:[#allocation2 + $0x348] sm:$0xff]  ;;  %v406_v3 = vld [vmem:[#allocation5 + $0x2e0] sm:$0xff] }
  0x47   :  { %551 = vmatpush.msrb.mxu1 %v337_v50  ;;  %665 = vmatpush.msrb.mxu2 %v352_v51  ;;  %v307_v50 = vld [vmem:[#allocation2 + $0x6c8] sm:$0xff] }
  0x48   :  { %452 = vmatmul.f32.gmra.mxu0 %v104_v52  ;;  %773 = vmatpush.msrb.mxu3 %v373_v53  ;;  %v139_v51 = vld [vmem:[#allocation2 + $0x188] sm:$0xff]  ;;  %v92_v53 = vld [vmem:[#allocation2 + $0x10] sm:$0xff] }
  0x49   :  { %552 = vmatpush.msrb.mxu1 %v336_v54  ;;  %666 = vmatpush.msrb.mxu2 %v351_v55  ;;  %v91_v52 = vld [vmem:[#allocation2 + $0x8] sm:$0xff]  ;;  %v93_v54 = vld [vmem:[#allocation2 + $0x18] sm:$0xff] }
  0x4a   :  { %774 = vmatpush.msrb.mxu3 %v372_v56  ;;  %886 = vmatpush.msrb.mxu0 %v389_v7  ;;  %v423_v55 = vld [vmem:[#allocation5 + $0x368] sm:$0xff]  ;;  %v94_v56 = vld [vmem:[#allocation2 + $0x20] sm:$0xff] }
  0x4b   :  { %553 = vmatpush.msrb.mxu1 %v335_v58  ;;  %667 = vmatpush.msrb.mxu2 %v350_v59  ;;  %v98_v58 = vld [vmem:[#allocation2 + $0x40] sm:$0xff]  ;;  %v99_v59 = vld [vmem:[#allocation2 + $0x48] sm:$0xff] }
  0x4c   :  { %479 = vmatmul.f32.gmra.mxu1 %v167_v60  ;;  %503 = vmatmul.f32.gmra.mxu2 %v223_v61  ;;  %v100_v60 = vld [vmem:[#allocation2 + $0x50] sm:$0xff]  ;;  %v101_v61 = vld [vmem:[#allocation2 + $0x58] sm:$0xff]  ;;  %v115_v7 = vld [vmem:[#allocation2 + $0xc8] sm:$0xff] }
  0x4d   :  { %775 = vmatpush.msrb.mxu3 %v371_v62  ;;  %554 = vmatpush.msrb.mxu1 %v334_v63  ;;  %v105_v62 = vld [vmem:[#allocation2 + $0x78] sm:$0xff]  ;;  %v106_v63 = vld [vmem:[#allocation2 + $0x80] sm:$0xff] }
  0x4e   :  { %527 = vmatmul.f32.gmra.mxu3 %v279_v0  ;;  %668 = vmatpush.msrb.mxu2 %v349_v1  ;;  %v107_v0 = vld [vmem:[#allocation2 + $0x88] sm:$0xff]  ;;  %v422_v1 = vld [vmem:[#allocation5 + $0x360] sm:$0xff] }
  0x4f   :  { %776 = vmatpush.msrb.mxu3 %v370_v2  ;;  %555 = vmatpush.msrb.mxu1 %v333_v5  ;;  %v108_v2 = vld [vmem:[#allocation2 + $0x90] sm:$0xff]  ;;  %v113_v5 = vld [vmem:[#allocation2 + $0xb8] sm:$0xff] }
  0x50   :  { %455 = vmatmul.f32.gmra.mxu0 %v111_v4  ;;  %669 = vmatpush.msrb.mxu2 %v348_v8  ;;  %v112_v4 = vld [vmem:[#allocation2 + $0xb0] sm:$0xff]  ;;  %v119_v8 = vld [vmem:[#allocation2 + $0xe8] sm:$0xff] }
  0x51   :  { %777 = vmatpush.msrb.mxu3 %v369_v6  ;;  %556 = vmatpush.msrb.mxu1 %v332_v9  ;;  %v114_v6 = vld [vmem:[#allocation2 + $0xc0] sm:$0xff]  ;;  %v120_v9 = vld [vmem:[#allocation2 + $0xf0] sm:$0xff] }
  0x52   :  { %887 = vmatpush.msrb.mxu0 %v388_v11  ;;  %670 = vmatpush.msrb.mxu2 %v347_v17  ;;  %v421_v11 = vld [vmem:[#allocation5 + $0x358] sm:$0xff] }
  0x53   :  { %778 = vmatpush.msrb.mxu3 %v368_v10  ;;  %557 = vmatpush.msrb.mxu1 %v331_v21  ;;  %v121_v10 = vld [vmem:[#allocation2 + $0xf8] sm:$0xff]  ;;  %v420_v21 = vld [vmem:[#allocation5 + $0x350] sm:$0xff] }
  0x54   :  { %482 = vmatmul.f32.gmra.mxu1 %v174_v12  ;;  %506 = vmatmul.f32.gmra.mxu2 %v230_v13  ;;  %v122_v12 = vld [vmem:[#allocation2 + $0x100] sm:$0xff]  ;;  %v405_v13 = vld [vmem:[#allocation5 + $0x2d8] sm:$0xff] }
  0x55   :  { %779 = vmatpush.msrb.mxu3 %v367_v14  ;;  %888 = vmatpush.msrb.mxu0 %v387_v15  ;;  %v126_v14 = vld [vmem:[#allocation2 + $0x120] sm:$0xff]  ;;  %v127_v15 = vld [vmem:[#allocation2 + $0x128] sm:$0xff]  ;;  %v129_v17 = vld [vmem:[#allocation2 + $0x138] sm:$0xff] }
  0x56   :  { %530 = vmatmul.f32.gmra.mxu3 %v286_v16  ;;  %671 = vmatpush.msrb.mxu2 %v346_v24  ;;  %v128_v16 = vld [vmem:[#allocation2 + $0x130] sm:$0xff] }
  0x57   :  { %780 = vmatpush.msrb.mxu3 %v366_v18  ;;  %889 = vmatpush.msrb.mxu0 %v386_v19  ;;  %v133_v18 = vld [vmem:[#allocation2 + $0x158] sm:$0xff]  ;;  %v134_v19 = vld [vmem:[#allocation2 + $0x160] sm:$0xff]  ;;  %v140_v24 = vld [vmem:[#allocation2 + $0x190] sm:$0xff] }
  0x58   :  { %458 = vmatmul.f32.gmra.mxu0 %v118_v20  ;;  %558 = vmatpush.msrb.mxu1 %v330_v25  ;;  %v135_v20 = vld [vmem:[#allocation2 + $0x168] sm:$0xff]  ;;  %v141_v25 = vld [vmem:[#allocation2 + $0x198] sm:$0xff] }
  0x59   :  { %781 = vmatpush.msrb.mxu3 %v365_v22  ;;  %890 = vmatpush.msrb.mxu0 %v385_v23  ;;  %v136_v22 = vld [vmem:[#allocation2 + $0x170] sm:$0xff] }
  0x5a   :  { %1108 = vmatpush.msra.mxu2 %v425_v33  ;;  %995 = vmatpush.msra.mxu1 %v409_v37  ;;  %v404_v23 = vld [vmem:[#allocation5 + $0x2d0] sm:$0xff] }
  0x5b   :  { %782 = vmatpush.msrb.mxu3 %v364_v26  ;;  %891 = vmatpush.msrb.mxu0 %v384_v27  ;;  %v142_v26 = vld [vmem:[#allocation2 + $0x1a0] sm:$0xff]  ;;  %v143_v27 = vld [vmem:[#allocation2 + $0x1a8] sm:$0xff] }
  0x5c   :  { %485 = vmatmul.f32.gmra.mxu1 %v181_v28  ;;  %509 = vmatmul.f32.gmra.mxu2 %v237_v29  ;;  %v147_v29 = vld [vmem:[#allocation2 + $0x1c8] sm:$0xff] }
  0x5d   :  { %783 = vmatpush.msrb.mxu3 %v363_v30  ;;  %892 = vmatpush.msrb.mxu0 %v383_v31  ;;  %v148_v30 = vld [vmem:[#allocation2 + $0x1d0] sm:$0xff]  ;;  %v149_v31 = vld [vmem:[#allocation2 + $0x1d8] sm:$0xff] }
  0x5e   :  { %533 = vmatmul.f32.gmra.mxu3 %v293_v32  ;;  %1109 = vmatpush.msra.mxu2 %v424_v45  ;;  %v419_v32 = vld [vmem:[#allocation5 + $0x348] sm:$0xff] }
  0x5f   :  { %784 = vmatpush.msrb.mxu3 %v362_v34  ;;  %893 = vmatpush.msrb.mxu0 %v382_v35  ;;  %v150_v34 = vld [vmem:[#allocation2 + $0x1e0] sm:$0xff] }
  0x60   :  { %461 = vmatmul.f32.gmra.mxu0 %v125_v36  ;;  %996 = vmatpush.msra.mxu1 %v408_v47  ;;  %v3476_v35 = vld [vmem:[%s4654_s2] ss:$0 sm:$0xff] }
  0x61   :  { %894 = vmatpush.msrb.mxu0 %v381_v38  ;;  %1110 = vmatpush.msra.mxu2 %v423_v55  ;;  %v403_v38 = vld [vmem:[#allocation5 + $0x2c8] sm:$0xff]  ;;  %v418_v55 = vld [vmem:[#allocation5 + $0x340] sm:$0xff] }
  0x62   :  { %997 = vmatpush.msra.mxu1 %v407_v57  ;;  %v164_v57 = vld [vmem:[#allocation2 + $0x250] sm:$0xff] }
  0x63   :  { %895 = vmatpush.msrb.mxu0 %v380_v39  ;;  %1111 = vmatpush.msra.mxu2 %v422_v1 }
  0x64   :  { %488 = vmatmul.f32.gmra.mxu1 %v188_v40  ;;  %512 = vmatmul.f32.gmra.mxu2 %v244_v41  ;;  %v154_v41 = vld [vmem:[#allocation2 + $0x200] sm:$0xff] }
  0x65   :  { %896 = vmatpush.msrb.mxu0 %v379_v42  ;;  %998 = vmatpush.msra.mxu1 %v406_v3  ;;  %v155_v42 = vld [vmem:[#allocation2 + $0x208] sm:$0xff] }
  0x66   :  { %536 = vmatmul.f32.gmra.mxu3 %v300_v43  ;;  %1112 = vmatpush.msra.mxu2 %v421_v11 }
  0x67   :  { %897 = vmatpush.msrb.mxu0 %v378_v44  ;;  %999 = vmatpush.msra.mxu1 %v405_v13  ;;  %v156_v44 = vld [vmem:[#allocation2 + $0x210] sm:$0xff]  ;;  %v417_v13 = vld [vmem:[#allocation5 + $0x338] sm:$0xff] }
  0x68   :  { %464 = vmatmul.f32.gmra.mxu0 %v132_v46  ;;  %1113 = vmatpush.msra.mxu2 %v420_v21  ;;  %v157_v46 = vld [vmem:[#allocation2 + $0x218] sm:$0xff]  ;;  %v182_v21 = vld [vmem:[#allocation2 + $0x2e0] sm:$0xff] }
  0x69   :  { %1000 = vmatpush.msra.mxu1 %v404_v23 }
  0x6a   :  { %1114 = vmatpush.msra.mxu2 %v419_v32  ;;  %v189_v32 = vld [vmem:[#allocation2 + $0x318] sm:$0xff] }
  0x6b   :  { %1001 = vmatpush.msra.mxu1 %v403_v38  ;;  %v191_v38 = vld [vmem:[#allocation2 + $0x328] sm:$0xff] }
  0x6c   :  { %491 = vmatmul.f32.gmra.mxu1 %v195_v48  ;;  %515 = vmatmul.f32.gmra.mxu2 %v251_v49 }
  0x6d   :  { %1115 = vmatpush.msra.mxu2 %v418_v55 }
  0x6e   :  { %539 = vmatmul.f32.gmra.mxu3 %v307_v50 }
  0x6f   :  { %1116 = vmatpush.msra.mxu2 %v417_v13  ;;  %v415_v13 = vld [vmem:[#allocation5 + $0x328] sm:$0xff] }
  0x70   :  { %467 = vmatmul.f32.gmra.mxu0 %v139_v51  ;;  %v161_v51 = vld [vmem:[#allocation2 + $0x238] sm:$0xff] }
  0x74   :  { %559 = vmatmul.f32.vlgmr.msrb.gmra.mxu1 %v91_v52  ;;  %672 = vmatmul.f32.vlgmr.msrb.gmra.mxu2 %v92_v53  ;;  %v162_v52 = vld [vmem:[#allocation2 + $0x240] sm:$0xff] }
  0x76   :  { %785 = vmatmul.f32.vlgmr.msrb.gmra.mxu3 %v93_v54  ;;  %v163_v54 = vld [vmem:[#allocation2 + $0x248] sm:$0xff] }
  0x78   :  { %898 = vmatmul.f32.vlgmr.msrb.gmra.mxu0 %v94_v56 }
  0x7c   :  { %562 = vmatmul.f32.gmra.mxu1 %v98_v58  ;;  %675 = vmatmul.f32.gmra.mxu2 %v99_v59 }
  0x7e   :  { %788 = vmatmul.f32.gmra.mxu3 %v100_v60  ;;  %v402_v60 = vld [vmem:[#allocation5 + $0x2c0] sm:$0xff] }
  0x7f   :  { %1002 = vmatpush.msra.mxu1 %v402_v60  ;;  %v199_v60 = vld [vmem:[#allocation2 + $0x368] sm:$0xff] }
  0x80   :  { %901 = vmatmul.f32.gmra.mxu0 %v101_v61 }
  0x84   :  { %565 = vmatmul.f32.gmra.mxu1 %v105_v62  ;;  %678 = vmatmul.f32.gmra.mxu2 %v106_v63  ;;  %v168_v63 = vld [vmem:[#allocation2 + $0x270] sm:$0xff] }
  0x86   :  { %791 = vmatmul.f32.gmra.mxu3 %v107_v0  ;;  %v169_v0 = vld [vmem:[#allocation2 + $0x278] sm:$0xff] }
  0x88   :  { %904 = vmatmul.f32.gmra.mxu0 %v108_v2  ;;  %v170_v2 = vld [vmem:[#allocation2 + $0x280] sm:$0xff] }
  0x8c   :  { %568 = vmatmul.f32.gmra.mxu1 %v112_v4  ;;  %681 = vmatmul.f32.gmra.mxu2 %v113_v5  ;;  %v171_v4 = vld [vmem:[#allocation2 + $0x288] sm:$0xff] }
  0x8e   :  { %794 = vmatmul.f32.gmra.mxu3 %v114_v6 }
  0x90   :  { %907 = vmatmul.f32.gmra.mxu0 %v115_v7 }
  0x94   :  { %571 = vmatmul.f32.gmra.mxu1 %v119_v8  ;;  %684 = vmatmul.f32.gmra.mxu2 %v120_v9  ;;  %v175_v9 = vld [vmem:[#allocation2 + $0x2a8] sm:$0xff] }
  0x96   :  { %797 = vmatmul.f32.gmra.mxu3 %v121_v10  ;;  %v176_v10 = vld [vmem:[#allocation2 + $0x2b0] sm:$0xff] }
  0x98   :  { %910 = vmatmul.f32.gmra.mxu0 %v122_v12  ;;  %v177_v12 = vld [vmem:[#allocation2 + $0x2b8] sm:$0xff] }
  0x9c   :  { %574 = vmatmul.f32.gmra.mxu1 %v126_v14  ;;  %687 = vmatmul.f32.gmra.mxu2 %v127_v15  ;;  %v178_v15 = vld [vmem:[#allocation2 + $0x2c0] sm:$0xff] }
  0x9e   :  { %800 = vmatmul.f32.gmra.mxu3 %v128_v16 }
  0xa0   :  { %913 = vmatmul.f32.gmra.mxu0 %v129_v17 }
  0xa4   :  { %577 = vmatmul.f32.gmra.mxu1 %v133_v18  ;;  %690 = vmatmul.f32.gmra.mxu2 %v134_v19  ;;  %v401_v18 = vld [vmem:[#allocation5 + $0x2b8] sm:$0xff] }
  0xa5   :  { %1003 = vmatpush.msra.mxu1 %v401_v18 }
  0xa6   :  { %803 = vmatmul.f32.gmra.mxu3 %v135_v20 }
  0xa8   :  { %916 = vmatmul.f32.gmra.mxu0 %v136_v22  ;;  %v183_v22 = vld [vmem:[#allocation2 + $0x2e8] sm:$0xff] }
  0xac   :  { %580 = vmatmul.f32.gmra.mxu1 %v140_v24  ;;  %693 = vmatmul.f32.gmra.mxu2 %v141_v25  ;;  %v184_v24 = vld [vmem:[#allocation2 + $0x2f0] sm:$0xff] }
  0xae   :  { %806 = vmatmul.f32.gmra.mxu3 %v142_v26  ;;  %v185_v26 = vld [vmem:[#allocation2 + $0x2f8] sm:$0xff] }
  0xb0   :  { %919 = vmatmul.f32.gmra.mxu0 %v143_v27 }
  0xb1   :  { %v3469_v28 = vpop.f32.mrf.mxu1 }
  0xb4   :  { %583 = vmatmul.f32.gmra.mxu1 %v147_v29  ;;  %696 = vmatmul.f32.gmra.mxu2 %v148_v30 }
  0xb5   :  { %v3471_v33 = vpop.f32.mrf.mxu0 }
  0xb6   :  { %809 = vmatmul.f32.gmra.mxu3 %v149_v31 }
  0xb7   :  { %v495_v36 = vpop.f32.mrf.mxu2 }
  0xb8   :  { %v3479_v37 = vadd.f32 %v3476_v35, %v495_v36  ;;  %922 = vmatmul.f32.gmra.mxu0 %v150_v34  ;;  %v190_v34 = vld [vmem:[#allocation2 + $0x320] sm:$0xff] }
  0xb9   :  { %v3481_v39 = vpop.f32.mrf.mxu1  ;;  %v519_v40 = vpop.f32.mrf.mxu3 }
  0xba   :  { %v3484_v43 = vadd.f32 %v3476_v35, %v519_v40  ;;  %v416_v40 = vld [vmem:[#allocation5 + $0x330] sm:$0xff] }
  0xbb   :  { %1117 = vmatpush.msra.mxu2 %v416_v40 }
  0xbc   :  { %586 = vmatmul.f32.gmra.mxu1 %v154_v41  ;;  %699 = vmatmul.f32.gmra.mxu2 %v155_v42  ;;  %v192_v42 = vld [vmem:[#allocation2 + $0x330] sm:$0xff] }
  0xbd   :  { %v3486_v45 = vpop.f32.mrf.mxu0  ;;  %1118 = vmatpush.msra.mxu2 %v415_v13  ;;  %v398_v13 = vld [vmem:[#allocation5 + $0x2a0] sm:$0xff] }
  0xbe   :  { %812 = vmatmul.f32.gmra.mxu3 %v156_v44  ;;  %v451_v18 = vadd.f32 %v3476_v35, %v3486_v45 }
  0xbf   :  { %v498_v47 = vpop.f32.mrf.mxu2 }
  0xc0   :  { %v3489_v48 = vadd.f32 %v3476_v35, %v498_v47  ;;  %925 = vmatmul.f32.gmra.mxu0 %v157_v46  ;;  %v400_v47 = vld [vmem:[#allocation5 + $0x2b0] sm:$0xff] }
  0xc1   :  { %v3491_v49 = vpop.f32.mrf.mxu1  ;;  %v522_v50 = vpop.f32.mrf.mxu3  ;;  %1004 = vmatpush.msra.mxu1 %v400_v47 }
  0xc2   :  { %v3494_v53 = vadd.f32 %v3476_v35, %v522_v50 }
  0xc4   :  { %589 = vmatmul.f32.gmra.mxu1 %v161_v51  ;;  %702 = vmatmul.f32.gmra.mxu2 %v162_v52  ;;  %v196_v52 = vld [vmem:[#allocation2 + $0x350] sm:$0xff] }
  0xc5   :  { %v3496_v56 = vpop.f32.mrf.mxu0 }
  0xc6   :  { %815 = vmatmul.f32.gmra.mxu3 %v163_v54  ;;  %v197_v54 = vld [vmem:[#allocation2 + $0x358] sm:$0xff]  ;;  %v454_v45 = vadd.f32 %v3476_v35, %v3496_v56 }
  0xc7   :  { %v501_v58 = vpop.f32.mrf.mxu2 }
  0xc8   :  { %v3499_v59 = vadd.f32 %v3476_v35, %v501_v58  ;;  %928 = vmatmul.f32.gmra.mxu0 %v164_v57  ;;  %v198_v57 = vld [vmem:[#allocation2 + $0x360] sm:$0xff] }
  0xc9   :  { %v3501_v61 = vpop.f32.mrf.mxu1  ;;  %v525_v62 = vpop.f32.mrf.mxu3 }
  0xca   :  { %v3504_v1 = vadd.f32 %v3476_v35, %v525_v62 }
  0xcc   :  { %592 = vmatmul.f32.gmra.mxu1 %v168_v63  ;;  %705 = vmatmul.f32.gmra.mxu2 %v169_v0  ;;  %v448_v63 = vadd.f32 %v3476_v35, %v3471_v33 }
  0xcd   :  { %v3506_v3 = vpop.f32.mrf.mxu0 }
  0xce   :  { %818 = vmatmul.f32.gmra.mxu3 %v170_v2  ;;  %v457_v56 = vadd.f32 %v3476_v35, %v3506_v3 }
  0xcf   :  { %v504_v5 = vpop.f32.mrf.mxu2 }
  0xd0   :  { %v3509_v6 = vadd.f32 %v3476_v35, %v504_v5  ;;  %931 = vmatmul.f32.gmra.mxu0 %v171_v4  ;;  %v203_v5 = vld [vmem:[#allocation2 + $0x388] sm:$0xff] }
  0xd1   :  { %v3511_v7 = vpop.f32.mrf.mxu1  ;;  %v528_v8 = vpop.f32.mrf.mxu3 }
  0xd2   :  { %v3514_v11 = vadd.f32 %v3476_v35, %v528_v8  ;;  %v204_v8 = vld [vmem:[#allocation2 + $0x390] sm:$0xff] }
  0xd4   :  { %595 = vmatmul.f32.gmra.mxu1 %v175_v9  ;;  %708 = vmatmul.f32.gmra.mxu2 %v176_v10  ;;  %v205_v10 = vld [vmem:[#allocation2 + $0x398] sm:$0xff] }
  0xd5   :  { %v3516_v14 = vpop.f32.mrf.mxu0 }
  0xd6   :  { %821 = vmatmul.f32.gmra.mxu3 %v177_v12  ;;  %v460_v3 = vadd.f32 %v3476_v35, %v3516_v14 }
  0xd7   :  { %v507_v16 = vpop.f32.mrf.mxu2 }
  0xd8   :  { %v3519_v17 = vadd.f32 %v3476_v35, %v507_v16  ;;  %934 = vmatmul.f32.gmra.mxu0 %v178_v15  ;;  %v206_v16 = vld [vmem:[#allocation2 + $0x3a0] sm:$0xff] }
  0xd9   :  { %v3521_v19 = vpop.f32.mrf.mxu1  ;;  %v531_v20 = vpop.f32.mrf.mxu3 }
  0xda   :  { %v3524_v23 = vadd.f32 %v3476_v35, %v531_v20 }
  0xdc   :  { %598 = vmatmul.f32.gmra.mxu1 %v182_v21  ;;  %711 = vmatmul.f32.gmra.mxu2 %v183_v22  ;;  %v399_v21 = vld [vmem:[#allocation5 + $0x2a8] sm:$0xff] }
  0xdd   :  { %v3526_v25 = vpop.f32.mrf.mxu0  ;;  %1005 = vmatpush.msra.mxu1 %v399_v21  ;;  %v226_v21 = vld [vmem:[#allocation2 + $0x440] sm:$0xff] }
  0xde   :  { %824 = vmatmul.f32.gmra.mxu3 %v184_v24  ;;  %v463_v14 = vadd.f32 %v3476_v35, %v3526_v25 }
  0xdf   :  { %v510_v27 = vpop.f32.mrf.mxu2  ;;  %1006 = vmatpush.msra.mxu1 %v398_v13  ;;  %v240_v13 = vld [vmem:[#allocation2 + $0x4b0] sm:$0xff] }
  0xe0   :  { %v3529_v29 = vadd.f32 %v3476_v35, %v510_v27  ;;  %937 = vmatmul.f32.gmra.mxu0 %v185_v26  ;;  %v210_v26 = vld [vmem:[#allocation2 + $0x3c0] sm:$0xff]  ;;  %v211_v27 = vld [vmem:[#allocation2 + $0x3c8] sm:$0xff] }
  0xe1   :  { %v3531_v30 = vpop.f32.mrf.mxu1  ;;  %v534_v31 = vpop.f32.mrf.mxu3 }
  0xe2   :  { %v3534_v36 = vadd.f32 %v3476_v35, %v534_v31 }
  0xe4   :  { %601 = vmatmul.f32.gmra.mxu1 %v189_v32  ;;  %714 = vmatmul.f32.gmra.mxu2 %v190_v34  ;;  %v212_v32 = vld [vmem:[#allocation2 + $0x3d0] sm:$0xff] }
  0xe5   :  { %v3536_v41 = vpop.f32.mrf.mxu0 }
  0xe6   :  { %827 = vmatmul.f32.gmra.mxu3 %v191_v38  ;;  %v466_v25 = vadd.f32 %v3476_v35, %v3536_v41 }
  0xe7   :  { %v513_v44 = vpop.f32.mrf.mxu2 }
  0xe8   :  { %v3539_v46 = vadd.f32 %v3476_v35, %v513_v44  ;;  %940 = vmatmul.f32.gmra.mxu0 %v192_v42  ;;  %v213_v42 = vld [vmem:[#allocation2 + $0x3d8] sm:$0xff] }
  0xe9   :  { %v3541_v50 = vpop.f32.mrf.mxu1  ;;  %v537_v51 = vpop.f32.mrf.mxu3 }
  0xea   :  { %v3544_v55 = vadd.f32 %v3476_v35, %v537_v51 }
  0xec   :  { %604 = vmatmul.f32.gmra.mxu1 %v196_v52  ;;  %717 = vmatmul.f32.gmra.mxu2 %v197_v54  ;;  %v217_v54 = vld [vmem:[#allocation2 + $0x3f8] sm:$0xff] }
  0xed   :  { %v3546_v58 = vpop.f32.mrf.mxu0 }
  0xee   :  { %830 = vmatmul.f32.gmra.mxu3 %v198_v57  ;;  %v218_v57 = vld [vmem:[#allocation2 + $0x400] sm:$0xff]  ;;  %v469_v41 = vadd.f32 %v3476_v35, %v3546_v58 }
  0xef   :  { %v516_v62 = vpop.f32.mrf.mxu2 }
  0xf0   :  { %v3551_v0 = vadd.f32 %v3476_v35, %v516_v62  ;;  %943 = vmatmul.f32.gmra.mxu0 %v199_v60  ;;  %v219_v62 = vld [vmem:[#allocation2 + $0x408] sm:$0xff] }
  0xf1   :  { %v540_v2 = vpop.f32.mrf.mxu3  ;;  %v560_v4 = vpop.f32.mrf.mxu1 }
  0xf2   :  { %v3554_v9 = vadd.f32 %v3476_v35, %v540_v2  ;;  %v561_v12 = vadd.f32 %v560_v4, %v448_v63  ;;  %v414_v4 = vld [vmem:[#allocation5 + $0x320] sm:$0xff] }
  0xf3   :  { %1119 = vmatpush.msra.mxu2 %v414_v4  ;;  %v397_v4 = vld [vmem:[#allocation5 + $0x298] sm:$0xff] }
  0xf4   :  { %607 = vmatmul.f32.gmra.mxu1 %v203_v5  ;;  %720 = vmatmul.f32.gmra.mxu2 %v204_v8  ;;  %v220_v8 = vld [vmem:[#allocation2 + $0x410] sm:$0xff] }
  0xf5   :  { %v899_v15 = vpop.f32.mrf.mxu0  ;;  %1007 = vmatpush.msra.mxu1 %v397_v4  ;;  %v254_v4 = vld [vmem:[#allocation2 + $0x520] sm:$0xff] }
  0xf6   :  { %833 = vmatmul.f32.gmra.mxu3 %v205_v10 }
  0xf7   :  { %v673_v33 = vpop.f32.mrf.mxu2 }
  0xf8   :  { %v674_v20 = vadd.f32 %v673_v33, %v561_v12  ;;  %946 = vmatmul.f32.gmra.mxu0 %v206_v16  ;;  %v224_v33 = vld [vmem:[#allocation2 + $0x430] sm:$0xff] }
  0xf9   :  { %v563_v22 = vpop.f32.mrf.mxu1  ;;  %v786_v24 = vpop.f32.mrf.mxu3 }
  0xfa   :  { %v787_v31 = vadd.f32 %v786_v24, %v674_v20  ;;  %v564_v34 = vadd.f32 %v563_v22, %v451_v18  ;;  %v225_v18 = vld [vmem:[#allocation2 + $0x438] sm:$0xff] }
  0xfc   :  { %v3558_v38 = vadd.f32 %v899_v15, %v787_v31  ;;  %610 = vmatmul.f32.gmra.mxu1 %v210_v26  ;;  %723 = vmatmul.f32.gmra.mxu2 %v211_v27  ;;  %v227_v27 = vld [vmem:[#allocation2 + $0x448] sm:$0xff] }
  0xfd   :  { %v902_v40 = vpop.f32.mrf.mxu0 }
  0xfe   :  { %836 = vmatmul.f32.gmra.mxu3 %v212_v32 }
  0xff   :  { %v676_v44 = vpop.f32.mrf.mxu2 }
 0x100   :  { %v677_v47 = vadd.f32 %v676_v44, %v564_v34  ;;  %949 = vmatmul.f32.gmra.mxu0 %v213_v42  ;;  %v231_v42 = vld [vmem:[#allocation2 + $0x468] sm:$0xff]  ;;  %v232_v44 = vld [vmem:[#allocation2 + $0x470] sm:$0xff] }
 0x101   :  { %v566_v51 = vpop.f32.mrf.mxu1  ;;  %v789_v52 = vpop.f32.mrf.mxu3 }
 0x102   :  { %v790_v60 = vadd.f32 %v789_v52, %v677_v47  ;;  %v567_v63 = vadd.f32 %v566_v51, %v454_v45  ;;  %v233_v47 = vld [vmem:[#allocation2 + $0x478] sm:$0xff] }
 0x104   :  { %v3562_v2 = vadd.f32 %v902_v40, %v790_v60  ;;  %613 = vmatmul.f32.gmra.mxu1 %v217_v54  ;;  %726 = vmatmul.f32.gmra.mxu2 %v218_v57  ;;  %v413_v54 = vld [vmem:[#allocation5 + $0x318] sm:$0xff]  ;;  %v234_v60 = vld [vmem:[#allocation2 + $0x480] sm:$0xff] }
 0x105   :  { %v905_v5 = vpop.f32.mrf.mxu0  ;;  %1120 = vmatpush.msra.mxu2 %v413_v54  ;;  %v396_v54 = vld [vmem:[#allocation5 + $0x290] sm:$0xff] }
 0x106   :  { %839 = vmatmul.f32.gmra.mxu3 %v219_v62  ;;  %1008 = vmatpush.msra.mxu1 %v396_v54 }
 0x107   :  { %v679_v10 = vpop.f32.mrf.mxu2 }
 0x108   :  { %v680_v12 = vadd.f32 %v679_v10, %v567_v63  ;;  %952 = vmatmul.f32.gmra.mxu0 %v220_v8  ;;  %v238_v10 = vld [vmem:[#allocation2 + $0x4a0] sm:$0xff] }
 0x109   :  { %v569_v15 = vpop.f32.mrf.mxu1  ;;  %v792_v16 = vpop.f32.mrf.mxu3 }
 0x10a   :  { %v793_v20 = vadd.f32 %v792_v16, %v680_v12  ;;  %v570_v22 = vadd.f32 %v569_v15, %v457_v56  ;;  %v239_v56 = vld [vmem:[#allocation2 + $0x4a8] sm:$0xff] }
 0x10c   :  { %v3566_v24 = vadd.f32 %v905_v5, %v793_v20  ;;  %616 = vmatmul.f32.gmra.mxu1 %v224_v33  ;;  %729 = vmatmul.f32.gmra.mxu2 %v225_v18  ;;  %v241_v18 = vld [vmem:[#allocation2 + $0x4b8] sm:$0xff] }
 0x10d   :  { %v908_v26 = vpop.f32.mrf.mxu0 }
 0x10e   :  { %842 = vmatmul.f32.gmra.mxu3 %v226_v21 }
 0x10f   :  { %v682_v31 = vpop.f32.mrf.mxu2 }
 0x110   :  { %v683_v32 = vadd.f32 %v682_v31, %v570_v22  ;;  %955 = vmatmul.f32.gmra.mxu0 %v227_v27  ;;  %v245_v27 = vld [vmem:[#allocation2 + $0x4d8] sm:$0xff]  ;;  %v246_v31 = vld [vmem:[#allocation2 + $0x4e0] sm:$0xff] }
 0x111   :  { %v572_v34 = vpop.f32.mrf.mxu1  ;;  %v795_v40 = vpop.f32.mrf.mxu3 }
 0x112   :  { %v796_v45 = vadd.f32 %v795_v40, %v683_v32  ;;  %v573_v51 = vadd.f32 %v572_v34, %v460_v3  ;;  %v247_v32 = vld [vmem:[#allocation2 + $0x4e8] sm:$0xff] }
 0x114   :  { %v3570_v52 = vadd.f32 %v908_v26, %v796_v45  ;;  %619 = vmatmul.f32.gmra.mxu1 %v231_v42  ;;  %732 = vmatmul.f32.gmra.mxu2 %v232_v44  ;;  %v412_v42 = vld [vmem:[#allocation5 + $0x310] sm:$0xff] }
 0x115   :  { %v911_v57 = vpop.f32.mrf.mxu0  ;;  %v248_v44 = vld [vmem:[#allocation2 + $0x4f0] sm:$0xff]  ;;  %1121 = vmatpush.msra.mxu2 %v412_v42 }
 0x116   :  { %845 = vmatmul.f32.gmra.mxu3 %v233_v47 }
 0x117   :  { %v685_v62 = vpop.f32.mrf.mxu2 }
 0x118   :  { %v686_v63 = vadd.f32 %v685_v62, %v573_v51  ;;  %958 = vmatmul.f32.gmra.mxu0 %v234_v60  ;;  %v252_v62 = vld [vmem:[#allocation2 + $0x510] sm:$0xff] }
 0x119   :  { %v575_v5 = vpop.f32.mrf.mxu1  ;;  %v798_v8 = vpop.f32.mrf.mxu3 }
 0x11a   :  { %v799_v12 = vadd.f32 %v798_v8, %v686_v63  ;;  %v576_v15 = vadd.f32 %v575_v5, %v463_v14  ;;  %v253_v14 = vld [vmem:[#allocation2 + $0x518] sm:$0xff] }
 0x11c   :  { %v3574_v16 = vadd.f32 %v911_v57, %v799_v12  ;;  %622 = vmatmul.f32.gmra.mxu1 %v238_v10  ;;  %735 = vmatmul.f32.gmra.mxu2 %v239_v56  ;;  %v255_v10 = vld [vmem:[#allocation2 + $0x528] sm:$0xff] }
 0x11d   :  { %v914_v33 = vpop.f32.mrf.mxu0 }
 0x11e   :  { %848 = vmatmul.f32.gmra.mxu3 %v240_v13 }
 0x11f   :  { %v688_v20 = vpop.f32.mrf.mxu2 }
 0x120   :  { %v689_v21 = vadd.f32 %v688_v20, %v576_v15  ;;  %961 = vmatmul.f32.gmra.mxu0 %v241_v18  ;;  %v260_v18 = vld [vmem:[#allocation2 + $0x550] sm:$0xff] }
 0x121   :  { %v578_v22 = vpop.f32.mrf.mxu1  ;;  %v801_v26 = vpop.f32.mrf.mxu3 }
 0x122   :  { %v802_v3 = vadd.f32 %v801_v26, %v689_v21  ;;  %v579_v34 = vadd.f32 %v578_v22, %v466_v25  ;;  %v261_v25 = vld [vmem:[#allocation2 + $0x558] sm:$0xff]  ;;  %v472_v21 = vadd.f32 %v3476_v35, %v3469_v28  ;;  %v411_v26 = vld [vmem:[#allocation5 + $0x308] sm:$0xff]  ;;  %v475_v28 = vadd.f32 %v3476_v35, %v3481_v39  ;;  %v276_v39 = vld [vmem:[#allocation2 + $0x5d0] sm:$0xff] }
 0x123   :  { %1122 = vmatpush.msra.mxu2 %v411_v26 }
 0x124   :  { %v3578_v40 = vadd.f32 %v914_v33, %v802_v3  ;;  %625 = vmatmul.f32.gmra.mxu1 %v245_v27  ;;  %738 = vmatmul.f32.gmra.mxu2 %v246_v31  ;;  %v259_v33 = vld [vmem:[#allocation2 + $0x548] sm:$0xff]  ;;  %v262_v27 = vld [vmem:[#allocation2 + $0x560] sm:$0xff] }
 0x125   :  { %v917_v45 = vpop.f32.mrf.mxu0 }
 0x126   :  { %851 = vmatmul.f32.gmra.mxu3 %v247_v32 }
 0x127   :  { %v691_v47 = vpop.f32.mrf.mxu2 }
 0x128   :  { %v692_v51 = vadd.f32 %v691_v47, %v579_v34  ;;  %964 = vmatmul.f32.gmra.mxu0 %v248_v44  ;;  %v395_v34 = vld [vmem:[#allocation5 + $0x288] sm:$0xff]  ;;  %v266_v44 = vld [vmem:[#allocation2 + $0x580] sm:$0xff]  ;;  %v268_v47 = vld [vmem:[#allocation2 + $0x590] sm:$0xff] }
 0x129   :  { %v581_v57 = vpop.f32.mrf.mxu1  ;;  %v804_v60 = vpop.f32.mrf.mxu3  ;;  %1009 = vmatpush.msra.mxu1 %v395_v34  ;;  %v289_v34 = vld [vmem:[#allocation2 + $0x638] sm:$0xff] }
 0x12a   :  { %v805_v63 = vadd.f32 %v804_v60, %v692_v51  ;;  %v582_v5 = vadd.f32 %v581_v57, %v469_v41  ;;  %v269_v41 = vld [vmem:[#allocation2 + $0x598] sm:$0xff] }
 0x12c   :  { %v3582_v8 = vadd.f32 %v917_v45, %v805_v63  ;;  %628 = vmatmul.f32.gmra.mxu1 %v252_v62  ;;  %741 = vmatmul.f32.gmra.mxu2 %v253_v14  ;;  %v267_v45 = vld [vmem:[#allocation2 + $0x588] sm:$0xff]  ;;  %v273_v62 = vld [vmem:[#allocation2 + $0x5b8] sm:$0xff]  ;;  %v274_v14 = vld [vmem:[#allocation2 + $0x5c0] sm:$0xff] }
 0x12d   :  { %v920_v58 = vpop.f32.mrf.mxu0  ;;  %v275_v63 = vld [vmem:[#allocation2 + $0x5c8] sm:$0xff] }
 0x12e   :  { %854 = vmatmul.f32.gmra.mxu3 %v254_v4  ;;  %v478_v4 = vadd.f32 %v3476_v35, %v3491_v49  ;;  %v481_v49 = vadd.f32 %v3476_v35, %v3501_v61 }
 0x12f   :  { %v694_v56 = vpop.f32.mrf.mxu2 }
 0x130   :  { %v695_v12 = vadd.f32 %v694_v56, %v582_v5  ;;  %967 = vmatmul.f32.gmra.mxu0 %v255_v10  ;;  %v410_v5 = vld [vmem:[#allocation5 + $0x300] sm:$0xff] }
 0x131   :  { %v584_v13 = vpop.f32.mrf.mxu1  ;;  %v807_v15 = vpop.f32.mrf.mxu3  ;;  %1123 = vmatpush.msra.mxu2 %v410_v5  ;;  %v301_v5 = vld [vmem:[#allocation2 + $0x698] sm:$0xff] }
 0x132   :  { %v808_v20 = vadd.f32 %v807_v15, %v695_v12  ;;  %v585_v31 = vadd.f32 %v584_v13, %v472_v21  ;;  %v280_v15 = vld [vmem:[#allocation2 + $0x5f0] sm:$0xff] }
 0x134   :  { %v3586_v22 = vadd.f32 %v920_v58, %v808_v20  ;;  %631 = vmatmul.f32.gmra.mxu1 %v259_v33  ;;  %744 = vmatmul.f32.gmra.mxu2 %v260_v18  ;;  %v394_v58 = vld [vmem:[#allocation5 + $0x280] sm:$0xff]  ;;  %v281_v33 = vld [vmem:[#allocation2 + $0x5f8] sm:$0xff]  ;;  %v283_v20 = vld [vmem:[#allocation2 + $0x608] sm:$0xff] }
 0x135   :  { %1010 = vmatpush.msra.mxu1 %v394_v58  ;;  %v282_v18 = vld [vmem:[#allocation2 + $0x600] sm:$0xff]  ;;  %v304_v58 = vld [vmem:[#allocation2 + $0x6b0] sm:$0xff] }
 0x136   :  { %857 = vmatmul.f32.gmra.mxu3 %v261_v25 }
 0x137   :  { %v697_v3 = vpop.f32.mrf.mxu2 }
 0x138   :  { %v3588_v32 = vadd.f32 %v697_v3, %v585_v31  ;;  %970 = vmatmul.f32.gmra.mxu0 %v262_v27  ;;  %v287_v31 = vld [vmem:[#allocation2 + $0x628] sm:$0xff]  ;;  %v288_v3 = vld [vmem:[#allocation2 + $0x630] sm:$0xff] }
 0x139   :  { %v587_v42 = vpop.f32.mrf.mxu1 }
 0x13a   :  { %v588_v51 = vadd.f32 %v587_v42, %v475_v28  ;;  %v484_v42 = vadd.f32 %v3476_v35, %v3511_v7 }
 0x13c   :  { %634 = vmatmul.f32.gmra.mxu1 %v266_v44  ;;  %747 = vmatmul.f32.gmra.mxu2 %v267_v45  ;;  %v290_v44 = vld [vmem:[#allocation2 + $0x640] sm:$0xff] }
 0x13e   :  { %860 = vmatmul.f32.gmra.mxu3 %v268_v47 }
 0x13f   :  { %v700_v54 = vpop.f32.mrf.mxu2 }
 0x140   :  { %v3592_v57 = vadd.f32 %v700_v54, %v588_v51  ;;  %973 = vmatmul.f32.gmra.mxu0 %v269_v41  ;;  %v294_v41 = vld [vmem:[#allocation2 + $0x660] sm:$0xff]  ;;  %v295_v51 = vld [vmem:[#allocation2 + $0x668] sm:$0xff]  ;;  %v296_v54 = vld [vmem:[#allocation2 + $0x670] sm:$0xff] }
 0x141   :  { %v590_v60 = vpop.f32.mrf.mxu1 }
 0x142   :  { %v591_v10 = vadd.f32 %v590_v60, %v478_v4  ;;  %v487_v60 = vadd.f32 %v3476_v35, %v3521_v19 }
 0x144   :  { %637 = vmatmul.f32.gmra.mxu1 %v273_v62  ;;  %750 = vmatmul.f32.gmra.mxu2 %v274_v14  ;;  %v297_v62 = vld [vmem:[#allocation2 + $0x678] sm:$0xff] }
 0x146   :  { %863 = vmatmul.f32.gmra.mxu3 %v275_v63 }
 0x147   :  { %v703_v56 = vpop.f32.mrf.mxu2 }
 0x148   :  { %v3596_v12 = vadd.f32 %v703_v56, %v591_v10  ;;  %976 = vmatmul.f32.gmra.mxu0 %v276_v39  ;;  %v302_v39 = vld [vmem:[#allocation2 + $0x6a0] sm:$0xff]  ;;  %v303_v10 = vld [vmem:[#allocation2 + $0x6a8] sm:$0xff]  ;;  %v490_v56 = vadd.f32 %v3476_v35, %v3531_v30 }
 0x149   :  { %v593_v13 = vpop.f32.mrf.mxu1 }
 0x14a   :  { %v594_v25 = vadd.f32 %v593_v13, %v481_v49  ;;  %v309_v49 = vld [vmem:[#allocation2 + $0x6d8] sm:$0xff] }
 0x14c   :  { %640 = vmatmul.f32.gmra.mxu1 %v280_v15  ;;  %753 = vmatmul.f32.gmra.mxu2 %v281_v33 }
 0x14e   :  { %866 = vmatmul.f32.gmra.mxu3 %v282_v18  ;;  %v308_v18 = vld [vmem:[#allocation2 + $0x6d0] sm:$0xff] }
 0x14f   :  { %v706_v21 = vpop.f32.mrf.mxu2 }
 0x150   :  { %v3600_v26 = vadd.f32 %v706_v21, %v594_v25  ;;  %979 = vmatmul.f32.gmra.mxu0 %v283_v20  ;;  %v310_v20 = vld [vmem:[#allocation2 + $0x6e0] sm:$0xff]  ;;  %v493_v25 = vadd.f32 %v3476_v35, %v3541_v50  ;;  %v311_v21 = vld [vmem:[#allocation2 + $0x6e8] sm:$0xff] }
 0x151   :  { %v596_v27 = vpop.f32.mrf.mxu1  ;;  %v102_v50 = vld [vmem:[#allocation2 + $0x60] sm:$0xff] }
 0x152   :  { %v597_v61 = vadd.f32 %v596_v27, %v484_v42  ;;  %v96_v42 = vld [vmem:[#allocation2 + $0x30] sm:$0xff] }
 0x154   :  { %643 = vmatmul.f32.gmra.mxu1 %v287_v31  ;;  %756 = vmatmul.f32.gmra.mxu2 %v288_v3 }
 0x156   :  { %869 = vmatmul.f32.gmra.mxu3 %v289_v34  ;;  %v95_v34 = vld [vmem:[#allocation2 + $0x28] sm:$0xff] }
 0x157   :  { %v709_v45 = vpop.f32.mrf.mxu2 }
 0x158   :  { %v3604_v47 = vadd.f32 %v709_v45, %v597_v61  ;;  %982 = vmatmul.f32.gmra.mxu0 %v290_v44 }
 0x159   :  { %v599_v28 = vpop.f32.mrf.mxu1 }
 0x15a   :  { %v600_v7 = vadd.f32 %v599_v28, %v487_v60  ;;  %v103_v28 = vld [vmem:[#allocation2 + $0x68] sm:$0xff] }
 0x15c   :  { %646 = vmatmul.f32.gmra.mxu1 %v294_v41  ;;  %759 = vmatmul.f32.gmra.mxu2 %v295_v51 }
 0x15e   :  { %872 = vmatmul.f32.gmra.mxu3 %v296_v54 }
 0x15f   :  { %v712_v14 = vpop.f32.mrf.mxu2 }
 0x160   :  { %v3608_v63 = vadd.f32 %v712_v14, %v600_v7  ;;  %985 = vmatmul.f32.gmra.mxu0 %v297_v62  ;;  %v109_v62 = vld [vmem:[#allocation2 + $0x98] sm:$0xff]  ;;  %v110_v7 = vld [vmem:[#allocation2 + $0xa0] sm:$0xff] }
 0x161   :  { %v602_v4 = vpop.f32.mrf.mxu1 }
 0x162   :  { %v603_v19 = vadd.f32 %v602_v4, %v490_v56 }
 0x164   :  { %649 = vmatmul.f32.gmra.mxu1 %v301_v5  ;;  %762 = vmatmul.f32.gmra.mxu2 %v302_v39  ;;  %v116_v39 = vld [vmem:[#allocation2 + $0xd0] sm:$0xff] }
 0x166   :  { %875 = vmatmul.f32.gmra.mxu3 %v303_v10  ;;  %v117_v10 = vld [vmem:[#allocation2 + $0xd8] sm:$0xff] }
 0x167   :  { %v715_v13 = vpop.f32.mrf.mxu2 }
 0x168   :  { %v3612_v15 = vadd.f32 %v715_v13, %v603_v19  ;;  %988 = vmatmul.f32.gmra.mxu0 %v304_v58  ;;  %v123_v13 = vld [vmem:[#allocation2 + $0x108] sm:$0xff] }
 0x169   :  { %v605_v33 = vpop.f32.mrf.mxu1 }
 0x16a   :  { %v606_v30 = vadd.f32 %v605_v33, %v493_v25  ;;  %v124_v33 = vld [vmem:[#allocation2 + $0x110] sm:$0xff]  ;;  %v130_v25 = vld [vmem:[#allocation2 + $0x140] sm:$0xff] }
 0x16c   :  { %652 = vmatmul.f32.gmra.mxu1 %v308_v18  ;;  %765 = vmatmul.f32.gmra.mxu2 %v309_v49 }
 0x16e   :  { %878 = vmatmul.f32.gmra.mxu3 %v310_v20 }
 0x16f   :  { %v718_v27 = vpop.f32.mrf.mxu2 }
 0x170   :  { %v3616_v31 = vadd.f32 %v718_v27, %v606_v30  ;;  %991 = vmatmul.f32.gmra.mxu0 %v311_v21  ;;  %v131_v21 = vld [vmem:[#allocation2 + $0x148] sm:$0xff] }
 0x171   :  { %v608_v3 = vpop.f32.mrf.mxu1 }
 0x172   :  { %v609_v44 = vadd.f32 %v608_v3, %v3479_v37 }
 0x174   :  { %1011 = vmatmul.f32.vlgmr.msra.gmra.mxu1 %v95_v34  ;;  %1124 = vmatmul.f32.vlgmr.msra.gmra.mxu2 %v96_v42  ;;  %v137_v34 = vld [vmem:[#allocation2 + $0x178] sm:$0xff]  ;;  %v138_v42 = vld [vmem:[#allocation2 + $0x180] sm:$0xff] }
 0x177   :  { %v721_v61 = vpop.f32.mrf.mxu2 }
 0x178   :  { %v3619_v45 = vadd.f32 %v721_v61, %v609_v44 }
 0x179   :  { %v611_v35 = vpop.f32.mrf.mxu1 }
 0x17a   :  { %v612_v41 = vadd.f32 %v611_v35, %v3489_v48 }
 0x17c   :  { %1014 = vmatmul.f32.gmra.mxu1 %v102_v50  ;;  %1127 = vmatmul.f32.gmra.mxu2 %v103_v28  ;;  %v144_v50 = vld [vmem:[#allocation2 + $0x1b0] sm:$0xff]  ;;  %v145_v28 = vld [vmem:[#allocation2 + $0x1b8] sm:$0xff] }
 0x17f   :  { %v724_v51 = vpop.f32.mrf.mxu2 }
 0x180   :  { %v3622_v54 = vadd.f32 %v724_v51, %v612_v41 }
 0x181   :  { %v614_v60 = vpop.f32.mrf.mxu1 }
 0x182   :  { %v615_v37 = vadd.f32 %v614_v60, %v3499_v59 }
 0x184   :  { %1017 = vmatmul.f32.gmra.mxu1 %v109_v62  ;;  %1130 = vmatmul.f32.gmra.mxu2 %v110_v7  ;;  %v151_v62 = vld [vmem:[#allocation2 + $0x1e8] sm:$0xff]  ;;  %v152_v7 = vld [vmem:[#allocation2 + $0x1f0] sm:$0xff] }
 0x187   :  { %v727_v14 = vpop.f32.mrf.mxu2 }
 0x188   :  { %v3625_v4 = vadd.f32 %v727_v14, %v615_v37 }
 0x189   :  { %v617_v5 = vpop.f32.mrf.mxu1 }
 0x18a   :  { %v618_v48 = vadd.f32 %v617_v5, %v3509_v6 }
 0x18c   :  { %1020 = vmatmul.f32.gmra.mxu1 %v116_v39  ;;  %1133 = vmatmul.f32.gmra.mxu2 %v117_v10  ;;  %v158_v39 = vld [vmem:[#allocation2 + $0x220] sm:$0xff]  ;;  %v159_v10 = vld [vmem:[#allocation2 + $0x228] sm:$0xff] }
 0x18f   :  { %v730_v56 = vpop.f32.mrf.mxu2 }
 0x190   :  { %v3628_v58 = vadd.f32 %v730_v56, %v618_v48 }
 0x191   :  { %v620_v19 = vpop.f32.mrf.mxu1 }
 0x192   :  { %v621_v59 = vadd.f32 %v620_v19, %v3519_v17 }
 0x194   :  { %1023 = vmatmul.f32.gmra.mxu1 %v123_v13  ;;  %1136 = vmatmul.f32.gmra.mxu2 %v124_v33  ;;  %v165_v13 = vld [vmem:[#allocation2 + $0x258] sm:$0xff]  ;;  %v166_v33 = vld [vmem:[#allocation2 + $0x260] sm:$0xff] }
 0x197   :  { %v733_v18 = vpop.f32.mrf.mxu2 }
 0x198   :  { %v3631_v49 = vadd.f32 %v733_v18, %v621_v59 }
 0x199   :  { %v623_v20 = vpop.f32.mrf.mxu1 }
 0x19a   :  { %v624_v6 = vadd.f32 %v623_v20, %v3529_v29 }
 0x19c   :  { %1026 = vmatmul.f32.gmra.mxu1 %v130_v25  ;;  %1139 = vmatmul.f32.gmra.mxu2 %v131_v21  ;;  %v172_v25 = vld [vmem:[#allocation2 + $0x290] sm:$0xff]  ;;  %v173_v21 = vld [vmem:[#allocation2 + $0x298] sm:$0xff] }
 0x19f   :  { %v736_v30 = vpop.f32.mrf.mxu2 }
 0x1a0   :  { %v3634_v27 = vadd.f32 %v736_v30, %v624_v6 }
 0x1a1   :  { %v626_v3 = vpop.f32.mrf.mxu1 }
 0x1a2   :  { %v627_v17 = vadd.f32 %v626_v3, %v3539_v46 }
 0x1a4   :  { %1029 = vmatmul.f32.gmra.mxu1 %v137_v34  ;;  %1142 = vmatmul.f32.gmra.mxu2 %v138_v42  ;;  %v179_v34 = vld [vmem:[#allocation2 + $0x2c8] sm:$0xff]  ;;  %v180_v42 = vld [vmem:[#allocation2 + $0x2d0] sm:$0xff] }
 0x1a7   :  { %v739_v44 = vpop.f32.mrf.mxu2 }
 0x1a8   :  { %v3637_v61 = vadd.f32 %v739_v44, %v627_v17 }
 0x1a9   :  { %v629_v35 = vpop.f32.mrf.mxu1 }
 0x1aa   :  { %v630_v29 = vadd.f32 %v629_v35, %v3551_v0 }
 0x1ac   :  { %1032 = vmatmul.f32.gmra.mxu1 %v144_v50  ;;  %1145 = vmatmul.f32.gmra.mxu2 %v145_v28  ;;  %v186_v50 = vld [vmem:[#allocation2 + $0x300] sm:$0xff]  ;;  %v187_v28 = vld [vmem:[#allocation2 + $0x308] sm:$0xff] }
 0x1af   :  { %v742_v41 = vpop.f32.mrf.mxu2 }
 0x1b0   :  { %v3640_v51 = vadd.f32 %v742_v41, %v630_v29 }
 0x1b1   :  { %v632_v60 = vpop.f32.mrf.mxu1 }
 0x1b2   :  { %v633_v46 = vadd.f32 %v632_v60, %v3484_v43 }
 0x1b4   :  { %1035 = vmatmul.f32.gmra.mxu1 %v151_v62  ;;  %1148 = vmatmul.f32.gmra.mxu2 %v152_v7  ;;  %v193_v62 = vld [vmem:[#allocation2 + $0x338] sm:$0xff]  ;;  %v194_v7 = vld [vmem:[#allocation2 + $0x340] sm:$0xff] }
 0x1b7   :  { %v745_v37 = vpop.f32.mrf.mxu2 }
 0x1b8   :  { %v3643_v14 = vadd.f32 %v745_v37, %v633_v46 }
 0x1b9   :  { %v635_v5 = vpop.f32.mrf.mxu1 }
 0x1ba   :  { %v636_v0 = vadd.f32 %v635_v5, %v3494_v53 }
 0x1bc   :  { %1038 = vmatmul.f32.gmra.mxu1 %v158_v39  ;;  %1151 = vmatmul.f32.gmra.mxu2 %v159_v10  ;;  %v200_v39 = vld [vmem:[#allocation2 + $0x370] sm:$0xff]  ;;  %v201_v10 = vld [vmem:[#allocation2 + $0x378] sm:$0xff] }
 0x1bf   :  { %v748_v48 = vpop.f32.mrf.mxu2 }
 0x1c0   :  { %v3646_v56 = vadd.f32 %v748_v48, %v636_v0 }
 0x1c1   :  { %v638_v19 = vpop.f32.mrf.mxu1 }
 0x1c2   :  { %v639_v43 = vadd.f32 %v638_v19, %v3504_v1 }
 0x1c4   :  { %1041 = vmatmul.f32.gmra.mxu1 %v165_v13  ;;  %1154 = vmatmul.f32.gmra.mxu2 %v166_v33  ;;  %v207_v13 = vld [vmem:[#allocation2 + $0x3a8] sm:$0xff]  ;;  %v208_v33 = vld [vmem:[#allocation2 + $0x3b0] sm:$0xff] }
 0x1c7   :  { %v751_v59 = vpop.f32.mrf.mxu2 }
 0x1c8   :  { %v3649_v18 = vadd.f32 %v751_v59, %v639_v43 }
 0x1c9   :  { %v641_v20 = vpop.f32.mrf.mxu1 }
 0x1ca   :  { %v642_v53 = vadd.f32 %v641_v20, %v3514_v11 }
 0x1cc   :  { %1044 = vmatmul.f32.gmra.mxu1 %v172_v25  ;;  %1157 = vmatmul.f32.gmra.mxu2 %v173_v21  ;;  %v214_v25 = vld [vmem:[#allocation2 + $0x3e0] sm:$0xff]  ;;  %v215_v21 = vld [vmem:[#allocation2 + $0x3e8] sm:$0xff] }
 0x1cf   :  { %v754_v6 = vpop.f32.mrf.mxu2 }
 0x1d0   :  { %v3652_v30 = vadd.f32 %v754_v6, %v642_v53 }
 0x1d1   :  { %v644_v3 = vpop.f32.mrf.mxu1 }
 0x1d2   :  { %v645_v1 = vadd.f32 %v644_v3, %v3524_v23 }
 0x1d4   :  { %1047 = vmatmul.f32.gmra.mxu1 %v179_v34  ;;  %1160 = vmatmul.f32.gmra.mxu2 %v180_v42 }
 0x1d7   :  { %v757_v17 = vpop.f32.mrf.mxu2 }
 0x1d8   :  { %v3655_v44 = vadd.f32 %v757_v17, %v645_v1  ;;  %v221_v1 = vld [vmem:[#allocation2 + $0x418] sm:$0xff] }
 0x1d9   :  { %v647_v35 = vpop.f32.mrf.mxu1 }
 0x1da   :  { %v648_v11 = vadd.f32 %v647_v35, %v3534_v36 }
 0x1dc   :  { %1050 = vmatmul.f32.gmra.mxu1 %v186_v50  ;;  %1163 = vmatmul.f32.gmra.mxu2 %v187_v28 }
 0x1df   :  { %v760_v29 = vpop.f32.mrf.mxu2 }
 0x1e0   :  { %v3658_v41 = vadd.f32 %v760_v29, %v648_v11 }
 0x1e1   :  { %v650_v60 = vpop.f32.mrf.mxu1 }
 0x1e2   :  { %v651_v23 = vadd.f32 %v650_v60, %v3544_v55  ;;  %v228_v60 = vld [vmem:[#allocation2 + $0x450] sm:$0xff] }
 0x1e4   :  { %1053 = vmatmul.f32.gmra.mxu1 %v193_v62  ;;  %1166 = vmatmul.f32.gmra.mxu2 %v194_v7 }
 0x1e7   :  { %v763_v46 = vpop.f32.mrf.mxu2 }
 0x1e8   :  { %v3661_v37 = vadd.f32 %v763_v46, %v651_v23 }
 0x1e9   :  { %v653_v5 = vpop.f32.mrf.mxu1 }
 0x1ea   :  { %v654_v36 = vadd.f32 %v653_v5, %v3554_v9 }
 0x1ec   :  { %1056 = vmatmul.f32.gmra.mxu1 %v200_v39  ;;  %1169 = vmatmul.f32.gmra.mxu2 %v201_v10  ;;  %v235_v10 = vld [vmem:[#allocation2 + $0x488] sm:$0xff] }
 0x1ef   :  { %v766_v0 = vpop.f32.mrf.mxu2 }
 0x1f0   :  { %v3664_v48 = vadd.f32 %v766_v0, %v654_v36 }
 0x1f1   :  { %v1012_v19 = vpop.f32.mrf.mxu1 }
 0x1f2   :  { %v1013_v55 = vadd.f32 %v1012_v19, %v3558_v38  ;;  %v222_v38 = vld [vmem:[#allocation2 + $0x420] sm:$0xff] }
 0x1f4   :  { %1059 = vmatmul.f32.gmra.mxu1 %v207_v13  ;;  %1172 = vmatmul.f32.gmra.mxu2 %v208_v33 }
 0x1f7   :  { %v1125_v43 = vpop.f32.mrf.mxu2 }
 0x1f8   :  { %v1126_v59 = vadd.f32 %v1125_v43, %v1013_v55  ;;  %v242_v43 = vld [vmem:[#allocation2 + $0x4c0] sm:$0xff] }
 0x1f9   :  { %v1015_v20 = vpop.f32.mrf.mxu1 }
 0x1fa   :  { %vm1221_vm0 = vcmp.ge.f32.partialorder %v1126_v59, 0.0  ;;  %v1253_v53 = vmul.f32 0.01, %v1126_v59  ;;  %v1016_v6 = vadd.f32 %v1015_v20, %v3562_v2  ;;  %v229_v2 = vld [vmem:[#allocation2 + $0x458] sm:$0xff] }
 0x1fc   :  { %1062 = vmatmul.f32.gmra.mxu1 %v214_v25  ;;  %1175 = vmatmul.f32.gmra.mxu2 %v215_v21  ;;  %v3667_v9 = vsel %vm1221_vm0, %v1126_v59, %v1253_v53 }
 0x1fd   :  { %1320 = vadd.xlane.f32.xlu0 %v3667_v9 }
 0x1ff   :  { %v1128_v3 = vpop.f32.mrf.mxu2 }
 0x200   :  { %v1129_v34 = vadd.f32 %v1128_v3, %v1016_v6  ;;  %v249_v6 = vld [vmem:[#allocation2 + $0x4f8] sm:$0xff]  ;;  %v250_v3 = vld [vmem:[#allocation2 + $0x500] sm:$0xff] }
 0x201   :  { %v1018_v42 = vpop.f32.mrf.mxu1 }
 0x202   :  { %vm1222_vm1 = vcmp.ge.f32.partialorder %v1129_v34, 0.0  ;;  %v1254_v17 = vmul.f32 0.01, %v1129_v34  ;;  %v1019_v50 = vadd.f32 %v1018_v42, %v3566_v24  ;;  %v236_v24 = vld [vmem:[#allocation2 + $0x490] sm:$0xff] }
 0x204   :  { %1065 = vmatmul.f32.gmra.mxu1 %v221_v1  ;;  %1178 = vmatmul.f32.gmra.mxu2 %v222_v38  ;;  %v3671_v35 = vsel %vm1222_vm1, %v1129_v34, %v1254_v17 }
 0x205   :  { %1322 = vadd.xlane.f32.xlu0 %v3671_v35 }
 0x207   :  { %v1131_v28 = vpop.f32.mrf.mxu2 }
 0x208   :  { %v1132_v11 = vadd.f32 %v1131_v28, %v1019_v50  ;;  %v256_v50 = vld [vmem:[#allocation2 + $0x530] sm:$0xff]  ;;  %v257_v28 = vld [vmem:[#allocation2 + $0x538] sm:$0xff] }
 0x209   :  { %v1021_v29 = vpop.f32.mrf.mxu1 }
 0x20a   :  { %vm1223_vm2 = vcmp.ge.f32.partialorder %v1132_v11, 0.0  ;;  %v1255_v62 = vmul.f32 0.01, %v1132_v11  ;;  %v1022_v23 = vadd.f32 %v1021_v29, %v3570_v52  ;;  %v243_v52 = vld [vmem:[#allocation2 + $0x4c8] sm:$0xff] }
 0x20b   :  { %v263_v29 = vld [vmem:[#allocation2 + $0x568] sm:$0xff] }
 0x20c   :  { %1068 = vmatmul.f32.gmra.mxu1 %v228_v60  ;;  %1181 = vmatmul.f32.gmra.mxu2 %v229_v2  ;;  %v3675_v7 = vsel %vm1223_vm2, %v1132_v11, %v1255_v62  ;;  %v264_v60 = vld [vmem:[#allocation2 + $0x570] sm:$0xff]  ;;  %v270_v2 = vld [vmem:[#allocation2 + $0x5a0] sm:$0xff]  ;;  %v271_v62 = vld [vmem:[#allocation2 + $0x5a8] sm:$0xff] }
 0x20d   :  { %1324 = vadd.xlane.f32.xlu1 %v3675_v7 }
 0x20f   :  { %v1134_v46 = vpop.f32.mrf.mxu2 }
 0x210   :  { %v1135_v5 = vadd.f32 %v1134_v46, %v1022_v23  ;;  %v278_v23 = vld [vmem:[#allocation2 + $0x5e0] sm:$0xff]  ;;  %v284_v46 = vld [vmem:[#allocation2 + $0x610] sm:$0xff] }
 0x211   :  { %v1024_v39 = vpop.f32.mrf.mxu1 }
 0x212   :  { %vm1224_vm3 = vcmp.ge.f32.partialorder %v1135_v5, 0.0  ;;  %v1256_v36 = vmul.f32 0.01, %v1135_v5  ;;  %v1025_v19 = vadd.f32 %v1024_v39, %v3574_v16  ;;  %v291_v39 = vld [vmem:[#allocation2 + $0x648] sm:$0xff] }
 0x214   :  { %1071 = vmatmul.f32.gmra.mxu1 %v235_v10  ;;  %1184 = vmatmul.f32.gmra.mxu2 %v236_v24  ;;  %v3679_v0 = vsel %vm1224_vm3, %v1135_v5, %v1256_v36  ;;  %v285_v5 = vld [vmem:[#allocation2 + $0x618] sm:$0xff]  ;;  %v292_v10 = vld [vmem:[#allocation2 + $0x650] sm:$0xff]  ;;  %v298_v24 = vld [vmem:[#allocation2 + $0x680] sm:$0xff] }
 0x215   :  { %1326 = vadd.xlane.f32.xlu1 %v3679_v0  ;;  %v299_v36 = vld [vmem:[#allocation2 + $0x688] sm:$0xff] }
 0x217   :  { %v1137_v13 = vpop.f32.mrf.mxu2 }
 0x218   :  { %v1138_v33 = vadd.f32 %v1137_v13, %v1025_v19  ;;  %v305_v19 = vld [vmem:[#allocation2 + $0x6b8] sm:$0xff]  ;;  %v306_v13 = vld [vmem:[#allocation2 + $0x6c0] sm:$0xff] }
 0x219   :  { %v1027_v55 = vpop.f32.mrf.mxu1 }
 0x21a   :  { %vm1225_vm4 = vcmp.ge.f32.partialorder %v1138_v33, 0.0  ;;  %v1257_v59 = vmul.f32 0.01, %v1138_v33  ;;  %v1028_v25 = vadd.f32 %v1027_v55, %v3578_v40 }
 0x21c   :  { %1074 = vmatmul.f32.gmra.mxu1 %v242_v43  ;;  %1187 = vmatmul.f32.gmra.mxu2 %v243_v52  ;;  %v3683_v20 = vsel %vm1225_vm4, %v1138_v33, %v1257_v59  ;;  %v312_v43 = vld [vmem:[#allocation2 + $0x6f0] sm:$0xff]  ;;  %v313_v52 = vld [vmem:[#allocation2 + $0x6f8] sm:$0xff]  ;;  %v810_v59 = vpop.f32.mrf.mxu3 }
 0x21d   :  { %1328 = vadd.xlane.f32.xlu2 %v3683_v20 }
 0x21f   :  { %v1140_v21 = vpop.f32.mrf.mxu2 }
 0x220   :  { %v1141_v53 = vadd.f32 %v1140_v21, %v1028_v25  ;;  %v1317_v25 = vlaneseq  ;;  %v923_v21 = vpop.f32.mrf.mxu0 }
 0x221   :  { %v1030_v34 = vpop.f32.mrf.mxu1 }
 0x222   :  { %vm1226_vm5 = vcmp.ge.f32.partialorder %v1141_v53, 0.0  ;;  %v1258_v16 = vmul.f32 0.01, %v1141_v53  ;;  %v1031_v1 = vadd.f32 %v1030_v34, %v3582_v8  ;;  %v277_v8 = vld [vmem:[#allocation2 + $0x5d8] sm:$0xff] }
 0x224   :  { %1077 = vmatmul.f32.gmra.mxu1 %v249_v6  ;;  %1190 = vmatmul.f32.gmra.mxu2 %v250_v3  ;;  %v3687_v42 = vsel %vm1226_vm5, %v1141_v53, %v1258_v16  ;;  %v3694_v53 = vand.u32 127, %v1317_v25 }
 0x225   :  { %1330 = vadd.xlane.f32.xlu2 %v3687_v42 }
 0x226   :  { %vm1319_vm7 = vcmp.lt.s32.totalorder %v3694_v53, 32 }
 0x227   :  { %v1143_v38 = vpop.f32.mrf.mxu2 }
 0x228   :  { %v1144_v17 = vadd.f32 %v1143_v38, %v1031_v1  ;;  %v813_v38 = vpop.f32.mrf.mxu3 }
 0x229   :  { %v1033_v33 = vpop.f32.mrf.mxu1 }
 0x22a   :  { %vm1227_vm6 = vcmp.ge.f32.partialorder %v1144_v17, 0.0  ;;  %v1259_v40 = vmul.f32 0.01, %v1144_v17 }
 0x22c   :  { %1080 = vmatmul.f32.gmra.mxu1 %v256_v50  ;;  %1193 = vmatmul.f32.gmra.mxu2 %v257_v28  ;;  %v3691_v11 = vsel %vm1227_vm6, %v1144_v17, %v1259_v40  ;;  %v1034_v17 = vadd.f32 %v1033_v33, %v3586_v22  ;;  %v811_v40 = vadd.f32 %v810_v59, %v3588_v32 }
 0x22d   :  { %1332 = vadd.xlane.f32.xlu1 %v3691_v11 }
 0x22f   :  { %v1146_v55 = vpop.f32.mrf.mxu2 }
 0x230   :  { %v816_v32 = vpop.f32.mrf.mxu3 }
 0x231   :  { %v1036_v6 = vpop.f32.mrf.mxu1 }
 0x234   :  { %1083 = vmatmul.f32.gmra.mxu1 %v263_v29  ;;  %1196 = vmatmul.f32.gmra.mxu2 %v264_v60  ;;  %v1147_v29 = vadd.f32 %v1146_v55, %v1034_v17  ;;  %v926_v60 = vpop.f32.mrf.mxu0  ;;  %v2008_v17 = vld [vmem:[#allocation7 + $0x70] sm:$0xff] }
 0x236   :  { %vm1228_vm8 = vcmp.ge.f32.partialorder %v1147_v29, 0.0 }
 0x237   :  { %v1149_v34 = vpop.f32.mrf.mxu2 }
 0x23c   :  { %1086 = vmatmul.f32.gmra.mxu1 %v270_v2  ;;  %1199 = vmatmul.f32.gmra.mxu2 %v271_v62  ;;  %v2009_v62 = vld [vmem:[#allocation7 + $0x78] sm:$0xff]  ;;  %v929_v55 = vpop.f32.mrf.mxu0 }
 0x23d   :  { %2014 = vmatpush.msra.mxu3 %v2009_v62 }
 0x23f   :  { %2015 = vmatpush.msra.mxu3 %v2008_v17 }
 0x244   :  { %1089 = vmatmul.f32.gmra.mxu1 %v277_v8  ;;  %1202 = vmatmul.f32.gmra.mxu2 %v278_v23  ;;  %v924_v23 = vadd.f32 %v923_v21, %v811_v40 }
 0x24c   :  { %1092 = vmatmul.f32.gmra.mxu1 %v284_v46  ;;  %1205 = vmatmul.f32.gmra.mxu2 %v285_v5  ;;  %v1260_v46 = vmul.f32 0.01, %v1147_v29  ;;  %v1152_v5 = vpop.f32.mrf.mxu2 }
 0x254   :  { %1095 = vmatmul.f32.gmra.mxu1 %v291_v39  ;;  %1208 = vmatmul.f32.gmra.mxu2 %v292_v10  ;;  %v1037_v39 = vadd.f32 %v1036_v6, %v924_v23 }
 0x25c   :  { %1098 = vmatmul.f32.gmra.mxu1 %v298_v24  ;;  %1211 = vmatmul.f32.gmra.mxu2 %v299_v36  ;;  %v814_v36 = vadd.f32 %v813_v38, %v3592_v57  ;;  %v1155_v57 = vpop.f32.mrf.mxu2  ;;  %v819_v38 = vpop.f32.mrf.mxu3 }
 0x25d   :  { %v820_v23 = vadd.f32 %v819_v38, %v3600_v26 }
 0x264   :  { %1101 = vmatmul.f32.gmra.mxu1 %v305_v19  ;;  %1214 = vmatmul.f32.gmra.mxu2 %v306_v13  ;;  %v1150_v19 = vadd.f32 %v1149_v34, %v1037_v39  ;;  %v3714_v13 = vsel %vm1228_vm8, %v1147_v29, %v1260_v46 }
 0x266   :  { %v1261_v59 = vmul.f32 0.01, %v1150_v19  ;;  %vm1229_vm9 = vcmp.ge.f32.partialorder %v1150_v19, 0.0 }
 0x26c   :  { %1104 = vmatmul.f32.gmra.mxu1 %v312_v43  ;;  %1217 = vmatmul.f32.gmra.mxu2 %v313_v52  ;;  %v927_v43 = vadd.f32 %v926_v60, %v814_v36 }
 0x270   :  { %v1321_v3 = vpop.xlane.xlu0 %1320 }
 0x271   :  { %v1384_v16 = vmul.f32 0.03125, %v1321_v3 }
 0x273   :  { %v1416_v1 = vsub.f32 %v3667_v9, %v1384_v16  ;;  %v1039_v9 = vpop.f32.mrf.mxu1  ;;  %v817_v16 = vadd.f32 %v816_v32, %v3596_v12  ;;  %v822_v32 = vpop.f32.mrf.mxu3 }
 0x274   :  { %v1040_v21 = vadd.f32 %v1039_v9, %v927_v43  ;;  %v823_v43 = vadd.f32 %v822_v32, %v3604_v47 }
 0x275   :  { %v3701_v50 = vsel %vm1319_vm7, %v1416_v1, 0.0  ;;  %v3725_v1 = vsel %vm1229_vm9, %v1150_v19, %v1261_v59  ;;  %v930_v40 = vadd.f32 %v929_v55, %v817_v16 }
 0x276   :  { %v1482_v28 = vmul.f32 %v3701_v50, %v3701_v50  ;;  %v1153_v34 = vadd.f32 %v1152_v5, %v1040_v21  ;;  %v1158_v5 = vpop.f32.mrf.mxu2 }
 0x278   :  { %1514 = vadd.xlane.f32.xlu0 %v1482_v28  ;;  %v1323_v2 = vpop.xlane.xlu0 %1322  ;;  %v1262_v60 = vmul.f32 0.01, %v1153_v34  ;;  %vm1230_vm10 = vcmp.ge.f32.partialorder %v1153_v34, 0.0 }
 0x279   :  { %v1385_v8 = vmul.f32 0.03125, %v1323_v2  ;;  %v932_v2 = vpop.f32.mrf.mxu0 }
 0x27a   :  { %v3736_v46 = vsel %vm1230_vm10, %v1153_v34, %v1262_v60 }
 0x27b   :  { %v1417_v22 = vsub.f32 %v3671_v35, %v1385_v8  ;;  %v1042_v25 = vpop.f32.mrf.mxu1 }
 0x27c   :  { %v1043_v62 = vadd.f32 %v1042_v25, %v930_v40 }
 0x27d   :  { %v3709_v10 = vsel %vm1319_vm7, %v1417_v22, 0.0 }
 0x27e   :  { %v1483_v24 = vmul.f32 %v3709_v10, %v3709_v10  ;;  %v1156_v22 = vadd.f32 %v1155_v57, %v1043_v62 }
 0x280   :  { %v1325_v33 = vpop.xlane.xlu1 %1324  ;;  %1334 = vadd.xlane.f32.xlu0 %v3714_v13  ;;  %1516 = vadd.xlane.f32.xlu2 %v1483_v24  ;;  %v933_v24 = vadd.f32 %v932_v2, %v820_v23  ;;  %v1263_v19 = vmul.f32 0.01, %v1156_v22  ;;  %vm1231_vm11 = vcmp.ge.f32.partialorder %v1156_v22, 0.0 }
 0x281   :  { %v1386_v35 = vmul.f32 0.03125, %v1325_v33  ;;  %v935_v26 = vpop.f32.mrf.mxu0 }
 0x282   :  { %v3747_v59 = vsel %vm1231_vm11, %v1156_v22, %v1263_v19  ;;  %v936_v16 = vadd.f32 %v935_v26, %v823_v43  ;;  %v2004_v26 = vld [vmem:[#allocation7 + $0x50] sm:$0xff]  ;;  %v2002_v43 = vld [vmem:[#allocation7 + $0x40] sm:$0xff] }
 0x283   :  { %v1418_v52 = vsub.f32 %v3675_v7, %v1386_v35  ;;  %v1045_v8 = vpop.f32.mrf.mxu1 }
 0x284   :  { %v1046_v33 = vadd.f32 %v1045_v8, %v933_v24 }
 0x285   :  { %v3720_v6 = vsel %vm1319_vm7, %v1418_v52, 0.0 }
 0x286   :  { %v1484_v3 = vmul.f32 %v3720_v6, %v3720_v6  ;;  %v1159_v52 = vadd.f32 %v1158_v5, %v1046_v33  ;;  %v2005_v33 = vld [vmem:[#allocation7 + $0x58] sm:$0xff] }
 0x288   :  { %1518 = vadd.xlane.f32.xlu1 %v1484_v3  ;;  %v1327_v7 = vpop.xlane.xlu1 %1326  ;;  %1336 = vadd.xlane.f32.xlu2 %v3725_v1  ;;  %v1161_v3 = vpop.f32.mrf.mxu2  ;;  %v1264_v38 = vmul.f32 0.01, %v1159_v52  ;;  %vm1232_vm12 = vcmp.ge.f32.partialorder %v1159_v52, 0.0 }
 0x289   :  { %v1387_v28 = vmul.f32 0.03125, %v1327_v7  ;;  %v825_v7 = vpop.f32.mrf.mxu3  ;;  %v938_v2 = vpop.f32.mrf.mxu0 }
 0x28a   :  { %v826_v40 = vadd.f32 %v825_v7, %v3608_v63  ;;  %v3758_v60 = vsel %vm1232_vm12, %v1159_v52, %v1264_v38  ;;  %v2001_v52 = vld [vmem:[#allocation7 + $0x38] sm:$0xff]  ;;  %v1994_v38 = vld [vmem:[#allocation7] sm:$0xff] }
 0x28b   :  { %v1419_v29 = vsub.f32 %v3679_v0, %v1387_v28  ;;  %v1048_v25 = vpop.f32.mrf.mxu1 }
 0x28c   :  { %v1049_v17 = vadd.f32 %v1048_v25, %v936_v16  ;;  %v2000_v25 = vld [vmem:[#allocation7 + $0x30] sm:$0xff]  ;;  %v1995_v16 = vld [vmem:[#allocation7 + $0x8] sm:$0xff] }
 0x28d   :  { %v3731_v12 = vsel %vm1319_vm7, %v1419_v29, 0.0 }
 0x28e   :  { %v1485_v9 = vmul.f32 %v3731_v12, %v3731_v12  ;;  %v1162_v29 = vadd.f32 %v1161_v3, %v1049_v17  ;;  %v1996_v3 = vld [vmem:[#allocation7 + $0x10] sm:$0xff] }
 0x290   :  { %v1329_v39 = vpop.xlane.xlu2 %1328  ;;  %1338 = vadd.xlane.f32.xlu1 %v3736_v46  ;;  %1520 = vadd.xlane.f32.xlu0 %v1485_v9  ;;  %v939_v9 = vadd.f32 %v938_v2, %v826_v40  ;;  %v1265_v22 = vmul.f32 0.01, %v1162_v29  ;;  %v1164_v5 = vpop.f32.mrf.mxu2  ;;  %vm1233_vm13 = vcmp.ge.f32.partialorder %v1162_v29, 0.0 }
 0x291   :  { %v1388_v0 = vmul.f32 0.03125, %v1329_v39  ;;  %v941_v7 = vpop.f32.mrf.mxu0 }
 0x292   :  { %v3768_v24 = vsel %vm1233_vm13, %v1162_v29, %v1265_v22 }
 0x293   :  { %v1420_v36 = vsub.f32 %v3683_v20, %v1388_v0  ;;  %v2007_v20 = vld [vmem:[#allocation7 + $0x68] sm:$0xff]  ;;  %v1051_v8 = vpop.f32.mrf.mxu1 }
 0x294   :  { %2016 = vmatpush.msra.mxu3 %v2007_v20  ;;  %v1052_v39 = vadd.f32 %v1051_v8, %v939_v9  ;;  %v1998_v20 = vld [vmem:[#allocation7 + $0x20] sm:$0xff] }
 0x295   :  { %v3742_v35 = vsel %vm1319_vm7, %v1420_v36, 0.0  ;;  %v2006_v36 = vld [vmem:[#allocation7 + $0x60] sm:$0xff] }
 0x296   :  { %v1486_v55 = vmul.f32 %v3742_v35, %v3742_v35  ;;  %v1165_v32 = vadd.f32 %v1164_v5, %v1052_v39  ;;  %2017 = vmatpush.msra.mxu3 %v2006_v36 }
 0x298   :  { %v1331_v21 = vpop.xlane.xlu2 %1330  ;;  %1340 = vadd.xlane.f32.xlu0 %v3747_v59  ;;  %1522 = vadd.xlane.f32.xlu2 %v1486_v55  ;;  %vm1234_vm14 = vcmp.ge.f32.partialorder %v1165_v32, 0.0  ;;  %v2003_v55 = vld [vmem:[#allocation7 + $0x48] sm:$0xff] }
 0x299   :  { %v1389_v57 = vmul.f32 0.03125, %v1331_v21  ;;  %2018 = vmatpush.msra.mxu3 %v2005_v33  ;;  %v1999_v21 = vld [vmem:[#allocation7 + $0x28] sm:$0xff] }
 0x29b   :  { %v1421_v34 = vsub.f32 %v3687_v42, %v1389_v57  ;;  %2019 = vmatpush.msra.mxu3 %v2004_v26  ;;  %v1997_v57 = vld [vmem:[#allocation7 + $0x18] sm:$0xff]  ;;  %v1054_v17 = vpop.f32.mrf.mxu1 }
 0x29d   :  { %v3753_v47 = vsel %vm1319_vm7, %v1421_v34, 0.0  ;;  %2020 = vmatpush.msra.mxu3 %v2003_v55  ;;  %v828_v34 = vpop.f32.mrf.mxu3 }
 0x29e   :  { %v1487_v28 = vmul.f32 %v3753_v47, %v3753_v47  ;;  %v829_v8 = vadd.f32 %v828_v34, %v3612_v15 }
 0x29f   :  { %2021 = vmatpush.msra.mxu3 %v2002_v43 }
 0x2a0   :  { %1524 = vadd.xlane.f32.xlu1 %v1487_v28  ;;  %v1333_v62 = vpop.xlane.xlu1 %1332  ;;  %1342 = vadd.xlane.f32.xlu2 %v3758_v60  ;;  %v1167_v28 = vpop.f32.mrf.mxu2  ;;  %v942_v36 = vadd.f32 %v941_v7, %v829_v8 }
 0x2a1   :  { %v1390_v42 = vmul.f32 0.03125, %v1333_v62  ;;  %2022 = vmatpush.msra.mxu3 %v2001_v52 }
 0x2a2   :  { %v1055_v43 = vadd.f32 %v1054_v17, %v942_v36 }
 0x2a3   :  { %v1422_v23 = vsub.f32 %v3691_v11, %v1390_v42  ;;  %v1266_v11 = vmul.f32 0.01, %v1165_v32  ;;  %2023 = vmatpush.msra.mxu3 %v2000_v25  ;;  %v944_v42 = vpop.f32.mrf.mxu0  ;;  %v1057_v9 = vpop.f32.mrf.mxu1 }
 0x2a5   :  { %v3764_v63 = vsel %vm1319_vm7, %v1422_v23, 0.0  ;;  %v3771_v19 = vsel %vm1234_vm14, %v1165_v32, %v1266_v11  ;;  %2024 = vmatpush.msra.mxu3 %v1999_v21  ;;  %v831_v29 = vpop.f32.mrf.mxu3 }
 0x2a6   :  { %v1488_v0 = vmul.f32 %v3764_v63, %v3764_v63  ;;  %v832_v21 = vadd.f32 %v831_v29, %v3616_v31 }
 0x2a7   :  { %2025 = vmatpush.msra.mxu3 %v1998_v20 }
 0x2a8   :  { %1344 = vadd.xlane.f32.xlu1 %v3768_v24  ;;  %1526 = vadd.xlane.f32.xlu0 %v1488_v0  ;;  %v1170_v5 = vpop.f32.mrf.mxu2 }
 0x2a9   :  { %2026 = vmatpush.msra.mxu3 %v1997_v57  ;;  %v1168_v57 = vadd.f32 %v1167_v28, %v1055_v43 }
 0x2ab   :  { %2027 = vmatpush.msra.mxu3 %v1996_v3  ;;  %v947_v20 = vpop.f32.mrf.mxu0  ;;  %vm1235_vm1 = vcmp.ge.f32.partialorder %v1168_v57, 0.0 }
 0x2ad   :  { %2028 = vmatpush.msra.mxu3 %v1995_v16  ;;  %v834_v11 = vpop.f32.mrf.mxu3 }
 0x2af   :  { %2029 = vmatpush.msra.mxu3 %v1994_v38 }
 0x2b0   :  { %1346 = vadd.xlane.f32.xlu0 %v3771_v19  ;;  %v1173_v8 = vpop.f32.mrf.mxu2 }
 0x2b5   :  { %v837_v29 = vpop.f32.mrf.mxu3 }
 0x2eb   :  { %v1515_v40 = vpop.xlane.xlu0 %1514 }
 0x2ec   :  { %v1578_v2 = vmul.f32 0.03125, %v1515_v40 }
 0x2ee   :  { %v1610_v62 = vadd.f32 1e-05, %v1578_v2  ;;  %v945_v2 = vadd.f32 %v944_v42, %v832_v21 }
 0x2f0   :  { %3141 = vrsqrt.f32 %v1610_v62  ;;  %vm1648_vm0 = vweird.f32 %v1610_v62 }
 0x2f3   :  { %v1517_v23 = vpop.xlane.xlu2 %1516  ;;  %v1335_v22 = vpop.xlane.xlu0 %1334 }
 0x2f4   :  { %v1579_v39 = vmul.f32 0.03125, %v1517_v23  ;;  %v1391_v0 = vmul.f32 0.03125, %v1335_v22 }
 0x2f6   :  { %v3142_v32 = vpop.eup %3141  ;;  %v3775_v33 = vadd.f32 1e-05, %v1579_v39  ;;  %v1423_v26 = vsub.f32 %v3714_v13, %v1391_v0  ;;  %v1060_v13 = vpop.f32.mrf.mxu1  ;;  %v1267_v39 = vmul.f32 0.01, %v1168_v57  ;;  %v1058_v0 = vadd.f32 %v1057_v9, %v945_v2 }
 0x2f7   :  { %v1643_v55 = vmul.f32 %v3142_v32, %v1610_v62  ;;  %vm1649_vm15 = vweird.f32 %v3142_v32 }
 0x2f8   :  { %3143 = vrsqrt.f32 %v3775_v33  ;;  %v3781_v15 = vsel %vm1319_vm7, %v1423_v26, 0.0  ;;  %vm1650_vm2 = vmor %vm1648_vm0, %vm1649_vm15  ;;  %v1171_v62 = vadd.f32 %v1170_v5, %v1058_v0  ;;  %vm1658_vm4 = vweird.f32 %v3775_v33 }
 0x2f9   :  { %v1644_v52 = vmul.f32 %v3142_v32, %v1643_v55  ;;  %v1489_v25 = vmul.f32 %v3781_v15, %v3781_v15  ;;  %v835_v55 = vadd.f32 %v834_v11, %v3619_v45 }
 0x2fa   :  { %v1268_v11 = vmul.f32 0.01, %v1171_v62  ;;  %vm1236_vm5 = vcmp.ge.f32.partialorder %v1171_v62, 0.0 }
 0x2fb   :  { %v1645_v3 = vmul.f32 0.5, %v1644_v52  ;;  %v1519_v16 = vpop.xlane.xlu1 %1518  ;;  %v1337_v34 = vpop.xlane.xlu2 %1336  ;;  %1528 = vadd.xlane.f32.xlu2 %v1489_v25  ;;  %v3799_v52 = vsel %vm1235_vm1, %v1168_v57, %v1267_v39 }
 0x2fc   :  { %v1580_v38 = vmul.f32 0.03125, %v1519_v16  ;;  %v1392_v7 = vmul.f32 0.03125, %v1337_v34 }
 0x2fd   :  { %v1646_v17 = vsub.f32 1.5, %v1645_v3 }
 0x2fe   :  { %v3144_v40 = vpop.eup %3143  ;;  %v3786_v23 = vadd.f32 1e-05, %v1580_v38  ;;  %v1424_v22 = vsub.f32 %v3725_v1, %v1392_v7  ;;  %v948_v7 = vadd.f32 %v947_v20, %v835_v55  ;;  %v1063_v45 = vpop.f32.mrf.mxu1 }
 0x2ff   :  { %v1647_v31 = vmul.f32 %v3142_v32, %v1646_v17  ;;  %v1653_v28 = vmul.f32 %v3144_v40, %v3775_v33  ;;  %vm1659_vm3 = vweird.f32 %v3144_v40  ;;  %v838_v33 = vadd.f32 %v837_v29, %v3622_v54 }
 0x300   :  { %3145 = vrsqrt.f32 %v3786_v23  ;;  %v3793_v36 = vsel %vm1319_vm7, %v1424_v22, 0.0  ;;  %v1061_v2 = vadd.f32 %v1060_v13, %v948_v7  ;;  %v1176_v22 = vpop.f32.mrf.mxu2  ;;  %vm1660_vm6 = vmor %vm1658_vm4, %vm1659_vm3  ;;  %vm1668_vm9 = vweird.f32 %v3786_v23 }
 0x301   :  { %v1651_v42 = vsel %vm1650_vm2, %v3142_v32, %v1647_v31  ;;  %v1654_v26 = vmul.f32 %v3144_v40, %v1653_v28  ;;  %v1490_v1 = vmul.f32 %v3793_v36, %v3793_v36  ;;  %v950_v32 = vpop.f32.mrf.mxu0  ;;  %v840_v28 = vpop.f32.mrf.mxu3 }
 0x302   :  { %v1962_v43 = vmul.f32 %v1651_v42, %v3701_v50  ;;  %v1174_v0 = vadd.f32 %v1173_v8, %v1061_v2  ;;  %v3815_v42 = vsel %vm1236_vm5, %v1171_v62, %v1268_v11 }
 0x303   :  { %v1655_v9 = vmul.f32 0.5, %v1654_v26  ;;  %v1339_v25 = vpop.xlane.xlu1 %1338  ;;  %1530 = vadd.xlane.f32.xlu1 %v1490_v1  ;;  %1348 = vadd.xlane.f32.xlu2 %v3799_v52  ;;  %v1521_v21 = vpop.xlane.xlu0 %1520 }
 0x304   :  { %v1393_v3 = vmul.f32 0.03125, %v1339_v25  ;;  %v1581_v16 = vmul.f32 0.03125, %v1521_v21  ;;  %2030 = vmatmul.f32.vlgmr.msra.gmra.mxu3 %v1962_v43  ;;  %v951_v21 = vadd.f32 %v950_v32, %v838_v33  ;;  %v1269_v29 = vmul.f32 0.01, %v1174_v0 }
 0x305   :  { %v1656_v34 = vsub.f32 1.5, %v1655_v9  ;;  %vm1237_vm10 = vcmp.ge.f32.partialorder %v1174_v0, 0.0 }
 0x306   :  { %v3146_v38 = vpop.eup %3145  ;;  %v1425_v5 = vsub.f32 %v3736_v46, %v1393_v3  ;;  %v3803_v50 = vadd.f32 1e-05, %v1581_v16  ;;  %v1064_v16 = vadd.f32 %v1063_v45, %v951_v21 }
 0x307   :  { %v1663_v57 = vmul.f32 %v3146_v38, %v3786_v23  ;;  %v1657_v17 = vmul.f32 %v3144_v40, %v1656_v34  ;;  %vm1669_vm8 = vweird.f32 %v3146_v38  ;;  %v1066_v34 = vpop.f32.mrf.mxu1  ;;  %v841_v23 = vadd.f32 %v840_v28, %v3625_v4 }
 0x308   :  { %3147 = vrsqrt.f32 %v3803_v50  ;;  %v3810_v20 = vsel %vm1319_vm7, %v1425_v5, 0.0  ;;  %vm1670_vm11 = vmor %vm1668_vm9, %vm1669_vm8  ;;  %v1177_v11 = vadd.f32 %v1176_v22, %v1064_v16  ;;  %vm1678_vm13 = vweird.f32 %v3803_v50 }
 0x309   :  { %v1664_v39 = vmul.f32 %v3146_v38, %v1663_v57  ;;  %v1491_v46 = vmul.f32 %v3810_v20, %v3810_v20  ;;  %v1661_v31 = vsel %vm1660_vm6, %v3144_v40, %v1657_v17  ;;  %v953_v62 = vpop.f32.mrf.mxu0  ;;  %v1179_v57 = vpop.f32.mrf.mxu2  ;;  %v3832_v17 = vsel %vm1237_vm10, %v1174_v0, %v1269_v29 }
 0x30a   :  { %v1963_v13 = vmul.f32 %v1661_v31, %v3709_v10  ;;  %v954_v4 = vadd.f32 %v953_v62, %v841_v23  ;;  %v1270_v0 = vmul.f32 0.01, %v1177_v11  ;;  %vm1238_vm14 = vcmp.ge.f32.partialorder %v1177_v11, 0.0 }
 0x30b   :  { %v1665_v26 = vmul.f32 0.5, %v1664_v39  ;;  %1532 = vadd.xlane.f32.xlu0 %v1491_v46  ;;  %1350 = vadd.xlane.f32.xlu1 %v3815_v42  ;;  %v1523_v1 = vpop.xlane.xlu2 %1522  ;;  %v1341_v55 = vpop.xlane.xlu0 %1340 }
 0x30c   :  { %v1582_v43 = vmul.f32 0.03125, %v1523_v1  ;;  %v1394_v9 = vmul.f32 0.03125, %v1341_v55  ;;  %2033 = vmatmul.f32.gmra.mxu3 %v1963_v13  ;;  %v843_v13 = vpop.f32.mrf.mxu3  ;;  %v1067_v55 = vadd.f32 %v1066_v34, %v954_v4  ;;  %v3849_v62 = vsel %vm1238_vm14, %v1177_v11, %v1270_v0 }
 0x30d   :  { %v1666_v25 = vsub.f32 1.5, %v1665_v26 }
 0x30e   :  { %v3148_v40 = vpop.eup %3147  ;;  %v3819_v54 = vadd.f32 1e-05, %v1582_v43  ;;  %v1426_v8 = vsub.f32 %v3747_v59, %v1394_v9 }
 0x30f   :  { %v1673_v10 = vmul.f32 %v3148_v40, %v3803_v50  ;;  %v1667_v3 = vmul.f32 %v3146_v38, %v1666_v25  ;;  %vm1679_vm12 = vweird.f32 %v3148_v40  ;;  %v844_v50 = vadd.f32 %v843_v13, %v3628_v58  ;;  %v1069_v29 = vpop.f32.mrf.mxu1 }
 0x310   :  { %3149 = vrsqrt.f32 %v3819_v54  ;;  %v3827_v32 = vsel %vm1319_vm7, %v1426_v8, 0.0  ;;  %vm1680_vm15 = vmor %vm1678_vm13, %vm1679_vm12  ;;  %v1180_v8 = vadd.f32 %v1179_v57, %v1067_v55  ;;  %vm1688_vm1 = vweird.f32 %v3819_v54 }
 0x311   :  { %v1674_v7 = vmul.f32 %v3148_v40, %v1673_v10  ;;  %v1492_v59 = vmul.f32 %v3827_v32, %v3827_v32  ;;  %v1671_v5 = vsel %vm1670_vm11, %v3146_v38, %v1667_v3  ;;  %v956_v9 = vpop.f32.mrf.mxu0 }
 0x312   :  { %v1964_v45 = vmul.f32 %v1671_v5, %v3720_v6  ;;  %v1182_v5 = vpop.f32.mrf.mxu2  ;;  %v957_v58 = vadd.f32 %v956_v9, %v844_v50  ;;  %vm1239_vm2 = vcmp.ge.f32.partialorder %v1180_v8, 0.0 }
 0x313   :  { %v1675_v2 = vmul.f32 0.5, %v1674_v7  ;;  %v1525_v39 = vpop.xlane.xlu1 %1524  ;;  %1352 = vadd.xlane.f32.xlu0 %v3832_v17  ;;  %v1343_v46 = vpop.xlane.xlu2 %1342  ;;  %1534 = vadd.xlane.f32.xlu2 %v1492_v59 }
 0x314   :  { %v1583_v31 = vmul.f32 0.03125, %v1525_v39  ;;  %v1395_v33 = vmul.f32 0.03125, %v1343_v46  ;;  %2036 = vmatmul.f32.gmra.mxu3 %v1964_v45  ;;  %v1271_v45 = vmul.f32 0.01, %v1180_v8  ;;  %v1070_v46 = vadd.f32 %v1069_v29, %v957_v58 }
 0x315   :  { %v1676_v26 = vsub.f32 1.5, %v1675_v2  ;;  %v846_v2 = vpop.f32.mrf.mxu3 }
 0x316   :  { %v3150_v38 = vpop.eup %3149  ;;  %v3836_v22 = vadd.f32 1e-05, %v1583_v31  ;;  %v1427_v28 = vsub.f32 %v3758_v60, %v1395_v33  ;;  %v1183_v4 = vadd.f32 %v1182_v5, %v1070_v46 }
 0x317   :  { %v1683_v6 = vmul.f32 %v3150_v38, %v3819_v54  ;;  %v1677_v1 = vmul.f32 %v3148_v40, %v1676_v26  ;;  %vm1689_vm0 = vweird.f32 %v3150_v38  ;;  %v847_v26 = vadd.f32 %v846_v2, %v3631_v49  ;;  %v1072_v9 = vpop.f32.mrf.mxu1 }
 0x318   :  { %3151 = vrsqrt.f32 %v3836_v22  ;;  %v3844_v43 = vsel %vm1319_vm7, %v1427_v28, 0.0  ;;  %vm1690_vm3 = vmor %vm1688_vm1, %vm1689_vm0  ;;  %v3863_v54 = vsel %vm1239_vm2, %v1180_v8, %v1271_v45  ;;  %vm1698_vm5 = vweird.f32 %v3836_v22 }
 0x319   :  { %v1684_v25 = vmul.f32 %v3150_v38, %v1683_v6  ;;  %v1493_v60 = vmul.f32 %v3844_v43, %v3844_v43  ;;  %v1681_v21 = vsel %vm1680_vm15, %v3148_v40, %v1677_v1  ;;  %v959_v0 = vpop.f32.mrf.mxu0  ;;  %vm1240_vm6 = vcmp.ge.f32.partialorder %v1183_v4, 0.0 }
 0x31a   :  { %v1965_v10 = vmul.f32 %v1681_v21, %v3731_v12  ;;  %v1272_v21 = vmul.f32 0.01, %v1183_v4  ;;  %v1185_v50 = vpop.f32.mrf.mxu2 }
 0x31b   :  { %v1685_v3 = vmul.f32 0.5, %v1684_v25  ;;  %v1345_v16 = vpop.xlane.xlu1 %1344  ;;  %1536 = vadd.xlane.f32.xlu1 %v1493_v60  ;;  %1354 = vadd.xlane.f32.xlu2 %v3849_v62  ;;  %v1527_v34 = vpop.xlane.xlu0 %1526 }
 0x31c   :  { %v1396_v7 = vmul.f32 0.03125, %v1345_v16  ;;  %v1584_v59 = vmul.f32 0.03125, %v1527_v34  ;;  %2039 = vmatmul.f32.gmra.mxu3 %v1965_v10 }
 0x31d   :  { %v1686_v23 = vsub.f32 1.5, %v1685_v3 }
 0x31e   :  { %v3152_v40 = vpop.eup %3151  ;;  %v1428_v57 = vsub.f32 %v3768_v24, %v1396_v7  ;;  %v1616_v11 = vadd.f32 1e-05, %v1584_v59 }
 0x31f   :  { %v1693_v12 = vmul.f32 %v3152_v40, %v3836_v22  ;;  %v1687_v39 = vmul.f32 %v3150_v38, %v1686_v23  ;;  %vm1699_vm4 = vweird.f32 %v3152_v40 }
 0x320   :  { %3153 = vrsqrt.f32 %v1616_v11  ;;  %v3858_v31 = vsel %vm1319_vm7, %v1428_v57, 0.0  ;;  %vm1700_vm8 = vmor %vm1698_vm5, %vm1699_vm4  ;;  %vm1708_vm10 = vweird.f32 %v1616_v11 }
 0x321   :  { %v1694_v33 = vmul.f32 %v3152_v40, %v1693_v12  ;;  %v1494_v24 = vmul.f32 %v3858_v31, %v3858_v31  ;;  %v1691_v13 = vsel %vm1690_vm3, %v3150_v38, %v1687_v39  ;;  %v960_v38 = vadd.f32 %v959_v0, %v847_v26  ;;  %v962_v2 = vpop.f32.mrf.mxu0  ;;  %v1075_v12 = vpop.f32.mrf.mxu1 }
 0x322   :  { %v1966_v28 = vmul.f32 %v1691_v13, %v3742_v35  ;;  %v1188_v39 = vpop.f32.mrf.mxu2 }
 0x323   :  { %v1695_v6 = vmul.f32 0.5, %v1694_v33  ;;  %1538 = vadd.xlane.f32.xlu0 %v1494_v24  ;;  %1356 = vadd.xlane.f32.xlu1 %v3863_v54  ;;  %v1347_v1 = vpop.xlane.xlu0 %1346  ;;  %v1073_v29 = vadd.f32 %v1072_v9, %v960_v38 }
 0x324   :  { %v1397_v55 = vmul.f32 0.03125, %v1347_v1  ;;  %2042 = vmatmul.f32.gmra.mxu3 %v1966_v28 }
 0x325   :  { %v1696_v25 = vsub.f32 1.5, %v1695_v6  ;;  %v1186_v7 = vadd.f32 %v1185_v50, %v1073_v29 }
 0x326   :  { %v3154_v60 = vpop.eup %3153  ;;  %v1429_v49 = vsub.f32 %v3771_v19, %v1397_v55  ;;  %v3875_v19 = vsel %vm1240_vm6, %v1183_v4, %v1272_v21 }
 0x327   :  { %v1703_v35 = vmul.f32 %v3154_v60, %v1616_v11  ;;  %v1697_v8 = vmul.f32 %v3152_v40, %v1696_v25  ;;  %vm1709_vm9 = vweird.f32 %v3154_v60  ;;  %v1273_v23 = vmul.f32 0.01, %v1186_v7 }
 0x328   :  { %v3871_v10 = vsel %vm1319_vm7, %v1429_v49, 0.0  ;;  %vm1241_vm11 = vcmp.ge.f32.partialorder %v1186_v7, 0.0  ;;  %vm1710_vm12 = vmor %vm1708_vm10, %vm1709_vm9 }
 0x329   :  { %v1704_v3 = vmul.f32 %v3154_v60, %v1703_v35  ;;  %v1495_v16 = vmul.f32 %v3871_v10, %v3871_v10  ;;  %v1701_v34 = vsel %vm1700_vm8, %v3152_v40, %v1697_v8  ;;  %v3879_v45 = vsel %vm1241_vm11, %v1186_v7, %v1273_v23  ;;  %v965_v11 = vpop.f32.mrf.mxu0  ;;  %v1078_v4 = vpop.f32.mrf.mxu1 }
 0x32a   :  { %v1967_v59 = vmul.f32 %v1701_v34, %v3753_v47  ;;  %v849_v47 = vpop.f32.mrf.mxu3  ;;  %v1191_v6 = vpop.f32.mrf.mxu2 }
 0x32b   :  { %v1705_v22 = vmul.f32 0.5, %v1704_v3  ;;  %1358 = vadd.xlane.f32.xlu0 %v3875_v19  ;;  %1540 = vadd.xlane.f32.xlu2 %v1495_v16  ;;  %v850_v26 = vadd.f32 %v849_v47, %v3634_v27 }
 0x32c   :  { %2045 = vmatmul.f32.gmra.mxu3 %v1967_v59 }
 0x32d   :  { %v1706_v5 = vsub.f32 1.5, %v1705_v22  ;;  %v963_v9 = vadd.f32 %v962_v2, %v850_v26 }
 0x32f   :  { %v1707_v58 = vmul.f32 %v3154_v60, %v1706_v5  ;;  %v1076_v21 = vadd.f32 %v1075_v12, %v963_v9 }
 0x331   :  { %v1711_v57 = vsel %vm1710_vm12, %v3154_v60, %v1707_v58  ;;  %v968_v29 = vpop.f32.mrf.mxu0  ;;  %v1189_v3 = vadd.f32 %v1188_v39, %v1076_v21  ;;  %v1081_v7 = vpop.f32.mrf.mxu1 }
 0x332   :  { %v1968_v40 = vmul.f32 %v1711_v57, %v3764_v63  ;;  %v852_v33 = vpop.f32.mrf.mxu3  ;;  %v1194_v57 = vpop.f32.mrf.mxu2 }
 0x333   :  { %1360 = vadd.xlane.f32.xlu2 %v3879_v45  ;;  %v853_v8 = vadd.f32 %v852_v33, %v3637_v61  ;;  %v1274_v2 = vmul.f32 0.01, %v1189_v3  ;;  %vm1242_vm15 = vcmp.ge.f32.partialorder %v1189_v3, 0.0 }
 0x334   :  { %2048 = vmatmul.f32.gmra.mxu3 %v1968_v40 }
 0x335   :  { %v966_v58 = vadd.f32 %v965_v11, %v853_v8 }
 0x33a   :  { %v855_v25 = vpop.f32.mrf.mxu3 }
 0x342   :  { %v858_v39 = vpop.f32.mrf.mxu3 }
 0x36e   :  { %v1529_v46 = vpop.xlane.xlu2 %1528 }
 0x36f   :  { %v1585_v24 = vmul.f32 0.03125, %v1529_v46  ;;  %v1079_v46 = vadd.f32 %v1078_v4, %v966_v58 }
 0x371   :  { %v1617_v13 = vadd.f32 1e-05, %v1585_v24  ;;  %v1192_v26 = vadd.f32 %v1191_v6, %v1079_v46 }
 0x373   :  { %3155 = vrsqrt.f32 %v1617_v13  ;;  %vm1718_vm14 = vweird.f32 %v1617_v13  ;;  %vm1243_vm3 = vcmp.ge.f32.partialorder %v1192_v26, 0.0 }
 0x376   :  { %v1531_v28 = vpop.xlane.xlu1 %1530  ;;  %v1349_v0 = vpop.xlane.xlu2 %1348 }
 0x377   :  { %v1586_v63 = vmul.f32 0.03125, %v1531_v28  ;;  %v1398_v1 = vmul.f32 0.03125, %v1349_v0  ;;  %v3907_v28 = vsel %vm1242_vm15, %v1189_v3, %v1274_v2 }
 0x379   :  { %v3156_v55 = vpop.eup %3155  ;;  %v3884_v60 = vadd.f32 1e-05, %v1586_v63  ;;  %v1430_v38 = vsub.f32 %v3799_v52, %v1398_v1 }
 0x37a   :  { %v1713_v49 = vmul.f32 %v3156_v55, %v1617_v13  ;;  %vm1719_vm13 = vweird.f32 %v3156_v55  ;;  %v856_v13 = vadd.f32 %v855_v25, %v3640_v51  ;;  %v1084_v51 = vpop.f32.mrf.mxu1 }
 0x37b   :  { %3157 = vrsqrt.f32 %v3884_v60  ;;  %v3890_v27 = vsel %vm1319_vm7, %v1430_v38, 0.0  ;;  %vm1720_vm0 = vmor %vm1718_vm14, %vm1719_vm13  ;;  %vm1728_vm2 = vweird.f32 %v3884_v60 }
 0x37c   :  { %v1714_v50 = vmul.f32 %v3156_v55, %v1713_v49  ;;  %v1496_v35 = vmul.f32 %v3890_v27, %v3890_v27  ;;  %v971_v49 = vpop.f32.mrf.mxu0 }
 0x37e   :  { %v1715_v16 = vmul.f32 0.5, %v1714_v50  ;;  %v1351_v34 = vpop.xlane.xlu1 %1350  ;;  %1542 = vadd.xlane.f32.xlu1 %v1496_v35  ;;  %v1533_v52 = vpop.xlane.xlu0 %1532  ;;  %v969_v50 = vadd.f32 %v968_v29, %v856_v13 }
 0x37f   :  { %v1399_v59 = vmul.f32 0.03125, %v1351_v34  ;;  %v1587_v22 = vmul.f32 0.03125, %v1533_v52 }
 0x380   :  { %v1716_v5 = vsub.f32 1.5, %v1715_v16  ;;  %v1082_v3 = vadd.f32 %v1081_v7, %v969_v50  ;;  %v1197_v16 = vpop.f32.mrf.mxu2 }
 0x381   :  { %v3158_v23 = vpop.eup %3157  ;;  %v1431_v40 = vsub.f32 %v3815_v42, %v1399_v59  ;;  %v3896_v47 = vadd.f32 1e-05, %v1587_v22  ;;  %v861_v59 = vpop.f32.mrf.mxu3 }
 0x382   :  { %v1723_v61 = vmul.f32 %v3158_v23, %v3884_v60  ;;  %v1717_v12 = vmul.f32 %v3156_v55, %v1716_v5  ;;  %vm1729_vm1 = vweird.f32 %v3158_v23  ;;  %v859_v60 = vadd.f32 %v858_v39, %v3643_v14 }
 0x383   :  { %3159 = vrsqrt.f32 %v3896_v47  ;;  %v3902_v33 = vsel %vm1319_vm7, %v1431_v40, 0.0  ;;  %vm1730_vm4 = vmor %vm1728_vm2, %vm1729_vm1  ;;  %v1195_v22 = vadd.f32 %v1194_v57, %v1082_v3  ;;  %vm1738_vm6 = vweird.f32 %v3896_v47 }
 0x384   :  { %v1724_v24 = vmul.f32 %v3158_v23, %v1723_v61  ;;  %v1497_v42 = vmul.f32 %v3902_v33, %v3902_v33  ;;  %v1721_v11 = vsel %vm1720_vm0, %v3156_v55, %v1717_v12 }
 0x385   :  { %v1969_v0 = vmul.f32 %v1721_v11, %v3781_v15  ;;  %v1275_v15 = vmul.f32 0.01, %v1192_v26  ;;  %v1276_v39 = vmul.f32 0.01, %v1195_v22  ;;  %vm1244_vm8 = vcmp.ge.f32.partialorder %v1195_v22, 0.0 }
 0x386   :  { %v1725_v4 = vmul.f32 0.5, %v1724_v24  ;;  %1544 = vadd.xlane.f32.xlu0 %v1497_v42  ;;  %1362 = vadd.xlane.f32.xlu1 %v3907_v28  ;;  %v1535_v63 = vpop.xlane.xlu2 %1534  ;;  %v1353_v1 = vpop.xlane.xlu0 %1352  ;;  %v972_v24 = vadd.f32 %v971_v49, %v859_v60 }
 0x387   :  { %v1588_v9 = vmul.f32 0.03125, %v1535_v63  ;;  %v1400_v38 = vmul.f32 0.03125, %v1353_v1  ;;  %2051 = vmatmul.f32.gmra.mxu3 %v1969_v0  ;;  %v3924_v5 = vsel %vm1243_vm3, %v1192_v26, %v1275_v15  ;;  %v974_v42 = vpop.f32.mrf.mxu0  ;;  %v1087_v26 = vpop.f32.mrf.mxu1 }
 0x388   :  { %v1726_v21 = vsub.f32 1.5, %v1725_v4  ;;  %v1085_v13 = vadd.f32 %v1084_v51, %v972_v24 }
 0x389   :  { %v3160_v55 = vpop.eup %3159  ;;  %v3911_v6 = vadd.f32 1e-05, %v1588_v9  ;;  %v1432_v25 = vsub.f32 %v3832_v17, %v1400_v38  ;;  %v1200_v9 = vpop.f32.mrf.mxu2  ;;  %v3941_v38 = vsel %vm1244_vm8, %v1195_v22, %v1276_v39 }
 0x38a   :  { %v1733_v35 = vmul.f32 %v3160_v55, %v3896_v47  ;;  %v1727_v8 = vmul.f32 %v3158_v23, %v1726_v21  ;;  %vm1739_vm5 = vweird.f32 %v3160_v55  ;;  %v862_v47 = vadd.f32 %v861_v59, %v3646_v56 }
 0x38b   :  { %3161 = vrsqrt.f32 %v3911_v6  ;;  %v3919_v29 = vsel %vm1319_vm7, %v1432_v25, 0.0  ;;  %vm1740_vm9 = vmor %vm1738_vm6, %vm1739_vm5  ;;  %v1198_v1 = vadd.f32 %v1197_v16, %v1085_v13  ;;  %vm1748_vm11 = vweird.f32 %v3911_v6 }
 0x38c   :  { %v1734_v34 = vmul.f32 %v3160_v55, %v1733_v35  ;;  %v1498_v17 = vmul.f32 %v3919_v29, %v3919_v29  ;;  %v1731_v52 = vsel %vm1730_vm4, %v3158_v23, %v1727_v8  ;;  %v864_v35 = vpop.f32.mrf.mxu3  ;;  %v975_v56 = vadd.f32 %v974_v42, %v862_v47 }
 0x38d   :  { %v1970_v7 = vmul.f32 %v1731_v52, %v3793_v36  ;;  %vm1245_vm12 = vcmp.ge.f32.partialorder %v1198_v1, 0.0 }
 0x38e   :  { %v1735_v58 = vmul.f32 0.5, %v1734_v34  ;;  %1364 = vadd.xlane.f32.xlu0 %v3924_v5  ;;  %v1537_v40 = vpop.xlane.xlu1 %1536  ;;  %v1355_v2 = vpop.xlane.xlu2 %1354  ;;  %1546 = vadd.xlane.f32.xlu2 %v1498_v17  ;;  %v1277_v34 = vmul.f32 0.01, %v1198_v1  ;;  %v1088_v52 = vadd.f32 %v1087_v26, %v975_v56 }
 0x38f   :  { %v1589_v61 = vmul.f32 0.03125, %v1537_v40  ;;  %v1401_v12 = vmul.f32 0.03125, %v1355_v2  ;;  %2054 = vmatmul.f32.gmra.mxu3 %v1970_v7  ;;  %v977_v59 = vpop.f32.mrf.mxu0  ;;  %v1090_v40 = vpop.f32.mrf.mxu1 }
 0x390   :  { %v1736_v46 = vsub.f32 1.5, %v1735_v58  ;;  %v1201_v58 = vadd.f32 %v1200_v9, %v1088_v52  ;;  %v3958_v2 = vsel %vm1245_vm12, %v1198_v1, %v1277_v34 }
 0x391   :  { %v3162_v23 = vpop.eup %3161  ;;  %v3928_v14 = vadd.f32 1e-05, %v1589_v61  ;;  %v1433_v57 = vsub.f32 %v3849_v62, %v1401_v12  ;;  %v1203_v42 = vpop.f32.mrf.mxu2 }
 0x392   :  { %v1743_v36 = vmul.f32 %v3162_v23, %v3911_v6  ;;  %v1737_v11 = vmul.f32 %v3160_v55, %v1736_v46  ;;  %vm1749_vm10 = vweird.f32 %v3162_v23  ;;  %v865_v6 = vadd.f32 %v864_v35, %v3649_v18 }
 0x393   :  { %3163 = vrsqrt.f32 %v3928_v14  ;;  %v3936_v0 = vsel %vm1319_vm7, %v1433_v57, 0.0  ;;  %vm1750_vm13 = vmor %vm1748_vm11, %vm1749_vm10  ;;  %v1278_v26 = vmul.f32 0.01, %v1201_v58  ;;  %vm1758_vm15 = vweird.f32 %v3928_v14 }
 0x394   :  { %v1744_v4 = vmul.f32 %v3162_v23, %v1743_v36  ;;  %v1499_v62 = vmul.f32 %v3936_v0, %v3936_v0  ;;  %v1741_v63 = vsel %vm1740_vm9, %v3160_v55, %v1737_v11  ;;  %v978_v18 = vadd.f32 %v977_v59, %v865_v6 }
 0x395   :  { %v1971_v49 = vmul.f32 %v1741_v63, %v3810_v20  ;;  %vm1246_vm0 = vcmp.ge.f32.partialorder %v1201_v58, 0.0 }
 0x396   :  { %v1745_v21 = vmul.f32 0.5, %v1744_v4  ;;  %v1357_v50 = vpop.xlane.xlu1 %1356  ;;  %1548 = vadd.xlane.f32.xlu1 %v1499_v62  ;;  %1366 = vadd.xlane.f32.xlu2 %v3941_v38  ;;  %v1539_v51 = vpop.xlane.xlu0 %1538  ;;  %v1091_v63 = vadd.f32 %v1090_v40, %v978_v18 }
 0x397   :  { %v1402_v25 = vmul.f32 0.03125, %v1357_v50  ;;  %v1590_v15 = vmul.f32 0.03125, %v1539_v51  ;;  %2057 = vmatmul.f32.gmra.mxu3 %v1971_v49  ;;  %v867_v4 = vpop.f32.mrf.mxu3  ;;  %v980_v51 = vpop.f32.mrf.mxu0 }
 0x398   :  { %v1746_v8 = vsub.f32 1.5, %v1745_v21  ;;  %v868_v49 = vadd.f32 %v867_v4, %v3652_v30  ;;  %v1204_v21 = vadd.f32 %v1203_v42, %v1091_v63 }
 0x399   :  { %v3164_v55 = vpop.eup %3163  ;;  %v1434_v3 = vsub.f32 %v3863_v54, %v1402_v25  ;;  %v3946_v16 = vadd.f32 1e-05, %v1590_v15 }
 0x39a   :  { %v1753_v20 = vmul.f32 %v3164_v55, %v3928_v14  ;;  %v1747_v17 = vmul.f32 %v3162_v23, %v1746_v8  ;;  %vm1759_vm14 = vweird.f32 %v3164_v55  ;;  %v3972_v14 = vsel %vm1246_vm0, %v1201_v58, %v1278_v26  ;;  %v1093_v8 = vpop.f32.mrf.mxu1 }
 0x39b   :  { %3165 = vrsqrt.f32 %v3946_v16  ;;  %v3953_v60 = vsel %vm1319_vm7, %v1434_v3, 0.0  ;;  %vm1760_vm1 = vmor %vm1758_vm15, %vm1759_vm14  ;;  %v1279_v34 = vmul.f32 0.01, %v1204_v21  ;;  %vm1768_vm3 = vweird.f32 %v3946_v16 }
 0x39c   :  { %v1754_v22 = vmul.f32 %v3164_v55, %v1753_v20  ;;  %v1500_v54 = vmul.f32 %v3953_v60, %v3953_v60  ;;  %v1751_v7 = vsel %vm1750_vm13, %v3162_v23, %v1747_v17  ;;  %v1206_v20 = vpop.f32.mrf.mxu2  ;;  %vm1247_vm4 = vcmp.ge.f32.partialorder %v1204_v21, 0.0 }
 0x39d   :  { %v1972_v61 = vmul.f32 %v1751_v7, %v3827_v32 }
 0x39e   :  { %v1755_v12 = vmul.f32 0.5, %v1754_v22  ;;  %1550 = vadd.xlane.f32.xlu0 %v1500_v54  ;;  %1368 = vadd.xlane.f32.xlu1 %v3958_v2  ;;  %v1541_v46 = vpop.xlane.xlu2 %1540  ;;  %v1359_v24 = vpop.xlane.xlu0 %1358 }
 0x39f   :  { %v1591_v57 = vmul.f32 0.03125, %v1541_v46  ;;  %v1403_v39 = vmul.f32 0.03125, %v1359_v24  ;;  %2060 = vmatmul.f32.gmra.mxu3 %v1972_v61 }
 0x3a0   :  { %v1756_v36 = vsub.f32 1.5, %v1755_v12 }
 0x3a1   :  { %v3166_v23 = vpop.eup %3165  ;;  %v1623_v11 = vadd.f32 1e-05, %v1591_v57  ;;  %v1435_v13 = vsub.f32 %v3875_v19, %v1403_v39  ;;  %v983_v39 = vpop.f32.mrf.mxu0 }
 0x3a2   :  { %v1763_v32 = vmul.f32 %v3166_v23, %v3946_v16  ;;  %v1757_v62 = vmul.f32 %v3164_v55, %v1756_v36  ;;  %vm1769_vm2 = vweird.f32 %v3166_v23 }
 0x3a3   :  { %3167 = vrsqrt.f32 %v1623_v11  ;;  %v3967_v47 = vsel %vm1319_vm7, %v1435_v13, 0.0  ;;  %vm1770_vm5 = vmor %vm1768_vm3, %vm1769_vm2  ;;  %vm1778_vm8 = vweird.f32 %v1623_v11 }
 0x3a4   :  { %v1764_v1 = vmul.f32 %v3166_v23, %v1763_v32  ;;  %v1501_v9 = vmul.f32 %v3967_v47, %v3967_v47  ;;  %v1761_v19 = vsel %vm1760_vm1, %v3164_v55, %v1757_v62  ;;  %v981_v55 = vadd.f32 %v980_v51, %v868_v49  ;;  %v1209_v26 = vpop.f32.mrf.mxu2 }
 0x3a5   :  { %v1973_v50 = vmul.f32 %v1761_v19, %v3844_v43 }
 0x3a6   :  { %v1765_v25 = vmul.f32 0.5, %v1764_v1  ;;  %1370 = vadd.xlane.f32.xlu0 %v3972_v14  ;;  %v1361_v15 = vpop.xlane.xlu2 %1360  ;;  %1552 = vadd.xlane.f32.xlu2 %v1501_v9  ;;  %v1094_v52 = vadd.f32 %v1093_v8, %v981_v55 }
 0x3a7   :  { %v1404_v35 = vmul.f32 0.03125, %v1361_v15  ;;  %2063 = vmatmul.f32.gmra.mxu3 %v1973_v50 }
 0x3a8   :  { %v1766_v56 = vsub.f32 1.5, %v1765_v25  ;;  %v1207_v6 = vadd.f32 %v1206_v20, %v1094_v52 }
 0x3a9   :  { %v3168_v3 = vpop.eup %3167  ;;  %v1436_v30 = vsub.f32 %v3879_v45, %v1404_v35  ;;  %v3984_v45 = vsel %vm1247_vm4, %v1204_v21, %v1279_v34  ;;  %v986_v1 = vpop.f32.mrf.mxu0 }
 0x3aa   :  { %v1773_v43 = vmul.f32 %v3168_v3, %v1623_v11  ;;  %v1767_v17 = vmul.f32 %v3166_v23, %v1766_v56  ;;  %vm1779_vm6 = vweird.f32 %v3168_v3  ;;  %v1280_v61 = vmul.f32 0.01, %v1207_v6 }
 0x3ab   :  { %v3980_v59 = vsel %vm1319_vm7, %v1436_v30, 0.0  ;;  %vm1248_vm9 = vcmp.ge.f32.partialorder %v1207_v6, 0.0  ;;  %vm1780_vm10 = vmor %vm1778_vm8, %vm1779_vm6 }
 0x3ac   :  { %v1774_v22 = vmul.f32 %v3168_v3, %v1773_v43  ;;  %v1502_v54 = vmul.f32 %v3980_v59, %v3980_v59  ;;  %v1771_v7 = vsel %vm1770_vm5, %v3166_v23, %v1767_v17  ;;  %v3988_v24 = vsel %vm1248_vm9, %v1207_v6, %v1280_v61  ;;  %v1096_v23 = vpop.f32.mrf.mxu1 }
 0x3ad   :  { %v1974_v58 = vmul.f32 %v1771_v7, %v3858_v31  ;;  %v870_v31 = vpop.f32.mrf.mxu3 }
 0x3ae   :  { %v1775_v16 = vmul.f32 0.5, %v1774_v22  ;;  %1554 = vadd.xlane.f32.xlu1 %v1502_v54  ;;  %1372 = vadd.xlane.f32.xlu2 %v3984_v45  ;;  %v871_v11 = vadd.f32 %v870_v31, %v3655_v44 }
 0x3af   :  { %2066 = vmatmul.f32.gmra.mxu3 %v1974_v58 }
 0x3b0   :  { %v1776_v40 = vsub.f32 1.5, %v1775_v16  ;;  %v984_v9 = vadd.f32 %v983_v39, %v871_v11 }
 0x3b1   :  { %v989_v6 = vpop.f32.mrf.mxu0 }
 0x3b2   :  { %v1777_v12 = vmul.f32 %v3168_v3, %v1776_v40  ;;  %v1097_v25 = vadd.f32 %v1096_v23, %v984_v9 }
 0x3b4   :  { %v1781_v46 = vsel %vm1780_vm10, %v3168_v3, %v1777_v12  ;;  %v1099_v49 = vpop.f32.mrf.mxu1  ;;  %v1210_v56 = vadd.f32 %v1209_v26, %v1097_v25  ;;  %v1212_v3 = vpop.f32.mrf.mxu2 }
 0x3b5   :  { %v1975_v57 = vmul.f32 %v1781_v46, %v3871_v10  ;;  %v873_v36 = vpop.f32.mrf.mxu3 }
 0x3b6   :  { %1374 = vadd.xlane.f32.xlu1 %v3988_v24  ;;  %v874_v8 = vadd.f32 %v873_v36, %v3658_v41  ;;  %v1281_v7 = vmul.f32 0.01, %v1210_v56  ;;  %vm1249_vm13 = vcmp.ge.f32.partialorder %v1210_v56, 0.0 }
 0x3b7   :  { %2069 = vmatmul.f32.gmra.mxu3 %v1975_v57 }
 0x3b8   :  { %v987_v52 = vadd.f32 %v986_v1, %v874_v8 }
 0x3b9   :  { %v992_v25 = vpop.f32.mrf.mxu0 }
 0x3ba   :  { %v1100_v40 = vadd.f32 %v1099_v49, %v987_v52 }
 0x3bc   :  { %v1102_v61 = vpop.f32.mrf.mxu1  ;;  %v1213_v39 = vadd.f32 %v1212_v3, %v1100_v40  ;;  %v1215_v26 = vpop.f32.mrf.mxu2 }
 0x3bd   :  { %v876_v19 = vpop.f32.mrf.mxu3 }
 0x3be   :  { %v877_v31 = vadd.f32 %v876_v19, %v3661_v37  ;;  %vm1250_vm1 = vcmp.ge.f32.partialorder %v1213_v39, 0.0 }
 0x3c4   :  { %v1105_v8 = vpop.f32.mrf.mxu1 }
 0x3c5   :  { %v879_v16 = vpop.f32.mrf.mxu3 }
 0x3c6   :  { %v880_v19 = vadd.f32 %v879_v16, %v3664_v48 }
 0x3f1   :  { %v1543_v42 = vpop.xlane.xlu1 %1542 }
 0x3f2   :  { %v1592_v18 = vmul.f32 0.03125, %v1543_v42  ;;  %v4016_v42 = vsel %vm1249_vm13, %v1210_v56, %v1281_v7  ;;  %v4040_v7 = vld [vmem:[%s4656_s4] ss:$0 sm:$0xff] }
 0x3f4   :  { %v1624_v13 = vadd.f32 1e-05, %v1592_v18 }
 0x3f6   :  { %3169 = vrsqrt.f32 %v1624_v13  ;;  %vm1788_vm12 = vweird.f32 %v1624_v13 }
 0x3f9   :  { %v1363_v4 = vpop.xlane.xlu1 %1362  ;;  %v1545_v32 = vpop.xlane.xlu0 %1544 }
 0x3fa   :  { %v1405_v62 = vmul.f32 0.03125, %v1363_v4  ;;  %v1593_v63 = vmul.f32 0.03125, %v1545_v32 }
 0x3fc   :  { %v3170_v10 = vpop.eup %3169  ;;  %v1437_v21 = vsub.f32 %v3907_v28, %v1405_v62  ;;  %v3994_v50 = vadd.f32 1e-05, %v1593_v63  ;;  %v990_v63 = vadd.f32 %v989_v6, %v877_v31 }
 0x3fd   :  { %v1783_v51 = vmul.f32 %v3170_v10, %v1624_v13  ;;  %vm1789_vm11 = vweird.f32 %v3170_v10 }
 0x3fe   :  { %3171 = vrsqrt.f32 %v3994_v50  ;;  %v3999_v44 = vsel %vm1319_vm7, %v1437_v21, 0.0  ;;  %vm1790_vm14 = vmor %vm1788_vm12, %vm1789_vm11  ;;  %vm1798_vm0 = vweird.f32 %v3994_v50  ;;  %v1103_v49 = vadd.f32 %v1102_v61, %v990_v63  ;;  %v2031_v21 = vpop.f32.mrf.mxu3 }
 0x3ff   :  { %v1784_v15 = vmul.f32 %v3170_v10, %v1783_v51  ;;  %v1503_v35 = vmul.f32 %v3999_v44, %v3999_v44 }
 0x401   :  { %v1785_v55 = vmul.f32 0.5, %v1784_v15  ;;  %1556 = vadd.xlane.f32.xlu0 %v1503_v35  ;;  %v1547_v28 = vpop.xlane.xlu2 %1546  ;;  %v1365_v30 = vpop.xlane.xlu0 %1364  ;;  %v1216_v35 = vadd.f32 %v1215_v26, %v1103_v49 }
 0x402   :  { %v1594_v34 = vmul.f32 0.03125, %v1547_v28  ;;  %v1406_v20 = vmul.f32 0.03125, %v1365_v30  ;;  %v993_v30 = vadd.f32 %v992_v25, %v880_v19 }
 0x403   :  { %v1786_v43 = vsub.f32 1.5, %v1785_v55  ;;  %vm1251_vm5 = vcmp.ge.f32.partialorder %v1216_v35, 0.0 }
 0x404   :  { %v3172_v17 = vpop.eup %3171  ;;  %v4004_v22 = vadd.f32 1e-05, %v1594_v34  ;;  %v1438_v54 = vsub.f32 %v3924_v5, %v1406_v20 }
 0x405   :  { %v1793_v41 = vmul.f32 %v3172_v17, %v3994_v50  ;;  %v1787_v58 = vmul.f32 %v3170_v10, %v1786_v43  ;;  %vm1799_vm15 = vweird.f32 %v3172_v17 }
 0x406   :  { %3173 = vrsqrt.f32 %v4004_v22  ;;  %v4011_v12 = vsel %vm1319_vm7, %v1438_v54, 0.0  ;;  %vm1800_vm2 = vmor %vm1798_vm0, %vm1799_vm15  ;;  %v1218_v54 = vpop.f32.mrf.mxu2  ;;  %vm1808_vm4 = vweird.f32 %v4004_v22 }
 0x407   :  { %v1794_v46 = vmul.f32 %v3172_v17, %v1793_v41  ;;  %v1504_v5 = vmul.f32 %v4011_v12, %v4011_v12  ;;  %v1791_v57 = vsel %vm1790_vm14, %v3170_v10, %v1787_v58  ;;  %v1282_v10 = vmul.f32 0.01, %v1213_v39 }
 0x408   :  { %v1976_v36 = vmul.f32 %v1791_v57, %v3890_v27  ;;  %v1283_v41 = vmul.f32 0.01, %v1216_v35  ;;  %v2032_v57 = vadd.f32 %v4040_v7, %v2031_v21 }
 0x409   :  { %v1795_v23 = vmul.f32 0.5, %v1794_v46  ;;  %1376 = vadd.xlane.f32.xlu0 %v4016_v42  ;;  %v1549_v18 = vpop.xlane.xlu1 %1548  ;;  %v1367_v13 = vpop.xlane.xlu2 %1366  ;;  %1558 = vadd.xlane.f32.xlu2 %v1504_v5  ;;  %v4033_v56 = vsel %vm1250_vm1, %v1213_v39, %v1282_v10 }
 0x40a   :  { %v1595_v11 = vmul.f32 0.03125, %v1549_v18  ;;  %v1407_v4 = vmul.f32 0.03125, %v1367_v13  ;;  %2072 = vmatmul.f32.gmra.mxu3 %v1976_v36  ;;  %v4055_v31 = vsel %vm1251_vm5, %v1216_v35, %v1283_v41  ;;  %vm2127_vm11 = vcmp.ge.f32.partialorder %v2032_v57, 0.0 }
 0x40b   :  { %v1796_v32 = vsub.f32 1.5, %v1795_v23 }
 0x40c   :  { %v3174_v62 = vpop.eup %3173  ;;  %v4020_v37 = vadd.f32 1e-05, %v1595_v11  ;;  %v1439_v1 = vsub.f32 %v3941_v38, %v1407_v4 }
 0x40d   :  { %v1803_v27 = vmul.f32 %v3174_v62, %v4004_v22  ;;  %v1797_v9 = vmul.f32 %v3172_v17, %v1796_v32  ;;  %vm1809_vm3 = vweird.f32 %v3174_v62  ;;  %v2034_v22 = vpop.f32.mrf.mxu3 }
 0x40e   :  { %3175 = vrsqrt.f32 %v4020_v37  ;;  %v4029_v51 = vsel %vm1319_vm7, %v1439_v1, 0.0  ;;  %vm1810_vm6 = vmor %vm1808_vm4, %vm1809_vm3  ;;  %v2159_v1 = vmul.f32 0.01, %v2032_v57  ;;  %vm1818_vm10 = vweird.f32 %v4020_v37 }
 0x40f   :  { %v1804_v38 = vmul.f32 %v3174_v62, %v1803_v27  ;;  %v1505_v50 = vmul.f32 %v4029_v51, %v4029_v51  ;;  %v1801_v15 = vsel %vm1800_vm2, %v3172_v17, %v1797_v9  ;;  %v1106_v17 = vadd.f32 %v1105_v8, %v993_v30 }
 0x410   :  { %v1977_v48 = vmul.f32 %v1801_v15, %v3902_v33 }
 0x411   :  { %v1805_v3 = vmul.f32 0.5, %v1804_v38  ;;  %v1369_v55 = vpop.xlane.xlu1 %1368  ;;  %1560 = vadd.xlane.f32.xlu1 %v1505_v50  ;;  %1378 = vadd.xlane.f32.xlu2 %v4033_v56  ;;  %v1551_v28 = vpop.xlane.xlu0 %1550  ;;  %v1219_v61 = vadd.f32 %v1218_v54, %v1106_v17 }
 0x412   :  { %v1408_v34 = vmul.f32 0.03125, %v1369_v55  ;;  %v1596_v20 = vmul.f32 0.03125, %v1551_v28  ;;  %2075 = vmatmul.f32.gmra.mxu3 %v1977_v48 }
 0x413   :  { %v1806_v43 = vsub.f32 1.5, %v1805_v3  ;;  %vm1252_vm9 = vcmp.ge.f32.partialorder %v1219_v61, 0.0  ;;  %v1284_v63 = vmul.f32 0.01, %v1219_v61 }
 0x414   :  { %v3176_v52 = vpop.eup %3175  ;;  %v1440_v33 = vsub.f32 %v3958_v2, %v1408_v34  ;;  %v4043_v6 = vadd.f32 1e-05, %v1596_v20 }
 0x415   :  { %v1813_v58 = vmul.f32 %v3176_v52, %v4020_v37  ;;  %v1807_v16 = vmul.f32 %v3174_v62, %v1806_v43  ;;  %vm1819_vm8 = vweird.f32 %v3176_v52  ;;  %v4070_v21 = vsel %vm1252_vm9, %v1219_v61, %v1284_v63  ;;  %v2037_v48 = vpop.f32.mrf.mxu3 }
 0x416   :  { %3177 = vrsqrt.f32 %v4043_v6  ;;  %v4050_v40 = vsel %vm1319_vm7, %v1440_v33, 0.0  ;;  %vm1820_vm12 = vmor %vm1818_vm10, %vm1819_vm8  ;;  %v4072_v37 = vsel %vm2127_vm11, %v2032_v57, %v2159_v1  ;;  %vm1828_vm14 = vweird.f32 %v4043_v6 }
 0x417   :  { %v1814_v46 = vmul.f32 %v3176_v52, %v1813_v58  ;;  %v1506_v2 = vmul.f32 %v4050_v40, %v4050_v40  ;;  %v1811_v5 = vsel %vm1810_vm6, %v3174_v62, %v1807_v16 }
 0x418   :  { %v1978_v39 = vmul.f32 %v1811_v5, %v3919_v29 }
 0x419   :  { %v1815_v36 = vmul.f32 0.5, %v1814_v46  ;;  %1562 = vadd.xlane.f32.xlu0 %v1506_v2  ;;  %1380 = vadd.xlane.f32.xlu1 %v4055_v31  ;;  %v1553_v23 = vpop.xlane.xlu2 %1552  ;;  %v1371_v18 = vpop.xlane.xlu0 %1370 }
 0x41a   :  { %v1597_v13 = vmul.f32 0.03125, %v1553_v23  ;;  %v1409_v26 = vmul.f32 0.03125, %v1371_v18  ;;  %2078 = vmatmul.f32.gmra.mxu3 %v1978_v39 }
 0x41b   :  { %v1816_v11 = vsub.f32 1.5, %v1815_v36 }
 0x41c   :  { %v3178_v4 = vpop.eup %3177  ;;  %v1629_v32 = vadd.f32 1e-05, %v1597_v13  ;;  %v1441_v62 = vsub.f32 %v3972_v14, %v1409_v26  ;;  %v2035_v14 = vadd.f32 %v4040_v7, %v2034_v22 }
 0x41d   :  { %v1823_v29 = vmul.f32 %v3178_v4, %v4043_v6  ;;  %v1817_v10 = vmul.f32 %v3176_v52, %v1816_v11  ;;  %vm1829_vm13 = vweird.f32 %v3178_v4  ;;  %v2038_v6 = vadd.f32 %v4040_v7, %v2037_v48  ;;  %v2040_v5 = vpop.f32.mrf.mxu3 }
 0x41e   :  { %3179 = vrsqrt.f32 %v1629_v32  ;;  %v4064_v27 = vsel %vm1319_vm7, %v1441_v62, 0.0  ;;  %v2160_v34 = vmul.f32 0.01, %v2035_v14  ;;  %vm2128_vm15 = vcmp.ge.f32.partialorder %v2035_v14, 0.0  ;;  %vm1830_vm0 = vmor %vm1828_vm14, %vm1829_vm13 }
 0x41f   :  { %v1824_v9 = vmul.f32 %v3178_v4, %v1823_v29  ;;  %v1507_v19 = vmul.f32 %v4064_v27, %v4064_v27  ;;  %v1821_v49 = vsel %vm1820_vm12, %v3176_v52, %v1817_v10  ;;  %vm1838_vm2 = vweird.f32 %v1629_v32 }
 0x420   :  { %v1979_v25 = vmul.f32 %v1821_v49, %v3936_v0  ;;  %v4085_v33 = vsel %vm2128_vm15, %v2035_v14, %v2160_v34  ;;  %v2161_v22 = vmul.f32 0.01, %v2038_v6  ;;  %vm2129_vm4 = vcmp.ge.f32.partialorder %v2038_v6, 0.0 }
 0x421   :  { %v1825_v38 = vmul.f32 0.5, %v1824_v9  ;;  %1382 = vadd.xlane.f32.xlu0 %v4070_v21  ;;  %v1555_v50 = vpop.xlane.xlu1 %1554  ;;  %2223 = vadd.xlane.f32.xlu1 %v4072_v37  ;;  %v1373_v15 = vpop.xlane.xlu2 %1372  ;;  %v2041_v13 = vadd.f32 %v4040_v7, %v2040_v5 }
 0x422   :  { %v1598_v35 = vmul.f32 0.03125, %v1555_v50  ;;  %v1410_v8 = vmul.f32 0.03125, %v1373_v15  ;;  %1564 = vadd.xlane.f32.xlu2 %v1507_v19  ;;  %2081 = vmatmul.f32.gmra.mxu3 %v1979_v25  ;;  %v4099_v11 = vsel %vm2129_vm4, %v2038_v6, %v2161_v22 }
 0x423   :  { %v1826_v3 = vsub.f32 1.5, %v1825_v38  ;;  %vm2130_vm8 = vcmp.ge.f32.partialorder %v2041_v13, 0.0 }
 0x424   :  { %v3180_v55 = vpop.eup %3179  ;;  %v1630_v28 = vadd.f32 1e-05, %v1598_v35  ;;  %v1442_v30 = vsub.f32 %v3984_v45, %v1410_v8 }
 0x425   :  { %v1833_v0 = vmul.f32 %v3180_v55, %v1629_v32  ;;  %v1827_v20 = vmul.f32 %v3178_v4, %v1826_v3  ;;  %vm1839_vm1 = vweird.f32 %v3180_v55  ;;  %v2162_v32 = vmul.f32 0.01, %v2041_v13  ;;  %v2043_v9 = vpop.f32.mrf.mxu3 }
 0x426   :  { %3181 = vrsqrt.f32 %v1630_v28  ;;  %v4081_v43 = vsel %vm1319_vm7, %v1442_v30, 0.0  ;;  %vm1840_vm3 = vmor %vm1838_vm2, %vm1839_vm1  ;;  %vm1848_vm6 = vweird.f32 %v1630_v28 }
 0x427   :  { %v1834_v52 = vmul.f32 %v3180_v55, %v1833_v0  ;;  %v1508_v17 = vmul.f32 %v4081_v43, %v4081_v43  ;;  %v1831_v54 = vsel %vm1830_vm0, %v3178_v4, %v1827_v20  ;;  %v4102_v1 = vsel %vm2130_vm8, %v2041_v13, %v2162_v32 }
 0x428   :  { %v1980_v45 = vmul.f32 %v1831_v54, %v3953_v60 }
 0x429   :  { %v1835_v41 = vmul.f32 0.5, %v1834_v52  ;;  %2225 = vadd.xlane.f32.xlu0 %v4085_v33  ;;  %v1375_v58 = vpop.xlane.xlu1 %1374 }
 0x42a   :  { %v1411_v16 = vmul.f32 0.03125, %v1375_v58  ;;  %1566 = vadd.xlane.f32.xlu2 %v1508_v17  ;;  %2084 = vmatmul.f32.gmra.mxu3 %v1980_v45 }
 0x42b   :  { %v1836_v61 = vsub.f32 1.5, %v1835_v41 }
 0x42c   :  { %v3182_v46 = vpop.eup %3181  ;;  %v1443_v2 = vsub.f32 %v3988_v24, %v1411_v16 }
 0x42d   :  { %v1843_v57 = vmul.f32 %v3182_v46, %v1630_v28  ;;  %v1837_v39 = vmul.f32 %v3180_v55, %v1836_v61  ;;  %vm1849_vm5 = vweird.f32 %v3182_v46  ;;  %v2046_v8 = vpop.f32.mrf.mxu3  ;;  %v2044_v28 = vadd.f32 %v4040_v7, %v2043_v9 }
 0x42e   :  { %v4093_v60 = vsel %vm1319_vm7, %v1443_v2, 0.0  ;;  %vm1850_vm9 = vmor %vm1848_vm6, %vm1849_vm5 }
 0x42f   :  { %v1844_v36 = vmul.f32 %v3182_v46, %v1843_v57  ;;  %v1509_v23 = vmul.f32 %v4093_v60, %v4093_v60  ;;  %v1841_v18 = vsel %vm1840_vm3, %v3180_v55, %v1837_v39  ;;  %v2163_v6 = vmul.f32 0.01, %v2044_v28 }
 0x430   :  { %v1981_v24 = vmul.f32 %v1841_v18, %v3967_v47  ;;  %vm2131_vm12 = vcmp.ge.f32.partialorder %v2044_v28, 0.0 }
 0x431   :  { %v1845_v26 = vmul.f32 0.5, %v1844_v36  ;;  %1568 = vadd.xlane.f32.xlu1 %v1509_v23  ;;  %v4125_v57 = vsel %vm2131_vm12, %v2044_v28, %v2163_v6 }
 0x432   :  { %2227 = vadd.xlane.f32.xlu2 %v4099_v11  ;;  %2087 = vmatmul.f32.gmra.mxu3 %v1981_v24 }
 0x433   :  { %v1846_v4 = vsub.f32 1.5, %v1845_v26 }
 0x435   :  { %v1847_v62 = vmul.f32 %v3182_v46, %v1846_v4  ;;  %v2049_v61 = vpop.f32.mrf.mxu3 }
 0x437   :  { %v1851_v63 = vsel %vm1850_vm9, %v3182_v46, %v1847_v62 }
 0x438   :  { %v1982_v29 = vmul.f32 %v1851_v63, %v3980_v59 }
 0x439   :  { %2229 = vadd.xlane.f32.xlu1 %v4102_v1 }
 0x43a   :  { %2090 = vmatmul.f32.gmra.mxu3 %v1982_v29 }
 0x474   :  { %v1557_v47 = vpop.xlane.xlu0 %1556 }
 0x475   :  { %v1599_v10 = vmul.f32 0.03125, %v1557_v47  ;;  %v2052_v47 = vpop.f32.mrf.mxu3 }
 0x477   :  { %v1631_v19 = vadd.f32 1e-05, %v1599_v10 }
 0x479   :  { %3183 = vrsqrt.f32 %v1631_v19  ;;  %vm1858_vm11 = vweird.f32 %v1631_v19 }
 0x47c   :  { %v1559_v49 = vpop.xlane.xlu2 %1558  ;;  %v1377_v14 = vpop.xlane.xlu0 %1376 }
 0x47d   :  { %v1600_v25 = vmul.f32 0.03125, %v1559_v49  ;;  %v1412_v38 = vmul.f32 0.03125, %v1377_v14 }
 0x47f   :  { %v3184_v50 = vpop.eup %3183  ;;  %v1632_v15 = vadd.f32 1e-05, %v1600_v25  ;;  %v1444_v35 = vsub.f32 %v4016_v42, %v1412_v38 }
 0x480   :  { %v1853_v48 = vmul.f32 %v3184_v50, %v1631_v19  ;;  %vm1859_vm10 = vweird.f32 %v3184_v50  ;;  %v2050_v19 = vadd.f32 %v4040_v7, %v2049_v61 }
 0x481   :  { %3185 = vrsqrt.f32 %v1632_v15  ;;  %v4109_v59 = vsel %vm1319_vm7, %v1444_v35, 0.0  ;;  %vm1860_vm13 = vmor %vm1858_vm11, %vm1859_vm10  ;;  %vm1868_vm15 = vweird.f32 %v1632_v15 }
 0x482   :  { %v1854_v3 = vmul.f32 %v3184_v50, %v1853_v48  ;;  %v1510_v55 = vmul.f32 %v4109_v59, %v4109_v59  ;;  %vm2133_vm3 = vcmp.ge.f32.partialorder %v2050_v19, 0.0 }
 0x484   :  { %v1855_v30 = vmul.f32 0.5, %v1854_v3  ;;  %v1561_v34 = vpop.xlane.xlu1 %1560  ;;  %v1379_v0 = vpop.xlane.xlu2 %1378  ;;  %1570 = vadd.xlane.f32.xlu0 %v1510_v55 }
 0x485   :  { %v1601_v20 = vmul.f32 0.03125, %v1561_v34  ;;  %v1413_v52 = vmul.f32 0.03125, %v1379_v0  ;;  %v2165_v34 = vmul.f32 0.01, %v2050_v19 }
 0x486   :  { %v1856_v42 = vsub.f32 1.5, %v1855_v30 }
 0x487   :  { %v3186_v17 = vpop.eup %3185  ;;  %v4114_v54 = vadd.f32 1e-05, %v1601_v20  ;;  %v1445_v45 = vsub.f32 %v4033_v56, %v1413_v52  ;;  %v2047_v56 = vadd.f32 %v4040_v7, %v2046_v8 }
 0x488   :  { %v1863_v41 = vmul.f32 %v3186_v17, %v1632_v15  ;;  %v1857_v58 = vmul.f32 %v3184_v50, %v1856_v42  ;;  %vm1869_vm14 = vweird.f32 %v3186_v17 }
 0x489   :  { %3187 = vrsqrt.f32 %v4114_v54  ;;  %v4120_v16 = vsel %vm1319_vm7, %v1445_v45, 0.0  ;;  %v2164_v62 = vmul.f32 0.01, %v2047_v56  ;;  %vm2132_vm0 = vcmp.ge.f32.partialorder %v2047_v56, 0.0  ;;  %vm1870_vm1 = vmor %vm1868_vm15, %vm1869_vm14 }
 0x48a   :  { %v1864_v46 = vmul.f32 %v3186_v17, %v1863_v41  ;;  %v1511_v2 = vmul.f32 %v4120_v16, %v4120_v16  ;;  %v1861_v5 = vsel %vm1860_vm13, %v3184_v50, %v1857_v58  ;;  %vm1878_vm4 = vweird.f32 %v4114_v54  ;;  %v2055_v41 = vpop.f32.mrf.mxu3 }
 0x48b   :  { %v1983_v22 = vmul.f32 %v1861_v5, %v3999_v44  ;;  %v4141_v49 = vsel %vm2132_vm0, %v2047_v56, %v2164_v62  ;;  %v4163_v45 = vsel %vm2133_vm3, %v2050_v19, %v2165_v34 }
 0x48c   :  { %v1865_v39 = vmul.f32 0.5, %v1864_v46  ;;  %v1381_v36 = vpop.xlane.xlu1 %1380  ;;  %1572 = vadd.xlane.f32.xlu2 %v1511_v2  ;;  %2231 = vadd.xlane.f32.xlu0 %v4125_v57  ;;  %v1563_v23 = vpop.xlane.xlu0 %1562 }
 0x48d   :  { %v1414_v18 = vmul.f32 0.03125, %v1381_v36  ;;  %v1602_v13 = vmul.f32 0.03125, %v1563_v23  ;;  %2093 = vmatmul.f32.gmra.mxu3 %v1983_v22 }
 0x48e   :  { %v1866_v24 = vsub.f32 1.5, %v1865_v39 }
 0x48f   :  { %v3188_v26 = vpop.eup %3187  ;;  %v1446_v4 = vsub.f32 %v4055_v31, %v1414_v18  ;;  %v4130_v32 = vadd.f32 1e-05, %v1602_v13 }
 0x490   :  { %v1873_v44 = vmul.f32 %v3188_v26, %v4114_v54  ;;  %v1867_v63 = vmul.f32 %v3186_v17, %v1866_v24  ;;  %vm1879_vm2 = vweird.f32 %v3188_v26 }
 0x491   :  { %3189 = vrsqrt.f32 %v4130_v32  ;;  %v4136_v29 = vsel %vm1319_vm7, %v1446_v4, 0.0  ;;  %vm1880_vm5 = vmor %vm1878_vm4, %vm1879_vm2  ;;  %vm1888_vm8 = vweird.f32 %v4130_v32 }
 0x492   :  { %v1874_v10 = vmul.f32 %v3188_v26, %v1873_v44  ;;  %v1512_v31 = vmul.f32 %v4136_v29, %v4136_v29  ;;  %v1871_v9 = vsel %vm1870_vm1, %v3186_v17, %v1867_v63  ;;  %v2053_v17 = vadd.f32 %v4040_v7, %v2052_v47 }
 0x493   :  { %v1984_v14 = vmul.f32 %v1871_v9, %v4011_v12  ;;  %v2056_v44 = vadd.f32 %v4040_v7, %v2055_v41  ;;  %v2058_v9 = vpop.f32.mrf.mxu3 }
 0x494   :  { %v1875_v25 = vmul.f32 0.5, %v1874_v10  ;;  %1574 = vadd.xlane.f32.xlu1 %v1512_v31  ;;  %v2224_v38 = vpop.xlane.xlu1 %2223  ;;  %2233 = vadd.xlane.f32.xlu2 %v4141_v49  ;;  %v1383_v50 = vpop.xlane.xlu0 %1382  ;;  %v2166_v36 = vmul.f32 0.01, %v2053_v17  ;;  %vm2134_vm9 = vcmp.ge.f32.partialorder %v2053_v17, 0.0 }
 0x495   :  { %v2287_v15 = vmul.f32 0.03125, %v2224_v38  ;;  %v1565_v35 = vpop.xlane.xlu2 %1564  ;;  %v1415_v8 = vmul.f32 0.03125, %v1383_v50  ;;  %2096 = vmatmul.f32.gmra.mxu3 %v1984_v14  ;;  %vm2135_vm12 = vcmp.ge.f32.partialorder %v2056_v44, 0.0 }
 0x496   :  { %v1876_v48 = vsub.f32 1.5, %v1875_v25  ;;  %v1603_v3 = vmul.f32 0.03125, %v1565_v35  ;;  %v4178_v62 = vsel %vm2134_vm9, %v2053_v17, %v2166_v36 }
 0x497   :  { %v3190_v55 = vpop.eup %3189  ;;  %v2319_v28 = vsub.f32 %v4072_v37, %v2287_v15  ;;  %v1447_v30 = vsub.f32 %v4070_v21, %v1415_v8  ;;  %v2167_v15 = vmul.f32 0.01, %v2056_v44 }
 0x498   :  { %v1883_v12 = vmul.f32 %v3190_v55, %v4130_v32  ;;  %v4148_v0 = vadd.f32 1e-05, %v1603_v3  ;;  %v1877_v20 = vmul.f32 %v3188_v26, %v1876_v48  ;;  %vm1889_vm6 = vweird.f32 %v3190_v55 }
 0x499   :  { %v4153_v52 = vsel %vm1319_vm7, %v2319_v28, 0.0  ;;  %v4157_v42 = vsel %vm1319_vm7, %v1447_v30, 0.0  ;;  %vm1890_vm10 = vmor %vm1888_vm8, %vm1889_vm6 }
 0x49a   :  { %v1884_v37 = vmul.f32 %v3190_v55, %v1883_v12  ;;  %3191 = vrsqrt.f32 %v4148_v0  ;;  %v2383_v21 = vmul.f32 %v4153_v52, %v4153_v52  ;;  %v1513_v54 = vmul.f32 %v4157_v42, %v4157_v42 }
 0x49b   :  { %v1881_v6 = vsel %vm1880_vm5, %v3188_v26, %v1877_v20  ;;  %vm1898_vm13 = vweird.f32 %v4148_v0  ;;  %v2061_v17 = vpop.f32.mrf.mxu3 }
 0x49c   :  { %v1885_v58 = vmul.f32 0.5, %v1884_v37  ;;  %2415 = vadd.xlane.f32.xlu1 %v2383_v21  ;;  %2235 = vadd.xlane.f32.xlu2 %v4163_v45  ;;  %v2226_v61 = vpop.xlane.xlu0 %2225  ;;  %v1985_v46 = vmul.f32 %v1881_v6, %v4029_v51 }
 0x49d   :  { %v1567_v2 = vpop.xlane.xlu2 %1566  ;;  %1576 = vadd.xlane.f32.xlu0 %v1513_v54  ;;  %v2288_v5 = vmul.f32 0.03125, %v2226_v61 }
 0x49e   :  { %v1886_v56 = vsub.f32 1.5, %v1885_v58  ;;  %v1604_v22 = vmul.f32 0.03125, %v1567_v2  ;;  %2099 = vmatmul.f32.gmra.mxu3 %v1985_v46  ;;  %v2062_v46 = vadd.f32 %v4040_v7, %v2061_v17 }
 0x49f   :  { %v2320_v39 = vsub.f32 %v4085_v33, %v2288_v5 }
 0x4a0   :  { %v3192_v23 = vpop.eup %3191  ;;  %v1636_v18 = vadd.f32 1e-05, %v1604_v22  ;;  %v1887_v13 = vmul.f32 %v3190_v55, %v1886_v56  ;;  %vm2137_vm5 = vcmp.ge.f32.partialorder %v2062_v46, 0.0 }
 0x4a1   :  { %v1893_v24 = vmul.f32 %v3192_v23, %v4148_v0  ;;  %v4174_v51 = vsel %vm1319_vm7, %v2320_v39, 0.0  ;;  %vm1899_vm11 = vweird.f32 %v3192_v23  ;;  %v2169_v39 = vmul.f32 0.01, %v2062_v46 }
 0x4a2   :  { %3193 = vrsqrt.f32 %v1636_v18  ;;  %v2384_v26 = vmul.f32 %v4174_v51, %v4174_v51  ;;  %v1891_v4 = vsel %vm1890_vm10, %v3190_v55, %v1887_v13  ;;  %vm1900_vm14 = vmor %vm1898_vm13, %vm1899_vm11  ;;  %v2059_v55 = vadd.f32 %v4040_v7, %v2058_v9  ;;  %v2902_v9 = vld [vmem:[#allocation8 + $0x38] sm:$0xff] }
 0x4a3   :  { %v1894_v33 = vmul.f32 %v3192_v23, %v1893_v24  ;;  %v1986_v32 = vmul.f32 %v1891_v4, %v4050_v40  ;;  %vm1908_vm0 = vweird.f32 %v1636_v18  ;;  %v2910_v24 = vld [vmem:[#allocation8 + $0x78] sm:$0xff]  ;;  %v2907_v4 = vld [vmem:[#allocation8 + $0x60] sm:$0xff] }
 0x4a4   :  { %2237 = vadd.xlane.f32.xlu1 %v4178_v62  ;;  %v1569_v63 = vpop.xlane.xlu1 %1568  ;;  %v2168_v6 = vmul.f32 0.01, %v2059_v55  ;;  %vm2136_vm1 = vcmp.ge.f32.partialorder %v2059_v55, 0.0  ;;  %2915 = vmatpush.msra.mxu0 %v2910_v24 }
 0x4a5   :  { %v1895_v47 = vmul.f32 0.5, %v1894_v33  ;;  %v1605_v10 = vmul.f32 0.03125, %v1569_v63  ;;  %v2228_v31 = vpop.xlane.xlu2 %2227  ;;  %2417 = vadd.xlane.f32.xlu0 %v2384_v26  ;;  %v2908_v26 = vld [vmem:[#allocation8 + $0x68] sm:$0xff]  ;;  %v2906_v33 = vld [vmem:[#allocation8 + $0x58] sm:$0xff] }
 0x4a6   :  { %v2289_v19 = vmul.f32 0.03125, %v2228_v31  ;;  %2102 = vmatmul.f32.gmra.mxu3 %v1986_v32  ;;  %v4204_v5 = vsel %vm2136_vm1, %v2059_v55, %v2168_v6  ;;  %v2905_v32 = vld [vmem:[#allocation8 + $0x50] sm:$0xff]  ;;  %v2898_v55 = vld [vmem:[#allocation8 + $0x18] sm:$0xff] }
 0x4a7   :  { %v1896_v14 = vsub.f32 1.5, %v1895_v47  ;;  %v1637_v25 = vadd.f32 1e-05, %v1605_v10  ;;  %v2064_v10 = vpop.f32.mrf.mxu3 }
 0x4a8   :  { %v3194_v38 = vpop.eup %3193  ;;  %v2321_v50 = vsub.f32 %v4099_v11, %v2289_v19  ;;  %v4192_v11 = vsel %vm2135_vm12, %v2056_v44, %v2167_v15  ;;  %v2904_v44 = vld [vmem:[#allocation8 + $0x48] sm:$0xff]  ;;  %v2901_v19 = vld [vmem:[#allocation8 + $0x30] sm:$0xff] }
 0x4a9   :  { %v1903_v40 = vmul.f32 %v3194_v38, %v1636_v18  ;;  %3195 = vrsqrt.f32 %v1637_v25  ;;  %v1897_v8 = vmul.f32 %v3192_v23, %v1896_v14  ;;  %vm1909_vm15 = vweird.f32 %v3194_v38  ;;  %v2900_v14 = vld [vmem:[#allocation8 + $0x28] sm:$0xff] }
 0x4aa   :  { %v4187_v35 = vsel %vm1319_vm7, %v2321_v50, 0.0  ;;  %vm1910_vm2 = vmor %vm1908_vm0, %vm1909_vm15  ;;  %vm1918_vm4 = vweird.f32 %v1637_v25  ;;  %v4208_v18 = vsel %vm2137_vm5, %v2062_v46, %v2169_v39 }
 0x4ab   :  { %v1904_v48 = vmul.f32 %v3194_v38, %v1903_v40  ;;  %v2385_v3 = vmul.f32 %v4187_v35, %v4187_v35  ;;  %v1901_v30 = vsel %vm1900_vm14, %v3192_v23, %v1897_v8  ;;  %v2899_v40 = vld [vmem:[#allocation8 + $0x20] sm:$0xff] }
 0x4ac   :  { %v2230_v28 = vpop.xlane.xlu1 %2229  ;;  %v1987_v0 = vmul.f32 %v1901_v30, %v4064_v27 }
 0x4ad   :  { %v1905_v34 = vmul.f32 0.5, %v1904_v48  ;;  %v2290_v12 = vmul.f32 0.03125, %v2230_v28  ;;  %2419 = vadd.xlane.f32.xlu2 %v2385_v3  ;;  %2239 = vadd.xlane.f32.xlu0 %v4192_v11 }
 0x4ae   :  { %2105 = vmatmul.f32.gmra.mxu3 %v1987_v0 }
 0x4af   :  { %v3196_v20 = vpop.eup %3195  ;;  %v1906_v37 = vsub.f32 1.5, %v1905_v34  ;;  %v2322_v21 = vsub.f32 %v4102_v1, %v2290_v12  ;;  %v2067_v28 = vpop.f32.mrf.mxu3  ;;  %v2897_v12 = vld [vmem:[#allocation8 + $0x10] sm:$0xff] }
 0x4b0   :  { %v1913_v54 = vmul.f32 %v3196_v20, %v1637_v25  ;;  %vm1919_vm3 = vweird.f32 %v3196_v20 }
 0x4b1   :  { %v4199_v41 = vsel %vm1319_vm7, %v2322_v21, 0.0  ;;  %v1907_v58 = vmul.f32 %v3194_v38, %v1906_v37  ;;  %vm1920_vm6 = vmor %vm1918_vm4, %vm1919_vm3  ;;  %v2065_v37 = vadd.f32 %v4040_v7, %v2064_v10  ;;  %v2896_v21 = vld [vmem:[#allocation8 + $0x8] sm:$0xff] }
 0x4b2   :  { %v1914_v61 = vmul.f32 %v3196_v20, %v1913_v54  ;;  %v2386_v27 = vmul.f32 %v4199_v41, %v4199_v41 }
 0x4b3   :  { %v1911_v2 = vsel %vm1910_vm2, %v3194_v38, %v1907_v58  ;;  %vm2138_vm10 = vcmp.ge.f32.partialorder %v2065_v37, 0.0 }
 0x4b4   :  { %v1915_v1 = vmul.f32 0.5, %v1914_v61  ;;  %2421 = vadd.xlane.f32.xlu1 %v2386_v27  ;;  %v1988_v56 = vmul.f32 %v1911_v2, %v4081_v43  ;;  %v2909_v43 = vld [vmem:[#allocation8 + $0x70] sm:$0xff]  ;;  %v2895_v61 = vld [vmem:[#allocation8] sm:$0xff] }
 0x4b5   :  { %2241 = vadd.xlane.f32.xlu2 %v4204_v5  ;;  %2916 = vmatpush.msra.mxu0 %v2909_v43 }
 0x4b6   :  { %v1916_v22 = vsub.f32 1.5, %v1915_v1  ;;  %2108 = vmatmul.f32.gmra.mxu3 %v1988_v56  ;;  %v2170_v56 = vmul.f32 0.01, %v2065_v37 }
 0x4b7   :  { %2917 = vmatpush.msra.mxu0 %v2908_v26 }
 0x4b8   :  { %v1917_v36 = vmul.f32 %v3196_v20, %v1916_v22  ;;  %v4235_v26 = vsel %vm2138_vm10, %v2065_v37, %v2170_v56 }
 0x4b9   :  { %2918 = vmatpush.msra.mxu0 %v2907_v4 }
 0x4ba   :  { %v1921_v23 = vsel %vm1920_vm6, %v3196_v20, %v1917_v36 }
 0x4bb   :  { %v1989_v13 = vmul.f32 %v1921_v23, %v4093_v60  ;;  %2919 = vmatpush.msra.mxu0 %v2906_v33  ;;  %v2903_v60 = vld [vmem:[#allocation8 + $0x40] sm:$0xff]  ;;  %v2070_v23 = vpop.f32.mrf.mxu3 }
 0x4bc   :  { %2243 = vadd.xlane.f32.xlu1 %v4208_v18 }
 0x4bd   :  { %2920 = vmatpush.msra.mxu0 %v2905_v32 }
 0x4be   :  { %2111 = vmatmul.f32.gmra.mxu3 %v1989_v13 }
 0x4bf   :  { %2921 = vmatpush.msra.mxu0 %v2904_v44 }
 0x4c1   :  { %2922 = vmatpush.msra.mxu0 %v2903_v60 }
 0x4c3   :  { %2923 = vmatpush.msra.mxu0 %v2902_v9 }
 0x4c5   :  { %2924 = vmatpush.msra.mxu0 %v2901_v19 }
 0x4c7   :  { %2925 = vmatpush.msra.mxu0 %v2900_v14 }
 0x4c9   :  { %2926 = vmatpush.msra.mxu0 %v2899_v40  ;;  %v2073_v40 = vpop.f32.mrf.mxu3 }
 0x4cb   :  { %2927 = vmatpush.msra.mxu0 %v2898_v55 }
 0x4cd   :  { %2928 = vmatpush.msra.mxu0 %v2897_v12 }
 0x4cf   :  { %2929 = vmatpush.msra.mxu0 %v2896_v21 }
 0x4d1   :  { %2930 = vmatpush.msra.mxu0 %v2895_v61 }
 0x4f7   :  { %v1571_v63 = vpop.xlane.xlu0 %1570 }
 0x4f8   :  { %v1606_v47 = vmul.f32 0.03125, %v1571_v63 }
 0x4fa   :  { %v1638_v31 = vadd.f32 1e-05, %v1606_v47 }
 0x4fc   :  { %3197 = vrsqrt.f32 %v1638_v31  ;;  %vm1928_vm9 = vweird.f32 %v1638_v31 }
 0x4ff   :  { %v1573_v25 = vpop.xlane.xlu2 %1572  ;;  %v2232_v38 = vpop.xlane.xlu0 %2231 }
 0x500   :  { %v1607_v50 = vmul.f32 0.03125, %v1573_v25  ;;  %v2291_v15 = vmul.f32 0.03125, %v2232_v38 }
 0x502   :  { %v3198_v8 = vpop.eup %3197  ;;  %v4212_v48 = vadd.f32 1e-05, %v1607_v50  ;;  %v2323_v3 = vsub.f32 %v4125_v57, %v2291_v15 }
 0x503   :  { %v1923_v30 = vmul.f32 %v3198_v8, %v1638_v31  ;;  %vm1929_vm8 = vweird.f32 %v3198_v8 }
 0x504   :  { %3199 = vrsqrt.f32 %v4212_v48  ;;  %v4218_v34 = vsel %vm1319_vm7, %v2323_v3, 0.0  ;;  %vm1930_vm11 = vmor %vm1928_vm9, %vm1929_vm8  ;;  %vm1938_vm14 = vweird.f32 %v4212_v48  ;;  %v2071_v3 = vadd.f32 %v4040_v7, %v2070_v23 }
 0x505   :  { %v1924_v0 = vmul.f32 %v3198_v8, %v1923_v30  ;;  %v2387_v20 = vmul.f32 %v4218_v34, %v4218_v34 }
 0x506   :  { %vm2140_vm1 = vcmp.ge.f32.partialorder %v2071_v3, 0.0 }
 0x507   :  { %v1925_v57 = vmul.f32 0.5, %v1924_v0  ;;  %v1575_v17 = vpop.xlane.xlu1 %1574  ;;  %v2234_v54 = vpop.xlane.xlu2 %2233  ;;  %2423 = vadd.xlane.f32.xlu0 %v2387_v20 }
 0x508   :  { %v1608_v6 = vmul.f32 0.03125, %v1575_v17  ;;  %v2292_v58 = vmul.f32 0.03125, %v2234_v54  ;;  %v2172_v54 = vmul.f32 0.01, %v2071_v3 }
 0x509   :  { %v1926_v27 = vsub.f32 1.5, %v1925_v57 }
 0x50a   :  { %v3200_v46 = vpop.eup %3199  ;;  %v4223_v2 = vadd.f32 1e-05, %v1608_v6  ;;  %v2324_v1 = vsub.f32 %v4141_v49, %v2292_v58  ;;  %v2068_v49 = vadd.f32 %v4040_v7, %v2067_v28 }
 0x50b   :  { %v1933_v22 = vmul.f32 %v3200_v46, %v4212_v48  ;;  %v1927_v39 = vmul.f32 %v3198_v8, %v1926_v27  ;;  %vm1939_vm12 = vweird.f32 %v3200_v46 }
 0x50c   :  { %3201 = vrsqrt.f32 %v4223_v2  ;;  %v4230_v36 = vsel %vm1319_vm7, %v2324_v1, 0.0  ;;  %v2171_v25 = vmul.f32 0.01, %v2068_v49  ;;  %vm2139_vm13 = vcmp.ge.f32.partialorder %v2068_v49, 0.0  ;;  %vm1940_vm15 = vmor %vm1938_vm14, %vm1939_vm12 }
 0x50d   :  { %v1934_v13 = vmul.f32 %v3200_v46, %v1933_v22  ;;  %v2388_v24 = vmul.f32 %v4230_v36, %v4230_v36  ;;  %v1931_v43 = vsel %vm1930_vm11, %v3198_v8, %v1927_v39  ;;  %vm1948_vm2 = vweird.f32 %v4223_v2 }
 0x50e   :  { %v1990_v4 = vmul.f32 %v1931_v43, %v4109_v59  ;;  %v4255_v55 = vsel %vm2139_vm13, %v2068_v49, %v2171_v25  ;;  %v4273_v39 = vsel %vm2140_vm1, %v2071_v3, %v2172_v54 }
 0x50f   :  { %v1935_v33 = vmul.f32 0.5, %v1934_v13  ;;  %v2416_v32 = vpop.xlane.xlu1 %2415  ;;  %2425 = vadd.xlane.f32.xlu2 %v2388_v24  ;;  %v2236_v44 = vpop.xlane.xlu2 %2235  ;;  %2245 = vadd.xlane.f32.xlu0 %v4235_v26 }
 0x510   :  { %v2479_v63 = vmul.f32 0.03125, %v2416_v32  ;;  %v2293_v47 = vmul.f32 0.03125, %v2236_v44  ;;  %v1577_v60 = vpop.xlane.xlu0 %1576  ;;  %2114 = vmatmul.f32.gmra.mxu3 %v1990_v4  ;;  %v2076_v13 = vpop.f32.mrf.mxu3 }
 0x511   :  { %v1936_v10 = vsub.f32 1.5, %v1935_v33  ;;  %v1609_v31 = vmul.f32 0.03125, %v1577_v60 }
 0x512   :  { %v3202_v9 = vpop.eup %3201  ;;  %v4239_v19 = vadd.f32 1e-05, %v2479_v63  ;;  %v2325_v14 = vsub.f32 %v4163_v45, %v2293_v47 }
 0x513   :  { %v1943_v59 = vmul.f32 %v3202_v9, %v4223_v2  ;;  %v4243_v38 = vadd.f32 1e-05, %v1609_v31  ;;  %v1937_v50 = vmul.f32 %v3200_v46, %v1936_v10  ;;  %vm1949_vm0 = vweird.f32 %v3202_v9 }
 0x514   :  { %3203 = vrsqrt.f32 %v4239_v19  ;;  %v4249_v15 = vsel %vm1319_vm7, %v2325_v14, 0.0  ;;  %vm1950_vm3 = vmor %vm1948_vm2, %vm1949_vm0  ;;  %vm2549_vm8 = vweird.f32 %v4239_v19 }
 0x515   :  { %v1944_v8 = vmul.f32 %v3202_v9, %v1943_v59  ;;  %3205 = vrsqrt.f32 %v4243_v38  ;;  %v2389_v45 = vmul.f32 %v4249_v15, %v4249_v15  ;;  %v1941_v28 = vsel %vm1940_vm15, %v3200_v46, %v1937_v50 }
 0x516   :  { %v1991_v12 = vmul.f32 %v1941_v28, %v4120_v16  ;;  %v2074_v46 = vadd.f32 %v4040_v7, %v2073_v40  ;;  %vm1958_vm10 = vweird.f32 %v4243_v38 }
 0x517   :  { %v1945_v48 = vmul.f32 0.5, %v1944_v8  ;;  %v2238_v30 = vpop.xlane.xlu1 %2237  ;;  %2247 = vadd.xlane.f32.xlu2 %v4255_v55  ;;  %2427 = vadd.xlane.f32.xlu1 %v2389_v45  ;;  %v2077_v8 = vadd.f32 %v4040_v7, %v2076_v13 }
 0x518   :  { %v2294_v0 = vmul.f32 0.03125, %v2238_v30  ;;  %v2418_v20 = vpop.xlane.xlu0 %2417  ;;  %2117 = vmatmul.f32.gmra.mxu3 %v1991_v12  ;;  %v2173_v33 = vmul.f32 0.01, %v2074_v46  ;;  %vm2141_vm6 = vcmp.ge.f32.partialorder %v2074_v46, 0.0  ;;  %v2079_v12 = vpop.f32.mrf.mxu3 }
 0x519   :  { %v1946_v37 = vsub.f32 1.5, %v1945_v48  ;;  %v2480_v21 = vmul.f32 0.03125, %v2418_v20  ;;  %v2174_v7 = vmul.f32 0.01, %v2077_v8  ;;  %vm2142_vm13 = vcmp.ge.f32.partialorder %v2077_v8, 0.0 }
 0x51a   :  { %v3204_v57 = vpop.eup %3203  ;;  %v2326_v17 = vsub.f32 %v4178_v62, %v2294_v0  ;;  %v4284_v59 = vsel %vm2141_vm6, %v2074_v46, %v2173_v33 }
 0x51b   :  { %v3206_v6 = vpop.eup %3205  ;;  %v2544_v58 = vmul.f32 %v3204_v57, %v4239_v19  ;;  %v4261_v61 = vadd.f32 1e-05, %v2480_v21  ;;  %v1947_v27 = vmul.f32 %v3202_v9, %v1946_v37  ;;  %vm2550_vm4 = vweird.f32 %v3204_v57 }
 0x51c   :  { %v1953_v16 = vmul.f32 %v3206_v6, %v4243_v38  ;;  %v4268_v1 = vsel %vm1319_vm7, %v2326_v17, 0.0  ;;  %vm1959_vm5 = vweird.f32 %v3206_v6  ;;  %vm2551_vm9 = vmor %vm2549_vm8, %vm2550_vm4  ;;  %v4311_v46 = vsel %vm2142_vm13, %v2077_v8, %v2174_v7 }
 0x51d   :  { %v2545_v62 = vmul.f32 %v3204_v57, %v2544_v58  ;;  %3207 = vrsqrt.f32 %v4261_v61  ;;  %v2390_v56 = vmul.f32 %v4268_v1, %v4268_v1  ;;  %v1951_v23 = vsel %vm1950_vm3, %v3202_v9, %v1947_v27  ;;  %vm1960_vm11 = vmor %vm1958_vm10, %vm1959_vm5 }
 0x51e   :  { %v1954_v22 = vmul.f32 %v3206_v6, %v1953_v16  ;;  %v1992_v2 = vmul.f32 %v1951_v23, %v4136_v29  ;;  %vm2559_vm14 = vweird.f32 %v4261_v61 }
 0x51f   :  { %v2546_v24 = vmul.f32 0.5, %v2545_v62  ;;  %2249 = vadd.xlane.f32.xlu1 %v4273_v39  ;;  %2429 = vadd.xlane.f32.xlu0 %v2390_v56 }
 0x520   :  { %v1955_v43 = vmul.f32 0.5, %v1954_v22  ;;  %v2420_v49 = vpop.xlane.xlu2 %2419  ;;  %v2240_v4 = vpop.xlane.xlu0 %2239  ;;  %2120 = vmatmul.f32.gmra.mxu3 %v1992_v2 }
 0x521   :  { %v2547_v32 = vsub.f32 1.5, %v2546_v24  ;;  %v2481_v44 = vmul.f32 0.03125, %v2420_v49  ;;  %v2295_v63 = vmul.f32 0.03125, %v2240_v4  ;;  %v2082_v24 = vpop.f32.mrf.mxu3 }
 0x522   :  { %v1956_v47 = vsub.f32 1.5, %v1955_v43 }
 0x523   :  { %v3208_v60 = vpop.eup %3207  ;;  %v2548_v10 = vmul.f32 %v3204_v57, %v2547_v32  ;;  %v4278_v31 = vadd.f32 1e-05, %v2481_v44  ;;  %v2327_v29 = vsub.f32 %v4192_v11, %v2295_v63 }
 0x524   :  { %v2554_v9 = vmul.f32 %v3208_v60, %v4261_v61  ;;  %v1957_v14 = vmul.f32 %v3206_v6, %v1956_v47  ;;  %vm2560_vm12 = vweird.f32 %v3208_v60 }
 0x525   :  { %v2552_v25 = vsel %vm2551_vm9, %v3204_v57, %v2548_v10  ;;  %3209 = vrsqrt.f32 %v4278_v31  ;;  %v4288_v50 = vsel %vm1319_vm7, %v2327_v29, 0.0  ;;  %vm2561_vm15 = vmor %vm2559_vm14, %vm2560_vm12  ;;  %vm2569_vm1 = vweird.f32 %v4278_v31 }
 0x526   :  { %v2863_v19 = vmul.f32 %v2552_v25, %v4153_v52  ;;  %v2555_v40 = vmul.f32 %v3208_v60, %v2554_v9  ;;  %v2391_v11 = vmul.f32 %v4288_v50, %v4288_v50  ;;  %v1961_v38 = vsel %vm1960_vm11, %v3206_v6, %v1957_v14 }
 0x527   :  { %v2422_v45 = vpop.xlane.xlu1 %2421  ;;  %2251 = vadd.xlane.f32.xlu0 %v4284_v59  ;;  %v1993_v3 = vmul.f32 %v1961_v38, %v4157_v42 }
 0x528   :  { %v2556_v28 = vmul.f32 0.5, %v2555_v40  ;;  %v2482_v48 = vmul.f32 0.03125, %v2422_v45  ;;  %v2242_v30 = vpop.xlane.xlu2 %2241  ;;  %2431 = vadd.xlane.f32.xlu2 %v2391_v11  ;;  %2931 = vmatmul.f32.vlgmr.msra.gmra.mxu0 %v2863_v19 }
 0x529   :  { %v2296_v0 = vmul.f32 0.03125, %v2242_v30  ;;  %2123 = vmatmul.f32.gmra.mxu3 %v1993_v3  ;;  %v2085_v19 = vpop.f32.mrf.mxu3 }
 0x52a   :  { %v2557_v52 = vsub.f32 1.5, %v2556_v28  ;;  %v2514_v20 = vadd.f32 1e-05, %v2482_v48 }
 0x52b   :  { %v3210_v37 = vpop.eup %3209  ;;  %v2328_v21 = vsub.f32 %v4204_v5, %v2296_v0  ;;  %v4308_v5 = vld [vmem:[%s4656_s4] ss:$0 sm:$0xff] }
 0x52c   :  { %v2564_v57 = vmul.f32 %v3210_v37, %v4278_v31  ;;  %3211 = vrsqrt.f32 %v2514_v20  ;;  %v2558_v17 = vmul.f32 %v3208_v60, %v2557_v52  ;;  %v2080_v58 = vadd.f32 %v4308_v5, %v2079_v12 }
 0x52d   :  { %v4301_v42 = vsel %vm1319_vm7, %v2328_v21, 0.0  ;;  %vm2570_vm0 = vweird.f32 %v3210_v37  ;;  %v2083_v32 = vadd.f32 %v4308_v5, %v2082_v24  ;;  %vm2579_vm5 = vweird.f32 %v2514_v20 }
 0x52e   :  { %v2565_v54 = vmul.f32 %v3210_v37, %v2564_v57  ;;  %v2392_v6 = vmul.f32 %v4301_v42, %v4301_v42  ;;  %v2562_v61 = vsel %vm2561_vm15, %v3208_v60, %v2558_v17  ;;  %v2175_v43 = vmul.f32 0.01, %v2080_v58  ;;  %vm2571_vm3 = vmor %vm2569_vm1, %vm2570_vm0 }
 0x52f   :  { %v2244_v27 = vpop.xlane.xlu1 %2243  ;;  %v2864_v56 = vmul.f32 %v2562_v61, %v4174_v51  ;;  %vm2143_vm2 = vcmp.ge.f32.partialorder %v2080_v58, 0.0  ;;  %v2176_v10 = vmul.f32 0.01, %v2083_v32  ;;  %vm2144_vm6 = vcmp.ge.f32.partialorder %v2083_v32, 0.0 }
 0x530   :  { %v2566_v16 = vmul.f32 0.5, %v2565_v54  ;;  %v2297_v62 = vmul.f32 0.03125, %v2244_v27  ;;  %2433 = vadd.xlane.f32.xlu1 %v2392_v6  ;;  %2253 = vadd.xlane.f32.xlu2 %v4311_v46  ;;  %v4324_v63 = vsel %vm2143_vm2, %v2080_v58, %v2175_v43 }
 0x531   :  { %2934 = vmatmul.f32.gmra.mxu0 %v2864_v56  ;;  %v4328_v9 = vsel %vm2144_vm6, %v2083_v32, %v2176_v10  ;;  %v2088_v30 = vpop.f32.mrf.mxu3 }
 0x532   :  { %v3212_v22 = vpop.eup %3211  ;;  %v2567_v23 = vsub.f32 1.5, %v2566_v16  ;;  %v2329_v13 = vsub.f32 %v4208_v18, %v2297_v62 }
 0x533   :  { %v2574_v2 = vmul.f32 %v3212_v22, %v2514_v20  ;;  %vm2580_vm4 = vweird.f32 %v3212_v22  ;;  %v2086_v20 = vadd.f32 %v4308_v5, %v2085_v19 }
 0x534   :  { %v4319_v49 = vsel %vm1319_vm7, %v2329_v13, 0.0  ;;  %v2568_v4 = vmul.f32 %v3210_v37, %v2567_v23  ;;  %vm2581_vm8 = vmor %vm2579_vm5, %vm2580_vm4 }
 0x535   :  { %v2575_v33 = vmul.f32 %v3212_v22, %v2574_v2  ;;  %v2393_v51 = vmul.f32 %v4319_v49, %v4319_v49  ;;  %v2177_v27 = vmul.f32 0.01, %v2086_v20  ;;  %vm2145_vm11 = vcmp.ge.f32.partialorder %v2086_v20, 0.0 }
 0x536   :  { %v2572_v18 = vsel %vm2571_vm3, %v3210_v37, %v2568_v4 }
 0x537   :  { %v2576_v44 = vmul.f32 0.5, %v2575_v33  ;;  %2435 = vadd.xlane.f32.xlu0 %v2393_v51  ;;  %v2865_v47 = vmul.f32 %v2572_v18, %v4187_v35  ;;  %v4351_v24 = vsel %vm2145_vm11, %v2086_v20, %v2177_v27 }
 0x538   :  { %2255 = vadd.xlane.f32.xlu1 %v4324_v63 }
 0x539   :  { %v2577_v60 = vsub.f32 1.5, %v2576_v44  ;;  %2937 = vmatmul.f32.gmra.mxu0 %v2865_v47  ;;  %v2091_v56 = vpop.f32.mrf.mxu3 }
 0x53a   :  { %v2092_v19 = vadd.f32 %v4308_v5, %v2091_v56 }
 0x53b   :  { %v2578_v31 = vmul.f32 %v3212_v22, %v2577_v60 }
 0x53c   :  { %vm2147_vm2 = vcmp.ge.f32.partialorder %v2092_v19, 0.0 }
 0x53d   :  { %v2582_v29 = vsel %vm2581_vm8, %v3212_v22, %v2578_v31 }
 0x53e   :  { %v2866_v14 = vmul.f32 %v2582_v29, %v4199_v41 }
 0x53f   :  { %2257 = vadd.xlane.f32.xlu0 %v4328_v9 }
 0x541   :  { %2940 = vmatmul.f32.gmra.mxu0 %v2866_v14  ;;  %v2094_v14 = vpop.f32.mrf.mxu3 }
 0x57a   :  { %v2424_v25 = vpop.xlane.xlu0 %2423 }
 0x57b   :  { %v2483_v35 = vmul.f32 0.03125, %v2424_v25 }
 0x57d   :  { %v2515_v40 = vadd.f32 1e-05, %v2483_v35 }
 0x57f   :  { %3213 = vrsqrt.f32 %v2515_v40  ;;  %vm2589_vm10 = vweird.f32 %v2515_v40 }
 0x582   :  { %v2426_v11 = vpop.xlane.xlu2 %2425  ;;  %v2246_v38 = vpop.xlane.xlu0 %2245 }
 0x583   :  { %v2484_v8 = vmul.f32 0.03125, %v2426_v11  ;;  %v2298_v45 = vmul.f32 0.03125, %v2246_v38 }
 0x585   :  { %v3214_v3 = vpop.eup %3213  ;;  %v2516_v28 = vadd.f32 1e-05, %v2484_v8  ;;  %v2330_v48 = vsub.f32 %v4235_v26, %v2298_v45 }
 0x586   :  { %v2584_v12 = vmul.f32 %v3214_v3, %v2515_v40  ;;  %vm2590_vm9 = vweird.f32 %v3214_v3 }
 0x587   :  { %3215 = vrsqrt.f32 %v2516_v28  ;;  %v4335_v41 = vsel %vm1319_vm7, %v2330_v48, 0.0  ;;  %vm2591_vm12 = vmor %vm2589_vm10, %vm2590_vm9  ;;  %vm2599_vm14 = vweird.f32 %v2516_v28 }
 0x588   :  { %v2585_v0 = vmul.f32 %v3214_v3, %v2584_v12  ;;  %v2394_v52 = vmul.f32 %v4335_v41, %v4335_v41 }
 0x58a   :  { %v2586_v37 = vmul.f32 0.5, %v2585_v0  ;;  %v2428_v21 = vpop.xlane.xlu1 %2427  ;;  %v2248_v7 = vpop.xlane.xlu2 %2247  ;;  %2437 = vadd.xlane.f32.xlu2 %v2394_v52  ;;  %v2179_v0 = vmul.f32 0.01, %v2092_v19 }
 0x58b   :  { %v2485_v57 = vmul.f32 0.03125, %v2428_v21  ;;  %v2299_v17 = vmul.f32 0.03125, %v2248_v7  ;;  %v2095_v7 = vadd.f32 %v4308_v5, %v2094_v14 }
 0x58c   :  { %v2587_v26 = vsub.f32 1.5, %v2586_v37 }
 0x58d   :  { %v3216_v54 = vpop.eup %3215  ;;  %v4340_v6 = vadd.f32 1e-05, %v2485_v57  ;;  %v2331_v58 = vsub.f32 %v4255_v55, %v2299_v17  ;;  %v2089_v55 = vadd.f32 %v4308_v5, %v2088_v30  ;;  %v4384_v57 = vsel %vm2147_vm2, %v2092_v19, %v2179_v0 }
 0x58e   :  { %v2594_v61 = vmul.f32 %v3216_v54, %v2516_v28  ;;  %v2588_v16 = vmul.f32 %v3214_v3, %v2587_v26  ;;  %vm2600_vm13 = vweird.f32 %v3216_v54  ;;  %v2097_v26 = vpop.f32.mrf.mxu3  ;;  %vm2148_vm8 = vcmp.ge.f32.partialorder %v2095_v7, 0.0 }
 0x58f   :  { %3217 = vrsqrt.f32 %v4340_v6  ;;  %v4346_v62 = vsel %vm1319_vm7, %v2331_v58, 0.0  ;;  %v2178_v10 = vmul.f32 0.01, %v2089_v55  ;;  %vm2146_vm15 = vcmp.ge.f32.partialorder %v2089_v55, 0.0  ;;  %vm2601_vm0 = vmor %vm2599_vm14, %vm2600_vm13  ;;  %v4391_v58 = vld [vmem:[%s4658_s6] ss:$0 sm:$0xff] }
 0x590   :  { %v2595_v22 = vmul.f32 %v3216_v54, %v2594_v61  ;;  %v2395_v23 = vmul.f32 %v4346_v62, %v4346_v62  ;;  %v2592_v13 = vsel %vm2591_vm12, %v3214_v3, %v2588_v16  ;;  %vm2609_vm3 = vweird.f32 %v4340_v6 }
 0x591   :  { %v2867_v2 = vmul.f32 %v2592_v13, %v4218_v34  ;;  %v4367_v40 = vsel %vm2146_vm15, %v2089_v55, %v2178_v10  ;;  %v2180_v13 = vmul.f32 0.01, %v2095_v7 }
 0x592   :  { %v2596_v43 = vmul.f32 0.5, %v2595_v22  ;;  %v2250_v4 = vpop.xlane.xlu1 %2249  ;;  %2439 = vadd.xlane.f32.xlu1 %v2395_v23  ;;  %2259 = vadd.xlane.f32.xlu2 %v4351_v24  ;;  %v2430_v33 = vpop.xlane.xlu0 %2429 }
 0x593   :  { %v2300_v51 = vmul.f32 0.03125, %v2250_v4  ;;  %v2486_v32 = vmul.f32 0.03125, %v2430_v33  ;;  %2943 = vmatmul.f32.gmra.mxu0 %v2867_v2 }
 0x594   :  { %v2597_v18 = vsub.f32 1.5, %v2596_v43 }
 0x595   :  { %v3218_v44 = vpop.eup %3217  ;;  %v2332_v47 = vsub.f32 %v4273_v39, %v2300_v51  ;;  %v4356_v60 = vadd.f32 1e-05, %v2486_v32 }
 0x596   :  { %v2604_v34 = vmul.f32 %v3218_v44, %v4340_v6  ;;  %v2598_v31 = vmul.f32 %v3216_v54, %v2597_v18  ;;  %vm2610_vm1 = vweird.f32 %v3218_v44 }
 0x597   :  { %3219 = vrsqrt.f32 %v4356_v60  ;;  %v4362_v29 = vsel %vm1319_vm7, %v2332_v47, 0.0  ;;  %vm2611_vm4 = vmor %vm2609_vm3, %vm2610_vm1  ;;  %vm2619_vm6 = vweird.f32 %v4356_v60  ;;  %v4406_v47 = vsel %vm2148_vm8, %v2095_v7, %v2180_v13 }
 0x598   :  { %v2605_v25 = vmul.f32 %v3218_v44, %v2604_v34  ;;  %v2396_v39 = vmul.f32 %v4362_v29, %v4362_v29  ;;  %v2602_v35 = vsel %vm2601_vm0, %v3216_v54, %v2598_v31 }
 0x599   :  { %v2868_v11 = vmul.f32 %v2602_v35, %v4230_v36 }
 0x59a   :  { %v2606_v38 = vmul.f32 0.5, %v2605_v25  ;;  %2261 = vadd.xlane.f32.xlu1 %v4367_v40  ;;  %2441 = vadd.xlane.f32.xlu0 %v2396_v39  ;;  %v2252_v8 = vpop.xlane.xlu0 %2251  ;;  %v2100_v25 = vpop.f32.mrf.mxu3 }
 0x59b   :  { %v2432_v45 = vpop.xlane.xlu2 %2431  ;;  %v2301_v3 = vmul.f32 0.03125, %v2252_v8  ;;  %2946 = vmatmul.f32.gmra.mxu0 %v2868_v11 }
 0x59c   :  { %v2607_v28 = vsub.f32 1.5, %v2606_v38  ;;  %v2487_v48 = vmul.f32 0.03125, %v2432_v45 }
 0x59d   :  { %v3220_v30 = vpop.eup %3219  ;;  %v2333_v12 = vsub.f32 %v4284_v59, %v2301_v3 }
 0x59e   :  { %v2614_v52 = vmul.f32 %v3220_v30, %v4356_v60  ;;  %v4373_v20 = vadd.f32 1e-05, %v2487_v48  ;;  %v2608_v36 = vmul.f32 %v3218_v44, %v2607_v28  ;;  %vm2620_vm5 = vweird.f32 %v3220_v30 }
 0x59f   :  { %v4378_v37 = vsel %vm1319_vm7, %v2333_v12, 0.0  ;;  %vm2621_vm9 = vmor %vm2619_vm6, %vm2620_vm5  ;;  %v2098_v60 = vadd.f32 %v4308_v5, %v2097_v26  ;;  %v2101_v12 = vadd.f32 %v4308_v5, %v2100_v25 }
 0x5a0   :  { %v2615_v21 = vmul.f32 %v3220_v30, %v2614_v52  ;;  %3221 = vrsqrt.f32 %v4373_v20  ;;  %v2397_v59 = vmul.f32 %v4378_v37, %v4378_v37  ;;  %v2612_v17 = vsel %vm2611_vm4, %v3218_v44, %v2608_v36 }
 0x5a1   :  { %v2869_v6 = vmul.f32 %v2612_v17, %v4249_v15  ;;  %v2181_v8 = vmul.f32 0.01, %v2098_v60  ;;  %vm2149_vm11 = vcmp.ge.f32.partialorder %v2098_v60, 0.0  ;;  %vm2629_vm12 = vweird.f32 %v4373_v20 }
 0x5a2   :  { %v2616_v54 = vmul.f32 0.5, %v2615_v21  ;;  %2263 = vadd.xlane.f32.xlu0 %v4384_v57  ;;  %2443 = vadd.xlane.f32.xlu2 %v2397_v59  ;;  %vm2150_vm0 = vcmp.ge.f32.partialorder %v2101_v12, 0.0 }
 0x5a3   :  { %v2434_v27 = vpop.xlane.xlu1 %2433  ;;  %v2254_v61 = vpop.xlane.xlu2 %2253  ;;  %2949 = vmatmul.f32.gmra.mxu0 %v2869_v6  ;;  %v4422_v0 = vsel %vm2149_vm11, %v2098_v60, %v2181_v8 }
 0x5a4   :  { %v2617_v16 = vsub.f32 1.5, %v2616_v54  ;;  %v2488_v56 = vmul.f32 0.03125, %v2434_v27  ;;  %v2302_v22 = vmul.f32 0.03125, %v2254_v61  ;;  %v2103_v54 = vpop.f32.mrf.mxu3  ;;  %v2182_v27 = vmul.f32 0.01, %v2101_v12 }
 0x5a5   :  { %v2932_v23 = vpop.f32.mrf.mxu0 }
 0x5a6   :  { %v3222_v55 = vpop.eup %3221  ;;  %v4394_v2 = vadd.f32 1e-05, %v2488_v56  ;;  %v2334_v15 = vsub.f32 %v4311_v46, %v2302_v22  ;;  %v2933_v43 = vadd.f32 %v4391_v58, %v2932_v23  ;;  %v2618_v4 = vmul.f32 %v3220_v30, %v2617_v16 }
 0x5a7   :  { %v2624_v33 = vmul.f32 %v3222_v55, %v4373_v20  ;;  %vm2630_vm10 = vweird.f32 %v3222_v55  ;;  %v2104_v23 = vadd.f32 %v4308_v5, %v2103_v54 }
 0x5a8   :  { %3223 = vrsqrt.f32 %v4394_v2  ;;  %3028 = vst [vmem:[#allocation10] sm:$0xff] %v2933_v43  ;;  %v4402_v51 = vsel %vm1319_vm7, %v2334_v15, 0.0  ;;  %v2622_v32 = vsel %vm2621_vm9, %v3220_v30, %v2618_v4  ;;  %vm2631_vm13 = vmor %vm2629_vm12, %vm2630_vm10  ;;  %vm2639_vm15 = vweird.f32 %v4394_v2 }
 0x5a9   :  { %v2625_v18 = vmul.f32 %v3222_v55, %v2624_v33  ;;  %v2398_v44 = vmul.f32 %v4402_v51, %v4402_v51  ;;  %v2870_v46 = vmul.f32 %v2622_v32, %v4268_v1  ;;  %v2183_v4 = vmul.f32 0.01, %v2104_v23 }
 0x5aa   :  { %2265 = vadd.xlane.f32.xlu2 %v4406_v47  ;;  %v2436_v10 = vpop.xlane.xlu0 %2435  ;;  %vm2151_vm4 = vcmp.ge.f32.partialorder %v2104_v23, 0.0 }
 0x5ab   :  { %v2626_v34 = vmul.f32 0.5, %v2625_v18  ;;  %v2256_v31 = vpop.xlane.xlu1 %2255  ;;  %2445 = vadd.xlane.f32.xlu1 %v2398_v44  ;;  %v2489_v14 = vmul.f32 0.03125, %v2436_v10  ;;  %2952 = vmatmul.f32.gmra.mxu0 %v2870_v46  ;;  %v4441_v46 = vsel %vm2151_vm4, %v2104_v23, %v2183_v4 }
 0x5ac   :  { %v2303_v39 = vmul.f32 0.03125, %v2256_v31 }
 0x5ad   :  { %v2627_v35 = vsub.f32 1.5, %v2626_v34  ;;  %v2521_v19 = vadd.f32 1e-05, %v2489_v14  ;;  %v2106_v34 = vpop.f32.mrf.mxu3 }
 0x5ae   :  { %v3224_v11 = vpop.eup %3223  ;;  %v2335_v38 = vsub.f32 %v4324_v63, %v2303_v39  ;;  %v2935_v45 = vpop.f32.mrf.mxu0 }
 0x5af   :  { %v2634_v1 = vmul.f32 %v3224_v11, %v4394_v2  ;;  %3225 = vrsqrt.f32 %v2521_v19  ;;  %v2936_v3 = vadd.f32 %v4391_v58, %v2935_v45  ;;  %v2628_v48 = vmul.f32 %v3222_v55, %v2627_v35 }
 0x5b0   :  { %v4417_v28 = vsel %vm1319_vm7, %v2335_v38, 0.0  ;;  %vm2640_vm14 = vweird.f32 %v3224_v11  ;;  %v4436_v2 = vsel %vm2150_vm0, %v2101_v12, %v2182_v27  ;;  %vm2649_vm3 = vweird.f32 %v2521_v19 }
 0x5b1   :  { %v2635_v30 = vmul.f32 %v3224_v11, %v2634_v1  ;;  %v2399_v63 = vmul.f32 %v4417_v28, %v4417_v28  ;;  %3029 = vst [vmem:[#allocation10 + $0x8] sm:$0xff] %v2936_v3  ;;  %v2632_v36 = vsel %vm2631_vm13, %v3222_v55, %v2628_v48  ;;  %vm2641_vm1 = vmor %vm2639_vm15, %vm2640_vm14  ;;  %v2107_v48 = vadd.f32 %v4308_v5, %v2106_v34 }
 0x5b2   :  { %v2258_v52 = vpop.xlane.xlu0 %2257  ;;  %v2871_v59 = vmul.f32 %v2632_v36, %v4288_v50 }
 0x5b3   :  { %v2636_v20 = vmul.f32 0.5, %v2635_v30  ;;  %2447 = vadd.xlane.f32.xlu0 %v2399_v63  ;;  %2267 = vadd.xlane.f32.xlu1 %v4422_v0  ;;  %v2304_v21 = vmul.f32 0.03125, %v2258_v52  ;;  %vm2152_vm8 = vcmp.ge.f32.partialorder %v2107_v48, 0.0 }
 0x5b4   :  { %2955 = vmatmul.f32.gmra.mxu0 %v2871_v59 }
 0x5b5   :  { %v3226_v7 = vpop.eup %3225  ;;  %v2637_v17 = vsub.f32 1.5, %v2636_v20  ;;  %v2336_v26 = vsub.f32 %v4328_v9, %v2304_v21  ;;  %v2109_v8 = vpop.f32.mrf.mxu3 }
 0x5b6   :  { %v2644_v6 = vmul.f32 %v3226_v7, %v2521_v19  ;;  %v2938_v61 = vpop.f32.mrf.mxu0  ;;  %vm2650_vm2 = vweird.f32 %v3226_v7 }
 0x5b7   :  { %v4430_v16 = vsel %vm1319_vm7, %v2336_v26, 0.0  ;;  %v2638_v56 = vmul.f32 %v3224_v11, %v2637_v17  ;;  %v2939_v22 = vadd.f32 %v4391_v58, %v2938_v61  ;;  %vm2651_vm5 = vmor %vm2649_vm3, %vm2650_vm2  ;;  %v2184_v17 = vmul.f32 0.01, %v2107_v48 }
 0x5b8   :  { %v2645_v50 = vmul.f32 %v3226_v7, %v2644_v6  ;;  %v2400_v9 = vmul.f32 %v4430_v16, %v4430_v16 }
 0x5b9   :  { %v2642_v13 = vsel %vm2641_vm1, %v3224_v11, %v2638_v56  ;;  %3030 = vst [vmem:[#allocation10 + $0x10] sm:$0xff] %v2939_v22  ;;  %v2110_v22 = vadd.f32 %v4308_v5, %v2109_v8 }
 0x5ba   :  { %v2646_v55 = vmul.f32 0.5, %v2645_v50  ;;  %2449 = vadd.xlane.f32.xlu2 %v2400_v9  ;;  %v2872_v15 = vmul.f32 %v2642_v13, %v4301_v42  ;;  %v4465_v9 = vsel %vm2152_vm8, %v2107_v48, %v2184_v17 }
 0x5bb   :  { %2269 = vadd.xlane.f32.xlu0 %v4436_v2  ;;  %vm2153_vm12 = vcmp.ge.f32.partialorder %v2110_v22, 0.0 }
 0x5bc   :  { %v2647_v43 = vsub.f32 1.5, %v2646_v55  ;;  %2958 = vmatmul.f32.gmra.mxu0 %v2872_v15 }
 0x5bd   :  { %v2112_v61 = vpop.f32.mrf.mxu3 }
 0x5be   :  { %v2648_v33 = vmul.f32 %v3226_v7, %v2647_v43  ;;  %v2941_v32 = vpop.f32.mrf.mxu0 }
 0x5bf   :  { %v2942_v18 = vadd.f32 %v4391_v58, %v2941_v32 }
 0x5c0   :  { %v2652_v44 = vsel %vm2651_vm5, %v3226_v7, %v2648_v33 }
 0x5c1   :  { %v2873_v60 = vmul.f32 %v2652_v44, %v4319_v49  ;;  %3031 = vst [vmem:[#allocation10 + $0x18] sm:$0xff] %v2942_v18 }
 0x5c2   :  { %2271 = vadd.xlane.f32.xlu2 %v4441_v46 }
 0x5c4   :  { %2961 = vmatmul.f32.gmra.mxu0 %v2873_v60 }
 0x5fd   :  { %v2438_v42 = vpop.xlane.xlu2 %2437 }
 0x5fe   :  { %v2490_v10 = vmul.f32 0.03125, %v2438_v42  ;;  %v2185_v42 = vmul.f32 0.01, %v2110_v22 }
 0x600   :  { %v2522_v31 = vadd.f32 1e-05, %v2490_v10 }
 0x602   :  { %3227 = vrsqrt.f32 %v2522_v31  ;;  %vm2659_vm9 = vweird.f32 %v2522_v31 }
 0x605   :  { %v2440_v14 = vpop.xlane.xlu1 %2439  ;;  %v2260_v25 = vpop.xlane.xlu2 %2259 }
 0x606   :  { %v2491_v39 = vmul.f32 0.03125, %v2440_v14  ;;  %v2305_v35 = vmul.f32 0.03125, %v2260_v25  ;;  %v2115_v14 = vpop.f32.mrf.mxu3 }
 0x607   :  { %v2116_v17 = vadd.f32 %v4308_v5, %v2115_v14 }
 0x608   :  { %v3228_v19 = vpop.eup %3227  ;;  %v2523_v11 = vadd.f32 1e-05, %v2491_v39  ;;  %v2337_v38 = vsub.f32 %v4351_v24, %v2305_v35  ;;  %v2113_v35 = vadd.f32 %v4308_v5, %v2112_v61 }
 0x609   :  { %v2654_v1 = vmul.f32 %v3228_v19, %v2522_v31  ;;  %vm2660_vm6 = vweird.f32 %v3228_v19  ;;  %vm2155_vm4 = vcmp.ge.f32.partialorder %v2116_v17, 0.0 }
 0x60a   :  { %3229 = vrsqrt.f32 %v2523_v11  ;;  %v4448_v49 = vsel %vm1319_vm7, %v2337_v38, 0.0  ;;  %vm2661_vm10 = vmor %vm2659_vm9, %vm2660_vm6  ;;  %vm2669_vm13 = vweird.f32 %v2523_v11  ;;  %vm2154_vm0 = vcmp.ge.f32.partialorder %v2113_v35, 0.0 }
 0x60b   :  { %v2655_v45 = vmul.f32 %v3228_v19, %v2654_v1  ;;  %v2401_v3 = vmul.f32 %v4448_v49, %v4448_v49 }
 0x60d   :  { %v2656_v30 = vmul.f32 0.5, %v2655_v45  ;;  %v2262_v63 = vpop.xlane.xlu1 %2261  ;;  %2451 = vadd.xlane.f32.xlu1 %v2401_v3  ;;  %v2442_v12 = vpop.xlane.xlu0 %2441 }
 0x60e   :  { %v2306_v52 = vmul.f32 0.03125, %v2262_v63  ;;  %v2492_v36 = vmul.f32 0.03125, %v2442_v12  ;;  %v2186_v12 = vmul.f32 0.01, %v2113_v35 }
 0x60f   :  { %v2657_v24 = vsub.f32 1.5, %v2656_v30 }
 0x610   :  { %v3230_v20 = vpop.eup %3229  ;;  %v2338_v21 = vsub.f32 %v4367_v40, %v2306_v52  ;;  %v4454_v59 = vadd.f32 1e-05, %v2492_v36  ;;  %v2944_v7 = vpop.f32.mrf.mxu0 }
 0x611   :  { %v2664_v26 = vmul.f32 %v3230_v20, %v2523_v11  ;;  %v2945_v54 = vadd.f32 %v4391_v58, %v2944_v7  ;;  %v2658_v6 = vmul.f32 %v3228_v19, %v2657_v24  ;;  %vm2670_vm11 = vweird.f32 %v3230_v20 }
 0x612   :  { %3231 = vrsqrt.f32 %v4454_v59  ;;  %v4460_v27 = vsel %vm1319_vm7, %v2338_v21, 0.0  ;;  %vm2671_vm14 = vmor %vm2669_vm13, %vm2670_vm11  ;;  %vm2679_vm1 = vweird.f32 %v4454_v59 }
 0x613   :  { %v2665_v56 = vmul.f32 %v3230_v20, %v2664_v26  ;;  %3032 = vst [vmem:[#allocation10 + $0x20] sm:$0xff] %v2945_v54  ;;  %v2402_v40 = vmul.f32 %v4460_v27, %v4460_v27  ;;  %v2662_v50 = vsel %vm2661_vm10, %v3228_v19, %v2658_v6  ;;  %v4482_v19 = vsel %vm2153_vm12, %v2110_v22, %v2185_v42 }
 0x614   :  { %v2874_v23 = vmul.f32 %v2662_v50, %v4335_v41  ;;  %v4500_v26 = vsel %vm2154_vm0, %v2113_v35, %v2186_v12 }
 0x615   :  { %v2666_v13 = vmul.f32 0.5, %v2665_v56  ;;  %2453 = vadd.xlane.f32.xlu0 %v2402_v40  ;;  %2273 = vadd.xlane.f32.xlu1 %v4465_v9  ;;  %v2444_v55 = vpop.xlane.xlu2 %2443  ;;  %v2264_v15 = vpop.xlane.xlu0 %2263 }
 0x616   :  { %v2493_v43 = vmul.f32 0.03125, %v2444_v55  ;;  %v2307_v4 = vmul.f32 0.03125, %v2264_v15  ;;  %2964 = vmatmul.f32.gmra.mxu0 %v2874_v23 }
 0x617   :  { %v2667_v33 = vsub.f32 1.5, %v2666_v13  ;;  %v2187_v13 = vmul.f32 0.01, %v2116_v17 }
 0x618   :  { %v3232_v32 = vpop.eup %3231  ;;  %v4469_v18 = vadd.f32 1e-05, %v2493_v43  ;;  %v2339_v44 = vsub.f32 %v4384_v57, %v2307_v4  ;;  %v2947_v60 = vpop.f32.mrf.mxu0 }
 0x619   :  { %v2674_v41 = vmul.f32 %v3232_v32, %v4454_v59  ;;  %v2948_v10 = vadd.f32 %v4391_v58, %v2947_v60  ;;  %v2668_v34 = vmul.f32 %v3230_v20, %v2667_v33  ;;  %vm2680_vm15 = vweird.f32 %v3232_v32  ;;  %v2118_v59 = vpop.f32.mrf.mxu3 }
 0x61a   :  { %3233 = vrsqrt.f32 %v4469_v18  ;;  %v4477_v31 = vsel %vm1319_vm7, %v2339_v44, 0.0  ;;  %vm2681_vm2 = vmor %vm2679_vm1, %vm2680_vm15  ;;  %vm2689_vm5 = vweird.f32 %v4469_v18 }
 0x61b   :  { %v2675_v25 = vmul.f32 %v3232_v32, %v2674_v41  ;;  %3033 = vst [vmem:[#allocation10 + $0x28] sm:$0xff] %v2948_v10  ;;  %v2403_v57 = vmul.f32 %v4477_v31, %v4477_v31  ;;  %v2672_v39 = vsel %vm2671_vm14, %v3230_v20, %v2668_v34  ;;  %v2119_v10 = vadd.f32 %v4308_v5, %v2118_v59 }
 0x61c   :  { %v2875_v11 = vmul.f32 %v2672_v39, %v4346_v62 }
 0x61d   :  { %v2676_v38 = vmul.f32 0.5, %v2675_v25  ;;  %2275 = vadd.xlane.f32.xlu0 %v4482_v19  ;;  %v2266_v8 = vpop.xlane.xlu2 %2265  ;;  %2455 = vadd.xlane.f32.xlu2 %v2403_v57  ;;  %vm2156_vm9 = vcmp.ge.f32.partialorder %v2119_v10, 0.0 }
 0x61e   :  { %v2446_v1 = vpop.xlane.xlu1 %2445  ;;  %v2308_v45 = vmul.f32 0.03125, %v2266_v8  ;;  %2967 = vmatmul.f32.gmra.mxu0 %v2875_v11 }
 0x61f   :  { %v2677_v3 = vsub.f32 1.5, %v2676_v38  ;;  %v2494_v48 = vmul.f32 0.03125, %v2446_v1 }
 0x620   :  { %v3234_v30 = vpop.eup %3233  ;;  %v2340_v63 = vsub.f32 %v4406_v47, %v2308_v45  ;;  %v2950_v62 = vpop.f32.mrf.mxu0  ;;  %v2188_v45 = vmul.f32 0.01, %v2119_v10 }
 0x621   :  { %v2684_v52 = vmul.f32 %v3234_v30, %v4469_v18  ;;  %v4488_v36 = vadd.f32 1e-05, %v2494_v48  ;;  %v2678_v24 = vmul.f32 %v3232_v32, %v2677_v3  ;;  %v2951_v20 = vadd.f32 %v4391_v58, %v2950_v62  ;;  %v2121_v39 = vpop.f32.mrf.mxu3 }
 0x622   :  { %v4494_v21 = vsel %vm1319_vm7, %v2340_v63, 0.0  ;;  %vm2690_vm3 = vweird.f32 %v3234_v30  ;;  %v4518_v18 = vsel %vm2155_vm4, %v2116_v17, %v2187_v13  ;;  %v4534_v62 = vsel %vm2156_vm9, %v2119_v10, %v2188_v45 }
 0x623   :  { %v2685_v7 = vmul.f32 %v3234_v30, %v2684_v52  ;;  %3235 = vrsqrt.f32 %v4488_v36  ;;  %v2404_v47 = vmul.f32 %v4494_v21, %v4494_v21  ;;  %3034 = vst [vmem:[#allocation10 + $0x30] sm:$0xff] %v2951_v20  ;;  %v2682_v54 = vsel %vm2681_vm2, %v3232_v32, %v2678_v24  ;;  %vm2691_vm6 = vmor %vm2689_vm5, %vm2690_vm3 }
 0x624   :  { %v2876_v61 = vmul.f32 %v2682_v54, %v4362_v29  ;;  %vm2699_vm10 = vweird.f32 %v4488_v36  ;;  %v2122_v52 = vadd.f32 %v4308_v5, %v2121_v39 }
 0x625   :  { %v2686_v6 = vmul.f32 0.5, %v2685_v7  ;;  %2457 = vadd.xlane.f32.xlu1 %v2404_v47  ;;  %2277 = vadd.xlane.f32.xlu2 %v4500_v26 }
 0x626   :  { %v2268_v56 = vpop.xlane.xlu1 %2267  ;;  %v2448_v40 = vpop.xlane.xlu0 %2447  ;;  %2970 = vmatmul.f32.gmra.mxu0 %v2876_v61  ;;  %vm2157_vm14 = vcmp.ge.f32.partialorder %v2122_v52, 0.0 }
 0x627   :  { %v2687_v50 = vsub.f32 1.5, %v2686_v6  ;;  %v2309_v22 = vmul.f32 0.03125, %v2268_v56  ;;  %v2495_v23 = vmul.f32 0.03125, %v2448_v40  ;;  %v2189_v56 = vmul.f32 0.01, %v2122_v52 }
 0x628   :  { %v2953_v4 = vpop.f32.mrf.mxu0 }
 0x629   :  { %v3236_v55 = vpop.eup %3235  ;;  %v2341_v15 = vsub.f32 %v4422_v0, %v2309_v22  ;;  %v4506_v43 = vadd.f32 1e-05, %v2495_v23  ;;  %v2688_v33 = vmul.f32 %v3234_v30, %v2687_v50  ;;  %v2954_v32 = vadd.f32 %v4391_v58, %v2953_v4  ;;  %v2124_v6 = vpop.f32.mrf.mxu3 }
 0x62a   :  { %v2694_v29 = vmul.f32 %v3236_v55, %v4488_v36  ;;  %vm2700_vm8 = vweird.f32 %v3236_v55  ;;  %v2125_v13 = vadd.f32 %v4308_v5, %v2124_v6 }
 0x62b   :  { %3237 = vrsqrt.f32 %v4506_v43  ;;  %v4513_v44 = vsel %vm1319_vm7, %v2341_v15, 0.0  ;;  %v2692_v60 = vsel %vm2691_vm6, %v3234_v30, %v2688_v33  ;;  %3035 = vst [vmem:[#allocation10 + $0x38] sm:$0xff] %v2954_v32  ;;  %vm2701_vm11 = vmor %vm2699_vm10, %vm2700_vm8  ;;  %vm2709_vm13 = vweird.f32 %v4506_v43 }
 0x62c   :  { %v2695_v42 = vmul.f32 %v3236_v55, %v2694_v29  ;;  %v2405_v0 = vmul.f32 %v4513_v44, %v4513_v44  ;;  %v2877_v41 = vmul.f32 %v2692_v60, %v4378_v37  ;;  %v2190_v29 = vmul.f32 0.01, %v2125_v13 }
 0x62d   :  { %2279 = vadd.xlane.f32.xlu1 %v4518_v18  ;;  %v2450_v34 = vpop.xlane.xlu2 %2449  ;;  %vm2158_vm2 = vcmp.ge.f32.partialorder %v2125_v13, 0.0 }
 0x62e   :  { %v2696_v14 = vmul.f32 0.5, %v2695_v42  ;;  %2459 = vadd.xlane.f32.xlu0 %v2405_v0  ;;  %v2496_v25 = vmul.f32 0.03125, %v2450_v34  ;;  %v2270_v57 = vpop.xlane.xlu0 %2269  ;;  %2973 = vmatmul.f32.gmra.mxu0 %v2877_v41  ;;  %v4553_v0 = vsel %vm2158_vm2, %v2125_v13, %v2190_v29 }
 0x62f   :  { %v2310_v35 = vmul.f32 0.03125, %v2270_v57 }
 0x630   :  { %v2697_v11 = vsub.f32 1.5, %v2696_v14  ;;  %v2528_v38 = vadd.f32 1e-05, %v2496_v25 }
 0x631   :  { %v3238_v8 = vpop.eup %3237  ;;  %v2342_v1 = vsub.f32 %v4436_v2, %v2310_v35  ;;  %v2956_v3 = vpop.f32.mrf.mxu0 }
 0x632   :  { %v2704_v37 = vmul.f32 %v3238_v8, %v4506_v43  ;;  %3239 = vrsqrt.f32 %v2528_v38  ;;  %v2957_v48 = vadd.f32 %v4391_v58, %v2956_v3  ;;  %v2698_v63 = vmul.f32 %v3236_v55, %v2697_v11 }
 0x633   :  { %v4529_v30 = vsel %vm1319_vm7, %v2342_v1, 0.0  ;;  %vm2710_vm12 = vweird.f32 %v3238_v8  ;;  %v4548_v43 = vsel %vm2157_vm14, %v2122_v52, %v2189_v56  ;;  %vm2719_vm1 = vweird.f32 %v2528_v38 }
 0x634   :  { %v2705_v12 = vmul.f32 %v3238_v8, %v2704_v37  ;;  %v2406_v2 = vmul.f32 %v4529_v30, %v4529_v30  ;;  %3036 = vst [vmem:[#allocation10 + $0x40] sm:$0xff] %v2957_v48  ;;  %v2702_v20 = vsel %vm2701_vm11, %v3236_v55, %v2698_v63  ;;  %vm2711_vm15 = vmor %vm2709_vm13, %vm2710_vm12 }
 0x635   :  { %v2272_v24 = vpop.xlane.xlu2 %2271  ;;  %v2878_v47 = vmul.f32 %v2702_v20, %v4402_v51 }
 0x636   :  { %v2706_v36 = vmul.f32 0.5, %v2705_v12  ;;  %2281 = vadd.xlane.f32.xlu0 %v4534_v62  ;;  %v2311_v7 = vmul.f32 0.03125, %v2272_v24  ;;  %2461 = vadd.xlane.f32.xlu2 %v2406_v2 }
 0x637   :  { %2976 = vmatmul.f32.gmra.mxu0 %v2878_v47 }
 0x638   :  { %v3240_v17 = vpop.eup %3239  ;;  %v2707_v54 = vsub.f32 1.5, %v2706_v36  ;;  %v2343_v59 = vsub.f32 %v4441_v46, %v2311_v7 }
 0x639   :  { %v2714_v61 = vmul.f32 %v3240_v17, %v2528_v38  ;;  %v2959_v40 = vpop.f32.mrf.mxu0  ;;  %vm2720_vm0 = vweird.f32 %v3240_v17 }
 0x63a   :  { %v4542_v50 = vsel %vm1319_vm7, %v2343_v59, 0.0  ;;  %v2708_v22 = vmul.f32 %v3238_v8, %v2707_v54  ;;  %v2960_v23 = vadd.f32 %v4391_v58, %v2959_v40  ;;  %vm2721_vm3 = vmor %vm2719_vm1, %vm2720_vm0 }
 0x63b   :  { %v2715_v51 = vmul.f32 %v3240_v17, %v2714_v61  ;;  %v2407_v46 = vmul.f32 %v4542_v50, %v4542_v50 }
 0x63c   :  { %v2712_v55 = vsel %vm2711_vm15, %v3238_v8, %v2708_v22  ;;  %3037 = vst [vmem:[#allocation10 + $0x48] sm:$0xff] %v2960_v23 }
 0x63d   :  { %v2716_v15 = vmul.f32 0.5, %v2715_v51  ;;  %2463 = vadd.xlane.f32.xlu1 %v2407_v46  ;;  %v2879_v4 = vmul.f32 %v2712_v55, %v4417_v28 }
 0x63e   :  { %2283 = vadd.xlane.f32.xlu2 %v4548_v43 }
 0x63f   :  { %v2717_v33 = vsub.f32 1.5, %v2716_v15  ;;  %2979 = vmatmul.f32.gmra.mxu0 %v2879_v4 }
 0x641   :  { %v2718_v32 = vmul.f32 %v3240_v17, %v2717_v33  ;;  %v2962_v60 = vpop.f32.mrf.mxu0 }
 0x642   :  { %v2963_v5 = vadd.f32 %v4391_v58, %v2962_v60 }
 0x643   :  { %v2722_v42 = vsel %vm2721_vm3, %v3240_v17, %v2718_v32 }
 0x644   :  { %v2880_v41 = vmul.f32 %v2722_v42, %v4430_v16  ;;  %3038 = vst [vmem:[#allocation10 + $0x50] sm:$0xff] %v2963_v5 }
 0x645   :  { %2285 = vadd.xlane.f32.xlu1 %v4553_v0 }
 0x647   :  { %2982 = vmatmul.f32.gmra.mxu0 %v2880_v41 }
 0x680   :  { %v2452_v28 = vpop.xlane.xlu1 %2451 }
 0x681   :  { %v2497_v10 = vmul.f32 0.03125, %v2452_v28 }
 0x683   :  { %v2529_v34 = vadd.f32 1e-05, %v2497_v10 }
 0x685   :  { %3241 = vrsqrt.f32 %v2529_v34  ;;  %vm2729_vm5 = vweird.f32 %v2529_v34 }
 0x688   :  { %v2274_v14 = vpop.xlane.xlu1 %2273  ;;  %v2454_v25 = vpop.xlane.xlu0 %2453 }
 0x689   :  { %v2312_v57 = vmul.f32 0.03125, %v2274_v14  ;;  %v2498_v39 = vmul.f32 0.03125, %v2454_v25 }
 0x68b   :  { %v3242_v35 = vpop.eup %3241  ;;  %v2344_v11 = vsub.f32 %v4465_v9, %v2312_v57  ;;  %v2530_v38 = vadd.f32 1e-05, %v2498_v39 }
 0x68c   :  { %v2724_v8 = vmul.f32 %v3242_v35, %v2529_v34  ;;  %vm2730_vm4 = vweird.f32 %v3242_v35 }
 0x68d   :  { %3243 = vrsqrt.f32 %v2530_v38  ;;  %v4560_v16 = vsel %vm1319_vm7, %v2344_v11, 0.0  ;;  %vm2731_vm6 = vmor %vm2729_vm5, %vm2730_vm4  ;;  %vm2739_vm9 = vweird.f32 %v2530_v38 }
 0x68e   :  { %v2725_v1 = vmul.f32 %v3242_v35, %v2724_v8  ;;  %v2408_v45 = vmul.f32 %v4560_v16, %v4560_v16 }
 0x690   :  { %v2726_v37 = vmul.f32 0.5, %v2725_v1  ;;  %2465 = vadd.xlane.f32.xlu0 %v2408_v45  ;;  %v2456_v3 = vpop.xlane.xlu2 %2455  ;;  %v2276_v48 = vpop.xlane.xlu0 %2275 }
 0x691   :  { %v2499_v63 = vmul.f32 0.03125, %v2456_v3  ;;  %v2313_v12 = vmul.f32 0.03125, %v2276_v48 }
 0x692   :  { %v2727_v2 = vsub.f32 1.5, %v2726_v37 }
 0x693   :  { %v3244_v9 = vpop.eup %3243  ;;  %v2531_v52 = vadd.f32 1e-05, %v2499_v63  ;;  %v2345_v24 = vsub.f32 %v4482_v19, %v2313_v12  ;;  %v2965_v20 = vpop.f32.mrf.mxu0 }
 0x694   :  { %v2734_v36 = vmul.f32 %v3244_v9, %v2530_v38  ;;  %v2966_v7 = vadd.f32 %v4391_v58, %v2965_v20  ;;  %v2728_v47 = vmul.f32 %v3242_v35, %v2727_v2  ;;  %vm2740_vm8 = vweird.f32 %v3244_v9 }
 0x695   :  { %3245 = vrsqrt.f32 %v2531_v52  ;;  %v4568_v17 = vsel %vm1319_vm7, %v2345_v24, 0.0  ;;  %vm2741_vm10 = vmor %vm2739_vm9, %vm2740_vm8  ;;  %vm2749_vm12 = vweird.f32 %v2531_v52 }
 0x696   :  { %v2735_v54 = vmul.f32 %v3244_v9, %v2734_v36  ;;  %3039 = vst [vmem:[#allocation10 + $0x58] sm:$0xff] %v2966_v7  ;;  %v2409_v59 = vmul.f32 %v4568_v17, %v4568_v17  ;;  %v2732_v6 = vsel %vm2731_vm6, %v3242_v35, %v2728_v47 }
 0x697   :  { %v2881_v19 = vmul.f32 %v2732_v6, %v4448_v49 }
 0x698   :  { %v2736_v61 = vmul.f32 0.5, %v2735_v54  ;;  %v2458_v56 = vpop.xlane.xlu1 %2457  ;;  %v2278_v40 = vpop.xlane.xlu2 %2277  ;;  %2467 = vadd.xlane.f32.xlu2 %v2409_v59 }
 0x699   :  { %v2500_v22 = vmul.f32 0.03125, %v2458_v56  ;;  %v2314_v51 = vmul.f32 0.03125, %v2278_v40  ;;  %2985 = vmatmul.f32.gmra.mxu0 %v2881_v19 }
 0x69a   :  { %v2737_v23 = vsub.f32 1.5, %v2736_v61 }
 0x69b   :  { %v3246_v46 = vpop.eup %3245  ;;  %v2532_v13 = vadd.f32 1e-05, %v2500_v22  ;;  %v2346_v55 = vsub.f32 %v4500_v26, %v2314_v51  ;;  %v2968_v15 = vpop.f32.mrf.mxu0 }
 0x69c   :  { %v2744_v4 = vmul.f32 %v3246_v46, %v2531_v52  ;;  %v2969_v33 = vadd.f32 %v4391_v58, %v2968_v15  ;;  %v2738_v29 = vmul.f32 %v3244_v9, %v2737_v23  ;;  %vm2750_vm11 = vweird.f32 %v3246_v46 }
 0x69d   :  { %3247 = vrsqrt.f32 %v2532_v13  ;;  %v4577_v49 = vsel %vm1319_vm7, %v2346_v55, 0.0  ;;  %vm2751_vm13 = vmor %vm2749_vm12, %vm2750_vm11  ;;  %vm2759_vm15 = vweird.f32 %v2532_v13 }
 0x69e   :  { %v2745_v32 = vmul.f32 %v3246_v46, %v2744_v4  ;;  %3040 = vst [vmem:[#allocation10 + $0x60] sm:$0xff] %v2969_v33  ;;  %v2410_v60 = vmul.f32 %v4577_v49, %v4577_v49  ;;  %v2742_v5 = vsel %vm2741_vm10, %v3244_v9, %v2738_v29 }
 0x69f   :  { %v2882_v26 = vmul.f32 %v2742_v5, %v4460_v27 }
 0x6a0   :  { %v2746_v42 = vmul.f32 0.5, %v2745_v32  ;;  %v2280_v41 = vpop.xlane.xlu1 %2279  ;;  %2469 = vadd.xlane.f32.xlu0 %v2410_v60 }
 0x6a1   :  { %v2315_v28 = vmul.f32 0.03125, %v2280_v41  ;;  %v2460_v10 = vpop.xlane.xlu0 %2459  ;;  %2988 = vmatmul.f32.gmra.mxu0 %v2882_v26 }
 0x6a2   :  { %v2747_v34 = vsub.f32 1.5, %v2746_v42  ;;  %v2501_v14 = vmul.f32 0.03125, %v2460_v10 }
 0x6a3   :  { %v3248_v25 = vpop.eup %3247  ;;  %v2347_v57 = vsub.f32 %v4518_v18, %v2315_v28  ;;  %v2971_v11 = vpop.f32.mrf.mxu0 }
 0x6a4   :  { %v2754_v39 = vmul.f32 %v3248_v25, %v2532_v13  ;;  %v2533_v35 = vadd.f32 1e-05, %v2501_v14  ;;  %v2748_v38 = vmul.f32 %v3246_v46, %v2747_v34  ;;  %v2972_v8 = vadd.f32 %v4391_v58, %v2971_v11 }
 0x6a5   :  { %v4586_v27 = vsel %vm1319_vm7, %v2347_v57, 0.0  ;;  %vm2760_vm14 = vweird.f32 %v3248_v25 }
 0x6a6   :  { %v2755_v1 = vmul.f32 %v3248_v25, %v2754_v39  ;;  %3249 = vrsqrt.f32 %v2533_v35  ;;  %v2411_v45 = vmul.f32 %v4586_v27, %v4586_v27  ;;  %3041 = vst [vmem:[#allocation10 + $0x68] sm:$0xff] %v2972_v8  ;;  %v2752_v37 = vsel %vm2751_vm13, %v3246_v46, %v2748_v38  ;;  %vm2761_vm0 = vmor %vm2759_vm15, %vm2760_vm14 }
 0x6a7   :  { %v2883_v3 = vmul.f32 %v2752_v37, %v4477_v31  ;;  %vm2769_vm2 = vweird.f32 %v2533_v35 }
 0x6a8   :  { %v2756_v18 = vmul.f32 0.5, %v2755_v1  ;;  %2471 = vadd.xlane.f32.xlu1 %v2411_v45 }
 0x6a9   :  { %v2462_v48 = vpop.xlane.xlu2 %2461  ;;  %v2282_v63 = vpop.xlane.xlu0 %2281  ;;  %2991 = vmatmul.f32.gmra.mxu0 %v2883_v3 }
 0x6aa   :  { %v2757_v12 = vsub.f32 1.5, %v2756_v18  ;;  %v2502_v2 = vmul.f32 0.03125, %v2462_v48  ;;  %v2316_v9 = vmul.f32 0.03125, %v2282_v63 }
 0x6ab   :  { %v2974_v36 = vpop.f32.mrf.mxu0 }
 0x6ac   :  { %v3250_v52 = vpop.eup %3249  ;;  %v2534_v24 = vadd.f32 1e-05, %v2502_v2  ;;  %v2348_v20 = vsub.f32 %v4534_v62, %v2316_v9  ;;  %v2758_v7 = vmul.f32 %v3248_v25, %v2757_v12  ;;  %v2975_v54 = vadd.f32 %v4391_v58, %v2974_v36 }
 0x6ad   :  { %v2764_v47 = vmul.f32 %v3250_v52, %v2533_v35  ;;  %vm2770_vm1 = vweird.f32 %v3250_v52 }
 0x6ae   :  { %3251 = vrsqrt.f32 %v2534_v24  ;;  %v4595_v31 = vsel %vm1319_vm7, %v2348_v20, 0.0  ;;  %v2762_v59 = vsel %vm2761_vm0, %v3248_v25, %v2758_v7  ;;  %3042 = vst [vmem:[#allocation10 + $0x70] sm:$0xff] %v2975_v54  ;;  %vm2771_vm3 = vmor %vm2769_vm2, %vm2770_vm1  ;;  %vm2779_vm5 = vweird.f32 %v2534_v24 }
 0x6af   :  { %v2765_v6 = vmul.f32 %v3250_v52, %v2764_v47  ;;  %v2412_v19 = vmul.f32 %v4595_v31, %v4595_v31  ;;  %v2884_v61 = vmul.f32 %v2762_v59, %v4494_v21 }
 0x6b0   :  { %v2464_v62 = vpop.xlane.xlu1 %2463 }
 0x6b1   :  { %v2766_v56 = vmul.f32 0.5, %v2765_v6  ;;  %v2503_v40 = vmul.f32 0.03125, %v2464_v62  ;;  %v2284_v22 = vpop.xlane.xlu2 %2283  ;;  %2473 = vadd.xlane.f32.xlu2 %v2412_v19  ;;  %2994 = vmatmul.f32.gmra.mxu0 %v2884_v61  ;;  %v4623_v19 = vld [vmem:[%s4658_s6] ss:$0 sm:$0xff]  ;;  %s3407_s6 = smov [#allocation10]  }
 0x6b2   :  { %v2317_v51 = vmul.f32 0.03125, %v2284_v22  ;;  %s3064_s29 = sshll.u32 %s3407_s6, 4  ;;  %s3065_s29 = int_to_ptr.vmem [resolvable:$true] %s3064_s29 }
 0x6b3   :  { %v2767_v23 = vsub.f32 1.5, %v2766_v56  ;;  %v2535_v46 = vadd.f32 1e-05, %v2503_v40 }
 0x6b4   :  { %v3252_v13 = vpop.eup %3251  ;;  %v2349_v55 = vsub.f32 %v4548_v43, %v2317_v51  ;;  %v2977_v4 = vpop.f32.mrf.mxu0 }
 0x6b5   :  { %v2774_v15 = vmul.f32 %v3252_v13, %v2534_v24  ;;  %3253 = vrsqrt.f32 %v2535_v46  ;;  %v2978_v33 = vadd.f32 %v4391_v58, %v2977_v4  ;;  %v2768_v29 = vmul.f32 %v3250_v52, %v2767_v23 }
 0x6b6   :  { %v4604_v21 = vsel %vm1319_vm7, %v2349_v55, 0.0  ;;  %vm2780_vm4 = vweird.f32 %v3252_v13  ;;  %vm2789_vm9 = vweird.f32 %v2535_v46 }
 0x6b7   :  { %v2775_v32 = vmul.f32 %v3252_v13, %v2774_v15  ;;  %v2413_v60 = vmul.f32 %v4604_v21, %v4604_v21  ;;  %3043 = vst [vmem:[#allocation10 + $0x78] sm:$0xff] %v2978_v33  ;;  %v2772_v26 = vsel %vm2771_vm3, %v3250_v52, %v2768_v29  ;;  %vm2781_vm6 = vmor %vm2779_vm5, %vm2780_vm4 }
 0x6b8   :  { %v2286_v5 = vpop.xlane.xlu1 %2285  ;;  %v2885_v41 = vmul.f32 %v2772_v26, %v4513_v44 }
 0x6b9   :  { %v2776_v43 = vmul.f32 0.5, %v2775_v32  ;;  %v2318_v42 = vmul.f32 0.03125, %v2286_v5  ;;  %2475 = vadd.xlane.f32.xlu0 %v2413_v60 }
 0x6ba   :  { %2997 = vmatmul.f32.gmra.mxu0 %v2885_v41 }
 0x6bb   :  { %v3254_v28 = vpop.eup %3253  ;;  %v2777_v10 = vsub.f32 1.5, %v2776_v43  ;;  %v2350_v34 = vsub.f32 %v4553_v0, %v2318_v42 }
 0x6bc   :  { %v2784_v14 = vmul.f32 %v3254_v28, %v2535_v46  ;;  %v2980_v25 = vpop.f32.mrf.mxu0  ;;  %vm2790_vm8 = vweird.f32 %v3254_v28 }
 0x6bd   :  { %v4612_v57 = vsel %vm1319_vm7, %v2350_v34, 0.0  ;;  %v2778_v39 = vmul.f32 %v3252_v13, %v2777_v10  ;;  %v2981_v11 = vadd.f32 %v4391_v58, %v2980_v25  ;;  %vm2791_vm7 = vmor %vm2789_vm9, %vm2790_vm8 }
 0x6be   :  { %v2785_v35 = vmul.f32 %v3254_v28, %v2784_v14  ;;  %v2414_v44 = vmul.f32 %v4612_v57, %v4612_v57 }
 0x6bf   :  { %v2782_v38 = vsel %vm2781_vm6, %v3252_v13, %v2778_v39  ;;  %3044 = vst [vmem:[#allocation10 + $0x80] sm:$0xff] %v2981_v11 }
 0x6c0   :  { %v2786_v8 = vmul.f32 0.5, %v2785_v35  ;;  %2477 = vadd.xlane.f32.xlu1 %v2414_v44  ;;  %v2886_v0 = vmul.f32 %v2782_v38, %v4529_v30 }
 0x6c2   :  { %v2787_v1 = vsub.f32 1.5, %v2786_v8  ;;  %3000 = vmatmul.f32.gmra.mxu0 %v2886_v0 }
 0x6c4   :  { %v2788_v53 = vmul.f32 %v3254_v28, %v2787_v1  ;;  %v2983_v45 = vpop.f32.mrf.mxu0 }
 0x6c5   :  { %v2984_v37 = vadd.f32 %v4391_v58, %v2983_v45 }
 0x6c6   :  { %v2792_v18 = vsel %vm2791_vm7, %v3254_v28, %v2788_v53 }
 0x6c7   :  { %v2887_v3 = vmul.f32 %v2792_v18, %v4542_v50  ;;  %3045 = vst [vmem:[#allocation10 + $0x88] sm:$0xff] %v2984_v37 }
 0x6ca   :  { %3003 = vmatmul.f32.gmra.mxu0 %v2887_v3 }
 0x703   :  { %v2466_v48 = vpop.xlane.xlu0 %2465 }
 0x704   :  { %v2504_v63 = vmul.f32 0.03125, %v2466_v48 }
 0x706   :  { %v2536_v12 = vadd.f32 1e-05, %v2504_v63 }
 0x708   :  { %3255 = vrsqrt.f32 %v2536_v12  ;;  %vm2799_vm11 = vweird.f32 %v2536_v12 }
 0x70b   :  { %v2468_v2 = vpop.xlane.xlu2 %2467 }
 0x70c   :  { %v2505_v30 = vmul.f32 0.03125, %v2468_v2 }
 0x70e   :  { %v3256_v9 = vpop.eup %3255  ;;  %v2537_v52 = vadd.f32 1e-05, %v2505_v30 }
 0x70f   :  { %v2794_v24 = vmul.f32 %v3256_v9, %v2536_v12  ;;  %vm2800_vm10 = vweird.f32 %v3256_v9 }
 0x710   :  { %3257 = vrsqrt.f32 %v2537_v52  ;;  %vm2801_vm12 = vmor %vm2799_vm11, %vm2800_vm10  ;;  %vm2809_vm14 = vweird.f32 %v2537_v52 }
 0x711   :  { %v2795_v20 = vmul.f32 %v3256_v9, %v2794_v24 }
 0x713   :  { %v2796_v36 = vmul.f32 0.5, %v2795_v20  ;;  %v2470_v7 = vpop.xlane.xlu0 %2469 }
 0x714   :  { %v2506_v47 = vmul.f32 0.03125, %v2470_v7 }
 0x715   :  { %v2797_v58 = vsub.f32 1.5, %v2796_v36 }
 0x716   :  { %v3258_v54 = vpop.eup %3257  ;;  %v2538_v50 = vadd.f32 1e-05, %v2506_v47  ;;  %v2986_v59 = vpop.f32.mrf.mxu0 }
 0x717   :  { %v2804_v6 = vmul.f32 %v3258_v54, %v2537_v52  ;;  %v2987_v61 = vadd.f32 %v4623_v19, %v2986_v59  ;;  %v2798_v62 = vmul.f32 %v3256_v9, %v2797_v58  ;;  %vm2810_vm13 = vweird.f32 %v3258_v54 }
 0x718   :  { %3259 = vrsqrt.f32 %v2538_v50  ;;  %vm2811_vm15 = vmor %vm2809_vm14, %vm2810_vm13  ;;  %vm2819_vm1 = vweird.f32 %v2538_v50 }
 0x719   :  { %v2805_v56 = vmul.f32 %v3258_v54, %v2804_v6  ;;  %3046 = vst [vmem:[#allocation10 + $0x90] sm:$0xff] %v2987_v61  ;;  %v2802_v40 = vsel %vm2801_vm12, %v3256_v9, %v2798_v62 }
 0x71a   :  { %v2888_v22 = vmul.f32 %v2802_v40, %v4560_v16 }
 0x71b   :  { %v2806_v51 = vmul.f32 0.5, %v2805_v56  ;;  %v2472_v23 = vpop.xlane.xlu1 %2471 }
 0x71c   :  { %v2507_v46 = vmul.f32 0.03125, %v2472_v23  ;;  %3006 = vmatmul.f32.gmra.mxu0 %v2888_v22 }
 0x71d   :  { %v2807_v13 = vsub.f32 1.5, %v2806_v51 }
 0x71e   :  { %v3260_v55 = vpop.eup %3259  ;;  %v2539_v15 = vadd.f32 1e-05, %v2507_v46  ;;  %v2989_v4 = vpop.f32.mrf.mxu0 }
 0x71f   :  { %v2814_v33 = vmul.f32 %v3260_v55, %v2538_v50  ;;  %v2990_v29 = vadd.f32 %v4623_v19, %v2989_v4  ;;  %v2808_v32 = vmul.f32 %v3258_v54, %v2807_v13  ;;  %vm2820_vm0 = vweird.f32 %v3260_v55 }
 0x720   :  { %3261 = vrsqrt.f32 %v2539_v15  ;;  %vm2821_vm2 = vmor %vm2819_vm1, %vm2820_vm0  ;;  %vm2829_vm4 = vweird.f32 %v2539_v15 }
 0x721   :  { %v2815_v60 = vmul.f32 %v3260_v55, %v2814_v33  ;;  %3047 = vst [vmem:[#allocation10 + $0x98] sm:$0xff] %v2990_v29  ;;  %v2812_v5 = vsel %vm2811_vm15, %v3258_v54, %v2808_v32 }
 0x722   :  { %v2889_v16 = vmul.f32 %v2812_v5, %v4568_v17 }
 0x723   :  { %v2816_v26 = vmul.f32 0.5, %v2815_v60 }
 0x724   :  { %v2474_v43 = vpop.xlane.xlu2 %2473  ;;  %3009 = vmatmul.f32.gmra.mxu0 %v2889_v16 }
 0x725   :  { %v2817_v42 = vsub.f32 1.5, %v2816_v26  ;;  %v2508_v41 = vmul.f32 0.03125, %v2474_v43 }
 0x726   :  { %v3262_v28 = vpop.eup %3261  ;;  %v2992_v14 = vpop.f32.mrf.mxu0 }
 0x727   :  { %v2824_v10 = vmul.f32 %v3262_v28, %v2539_v15  ;;  %v2540_v34 = vadd.f32 1e-05, %v2508_v41  ;;  %v2818_v25 = vmul.f32 %v3260_v55, %v2817_v42  ;;  %v2993_v39 = vadd.f32 %v4623_v19, %v2992_v14 }
 0x728   :  { %vm2830_vm3 = vweird.f32 %v3262_v28 }
 0x729   :  { %v2825_v35 = vmul.f32 %v3262_v28, %v2824_v10  ;;  %3263 = vrsqrt.f32 %v2540_v34  ;;  %v2822_v11 = vsel %vm2821_vm2, %v3260_v55, %v2818_v25  ;;  %3048 = vst [vmem:[#allocation10 + $0xa0] sm:$0xff] %v2993_v39  ;;  %vm2831_vm5 = vmor %vm2829_vm4, %vm2830_vm3  ;;  %vm2839_vm8 = vweird.f32 %v2540_v34 }
 0x72a   :  { %v2890_v17 = vmul.f32 %v2822_v11, %v4577_v49 }
 0x72b   :  { %v2826_v44 = vmul.f32 0.5, %v2825_v35 }
 0x72c   :  { %v2476_v38 = vpop.xlane.xlu0 %2475  ;;  %3012 = vmatmul.f32.gmra.mxu0 %v2890_v17 }
 0x72d   :  { %v2827_v8 = vsub.f32 1.5, %v2826_v44  ;;  %v2509_v0 = vmul.f32 0.03125, %v2476_v38 }
 0x72e   :  { %v2995_v45 = vpop.f32.mrf.mxu0 }
 0x72f   :  { %v3264_v1 = vpop.eup %3263  ;;  %v2541_v53 = vadd.f32 1e-05, %v2509_v0  ;;  %v2828_v37 = vmul.f32 %v3262_v28, %v2827_v8  ;;  %v2996_v3 = vadd.f32 %v4623_v19, %v2995_v45 }
 0x730   :  { %v2834_v18 = vmul.f32 %v3264_v1, %v2540_v34  ;;  %vm2840_vm6 = vweird.f32 %v3264_v1 }
 0x731   :  { %3265 = vrsqrt.f32 %v2541_v53  ;;  %v2832_v48 = vsel %vm2831_vm5, %v3262_v28, %v2828_v37  ;;  %3049 = vst [vmem:[#allocation10 + $0xa8] sm:$0xff] %v2996_v3  ;;  %vm2841_vm9 = vmor %vm2839_vm8, %vm2840_vm6  ;;  %vm2849_vm10 = vweird.f32 %v2541_v53 }
 0x732   :  { %v2835_v63 = vmul.f32 %v3264_v1, %v2834_v18  ;;  %v2891_v49 = vmul.f32 %v2832_v48, %v4586_v27 }
 0x733   :  { %v2478_v12 = vpop.xlane.xlu1 %2477 }
 0x734   :  { %v2836_v2 = vmul.f32 0.5, %v2835_v63  ;;  %v2510_v30 = vmul.f32 0.03125, %v2478_v12  ;;  %3015 = vmatmul.f32.gmra.mxu0 %v2891_v49 }
 0x736   :  { %v2837_v9 = vsub.f32 1.5, %v2836_v2  ;;  %v2542_v52 = vadd.f32 1e-05, %v2510_v30 }
 0x737   :  { %v3266_v24 = vpop.eup %3265  ;;  %v2998_v36 = vpop.f32.mrf.mxu0 }
 0x738   :  { %v2844_v20 = vmul.f32 %v3266_v24, %v2541_v53  ;;  %3267 = vrsqrt.f32 %v2542_v52  ;;  %v2999_v7 = vadd.f32 %v4623_v19, %v2998_v36  ;;  %v2838_v47 = vmul.f32 %v3264_v1, %v2837_v9 }
 0x739   :  { %vm2850_vm7 = vweird.f32 %v3266_v24  ;;  %vm2859_vm13 = vweird.f32 %v2542_v52 }
 0x73a   :  { %v2845_v58 = vmul.f32 %v3266_v24, %v2844_v20  ;;  %3050 = vst [vmem:[#allocation10 + $0xb0] sm:$0xff] %v2999_v7  ;;  %v2842_v54 = vsel %vm2841_vm9, %v3264_v1, %v2838_v47  ;;  %vm2851_vm11 = vmor %vm2849_vm10, %vm2850_vm7 }
 0x73b   :  { %v2892_v50 = vmul.f32 %v2842_v54, %v4595_v31 }
 0x73c   :  { %v2846_v27 = vmul.f32 0.5, %v2845_v58 }
 0x73d   :  { %3018 = vmatmul.f32.gmra.mxu0 %v2892_v50 }
 0x73e   :  { %v3268_v59 = vpop.eup %3267  ;;  %v2847_v6 = vsub.f32 1.5, %v2846_v27 }
 0x73f   :  { %v2854_v61 = vmul.f32 %v3268_v59, %v2542_v52  ;;  %v3001_v62 = vpop.f32.mrf.mxu0  ;;  %vm2860_vm12 = vweird.f32 %v3268_v59 }
 0x740   :  { %v2848_v56 = vmul.f32 %v3266_v24, %v2847_v6  ;;  %v3002_v22 = vadd.f32 %v4623_v19, %v3001_v62  ;;  %vm2861_vm14 = vmor %vm2859_vm13, %vm2860_vm12 }
 0x741   :  { %v2855_v40 = vmul.f32 %v3268_v59, %v2854_v61 }
 0x742   :  { %v2852_v51 = vsel %vm2851_vm11, %v3266_v24, %v2848_v56  ;;  %3051 = vst [vmem:[#allocation10 + $0xb8] sm:$0xff] %v3002_v22 }
 0x743   :  { %v2856_v23 = vmul.f32 0.5, %v2855_v40  ;;  %v2893_v46 = vmul.f32 %v2852_v51, %v4604_v21 }
 0x745   :  { %v2857_v13 = vsub.f32 1.5, %v2856_v23  ;;  %3021 = vmatmul.f32.gmra.mxu0 %v2893_v46 }
 0x747   :  { %v2858_v31 = vmul.f32 %v3268_v59, %v2857_v13  ;;  %v3004_v55 = vpop.f32.mrf.mxu0 }
 0x748   :  { %v3005_v15 = vadd.f32 %v4623_v19, %v3004_v55 }
 0x749   :  { %v2862_v4 = vsel %vm2861_vm14, %v3268_v59, %v2858_v31 }
 0x74a   :  { %v2894_v33 = vmul.f32 %v2862_v4, %v4612_v57  ;;  %3052 = vst [vmem:[#allocation10 + $0xc0] sm:$0xff] %v3005_v15 }
 0x74d   :  { %3024 = vmatmul.f32.gmra.mxu0 %v2894_v33 }
 0x799   :  { %v3007_v29 = vpop.f32.mrf.mxu0 }
 0x79a   :  { %v3008_v32 = vadd.f32 %v4623_v19, %v3007_v29 }
 0x79c   :  { %3053 = vst [vmem:[#allocation10 + $0xc8] sm:$0xff] %v3008_v32 }
 0x7a1   :  { %v3010_v60 = vpop.f32.mrf.mxu0 }
 0x7a2   :  { %v3011_v21 = vadd.f32 %v4623_v19, %v3010_v60 }
 0x7a4   :  { %3054 = vst [vmem:[#allocation10 + $0xd0] sm:$0xff] %v3011_v21 }
 0x7a9   :  { %v3013_v5 = vpop.f32.mrf.mxu0 }
 0x7aa   :  { %v3014_v16 = vadd.f32 %v4623_v19, %v3013_v5 }
 0x7ac   :  { %3055 = vst [vmem:[#allocation10 + $0xd8] sm:$0xff] %v3014_v16 }
 0x7b1   :  { %v3016_v26 = vpop.f32.mrf.mxu0 }
 0x7b2   :  { %v3017_v43 = vadd.f32 %v4623_v19, %v3016_v26 }
 0x7b4   :  { %3056 = vst [vmem:[#allocation10 + $0xe0] sm:$0xff] %v3017_v43 }
 0x7ba   :  { %v3019_v42 = vpop.f32.mrf.mxu0 }
 0x7bb   :  { %v3020_v57 = vadd.f32 %v4623_v19, %v3019_v42 }
 0x7bd   :  { %3057 = vst [vmem:[#allocation10 + $0xe8] sm:$0xff] %v3020_v57 }
 0x7c2   :  { %v3022_v41 = vpop.f32.mrf.mxu0 }
 0x7c3   :  { %v3023_v28 = vadd.f32 %v4623_v19, %v3022_v41 }
 0x7c5   :  { %3058 = vst [vmem:[#allocation10 + $0xf0] sm:$0xff] %v3023_v28 }
 0x7ca   :  { %v3025_v10 = vpop.f32.mrf.mxu0 }
 0x7cb   :  { %v3026_v34 = vadd.f32 %v4623_v19, %v3025_v10 }
 0x7cd   :  { %3059 = vst [vmem:[#allocation10 + $0xf8] sm:$0xff] %v3026_v34 }
 0x7ce   :  { %3072 = dma.vmem_to_hbm [thread:$0]  %s3065_s29, 4096, %s3067_s11, [#allocation4], %s3400_s9, %s3400_s9, %s3401_s10  }
 0x7cf   :  { %3397 = dma.done.wait [#allocation4], 4096  }
 0x7d0   :  { %3398 = vsyncadd [#allocation4], 4294963200 }
 0x7d1   :  { %3077 = vsyncpa [#allocation3], 1 }
 0x7d2   :  { %3078 = vsyncpa [#allocation6], 1 }
 0x7d3   :  { %3079 = vsyncpa [#allocation9], 1 }
 0x7d4   :  { %3080 = vsyncpa [#allocation4], 1 }

// kernel: tpu_custom_call.1
= control target key start
LH: loop header
LB: loop body
LE: loop exit
PB: predicated region body
PF: predicated region fallthrough
CT: control target
= control target key end

     0   :  { %12 = vsyncpa [#allocation3], 0  ;;  %s4652_s0 = inlined_call_operand.hbm [shape: f32[256,896], index: 0, kind: input, shape index: {}]   ;;  %s4653_s1 = inlined_call_operand.hbm [shape: f32[896,128], index: 1, kind: input, shape index: {}]   ;;  %s4654_s2 = inlined_call_operand.vmem [shape: f32[1,128], index: 2, kind: input, shape index: {}]   ;;  %s4655_s3 = inlined_call_operand.hbm [shape: f32[128,128], index: 3, kind: input, shape index: {}]   ;;  %s4656_s4 = inlined_call_operand.vmem [shape: f32[1,128], index: 4, kind: input, shape index: {}]   ;;  %s4657_s5 = inlined_call_operand.hbm [shape: f32[128,128], index: 5, kind: input, shape index: {}]   ;;  %s4658_s6 = inlined_call_operand.vmem [shape: f32[1,128], index: 6, kind: input, shape index: {}]   ;;  %s4659_s7 = inlined_call_operand.hbm [shape: f32[256,128], index: 7, kind: output, shape index: {}]  }
   0x1   :  { %13 = vsyncpa [#allocation6], 0 }
   0x2   :  { %14 = vsyncpa [#allocation9], 0  ;;  %s33_s26 = sshll.u32 %s4653_s1, 4  ;;  %s34_s26 = int_to_ptr.hbm [resolvable:$true] %s33_s26 }
   0x3   :  { %15 = vsyncpa [#allocation4], 0  ;;  %s3399_s27 = smov [#allocation5]   ;;  %s20_s8 = sshll.u32 %s4652_s0, 4  ;;  %s21_s8 = int_to_ptr.hbm [resolvable:$true] %s20_s8 }
   0x4   :  { %s35_s28 = sshll.u32 %s3399_s27, 4  ;;  %s3400_s9 = smov 128   ;;  %s36_s28 = int_to_ptr.vmem [resolvable:$true] %s35_s28 }
   0x5   :  { %s3401_s10 = smov 8   ;;  %s3402_s11 = smov [#allocation2]  }
   0x6   :  { %41 = dma.hbm_to_vmem [thread:$0]  %s34_s26, 14336, %s36_s28, [#allocation6], %s3400_s9, %s3400_s9, %s3401_s10  }
   0x7   :  { %s22_s12 = sshll.u32 %s3402_s11, 4  ;;  %s3403_s1 = smov 896   ;;  %s23_s12 = int_to_ptr.vmem [resolvable:$true] %s22_s12 }
   0x8   :  { %s3404_s13 = smov 56   ;;  %s48_s16 = sshll.u32 %s4655_s3, 4  ;;  %s49_s16 = int_to_ptr.hbm [resolvable:$true] %s48_s16 }
   0x9   :  { %28 = dma.hbm_to_vmem [thread:$0]  %s21_s8, 28672, %s23_s12, [#allocation3], %s3403_s1, %s3403_s1, %s3404_s13  }
   0xa   :  { %s3405_s17 = smov [#allocation7]   ;;  %s63_s20 = sshll.u32 %s4657_s5, 4  ;;  %s64_s20 = int_to_ptr.hbm [resolvable:$true] %s63_s20 }
   0xb   :  { %s50_s0 = sshll.u32 %s3405_s17, 4  ;;  %s3406_s21 = smov [#allocation8]   ;;  %s51_s0 = int_to_ptr.vmem [resolvable:$true] %s50_s0 }
   0xc   :  { %56 = dma.hbm_to_vmem [thread:$0]  %s49_s16, 2048, %s51_s0, [#allocation6], %s3400_s9, %s3400_s9, %s3401_s10  }
   0xd   :  { %s65_s22 = sshll.u32 %s3406_s21, 4  ;;  %s66_s22 = int_to_ptr.vmem [resolvable:$true] %s65_s22 }
   0xe   :  { %71 = dma.hbm_to_vmem [thread:$0]  %s64_s20, 2048, %s66_s22, [#allocation9], %s3400_s9, %s3400_s9, %s3401_s10  }
   0xf   :  { %3391 = dma.done.wait [#allocation3], 28672  }
  0x10   :  { %3392 = vsyncadd [#allocation3], 4294938624 }
  0x11   :  { %3393 = dma.done.wait [#allocation6], 16384  }
  0x12   :  { %3394 = vsyncadd [#allocation6], 4294950912 }
  0x13   :  { %3395 = dma.done.wait [#allocation9], 2048  }
  0x14   :  { %3396 = vsyncadd [#allocation9], 4294965248  ;;  %v329_v0 = vld [vmem:[#allocation5 + $0x78] sm:$0xff]  ;;  %v328_v1 = vld [vmem:[#allocation5 + $0x70] sm:$0xff]  ;;  %s3066_s11 = sshll.u32 %s4659_s7, 4  ;;  %s3067_s11 = int_to_ptr.hbm [resolvable:$true] %s3066_s11 }
  0x15   :  { %3081 = vmatpush.msra.mxu1 %v329_v0  ;;  %3082 = vmatpush.msra.mxu2 %v329_v0  ;;  %v327_v2 = vld [vmem:[#allocation5 + $0x68] sm:$0xff]  ;;  %v326_v3 = vld [vmem:[#allocation5 + $0x60] sm:$0xff]  ;;  %v325_v4 = vld [vmem:[#allocation5 + $0x58] sm:$0xff] }
  0x16   :  { %3083 = vmatpush.msra.mxu3 %v329_v0  ;;  %430 = vmatpush.msra.mxu0 %v329_v0  ;;  %v324_v5 = vld [vmem:[#allocation5 + $0x50] sm:$0xff]  ;;  %v323_v6 = vld [vmem:[#allocation5 + $0x48] sm:$0xff]  ;;  %v322_v7 = vld [vmem:[#allocation5 + $0x40] sm:$0xff] }
  0x17   :  { %3084 = vmatpush.msra.mxu1 %v328_v1  ;;  %3085 = vmatpush.msra.mxu2 %v328_v1  ;;  %v321_v8 = vld [vmem:[#allocation5 + $0x38] sm:$0xff]  ;;  %v320_v9 = vld [vmem:[#allocation5 + $0x30] sm:$0xff]  ;;  %v319_v10 = vld [vmem:[#allocation5 + $0x28] sm:$0xff] }
  0x18   :  { %3086 = vmatpush.msra.mxu3 %v328_v1  ;;  %431 = vmatpush.msra.mxu0 %v328_v1  ;;  %v318_v11 = vld [vmem:[#allocation5 + $0x20] sm:$0xff]  ;;  %v317_v12 = vld [vmem:[#allocation5 + $0x18] sm:$0xff]  ;;  %v316_v13 = vld [vmem:[#allocation5 + $0x10] sm:$0xff] }
  0x19   :  { %3087 = vmatpush.msra.mxu1 %v327_v2  ;;  %3088 = vmatpush.msra.mxu2 %v327_v2  ;;  %v315_v14 = vld [vmem:[#allocation5 + $0x8] sm:$0xff]  ;;  %v314_v15 = vld [vmem:[#allocation5] sm:$0xff]  ;;  %v361_v18 = vld [vmem:[#allocation5 + $0x178] sm:$0xff] }
  0x1a   :  { %3089 = vmatpush.msra.mxu3 %v327_v2  ;;  %432 = vmatpush.msra.mxu0 %v327_v2  ;;  %v146_v16 = vld [vmem:[#allocation2 + $0x1c0] sm:$0xff]  ;;  %v345_v20 = vld [vmem:[#allocation5 + $0xf8] sm:$0xff]  ;;  %v360_v21 = vld [vmem:[#allocation5 + $0x170] sm:$0xff] }
  0x1b   :  { %3090 = vmatpush.msra.mxu1 %v326_v3  ;;  %3091 = vmatpush.msra.mxu2 %v326_v3  ;;  %v202_v17 = vld [vmem:[#allocation2 + $0x380] sm:$0xff]  ;;  %v344_v22 = vld [vmem:[#allocation5 + $0xf0] sm:$0xff]  ;;  %v359_v24 = vld [vmem:[#allocation5 + $0x168] sm:$0xff] }
  0x1c   :  { %3092 = vmatpush.msra.mxu3 %v326_v3  ;;  %433 = vmatpush.msra.mxu0 %v326_v3  ;;  %v258_v19 = vld [vmem:[#allocation2 + $0x540] sm:$0xff]  ;;  %v377_v25 = vld [vmem:[#allocation5 + $0x1f8] sm:$0xff]  ;;  %v343_v26 = vld [vmem:[#allocation5 + $0xe8] sm:$0xff] }
  0x1d   :  { %3093 = vmatpush.msra.mxu1 %v325_v4  ;;  %3094 = vmatpush.msra.mxu2 %v325_v4  ;;  %v90_v23 = vld [vmem:[#allocation2] sm:$0xff]  ;;  %v376_v28 = vld [vmem:[#allocation5 + $0x1f0] sm:$0xff]  ;;  %v153_v29 = vld [vmem:[#allocation2 + $0x1f8] sm:$0xff] }
  0x1e   :  { %3095 = vmatpush.msra.mxu3 %v325_v4  ;;  %434 = vmatpush.msra.mxu0 %v325_v4  ;;  %v358_v27 = vld [vmem:[#allocation5 + $0x160] sm:$0xff]  ;;  %v209_v30 = vld [vmem:[#allocation2 + $0x3b8] sm:$0xff]  ;;  %v356_v35 = vld [vmem:[#allocation5 + $0x150] sm:$0xff] }
  0x1f   :  { %3096 = vmatpush.msra.mxu1 %v324_v5  ;;  %3097 = vmatpush.msra.mxu2 %v324_v5  ;;  %v342_v31 = vld [vmem:[#allocation5 + $0xe0] sm:$0xff]  ;;  %v357_v32 = vld [vmem:[#allocation5 + $0x158] sm:$0xff]  ;;  %v375_v37 = vld [vmem:[#allocation5 + $0x1e8] sm:$0xff] }
  0x20   :  { %3098 = vmatpush.msra.mxu3 %v324_v5  ;;  %435 = vmatpush.msra.mxu0 %v324_v5  ;;  %v265_v33 = vld [vmem:[#allocation2 + $0x578] sm:$0xff]  ;;  %v340_v38 = vld [vmem:[#allocation5 + $0xd0] sm:$0xff]  ;;  %v355_v39 = vld [vmem:[#allocation5 + $0x148] sm:$0xff] }
  0x21   :  { %3099 = vmatpush.msra.mxu1 %v323_v6  ;;  %3100 = vmatpush.msra.mxu2 %v323_v6  ;;  %v341_v34 = vld [vmem:[#allocation5 + $0xd8] sm:$0xff]  ;;  %v374_v40 = vld [vmem:[#allocation5 + $0x1e0] sm:$0xff]  ;;  %v339_v42 = vld [vmem:[#allocation5 + $0xc8] sm:$0xff] }
  0x22   :  { %3101 = vmatpush.msra.mxu3 %v323_v6  ;;  %436 = vmatpush.msra.mxu0 %v323_v6  ;;  %v97_v36 = vld [vmem:[#allocation2 + $0x38] sm:$0xff]  ;;  %v354_v43 = vld [vmem:[#allocation5 + $0x140] sm:$0xff]  ;;  %v160_v44 = vld [vmem:[#allocation2 + $0x230] sm:$0xff] }
  0x23   :  { %3102 = vmatpush.msra.mxu1 %v322_v7  ;;  %3103 = vmatpush.msra.mxu2 %v322_v7  ;;  %v393_v41 = vld [vmem:[#allocation5 + $0x278] sm:$0xff]  ;;  %v216_v45 = vld [vmem:[#allocation2 + $0x3f0] sm:$0xff]  ;;  %v338_v46 = vld [vmem:[#allocation5 + $0xc0] sm:$0xff] }
  0x24   :  { %3104 = vmatpush.msra.mxu3 %v322_v7  ;;  %437 = vmatpush.msra.mxu0 %v322_v7  ;;  %v353_v47 = vld [vmem:[#allocation5 + $0x138] sm:$0xff]  ;;  %v272_v48 = vld [vmem:[#allocation2 + $0x5b0] sm:$0xff]  ;;  %v351_v55 = vld [vmem:[#allocation5 + $0x128] sm:$0xff] }
  0x25   :  { %3105 = vmatpush.msra.mxu1 %v321_v8  ;;  %3106 = vmatpush.msra.mxu2 %v321_v8  ;;  %v392_v49 = vld [vmem:[#allocation5 + $0x270] sm:$0xff]  ;;  %v337_v50 = vld [vmem:[#allocation5 + $0xb8] sm:$0xff]  ;;  %v391_v57 = vld [vmem:[#allocation5 + $0x268] sm:$0xff] }
  0x26   :  { %3107 = vmatpush.msra.mxu3 %v321_v8  ;;  %438 = vmatpush.msra.mxu0 %v321_v8  ;;  %v352_v51 = vld [vmem:[#allocation5 + $0x130] sm:$0xff]  ;;  %v373_v53 = vld [vmem:[#allocation5 + $0x1d8] sm:$0xff]  ;;  %v335_v58 = vld [vmem:[#allocation5 + $0xa8] sm:$0xff] }
  0x27   :  { %3108 = vmatpush.msra.mxu1 %v320_v9  ;;  %3109 = vmatpush.msra.mxu2 %v320_v9  ;;  %v104_v52 = vld [vmem:[#allocation2 + $0x70] sm:$0xff]  ;;  %v350_v59 = vld [vmem:[#allocation5 + $0x120] sm:$0xff]  ;;  %v167_v60 = vld [vmem:[#allocation2 + $0x268] sm:$0xff] }
  0x28   :  { %3110 = vmatpush.msra.mxu3 %v320_v9  ;;  %439 = vmatpush.msra.mxu0 %v320_v9  ;;  %v336_v54 = vld [vmem:[#allocation5 + $0xb0] sm:$0xff]  ;;  %v223_v61 = vld [vmem:[#allocation2 + $0x428] sm:$0xff]  ;;  %v334_v63 = vld [vmem:[#allocation5 + $0xa0] sm:$0xff] }
  0x29   :  { %3111 = vmatpush.msra.mxu1 %v319_v10  ;;  %3112 = vmatpush.msra.mxu2 %v319_v10  ;;  %v372_v56 = vld [vmem:[#allocation5 + $0x1d0] sm:$0xff]  ;;  %v371_v62 = vld [vmem:[#allocation5 + $0x1c8] sm:$0xff]  ;;  %v349_v1 = vld [vmem:[#allocation5 + $0x118] sm:$0xff] }
  0x2a   :  { %3113 = vmatpush.msra.mxu3 %v319_v10  ;;  %440 = vmatpush.msra.mxu0 %v319_v10  ;;  %v279_v0 = vld [vmem:[#allocation2 + $0x5e8] sm:$0xff]  ;;  %v370_v2 = vld [vmem:[#allocation5 + $0x1c0] sm:$0xff]  ;;  %v333_v5 = vld [vmem:[#allocation5 + $0x98] sm:$0xff] }
  0x2b   :  { %3114 = vmatpush.msra.mxu1 %v318_v11  ;;  %3115 = vmatpush.msra.mxu2 %v318_v11  ;;  %v390_v3 = vld [vmem:[#allocation5 + $0x260] sm:$0xff]  ;;  %v111_v4 = vld [vmem:[#allocation2 + $0xa8] sm:$0xff]  ;;  %v369_v6 = vld [vmem:[#allocation5 + $0x1b8] sm:$0xff] }
  0x2c   :  { %3116 = vmatpush.msra.mxu3 %v318_v11  ;;  %441 = vmatpush.msra.mxu0 %v318_v11  ;;  %v389_v7 = vld [vmem:[#allocation5 + $0x258] sm:$0xff]  ;;  %v348_v8 = vld [vmem:[#allocation5 + $0x110] sm:$0xff] }
  0x2d   :  { %3117 = vmatpush.msra.mxu1 %v317_v12  ;;  %3118 = vmatpush.msra.mxu2 %v317_v12  ;;  %v332_v9 = vld [vmem:[#allocation5 + $0x90] sm:$0xff] }
  0x2e   :  { %3119 = vmatpush.msra.mxu3 %v317_v12  ;;  %442 = vmatpush.msra.mxu0 %v317_v12  ;;  %v368_v10 = vld [vmem:[#allocation5 + $0x1b0] sm:$0xff]  ;;  %v174_v12 = vld [vmem:[#allocation2 + $0x2a0] sm:$0xff] }
  0x2f   :  { %3120 = vmatpush.msra.mxu1 %v316_v13  ;;  %3121 = vmatpush.msra.mxu2 %v316_v13  ;;  %v388_v11 = vld [vmem:[#allocation5 + $0x250] sm:$0xff] }
  0x30   :  { %3122 = vmatpush.msra.mxu3 %v316_v13  ;;  %443 = vmatpush.msra.mxu0 %v316_v13  ;;  %v230_v13 = vld [vmem:[#allocation2 + $0x460] sm:$0xff] }
  0x31   :  { %3123 = vmatpush.msra.mxu1 %v315_v14  ;;  %3124 = vmatpush.msra.mxu2 %v315_v14 }
  0x32   :  { %3125 = vmatpush.msra.mxu3 %v315_v14  ;;  %444 = vmatpush.msra.mxu0 %v315_v14  ;;  %v367_v14 = vld [vmem:[#allocation5 + $0x1a8] sm:$0xff] }
  0x33   :  { %3126 = vmatpush.msra.mxu1 %v314_v15  ;;  %3127 = vmatpush.msra.mxu2 %v314_v15 }
  0x34   :  { %470 = vmatmul.f32.vlgmr.msra.gmra.mxu1 %v146_v16  ;;  %494 = vmatmul.f32.vlgmr.msra.gmra.mxu2 %v202_v17  ;;  %v286_v16 = vld [vmem:[#allocation2 + $0x620] sm:$0xff]  ;;  %v347_v17 = vld [vmem:[#allocation5 + $0x108] sm:$0xff] }
  0x35   :  { %656 = vmatpush.msrb.mxu2 %v361_v18  ;;  %3128 = vmatpush.msra.mxu3 %v314_v15  ;;  %v366_v18 = vld [vmem:[#allocation5 + $0x1a0] sm:$0xff] }
  0x36   :  { %518 = vmatmul.f32.vlgmr.msra.gmra.mxu3 %v258_v19  ;;  %543 = vmatpush.msrb.mxu1 %v345_v20  ;;  %v386_v19 = vld [vmem:[#allocation5 + $0x240] sm:$0xff] }
  0x37   :  { %657 = vmatpush.msrb.mxu2 %v360_v21  ;;  %445 = vmatpush.msra.mxu0 %v314_v15  ;;  %v387_v15 = vld [vmem:[#allocation5 + $0x248] sm:$0xff]  ;;  %v118_v20 = vld [vmem:[#allocation2 + $0xe0] sm:$0xff] }
  0x38   :  { %544 = vmatpush.msrb.mxu1 %v344_v22  ;;  %446 = vmatmul.f32.vlgmr.msra.gmra.mxu0 %v90_v23  ;;  %v331_v21 = vld [vmem:[#allocation5 + $0x88] sm:$0xff]  ;;  %v365_v22 = vld [vmem:[#allocation5 + $0x198] sm:$0xff] }
  0x39   :  { %658 = vmatpush.msrb.mxu2 %v359_v24  ;;  %769 = vmatpush.msrb.mxu3 %v377_v25  ;;  %v385_v23 = vld [vmem:[#allocation5 + $0x238] sm:$0xff]  ;;  %v346_v24 = vld [vmem:[#allocation5 + $0x100] sm:$0xff] }
  0x3a   :  { %545 = vmatpush.msrb.mxu1 %v343_v26  ;;  %882 = vmatpush.msrb.mxu0 %v393_v41  ;;  %v330_v25 = vld [vmem:[#allocation5 + $0x80] sm:$0xff]  ;;  %v364_v26 = vld [vmem:[#allocation5 + $0x190] sm:$0xff] }
  0x3b   :  { %659 = vmatpush.msrb.mxu2 %v358_v27  ;;  %770 = vmatpush.msrb.mxu3 %v376_v28  ;;  %v384_v27 = vld [vmem:[#allocation5 + $0x230] sm:$0xff]  ;;  %v181_v28 = vld [vmem:[#allocation2 + $0x2d8] sm:$0xff] }
  0x3c   :  { %473 = vmatmul.f32.gmra.mxu1 %v153_v29  ;;  %497 = vmatmul.f32.gmra.mxu2 %v209_v30  ;;  %v237_v29 = vld [vmem:[#allocation2 + $0x498] sm:$0xff]  ;;  %v363_v30 = vld [vmem:[#allocation5 + $0x188] sm:$0xff]  ;;  %v244_v41 = vld [vmem:[#allocation2 + $0x4d0] sm:$0xff] }
  0x3d   :  { %546 = vmatpush.msrb.mxu1 %v342_v31  ;;  %660 = vmatpush.msrb.mxu2 %v357_v32  ;;  %v383_v31 = vld [vmem:[#allocation5 + $0x228] sm:$0xff]  ;;  %v293_v32 = vld [vmem:[#allocation2 + $0x658] sm:$0xff] }
  0x3e   :  { %521 = vmatmul.f32.gmra.mxu3 %v265_v33  ;;  %883 = vmatpush.msrb.mxu0 %v392_v49  ;;  %v425_v33 = vld [vmem:[#allocation5 + $0x378] sm:$0xff]  ;;  %v251_v49 = vld [vmem:[#allocation2 + $0x508] sm:$0xff] }
  0x3f   :  { %547 = vmatpush.msrb.mxu1 %v341_v34  ;;  %661 = vmatpush.msrb.mxu2 %v356_v35  ;;  %v362_v34 = vld [vmem:[#allocation5 + $0x180] sm:$0xff] }
  0x40   :  { %449 = vmatmul.f32.gmra.mxu0 %v97_v36  ;;  %771 = vmatpush.msrb.mxu3 %v375_v37  ;;  %v382_v35 = vld [vmem:[#allocation5 + $0x220] sm:$0xff]  ;;  %v125_v36 = vld [vmem:[#allocation2 + $0x118] sm:$0xff] }
  0x41   :  { %548 = vmatpush.msrb.mxu1 %v340_v38  ;;  %662 = vmatpush.msrb.mxu2 %v355_v39  ;;  %v409_v37 = vld [vmem:[#allocation5 + $0x2f8] sm:$0xff]  ;;  %v380_v39 = vld [vmem:[#allocation5 + $0x210] sm:$0xff] }
  0x42   :  { %772 = vmatpush.msrb.mxu3 %v374_v40  ;;  %884 = vmatpush.msrb.mxu0 %v391_v57  ;;  %v381_v38 = vld [vmem:[#allocation5 + $0x218] sm:$0xff]  ;;  %v188_v40 = vld [vmem:[#allocation2 + $0x310] sm:$0xff]  ;;  %v407_v57 = vld [vmem:[#allocation5 + $0x2e8] sm:$0xff] }
  0x43   :  { %549 = vmatpush.msrb.mxu1 %v339_v42  ;;  %663 = vmatpush.msrb.mxu2 %v354_v43  ;;  %v379_v42 = vld [vmem:[#allocation5 + $0x208] sm:$0xff]  ;;  %v300_v43 = vld [vmem:[#allocation2 + $0x690] sm:$0xff] }
  0x44   :  { %476 = vmatmul.f32.gmra.mxu1 %v160_v44  ;;  %500 = vmatmul.f32.gmra.mxu2 %v216_v45  ;;  %v378_v44 = vld [vmem:[#allocation5 + $0x200] sm:$0xff]  ;;  %v424_v45 = vld [vmem:[#allocation5 + $0x370] sm:$0xff] }
  0x45   :  { %550 = vmatpush.msrb.mxu1 %v338_v46  ;;  %664 = vmatpush.msrb.mxu2 %v353_v47  ;;  %v132_v46 = vld [vmem:[#allocation2 + $0x150] sm:$0xff] }
  0x46   :  { %524 = vmatmul.f32.gmra.mxu3 %v272_v48  ;;  %885 = vmatpush.msrb.mxu0 %v390_v3  ;;  %v408_v47 = vld [vmem:[#allocation5 + $0x2f0] sm:$0xff]  ;;  %v195_v48 = vld [vmem:[#allocation2 + $0x348] sm:$0xff]  ;;  %v406_v3 = vld [vmem:[#allocation5 + $0x2e0] sm:$0xff] }
  0x47   :  { %551 = vmatpush.msrb.mxu1 %v337_v50  ;;  %665 = vmatpush.msrb.mxu2 %v352_v51  ;;  %v307_v50 = vld [vmem:[#allocation2 + $0x6c8] sm:$0xff] }
  0x48   :  { %452 = vmatmul.f32.gmra.mxu0 %v104_v52  ;;  %773 = vmatpush.msrb.mxu3 %v373_v53  ;;  %v139_v51 = vld [vmem:[#allocation2 + $0x188] sm:$0xff]  ;;  %v92_v53 = vld [vmem:[#allocation2 + $0x10] sm:$0xff] }
  0x49   :  { %552 = vmatpush.msrb.mxu1 %v336_v54  ;;  %666 = vmatpush.msrb.mxu2 %v351_v55  ;;  %v91_v52 = vld [vmem:[#allocation2 + $0x8] sm:$0xff]  ;;  %v93_v54 = vld [vmem:[#allocation2 + $0x18] sm:$0xff] }
  0x4a   :  { %774 = vmatpush.msrb.mxu3 %v372_v56  ;;  %886 = vmatpush.msrb.mxu0 %v389_v7  ;;  %v423_v55 = vld [vmem:[#allocation5 + $0x368] sm:$0xff]  ;;  %v94_v56 = vld [vmem:[#allocation2 + $0x20] sm:$0xff] }
  0x4b   :  { %553 = vmatpush.msrb.mxu1 %v335_v58  ;;  %667 = vmatpush.msrb.mxu2 %v350_v59  ;;  %v98_v58 = vld [vmem:[#allocation2 + $0x40] sm:$0xff]  ;;  %v99_v59 = vld [vmem:[#allocation2 + $0x48] sm:$0xff] }
  0x4c   :  { %479 = vmatmul.f32.gmra.mxu1 %v167_v60  ;;  %503 = vmatmul.f32.gmra.mxu2 %v223_v61  ;;  %v100_v60 = vld [vmem:[#allocation2 + $0x50] sm:$0xff]  ;;  %v101_v61 = vld [vmem:[#allocation2 + $0x58] sm:$0xff]  ;;  %v115_v7 = vld [vmem:[#allocation2 + $0xc8] sm:$0xff] }
  0x4d   :  { %775 = vmatpush.msrb.mxu3 %v371_v62  ;;  %554 = vmatpush.msrb.mxu1 %v334_v63  ;;  %v105_v62 = vld [vmem:[#allocation2 + $0x78] sm:$0xff]  ;;  %v106_v63 = vld [vmem:[#allocation2 + $0x80] sm:$0xff] }
  0x4e   :  { %527 = vmatmul.f32.gmra.mxu3 %v279_v0  ;;  %668 = vmatpush.msrb.mxu2 %v349_v1  ;;  %v107_v0 = vld [vmem:[#allocation2 + $0x88] sm:$0xff]  ;;  %v422_v1 = vld [vmem:[#allocation5 + $0x360] sm:$0xff] }
  0x4f   :  { %776 = vmatpush.msrb.mxu3 %v370_v2  ;;  %555 = vmatpush.msrb.mxu1 %v333_v5  ;;  %v108_v2 = vld [vmem:[#allocation2 + $0x90] sm:$0xff]  ;;  %v113_v5 = vld [vmem:[#allocation2 + $0xb8] sm:$0xff] }
  0x50   :  { %455 = vmatmul.f32.gmra.mxu0 %v111_v4  ;;  %669 = vmatpush.msrb.mxu2 %v348_v8  ;;  %v112_v4 = vld [vmem:[#allocation2 + $0xb0] sm:$0xff]  ;;  %v119_v8 = vld [vmem:[#allocation2 + $0xe8] sm:$0xff] }
  0x51   :  { %777 = vmatpush.msrb.mxu3 %v369_v6  ;;  %556 = vmatpush.msrb.mxu1 %v332_v9  ;;  %v114_v6 = vld [vmem:[#allocation2 + $0xc0] sm:$0xff]  ;;  %v120_v9 = vld [vmem:[#allocation2 + $0xf0] sm:$0xff] }
  0x52   :  { %887 = vmatpush.msrb.mxu0 %v388_v11  ;;  %670 = vmatpush.msrb.mxu2 %v347_v17  ;;  %v421_v11 = vld [vmem:[#allocation5 + $0x358] sm:$0xff] }
  0x53   :  { %778 = vmatpush.msrb.mxu3 %v368_v10  ;;  %557 = vmatpush.msrb.mxu1 %v331_v21  ;;  %v121_v10 = vld [vmem:[#allocation2 + $0xf8] sm:$0xff]  ;;  %v420_v21 = vld [vmem:[#allocation5 + $0x350] sm:$0xff] }
  0x54   :  { %482 = vmatmul.f32.gmra.mxu1 %v174_v12  ;;  %506 = vmatmul.f32.gmra.mxu2 %v230_v13  ;;  %v122_v12 = vld [vmem:[#allocation2 + $0x100] sm:$0xff]  ;;  %v405_v13 = vld [vmem:[#allocation5 + $0x2d8] sm:$0xff] }
  0x55   :  { %779 = vmatpush.msrb.mxu3 %v367_v14  ;;  %888 = vmatpush.msrb.mxu0 %v387_v15  ;;  %v126_v14 = vld [vmem:[#allocation2 + $0x120] sm:$0xff]  ;;  %v127_v15 = vld [vmem:[#allocation2 + $0x128] sm:$0xff]  ;;  %v129_v17 = vld [vmem:[#allocation2 + $0x138] sm:$0xff] }
  0x56   :  { %530 = vmatmul.f32.gmra.mxu3 %v286_v16  ;;  %671 = vmatpush.msrb.mxu2 %v346_v24  ;;  %v128_v16 = vld [vmem:[#allocation2 + $0x130] sm:$0xff] }
  0x57   :  { %780 = vmatpush.msrb.mxu3 %v366_v18  ;;  %889 = vmatpush.msrb.mxu0 %v386_v19  ;;  %v133_v18 = vld [vmem:[#allocation2 + $0x158] sm:$0xff]  ;;  %v134_v19 = vld [vmem:[#allocation2 + $0x160] sm:$0xff]  ;;  %v140_v24 = vld [vmem:[#allocation2 + $0x190] sm:$0xff] }
  0x58   :  { %458 = vmatmul.f32.gmra.mxu0 %v118_v20  ;;  %558 = vmatpush.msrb.mxu1 %v330_v25  ;;  %v135_v20 = vld [vmem:[#allocation2 + $0x168] sm:$0xff]  ;;  %v141_v25 = vld [vmem:[#allocation2 + $0x198] sm:$0xff] }
  0x59   :  { %781 = vmatpush.msrb.mxu3 %v365_v22  ;;  %890 = vmatpush.msrb.mxu0 %v385_v23  ;;  %v136_v22 = vld [vmem:[#allocation2 + $0x170] sm:$0xff] }
  0x5a   :  { %1108 = vmatpush.msra.mxu2 %v425_v33  ;;  %995 = vmatpush.msra.mxu1 %v409_v37  ;;  %v404_v23 = vld [vmem:[#allocation5 + $0x2d0] sm:$0xff] }
  0x5b   :  { %782 = vmatpush.msrb.mxu3 %v364_v26  ;;  %891 = vmatpush.msrb.mxu0 %v384_v27  ;;  %v142_v26 = vld [vmem:[#allocation2 + $0x1a0] sm:$0xff]  ;;  %v143_v27 = vld [vmem:[#allocation2 + $0x1a8] sm:$0xff] }
  0x5c   :  { %485 = vmatmul.f32.gmra.mxu1 %v181_v28  ;;  %509 = vmatmul.f32.gmra.mxu2 %v237_v29  ;;  %v147_v29 = vld [vmem:[#allocation2 + $0x1c8] sm:$0xff] }
  0x5d   :  { %783 = vmatpush.msrb.mxu3 %v363_v30  ;;  %892 = vmatpush.msrb.mxu0 %v383_v31  ;;  %v148_v30 = vld [vmem:[#allocation2 + $0x1d0] sm:$0xff]  ;;  %v149_v31 = vld [vmem:[#allocation2 + $0x1d8] sm:$0xff] }
  0x5e   :  { %533 = vmatmul.f32.gmra.mxu3 %v293_v32  ;;  %1109 = vmatpush.msra.mxu2 %v424_v45  ;;  %v419_v32 = vld [vmem:[#allocation5 + $0x348] sm:$0xff] }
  0x5f   :  { %784 = vmatpush.msrb.mxu3 %v362_v34  ;;  %893 = vmatpush.msrb.mxu0 %v382_v35  ;;  %v150_v34 = vld [vmem:[#allocation2 + $0x1e0] sm:$0xff] }
  0x60   :  { %461 = vmatmul.f32.gmra.mxu0 %v125_v36  ;;  %996 = vmatpush.msra.mxu1 %v408_v47  ;;  %v3476_v35 = vld [vmem:[%s4654_s2] ss:$0 sm:$0xff] }
  0x61   :  { %894 = vmatpush.msrb.mxu0 %v381_v38  ;;  %1110 = vmatpush.msra.mxu2 %v423_v55  ;;  %v403_v38 = vld [vmem:[#allocation5 + $0x2c8] sm:$0xff]  ;;  %v418_v55 = vld [vmem:[#allocation5 + $0x340] sm:$0xff] }
  0x62   :  { %997 = vmatpush.msra.mxu1 %v407_v57  ;;  %v164_v57 = vld [vmem:[#allocation2 + $0x250] sm:$0xff] }
  0x63   :  { %895 = vmatpush.msrb.mxu0 %v380_v39  ;;  %1111 = vmatpush.msra.mxu2 %v422_v1 }
  0x64   :  { %488 = vmatmul.f32.gmra.mxu1 %v188_v40  ;;  %512 = vmatmul.f32.gmra.mxu2 %v244_v41  ;;  %v154_v41 = vld [vmem:[#allocation2 + $0x200] sm:$0xff] }
  0x65   :  { %896 = vmatpush.msrb.mxu0 %v379_v42  ;;  %998 = vmatpush.msra.mxu1 %v406_v3  ;;  %v155_v42 = vld [vmem:[#allocation2 + $0x208] sm:$0xff] }
  0x66   :  { %536 = vmatmul.f32.gmra.mxu3 %v300_v43  ;;  %1112 = vmatpush.msra.mxu2 %v421_v11 }
  0x67   :  { %897 = vmatpush.msrb.mxu0 %v378_v44  ;;  %999 = vmatpush.msra.mxu1 %v405_v13  ;;  %v156_v44 = vld [vmem:[#allocation2 + $0x210] sm:$0xff]  ;;  %v417_v13 = vld [vmem:[#allocation5 + $0x338] sm:$0xff] }
  0x68   :  { %464 = vmatmul.f32.gmra.mxu0 %v132_v46  ;;  %1113 = vmatpush.msra.mxu2 %v420_v21  ;;  %v157_v46 = vld [vmem:[#allocation2 + $0x218] sm:$0xff]  ;;  %v182_v21 = vld [vmem:[#allocation2 + $0x2e0] sm:$0xff] }
  0x69   :  { %1000 = vmatpush.msra.mxu1 %v404_v23 }
  0x6a   :  { %1114 = vmatpush.msra.mxu2 %v419_v32  ;;  %v189_v32 = vld [vmem:[#allocation2 + $0x318] sm:$0xff] }
  0x6b   :  { %1001 = vmatpush.msra.mxu1 %v403_v38  ;;  %v191_v38 = vld [vmem:[#allocation2 + $0x328] sm:$0xff] }
  0x6c   :  { %491 = vmatmul.f32.gmra.mxu1 %v195_v48  ;;  %515 = vmatmul.f32.gmra.mxu2 %v251_v49 }
  0x6d   :  { %1115 = vmatpush.msra.mxu2 %v418_v55 }
  0x6e   :  { %539 = vmatmul.f32.gmra.mxu3 %v307_v50 }
  0x6f   :  { %1116 = vmatpush.msra.mxu2 %v417_v13  ;;  %v415_v13 = vld [vmem:[#allocation5 + $0x328] sm:$0xff] }
  0x70   :  { %467 = vmatmul.f32.gmra.mxu0 %v139_v51  ;;  %v161_v51 = vld [vmem:[#allocation2 + $0x238] sm:$0xff] }
  0x74   :  { %559 = vmatmul.f32.vlgmr.msrb.gmra.mxu1 %v91_v52  ;;  %672 = vmatmul.f32.vlgmr.msrb.gmra.mxu2 %v92_v53  ;;  %v162_v52 = vld [vmem:[#allocation2 + $0x240] sm:$0xff] }
  0x76   :  { %785 = vmatmul.f32.vlgmr.msrb.gmra.mxu3 %v93_v54  ;;  %v163_v54 = vld [vmem:[#allocation2 + $0x248] sm:$0xff] }
  0x78   :  { %898 = vmatmul.f32.vlgmr.msrb.gmra.mxu0 %v94_v56 }
  0x7c   :  { %562 = vmatmul.f32.gmra.mxu1 %v98_v58  ;;  %675 = vmatmul.f32.gmra.mxu2 %v99_v59 }
  0x7e   :  { %788 = vmatmul.f32.gmra.mxu3 %v100_v60  ;;  %v402_v60 = vld [vmem:[#allocation5 + $0x2c0] sm:$0xff] }
  0x7f   :  { %1002 = vmatpush.msra.mxu1 %v402_v60  ;;  %v199_v60 = vld [vmem:[#allocation2 + $0x368] sm:$0xff] }
  0x80   :  { %901 = vmatmul.f32.gmra.mxu0 %v101_v61 }
  0x84   :  { %565 = vmatmul.f32.gmra.mxu1 %v105_v62  ;;  %678 = vmatmul.f32.gmra.mxu2 %v106_v63  ;;  %v168_v63 = vld [vmem:[#allocation2 + $0x270] sm:$0xff] }
  0x86   :  { %791 = vmatmul.f32.gmra.mxu3 %v107_v0  ;;  %v169_v0 = vld [vmem:[#allocation2 + $0x278] sm:$0xff] }
  0x88   :  { %904 = vmatmul.f32.gmra.mxu0 %v108_v2  ;;  %v170_v2 = vld [vmem:[#allocation2 + $0x280] sm:$0xff] }
  0x8c   :  { %568 = vmatmul.f32.gmra.mxu1 %v112_v4  ;;  %681 = vmatmul.f32.gmra.mxu2 %v113_v5  ;;  %v171_v4 = vld [vmem:[#allocation2 + $0x288] sm:$0xff] }
  0x8e   :  { %794 = vmatmul.f32.gmra.mxu3 %v114_v6 }
  0x90   :  { %907 = vmatmul.f32.gmra.mxu0 %v115_v7 }
  0x94   :  { %571 = vmatmul.f32.gmra.mxu1 %v119_v8  ;;  %684 = vmatmul.f32.gmra.mxu2 %v120_v9  ;;  %v175_v9 = vld [vmem:[#allocation2 + $0x2a8] sm:$0xff] }
  0x96   :  { %797 = vmatmul.f32.gmra.mxu3 %v121_v10  ;;  %v176_v10 = vld [vmem:[#allocation2 + $0x2b0] sm:$0xff] }
  0x98   :  { %910 = vmatmul.f32.gmra.mxu0 %v122_v12  ;;  %v177_v12 = vld [vmem:[#allocation2 + $0x2b8] sm:$0xff] }
  0x9c   :  { %574 = vmatmul.f32.gmra.mxu1 %v126_v14  ;;  %687 = vmatmul.f32.gmra.mxu2 %v127_v15  ;;  %v178_v15 = vld [vmem:[#allocation2 + $0x2c0] sm:$0xff] }
  0x9e   :  { %800 = vmatmul.f32.gmra.mxu3 %v128_v16 }
  0xa0   :  { %913 = vmatmul.f32.gmra.mxu0 %v129_v17 }
  0xa4   :  { %577 = vmatmul.f32.gmra.mxu1 %v133_v18  ;;  %690 = vmatmul.f32.gmra.mxu2 %v134_v19  ;;  %v401_v18 = vld [vmem:[#allocation5 + $0x2b8] sm:$0xff] }
  0xa5   :  { %1003 = vmatpush.msra.mxu1 %v401_v18 }
  0xa6   :  { %803 = vmatmul.f32.gmra.mxu3 %v135_v20 }
  0xa8   :  { %916 = vmatmul.f32.gmra.mxu0 %v136_v22  ;;  %v183_v22 = vld [vmem:[#allocation2 + $0x2e8] sm:$0xff] }
  0xac   :  { %580 = vmatmul.f32.gmra.mxu1 %v140_v24  ;;  %693 = vmatmul.f32.gmra.mxu2 %v141_v25  ;;  %v184_v24 = vld [vmem:[#allocation2 + $0x2f0] sm:$0xff] }
  0xae   :  { %806 = vmatmul.f32.gmra.mxu3 %v142_v26  ;;  %v185_v26 = vld [vmem:[#allocation2 + $0x2f8] sm:$0xff] }
  0xb0   :  { %919 = vmatmul.f32.gmra.mxu0 %v143_v27 }
  0xb1   :  { %v3469_v28 = vpop.f32.mrf.mxu1 }
  0xb4   :  { %583 = vmatmul.f32.gmra.mxu1 %v147_v29  ;;  %696 = vmatmul.f32.gmra.mxu2 %v148_v30 }
  0xb5   :  { %v3471_v33 = vpop.f32.mrf.mxu0 }
  0xb6   :  { %809 = vmatmul.f32.gmra.mxu3 %v149_v31 }
  0xb7   :  { %v495_v36 = vpop.f32.mrf.mxu2 }
  0xb8   :  { %v3479_v37 = vadd.f32 %v3476_v35, %v495_v36  ;;  %922 = vmatmul.f32.gmra.mxu0 %v150_v34  ;;  %v190_v34 = vld [vmem:[#allocation2 + $0x320] sm:$0xff] }
  0xb9   :  { %v3481_v39 = vpop.f32.mrf.mxu1  ;;  %v519_v40 = vpop.f32.mrf.mxu3 }
  0xba   :  { %v3484_v43 = vadd.f32 %v3476_v35, %v519_v40  ;;  %v416_v40 = vld [vmem:[#allocation5 + $0x330] sm:$0xff] }
  0xbb   :  { %1117 = vmatpush.msra.mxu2 %v416_v40 }
  0xbc   :  { %586 = vmatmul.f32.gmra.mxu1 %v154_v41  ;;  %699 = vmatmul.f32.gmra.mxu2 %v155_v42  ;;  %v192_v42 = vld [vmem:[#allocation2 + $0x330] sm:$0xff] }
  0xbd   :  { %v3486_v45 = vpop.f32.mrf.mxu0  ;;  %1118 = vmatpush.msra.mxu2 %v415_v13  ;;  %v398_v13 = vld [vmem:[#allocation5 + $0x2a0] sm:$0xff] }
  0xbe   :  { %812 = vmatmul.f32.gmra.mxu3 %v156_v44  ;;  %v451_v18 = vadd.f32 %v3476_v35, %v3486_v45 }
  0xbf   :  { %v498_v47 = vpop.f32.mrf.mxu2 }
  0xc0   :  { %v3489_v48 = vadd.f32 %v3476_v35, %v498_v47  ;;  %925 = vmatmul.f32.gmra.mxu0 %v157_v46  ;;  %v400_v47 = vld [vmem:[#allocation5 + $0x2b0] sm:$0xff] }
  0xc1   :  { %v3491_v49 = vpop.f32.mrf.mxu1  ;;  %v522_v50 = vpop.f32.mrf.mxu3  ;;  %1004 = vmatpush.msra.mxu1 %v400_v47 }
  0xc2   :  { %v3494_v53 = vadd.f32 %v3476_v35, %v522_v50 }
  0xc4   :  { %589 = vmatmul.f32.gmra.mxu1 %v161_v51  ;;  %702 = vmatmul.f32.gmra.mxu2 %v162_v52  ;;  %v196_v52 = vld [vmem:[#allocation2 + $0x350] sm:$0xff] }
  0xc5   :  { %v3496_v56 = vpop.f32.mrf.mxu0 }
  0xc6   :  { %815 = vmatmul.f32.gmra.mxu3 %v163_v54  ;;  %v197_v54 = vld [vmem:[#allocation2 + $0x358] sm:$0xff]  ;;  %v454_v45 = vadd.f32 %v3476_v35, %v3496_v56 }
  0xc7   :  { %v501_v58 = vpop.f32.mrf.mxu2 }
  0xc8   :  { %v3499_v59 = vadd.f32 %v3476_v35, %v501_v58  ;;  %928 = vmatmul.f32.gmra.mxu0 %v164_v57  ;;  %v198_v57 = vld [vmem:[#allocation2 + $0x360] sm:$0xff] }
  0xc9   :  { %v3501_v61 = vpop.f32.mrf.mxu1  ;;  %v525_v62 = vpop.f32.mrf.mxu3 }
  0xca   :  { %v3504_v1 = vadd.f32 %v3476_v35, %v525_v62 }
  0xcc   :  { %592 = vmatmul.f32.gmra.mxu1 %v168_v63  ;;  %705 = vmatmul.f32.gmra.mxu2 %v169_v0  ;;  %v448_v63 = vadd.f32 %v3476_v35, %v3471_v33 }
  0xcd   :  { %v3506_v3 = vpop.f32.mrf.mxu0 }
  0xce   :  { %818 = vmatmul.f32.gmra.mxu3 %v170_v2  ;;  %v457_v56 = vadd.f32 %v3476_v35, %v3506_v3 }
  0xcf   :  { %v504_v5 = vpop.f32.mrf.mxu2 }
  0xd0   :  { %v3509_v6 = vadd.f32 %v3476_v35, %v504_v5  ;;  %931 = vmatmul.f32.gmra.mxu0 %v171_v4  ;;  %v203_v5 = vld [vmem:[#allocation2 + $0x388] sm:$0xff] }
  0xd1   :  { %v3511_v7 = vpop.f32.mrf.mxu1  ;;  %v528_v8 = vpop.f32.mrf.mxu3 }
  0xd2   :  { %v3514_v11 = vadd.f32 %v3476_v35, %v528_v8  ;;  %v204_v8 = vld [vmem:[#allocation2 + $0x390] sm:$0xff] }
  0xd4   :  { %595 = vmatmul.f32.gmra.mxu1 %v175_v9  ;;  %708 = vmatmul.f32.gmra.mxu2 %v176_v10  ;;  %v205_v10 = vld [vmem:[#allocation2 + $0x398] sm:$0xff] }
  0xd5   :  { %v3516_v14 = vpop.f32.mrf.mxu0 }
  0xd6   :  { %821 = vmatmul.f32.gmra.mxu3 %v177_v12  ;;  %v460_v3 = vadd.f32 %v3476_v35, %v3516_v14 }
  0xd7   :  { %v507_v16 = vpop.f32.mrf.mxu2 }
  0xd8   :  { %v3519_v17 = vadd.f32 %v3476_v35, %v507_v16  ;;  %934 = vmatmul.f32.gmra.mxu0 %v178_v15  ;;  %v206_v16 = vld [vmem:[#allocation2 + $0x3a0] sm:$0xff] }
  0xd9   :  { %v3521_v19 = vpop.f32.mrf.mxu1  ;;  %v531_v20 = vpop.f32.mrf.mxu3 }
  0xda   :  { %v3524_v23 = vadd.f32 %v3476_v35, %v531_v20 }
  0xdc   :  { %598 = vmatmul.f32.gmra.mxu1 %v182_v21  ;;  %711 = vmatmul.f32.gmra.mxu2 %v183_v22  ;;  %v399_v21 = vld [vmem:[#allocation5 + $0x2a8] sm:$0xff] }
  0xdd   :  { %v3526_v25 = vpop.f32.mrf.mxu0  ;;  %1005 = vmatpush.msra.mxu1 %v399_v21  ;;  %v226_v21 = vld [vmem:[#allocation2 + $0x440] sm:$0xff] }
  0xde   :  { %824 = vmatmul.f32.gmra.mxu3 %v184_v24  ;;  %v463_v14 = vadd.f32 %v3476_v35, %v3526_v25 }
  0xdf   :  { %v510_v27 = vpop.f32.mrf.mxu2  ;;  %1006 = vmatpush.msra.mxu1 %v398_v13  ;;  %v240_v13 = vld [vmem:[#allocation2 + $0x4b0] sm:$0xff] }
  0xe0   :  { %v3529_v29 = vadd.f32 %v3476_v35, %v510_v27  ;;  %937 = vmatmul.f32.gmra.mxu0 %v185_v26  ;;  %v210_v26 = vld [vmem:[#allocation2 + $0x3c0] sm:$0xff]  ;;  %v211_v27 = vld [vmem:[#allocation2 + $0x3c8] sm:$0xff] }
  0xe1   :  { %v3531_v30 = vpop.f32.mrf.mxu1  ;;  %v534_v31 = vpop.f32.mrf.mxu3 }
  0xe2   :  { %v3534_v36 = vadd.f32 %v3476_v35, %v534_v31 }
  0xe4   :  { %601 = vmatmul.f32.gmra.mxu1 %v189_v32  ;;  %714 = vmatmul.f32.gmra.mxu2 %v190_v34  ;;  %v212_v32 = vld [vmem:[#allocation2 + $0x3d0] sm:$0xff] }
  0xe5   :  { %v3536_v41 = vpop.f32.mrf.mxu0 }
  0xe6   :  { %827 = vmatmul.f32.gmra.mxu3 %v191_v38  ;;  %v466_v25 = vadd.f32 %v3476_v35, %v3536_v41 }
  0xe7   :  { %v513_v44 = vpop.f32.mrf.mxu2 }
  0xe8   :  { %v3539_v46 = vadd.f32 %v3476_v35, %v513_v44  ;;  %940 = vmatmul.f32.gmra.mxu0 %v192_v42  ;;  %v213_v42 = vld [vmem:[#allocation2 + $0x3d8] sm:$0xff] }
  0xe9   :  { %v3541_v50 = vpop.f32.mrf.mxu1  ;;  %v537_v51 = vpop.f32.mrf.mxu3 }
  0xea   :  { %v3544_v55 = vadd.f32 %v3476_v35, %v537_v51 }
  0xec   :  { %604 = vmatmul.f32.gmra.mxu1 %v196_v52  ;;  %717 = vmatmul.f32.gmra.mxu2 %v197_v54  ;;  %v217_v54 = vld [vmem:[#allocation2 + $0x3f8] sm:$0xff] }
  0xed   :  { %v3546_v58 = vpop.f32.mrf.mxu0 }
  0xee   :  { %830 = vmatmul.f32.gmra.mxu3 %v198_v57  ;;  %v218_v57 = vld [vmem:[#allocation2 + $0x400] sm:$0xff]  ;;  %v469_v41 = vadd.f32 %v3476_v35, %v3546_v58 }
  0xef   :  { %v516_v62 = vpop.f32.mrf.mxu2 }
  0xf0   :  { %v3551_v0 = vadd.f32 %v3476_v35, %v516_v62  ;;  %943 = vmatmul.f32.gmra.mxu0 %v199_v60  ;;  %v219_v62 = vld [vmem:[#allocation2 + $0x408] sm:$0xff] }
  0xf1   :  { %v540_v2 = vpop.f32.mrf.mxu3  ;;  %v560_v4 = vpop.f32.mrf.mxu1 }
  0xf2   :  { %v3554_v9 = vadd.f32 %v3476_v35, %v540_v2  ;;  %v561_v12 = vadd.f32 %v560_v4, %v448_v63  ;;  %v414_v4 = vld [vmem:[#allocation5 + $0x320] sm:$0xff] }
  0xf3   :  { %1119 = vmatpush.msra.mxu2 %v414_v4  ;;  %v397_v4 = vld [vmem:[#allocation5 + $0x298] sm:$0xff] }
  0xf4   :  { %607 = vmatmul.f32.gmra.mxu1 %v203_v5  ;;  %720 = vmatmul.f32.gmra.mxu2 %v204_v8  ;;  %v220_v8 = vld [vmem:[#allocation2 + $0x410] sm:$0xff] }
  0xf5   :  { %v899_v15 = vpop.f32.mrf.mxu0  ;;  %1007 = vmatpush.msra.mxu1 %v397_v4  ;;  %v254_v4 = vld [vmem:[#allocation2 + $0x520] sm:$0xff] }
  0xf6   :  { %833 = vmatmul.f32.gmra.mxu3 %v205_v10 }
  0xf7   :  { %v673_v33 = vpop.f32.mrf.mxu2 }
  0xf8   :  { %v674_v20 = vadd.f32 %v673_v33, %v561_v12  ;;  %946 = vmatmul.f32.gmra.mxu0 %v206_v16  ;;  %v224_v33 = vld [vmem:[#allocation2 + $0x430] sm:$0xff] }
  0xf9   :  { %v563_v22 = vpop.f32.mrf.mxu1  ;;  %v786_v24 = vpop.f32.mrf.mxu3 }
  0xfa   :  { %v787_v31 = vadd.f32 %v786_v24, %v674_v20  ;;  %v564_v34 = vadd.f32 %v563_v22, %v451_v18  ;;  %v225_v18 = vld [vmem:[#allocation2 + $0x438] sm:$0xff] }
  0xfc   :  { %v3558_v38 = vadd.f32 %v899_v15, %v787_v31  ;;  %610 = vmatmul.f32.gmra.mxu1 %v210_v26  ;;  %723 = vmatmul.f32.gmra.mxu2 %v211_v27  ;;  %v227_v27 = vld [vmem:[#allocation2 + $0x448] sm:$0xff] }
  0xfd   :  { %v902_v40 = vpop.f32.mrf.mxu0 }
  0xfe   :  { %836 = vmatmul.f32.gmra.mxu3 %v212_v32 }
  0xff   :  { %v676_v44 = vpop.f32.mrf.mxu2 }
 0x100   :  { %v677_v47 = vadd.f32 %v676_v44, %v564_v34  ;;  %949 = vmatmul.f32.gmra.mxu0 %v213_v42  ;;  %v231_v42 = vld [vmem:[#allocation2 + $0x468] sm:$0xff]  ;;  %v232_v44 = vld [vmem:[#allocation2 + $0x470] sm:$0xff] }
 0x101   :  { %v566_v51 = vpop.f32.mrf.mxu1  ;;  %v789_v52 = vpop.f32.mrf.mxu3 }
 0x102   :  { %v790_v60 = vadd.f32 %v789_v52, %v677_v47  ;;  %v567_v63 = vadd.f32 %v566_v51, %v454_v45  ;;  %v233_v47 = vld [vmem:[#allocation2 + $0x478] sm:$0xff] }
 0x104   :  { %v3562_v2 = vadd.f32 %v902_v40, %v790_v60  ;;  %613 = vmatmul.f32.gmra.mxu1 %v217_v54  ;;  %726 = vmatmul.f32.gmra.mxu2 %v218_v57  ;;  %v413_v54 = vld [vmem:[#allocation5 + $0x318] sm:$0xff]  ;;  %v234_v60 = vld [vmem:[#allocation2 + $0x480] sm:$0xff] }
 0x105   :  { %v905_v5 = vpop.f32.mrf.mxu0  ;;  %1120 = vmatpush.msra.mxu2 %v413_v54  ;;  %v396_v54 = vld [vmem:[#allocation5 + $0x290] sm:$0xff] }
 0x106   :  { %839 = vmatmul.f32.gmra.mxu3 %v219_v62  ;;  %1008 = vmatpush.msra.mxu1 %v396_v54 }
 0x107   :  { %v679_v10 = vpop.f32.mrf.mxu2 }
 0x108   :  { %v680_v12 = vadd.f32 %v679_v10, %v567_v63  ;;  %952 = vmatmul.f32.gmra.mxu0 %v220_v8  ;;  %v238_v10 = vld [vmem:[#allocation2 + $0x4a0] sm:$0xff] }
 0x109   :  { %v569_v15 = vpop.f32.mrf.mxu1  ;;  %v792_v16 = vpop.f32.mrf.mxu3 }
 0x10a   :  { %v793_v20 = vadd.f32 %v792_v16, %v680_v12  ;;  %v570_v22 = vadd.f32 %v569_v15, %v457_v56  ;;  %v239_v56 = vld [vmem:[#allocation2 + $0x4a8] sm:$0xff] }
 0x10c   :  { %v3566_v24 = vadd.f32 %v905_v5, %v793_v20  ;;  %616 = vmatmul.f32.gmra.mxu1 %v224_v33  ;;  %729 = vmatmul.f32.gmra.mxu2 %v225_v18  ;;  %v241_v18 = vld [vmem:[#allocation2 + $0x4b8] sm:$0xff] }
 0x10d   :  { %v908_v26 = vpop.f32.mrf.mxu0 }
 0x10e   :  { %842 = vmatmul.f32.gmra.mxu3 %v226_v21 }
 0x10f   :  { %v682_v31 = vpop.f32.mrf.mxu2 }
 0x110   :  { %v683_v32 = vadd.f32 %v682_v31, %v570_v22  ;;  %955 = vmatmul.f32.gmra.mxu0 %v227_v27  ;;  %v245_v27 = vld [vmem:[#allocation2 + $0x4d8] sm:$0xff]  ;;  %v246_v31 = vld [vmem:[#allocation2 + $0x4e0] sm:$0xff] }
 0x111   :  { %v572_v34 = vpop.f32.mrf.mxu1  ;;  %v795_v40 = vpop.f32.mrf.mxu3 }
 0x112   :  { %v796_v45 = vadd.f32 %v795_v40, %v683_v32  ;;  %v573_v51 = vadd.f32 %v572_v34, %v460_v3  ;;  %v247_v32 = vld [vmem:[#allocation2 + $0x4e8] sm:$0xff] }
 0x114   :  { %v3570_v52 = vadd.f32 %v908_v26, %v796_v45  ;;  %619 = vmatmul.f32.gmra.mxu1 %v231_v42  ;;  %732 = vmatmul.f32.gmra.mxu2 %v232_v44  ;;  %v412_v42 = vld [vmem:[#allocation5 + $0x310] sm:$0xff] }
 0x115   :  { %v911_v57 = vpop.f32.mrf.mxu0  ;;  %v248_v44 = vld [vmem:[#allocation2 + $0x4f0] sm:$0xff]  ;;  %1121 = vmatpush.msra.mxu2 %v412_v42 }
 0x116   :  { %845 = vmatmul.f32.gmra.mxu3 %v233_v47 }
 0x117   :  { %v685_v62 = vpop.f32.mrf.mxu2 }
 0x118   :  { %v686_v63 = vadd.f32 %v685_v62, %v573_v51  ;;  %958 = vmatmul.f32.gmra.mxu0 %v234_v60  ;;  %v252_v62 = vld [vmem:[#allocation2 + $0x510] sm:$0xff] }
 0x119   :  { %v575_v5 = vpop.f32.mrf.mxu1  ;;  %v798_v8 = vpop.f32.mrf.mxu3 }
 0x11a   :  { %v799_v12 = vadd.f32 %v798_v8, %v686_v63  ;;  %v576_v15 = vadd.f32 %v575_v5, %v463_v14  ;;  %v253_v14 = vld [vmem:[#allocation2 + $0x518] sm:$0xff] }
 0x11c   :  { %v3574_v16 = vadd.f32 %v911_v57, %v799_v12  ;;  %622 = vmatmul.f32.gmra.mxu1 %v238_v10  ;;  %735 = vmatmul.f32.gmra.mxu2 %v239_v56  ;;  %v255_v10 = vld [vmem:[#allocation2 + $0x528] sm:$0xff] }
 0x11d   :  { %v914_v33 = vpop.f32.mrf.mxu0 }
 0x11e   :  { %848 = vmatmul.f32.gmra.mxu3 %v240_v13 }
 0x11f   :  { %v688_v20 = vpop.f32.mrf.mxu2 }
 0x120   :  { %v689_v21 = vadd.f32 %v688_v20, %v576_v15  ;;  %961 = vmatmul.f32.gmra.mxu0 %v241_v18  ;;  %v260_v18 = vld [vmem:[#allocation2 + $0x550] sm:$0xff] }
 0x121   :  { %v578_v22 = vpop.f32.mrf.mxu1  ;;  %v801_v26 = vpop.f32.mrf.mxu3 }
 0x122   :  { %v802_v3 = vadd.f32 %v801_v26, %v689_v21  ;;  %v579_v34 = vadd.f32 %v578_v22, %v466_v25  ;;  %v261_v25 = vld [vmem:[#allocation2 + $0x558] sm:$0xff]  ;;  %v472_v21 = vadd.f32 %v3476_v35, %v3469_v28  ;;  %v411_v26 = vld [vmem:[#allocation5 + $0x308] sm:$0xff]  ;;  %v475_v28 = vadd.f32 %v3476_v35, %v3481_v39  ;;  %v276_v39 = vld [vmem:[#allocation2 + $0x5d0] sm:$0xff] }
 0x123   :  { %1122 = vmatpush.msra.mxu2 %v411_v26 }
 0x124   :  { %v3578_v40 = vadd.f32 %v914_v33, %v802_v3  ;;  %625 = vmatmul.f32.gmra.mxu1 %v245_v27  ;;  %738 = vmatmul.f32.gmra.mxu2 %v246_v31  ;;  %v259_v33 = vld [vmem:[#allocation2 + $0x548] sm:$0xff]  ;;  %v262_v27 = vld [vmem:[#allocation2 + $0x560] sm:$0xff] }
 0x125   :  { %v917_v45 = vpop.f32.mrf.mxu0 }
 0x126   :  { %851 = vmatmul.f32.gmra.mxu3 %v247_v32 }
 0x127   :  { %v691_v47 = vpop.f32.mrf.mxu2 }
 0x128   :  { %v692_v51 = vadd.f32 %v691_v47, %v579_v34  ;;  %964 = vmatmul.f32.gmra.mxu0 %v248_v44  ;;  %v395_v34 = vld [vmem:[#allocation5 + $0x288] sm:$0xff]  ;;  %v266_v44 = vld [vmem:[#allocation2 + $0x580] sm:$0xff]  ;;  %v268_v47 = vld [vmem:[#allocation2 + $0x590] sm:$0xff] }
 0x129   :  { %v581_v57 = vpop.f32.mrf.mxu1  ;;  %v804_v60 = vpop.f32.mrf.mxu3  ;;  %1009 = vmatpush.msra.mxu1 %v395_v34  ;;  %v289_v34 = vld [vmem:[#allocation2 + $0x638] sm:$0xff] }
 0x12a   :  { %v805_v63 = vadd.f32 %v804_v60, %v692_v51  ;;  %v582_v5 = vadd.f32 %v581_v57, %v469_v41  ;;  %v269_v41 = vld [vmem:[#allocation2 + $0x598] sm:$0xff] }
 0x12c   :  { %v3582_v8 = vadd.f32 %v917_v45, %v805_v63  ;;  %628 = vmatmul.f32.gmra.mxu1 %v252_v62  ;;  %741 = vmatmul.f32.gmra.mxu2 %v253_v14  ;;  %v267_v45 = vld [vmem:[#allocation2 + $0x588] sm:$0xff]  ;;  %v273_v62 = vld [vmem:[#allocation2 + $0x5b8] sm:$0xff]  ;;  %v274_v14 = vld [vmem:[#allocation2 + $0x5c0] sm:$0xff] }
 0x12d   :  { %v920_v58 = vpop.f32.mrf.mxu0  ;;  %v275_v63 = vld [vmem:[#allocation2 + $0x5c8] sm:$0xff] }
 0x12e   :  { %854 = vmatmul.f32.gmra.mxu3 %v254_v4  ;;  %v478_v4 = vadd.f32 %v3476_v35, %v3491_v49  ;;  %v481_v49 = vadd.f32 %v3476_v35, %v3501_v61 }
 0x12f   :  { %v694_v56 = vpop.f32.mrf.mxu2 }
 0x130   :  { %v695_v12 = vadd.f32 %v694_v56, %v582_v5  ;;  %967 = vmatmul.f32.gmra.mxu0 %v255_v10  ;;  %v410_v5 = vld [vmem:[#allocation5 + $0x300] sm:$0xff] }
 0x131   :  { %v584_v13 = vpop.f32.mrf.mxu1  ;;  %v807_v15 = vpop.f32.mrf.mxu3  ;;  %1123 = vmatpush.msra.mxu2 %v410_v5  ;;  %v301_v5 = vld [vmem:[#allocation2 + $0x698] sm:$0xff] }
 0x132   :  { %v808_v20 = vadd.f32 %v807_v15, %v695_v12  ;;  %v585_v31 = vadd.f32 %v584_v13, %v472_v21  ;;  %v280_v15 = vld [vmem:[#allocation2 + $0x5f0] sm:$0xff] }
 0x134   :  { %v3586_v22 = vadd.f32 %v920_v58, %v808_v20  ;;  %631 = vmatmul.f32.gmra.mxu1 %v259_v33  ;;  %744 = vmatmul.f32.gmra.mxu2 %v260_v18  ;;  %v394_v58 = vld [vmem:[#allocation5 + $0x280] sm:$0xff]  ;;  %v281_v33 = vld [vmem:[#allocation2 + $0x5f8] sm:$0xff]  ;;  %v283_v20 = vld [vmem:[#allocation2 + $0x608] sm:$0xff] }
 0x135   :  { %1010 = vmatpush.msra.mxu1 %v394_v58  ;;  %v282_v18 = vld [vmem:[#allocation2 + $0x600] sm:$0xff]  ;;  %v304_v58 = vld [vmem:[#allocation2 + $0x6b0] sm:$0xff] }
 0x136   :  { %857 = vmatmul.f32.gmra.mxu3 %v261_v25 }
 0x137   :  { %v697_v3 = vpop.f32.mrf.mxu2 }
 0x138   :  { %v3588_v32 = vadd.f32 %v697_v3, %v585_v31  ;;  %970 = vmatmul.f32.gmra.mxu0 %v262_v27  ;;  %v287_v31 = vld [vmem:[#allocation2 + $0x628] sm:$0xff]  ;;  %v288_v3 = vld [vmem:[#allocation2 + $0x630] sm:$0xff] }
 0x139   :  { %v587_v42 = vpop.f32.mrf.mxu1 }
 0x13a   :  { %v588_v51 = vadd.f32 %v587_v42, %v475_v28  ;;  %v484_v42 = vadd.f32 %v3476_v35, %v3511_v7 }
 0x13c   :  { %634 = vmatmul.f32.gmra.mxu1 %v266_v44  ;;  %747 = vmatmul.f32.gmra.mxu2 %v267_v45  ;;  %v290_v44 = vld [vmem:[#allocation2 + $0x640] sm:$0xff] }
 0x13e   :  { %860 = vmatmul.f32.gmra.mxu3 %v268_v47 }
 0x13f   :  { %v700_v54 = vpop.f32.mrf.mxu2 }
 0x140   :  { %v3592_v57 = vadd.f32 %v700_v54, %v588_v51  ;;  %973 = vmatmul.f32.gmra.mxu0 %v269_v41  ;;  %v294_v41 = vld [vmem:[#allocation2 + $0x660] sm:$0xff]  ;;  %v295_v51 = vld [vmem:[#allocation2 + $0x668] sm:$0xff]  ;;  %v296_v54 = vld [vmem:[#allocation2 + $0x670] sm:$0xff] }
 0x141   :  { %v590_v60 = vpop.f32.mrf.mxu1 }
 0x142   :  { %v591_v10 = vadd.f32 %v590_v60, %v478_v4  ;;  %v487_v60 = vadd.f32 %v3476_v35, %v3521_v19 }
 0x144   :  { %637 = vmatmul.f32.gmra.mxu1 %v273_v62  ;;  %750 = vmatmul.f32.gmra.mxu2 %v274_v14  ;;  %v297_v62 = vld [vmem:[#allocation2 + $0x678] sm:$0xff] }
 0x146   :  { %863 = vmatmul.f32.gmra.mxu3 %v275_v63 }
 0x147   :  { %v703_v56 = vpop.f32.mrf.mxu2 }
 0x148   :  { %v3596_v12 = vadd.f32 %v703_v56, %v591_v10  ;;  %976 = vmatmul.f32.gmra.mxu0 %v276_v39  ;;  %v302_v39 = vld [vmem:[#allocation2 + $0x6a0] sm:$0xff]  ;;  %v303_v10 = vld [vmem:[#allocation2 + $0x6a8] sm:$0xff]  ;;  %v490_v56 = vadd.f32 %v3476_v35, %v3531_v30 }
 0x149   :  { %v593_v13 = vpop.f32.mrf.mxu1 }
 0x14a   :  { %v594_v25 = vadd.f32 %v593_v13, %v481_v49  ;;  %v309_v49 = vld [vmem:[#allocation2 + $0x6d8] sm:$0xff] }
 0x14c   :  { %640 = vmatmul.f32.gmra.mxu1 %v280_v15  ;;  %753 = vmatmul.f32.gmra.mxu2 %v281_v33 }
 0x14e   :  { %866 = vmatmul.f32.gmra.mxu3 %v282_v18  ;;  %v308_v18 = vld [vmem:[#allocation2 + $0x6d0] sm:$0xff] }
 0x14f   :  { %v706_v21 = vpop.f32.mrf.mxu2 }
 0x150   :  { %v3600_v26 = vadd.f32 %v706_v21, %v594_v25  ;;  %979 = vmatmul.f32.gmra.mxu0 %v283_v20  ;;  %v310_v20 = vld [vmem:[#allocation2 + $0x6e0] sm:$0xff]  ;;  %v493_v25 = vadd.f32 %v3476_v35, %v3541_v50  ;;  %v311_v21 = vld [vmem:[#allocation2 + $0x6e8] sm:$0xff] }
 0x151   :  { %v596_v27 = vpop.f32.mrf.mxu1  ;;  %v102_v50 = vld [vmem:[#allocation2 + $0x60] sm:$0xff] }
 0x152   :  { %v597_v61 = vadd.f32 %v596_v27, %v484_v42  ;;  %v96_v42 = vld [vmem:[#allocation2 + $0x30] sm:$0xff] }
 0x154   :  { %643 = vmatmul.f32.gmra.mxu1 %v287_v31  ;;  %756 = vmatmul.f32.gmra.mxu2 %v288_v3 }
 0x156   :  { %869 = vmatmul.f32.gmra.mxu3 %v289_v34  ;;  %v95_v34 = vld [vmem:[#allocation2 + $0x28] sm:$0xff] }
 0x157   :  { %v709_v45 = vpop.f32.mrf.mxu2 }
 0x158   :  { %v3604_v47 = vadd.f32 %v709_v45, %v597_v61  ;;  %982 = vmatmul.f32.gmra.mxu0 %v290_v44 }
 0x159   :  { %v599_v28 = vpop.f32.mrf.mxu1 }
 0x15a   :  { %v600_v7 = vadd.f32 %v599_v28, %v487_v60  ;;  %v103_v28 = vld [vmem:[#allocation2 + $0x68] sm:$0xff] }
 0x15c   :  { %646 = vmatmul.f32.gmra.mxu1 %v294_v41  ;;  %759 = vmatmul.f32.gmra.mxu2 %v295_v51 }
 0x15e   :  { %872 = vmatmul.f32.gmra.mxu3 %v296_v54 }
 0x15f   :  { %v712_v14 = vpop.f32.mrf.mxu2 }
 0x160   :  { %v3608_v63 = vadd.f32 %v712_v14, %v600_v7  ;;  %985 = vmatmul.f32.gmra.mxu0 %v297_v62  ;;  %v109_v62 = vld [vmem:[#allocation2 + $0x98] sm:$0xff]  ;;  %v110_v7 = vld [vmem:[#allocation2 + $0xa0] sm:$0xff] }
 0x161   :  { %v602_v4 = vpop.f32.mrf.mxu1 }
 0x162   :  { %v603_v19 = vadd.f32 %v602_v4, %v490_v56 }
 0x164   :  { %649 = vmatmul.f32.gmra.mxu1 %v301_v5  ;;  %762 = vmatmul.f32.gmra.mxu2 %v302_v39  ;;  %v116_v39 = vld [vmem:[#allocation2 + $0xd0] sm:$0xff] }
 0x166   :  { %875 = vmatmul.f32.gmra.mxu3 %v303_v10  ;;  %v117_v10 = vld [vmem:[#allocation2 + $0xd8] sm:$0xff] }
 0x167   :  { %v715_v13 = vpop.f32.mrf.mxu2 }
 0x168   :  { %v3612_v15 = vadd.f32 %v715_v13, %v603_v19  ;;  %988 = vmatmul.f32.gmra.mxu0 %v304_v58  ;;  %v123_v13 = vld [vmem:[#allocation2 + $0x108] sm:$0xff] }
 0x169   :  { %v605_v33 = vpop.f32.mrf.mxu1 }
 0x16a   :  { %v606_v30 = vadd.f32 %v605_v33, %v493_v25  ;;  %v124_v33 = vld [vmem:[#allocation2 + $0x110] sm:$0xff]  ;;  %v130_v25 = vld [vmem:[#allocation2 + $0x140] sm:$0xff] }
 0x16c   :  { %652 = vmatmul.f32.gmra.mxu1 %v308_v18  ;;  %765 = vmatmul.f32.gmra.mxu2 %v309_v49 }
 0x16e   :  { %878 = vmatmul.f32.gmra.mxu3 %v310_v20 }
 0x16f   :  { %v718_v27 = vpop.f32.mrf.mxu2 }
 0x170   :  { %v3616_v31 = vadd.f32 %v718_v27, %v606_v30  ;;  %991 = vmatmul.f32.gmra.mxu0 %v311_v21  ;;  %v131_v21 = vld [vmem:[#allocation2 + $0x148] sm:$0xff] }
 0x171   :  { %v608_v3 = vpop.f32.mrf.mxu1 }
 0x172   :  { %v609_v44 = vadd.f32 %v608_v3, %v3479_v37 }
 0x174   :  { %1011 = vmatmul.f32.vlgmr.msra.gmra.mxu1 %v95_v34  ;;  %1124 = vmatmul.f32.vlgmr.msra.gmra.mxu2 %v96_v42  ;;  %v137_v34 = vld [vmem:[#allocation2 + $0x178] sm:$0xff]  ;;  %v138_v42 = vld [vmem:[#allocation2 + $0x180] sm:$0xff] }
 0x177   :  { %v721_v61 = vpop.f32.mrf.mxu2 }
 0x178   :  { %v3619_v45 = vadd.f32 %v721_v61, %v609_v44 }
 0x179   :  { %v611_v35 = vpop.f32.mrf.mxu1 }
 0x17a   :  { %v612_v41 = vadd.f32 %v611_v35, %v3489_v48 }
 0x17c   :  { %1014 = vmatmul.f32.gmra.mxu1 %v102_v50  ;;  %1127 = vmatmul.f32.gmra.mxu2 %v103_v28  ;;  %v144_v50 = vld [vmem:[#allocation2 + $0x1b0] sm:$0xff]  ;;  %v145_v28 = vld [vmem:[#allocation2 + $0x1b8] sm:$0xff] }
 0x17f   :  { %v724_v51 = vpop.f32.mrf.mxu2 }
 0x180   :  { %v3622_v54 = vadd.f32 %v724_v51, %v612_v41 }
 0x181   :  { %v614_v60 = vpop.f32.mrf.mxu1 }
 0x182   :  { %v615_v37 = vadd.f32 %v614_v60, %v3499_v59 }
 0x184   :  { %1017 = vmatmul.f32.gmra.mxu1 %v109_v62  ;;  %1130 = vmatmul.f32.gmra.mxu2 %v110_v7  ;;  %v151_v62 = vld [vmem:[#allocation2 + $0x1e8] sm:$0xff]  ;;  %v152_v7 = vld [vmem:[#allocation2 + $0x1f0] sm:$0xff] }
 0x187   :  { %v727_v14 = vpop.f32.mrf.mxu2 }
 0x188   :  { %v3625_v4 = vadd.f32 %v727_v14, %v615_v37 }
 0x189   :  { %v617_v5 = vpop.f32.mrf.mxu1 }
 0x18a   :  { %v618_v48 = vadd.f32 %v617_v5, %v3509_v6 }
 0x18c   :  { %1020 = vmatmul.f32.gmra.mxu1 %v116_v39  ;;  %1133 = vmatmul.f32.gmra.mxu2 %v117_v10  ;;  %v158_v39 = vld [vmem:[#allocation2 + $0x220] sm:$0xff]  ;;  %v159_v10 = vld [vmem:[#allocation2 + $0x228] sm:$0xff] }
 0x18f   :  { %v730_v56 = vpop.f32.mrf.mxu2 }
 0x190   :  { %v3628_v58 = vadd.f32 %v730_v56, %v618_v48 }
 0x191   :  { %v620_v19 = vpop.f32.mrf.mxu1 }
 0x192   :  { %v621_v59 = vadd.f32 %v620_v19, %v3519_v17 }
 0x194   :  { %1023 = vmatmul.f32.gmra.mxu1 %v123_v13  ;;  %1136 = vmatmul.f32.gmra.mxu2 %v124_v33  ;;  %v165_v13 = vld [vmem:[#allocation2 + $0x258] sm:$0xff]  ;;  %v166_v33 = vld [vmem:[#allocation2 + $0x260] sm:$0xff] }
 0x197   :  { %v733_v18 = vpop.f32.mrf.mxu2 }
 0x198   :  { %v3631_v49 = vadd.f32 %v733_v18, %v621_v59 }
 0x199   :  { %v623_v20 = vpop.f32.mrf.mxu1 }
 0x19a   :  { %v624_v6 = vadd.f32 %v623_v20, %v3529_v29 }
 0x19c   :  { %1026 = vmatmul.f32.gmra.mxu1 %v130_v25  ;;  %1139 = vmatmul.f32.gmra.mxu2 %v131_v21  ;;  %v172_v25 = vld [vmem:[#allocation2 + $0x290] sm:$0xff]  ;;  %v173_v21 = vld [vmem:[#allocation2 + $0x298] sm:$0xff] }
 0x19f   :  { %v736_v30 = vpop.f32.mrf.mxu2 }
 0x1a0   :  { %v3634_v27 = vadd.f32 %v736_v30, %v624_v6 }
 0x1a1   :  { %v626_v3 = vpop.f32.mrf.mxu1 }
 0x1a2   :  { %v627_v17 = vadd.f32 %v626_v3, %v3539_v46 }
 0x1a4   :  { %1029 = vmatmul.f32.gmra.mxu1 %v137_v34  ;;  %1142 = vmatmul.f32.gmra.mxu2 %v138_v42  ;;  %v179_v34 = vld [vmem:[#allocation2 + $0x2c8] sm:$0xff]  ;;  %v180_v42 = vld [vmem:[#allocation2 + $0x2d0] sm:$0xff] }
 0x1a7   :  { %v739_v44 = vpop.f32.mrf.mxu2 }
 0x1a8   :  { %v3637_v61 = vadd.f32 %v739_v44, %v627_v17 }
 0x1a9   :  { %v629_v35 = vpop.f32.mrf.mxu1 }
 0x1aa   :  { %v630_v29 = vadd.f32 %v629_v35, %v3551_v0 }
 0x1ac   :  { %1032 = vmatmul.f32.gmra.mxu1 %v144_v50  ;;  %1145 = vmatmul.f32.gmra.mxu2 %v145_v28  ;;  %v186_v50 = vld [vmem:[#allocation2 + $0x300] sm:$0xff]  ;;  %v187_v28 = vld [vmem:[#allocation2 + $0x308] sm:$0xff] }
 0x1af   :  { %v742_v41 = vpop.f32.mrf.mxu2 }
 0x1b0   :  { %v3640_v51 = vadd.f32 %v742_v41, %v630_v29 }
 0x1b1   :  { %v632_v60 = vpop.f32.mrf.mxu1 }
 0x1b2   :  { %v633_v46 = vadd.f32 %v632_v60, %v3484_v43 }
 0x1b4   :  { %1035 = vmatmul.f32.gmra.mxu1 %v151_v62  ;;  %1148 = vmatmul.f32.gmra.mxu2 %v152_v7  ;;  %v193_v62 = vld [vmem:[#allocation2 + $0x338] sm:$0xff]  ;;  %v194_v7 = vld [vmem:[#allocation2 + $0x340] sm:$0xff] }
 0x1b7   :  { %v745_v37 = vpop.f32.mrf.mxu2 }
 0x1b8   :  { %v3643_v14 = vadd.f32 %v745_v37, %v633_v46 }
 0x1b9   :  { %v635_v5 = vpop.f32.mrf.mxu1 }
 0x1ba   :  { %v636_v0 = vadd.f32 %v635_v5, %v3494_v53 }
 0x1bc   :  { %1038 = vmatmul.f32.gmra.mxu1 %v158_v39  ;;  %1151 = vmatmul.f32.gmra.mxu2 %v159_v10  ;;  %v200_v39 = vld [vmem:[#allocation2 + $0x370] sm:$0xff]  ;;  %v201_v10 = vld [vmem:[#allocation2 + $0x378] sm:$0xff] }
 0x1bf   :  { %v748_v48 = vpop.f32.mrf.mxu2 }
 0x1c0   :  { %v3646_v56 = vadd.f32 %v748_v48, %v636_v0 }
 0x1c1   :  { %v638_v19 = vpop.f32.mrf.mxu1 }
 0x1c2   :  { %v639_v43 = vadd.f32 %v638_v19, %v3504_v1 }
 0x1c4   :  { %1041 = vmatmul.f32.gmra.mxu1 %v165_v13  ;;  %1154 = vmatmul.f32.gmra.mxu2 %v166_v33  ;;  %v207_v13 = vld [vmem:[#allocation2 + $0x3a8] sm:$0xff]  ;;  %v208_v33 = vld [vmem:[#allocation2 + $0x3b0] sm:$0xff] }
 0x1c7   :  { %v751_v59 = vpop.f32.mrf.mxu2 }
 0x1c8   :  { %v3649_v18 = vadd.f32 %v751_v59, %v639_v43 }
 0x1c9   :  { %v641_v20 = vpop.f32.mrf.mxu1 }
 0x1ca   :  { %v642_v53 = vadd.f32 %v641_v20, %v3514_v11 }
 0x1cc   :  { %1044 = vmatmul.f32.gmra.mxu1 %v172_v25  ;;  %1157 = vmatmul.f32.gmra.mxu2 %v173_v21  ;;  %v214_v25 = vld [vmem:[#allocation2 + $0x3e0] sm:$0xff]  ;;  %v215_v21 = vld [vmem:[#allocation2 + $0x3e8] sm:$0xff] }
 0x1cf   :  { %v754_v6 = vpop.f32.mrf.mxu2 }
 0x1d0   :  { %v3652_v30 = vadd.f32 %v754_v6, %v642_v53 }
 0x1d1   :  { %v644_v3 = vpop.f32.mrf.mxu1 }
 0x1d2   :  { %v645_v1 = vadd.f32 %v644_v3, %v3524_v23 }
 0x1d4   :  { %1047 = vmatmul.f32.gmra.mxu1 %v179_v34  ;;  %1160 = vmatmul.f32.gmra.mxu2 %v180_v42 }
 0x1d7   :  { %v757_v17 = vpop.f32.mrf.mxu2 }
 0x1d8   :  { %v3655_v44 = vadd.f32 %v757_v17, %v645_v1  ;;  %v221_v1 = vld [vmem:[#allocation2 + $0x418] sm:$0xff] }
 0x1d9   :  { %v647_v35 = vpop.f32.mrf.mxu1 }
 0x1da   :  { %v648_v11 = vadd.f32 %v647_v35, %v3534_v36 }
 0x1dc   :  { %1050 = vmatmul.f32.gmra.mxu1 %v186_v50  ;;  %1163 = vmatmul.f32.gmra.mxu2 %v187_v28 }
 0x1df   :  { %v760_v29 = vpop.f32.mrf.mxu2 }
 0x1e0   :  { %v3658_v41 = vadd.f32 %v760_v29, %v648_v11 }
 0x1e1   :  { %v650_v60 = vpop.f32.mrf.mxu1 }
 0x1e2   :  { %v651_v23 = vadd.f32 %v650_v60, %v3544_v55  ;;  %v228_v60 = vld [vmem:[#allocation2 + $0x450] sm:$0xff] }
 0x1e4   :  { %1053 = vmatmul.f32.gmra.mxu1 %v193_v62  ;;  %1166 = vmatmul.f32.gmra.mxu2 %v194_v7 }
 0x1e7   :  { %v763_v46 = vpop.f32.mrf.mxu2 }
 0x1e8   :  { %v3661_v37 = vadd.f32 %v763_v46, %v651_v23 }
 0x1e9   :  { %v653_v5 = vpop.f32.mrf.mxu1 }
 0x1ea   :  { %v654_v36 = vadd.f32 %v653_v5, %v3554_v9 }
 0x1ec   :  { %1056 = vmatmul.f32.gmra.mxu1 %v200_v39  ;;  %1169 = vmatmul.f32.gmra.mxu2 %v201_v10  ;;  %v235_v10 = vld [vmem:[#allocation2 + $0x488] sm:$0xff] }
 0x1ef   :  { %v766_v0 = vpop.f32.mrf.mxu2 }
 0x1f0   :  { %v3664_v48 = vadd.f32 %v766_v0, %v654_v36 }
 0x1f1   :  { %v1012_v19 = vpop.f32.mrf.mxu1 }
 0x1f2   :  { %v1013_v55 = vadd.f32 %v1012_v19, %v3558_v38  ;;  %v222_v38 = vld [vmem:[#allocation2 + $0x420] sm:$0xff] }
 0x1f4   :  { %1059 = vmatmul.f32.gmra.mxu1 %v207_v13  ;;  %1172 = vmatmul.f32.gmra.mxu2 %v208_v33 }
 0x1f7   :  { %v1125_v43 = vpop.f32.mrf.mxu2 }
 0x1f8   :  { %v1126_v59 = vadd.f32 %v1125_v43, %v1013_v55  ;;  %v242_v43 = vld [vmem:[#allocation2 + $0x4c0] sm:$0xff] }
 0x1f9   :  { %v1015_v20 = vpop.f32.mrf.mxu1 }
 0x1fa   :  { %vm1221_vm0 = vcmp.ge.f32.partialorder %v1126_v59, 0.0  ;;  %v1253_v53 = vmul.f32 0.01, %v1126_v59  ;;  %v1016_v6 = vadd.f32 %v1015_v20, %v3562_v2  ;;  %v229_v2 = vld [vmem:[#allocation2 + $0x458] sm:$0xff] }
 0x1fc   :  { %1062 = vmatmul.f32.gmra.mxu1 %v214_v25  ;;  %1175 = vmatmul.f32.gmra.mxu2 %v215_v21  ;;  %v3667_v9 = vsel %vm1221_vm0, %v1126_v59, %v1253_v53 }
 0x1fd   :  { %1320 = vadd.xlane.f32.xlu0 %v3667_v9 }
 0x1ff   :  { %v1128_v3 = vpop.f32.mrf.mxu2 }
 0x200   :  { %v1129_v34 = vadd.f32 %v1128_v3, %v1016_v6  ;;  %v249_v6 = vld [vmem:[#allocation2 + $0x4f8] sm:$0xff]  ;;  %v250_v3 = vld [vmem:[#allocation2 + $0x500] sm:$0xff] }
 0x201   :  { %v1018_v42 = vpop.f32.mrf.mxu1 }
 0x202   :  { %vm1222_vm1 = vcmp.ge.f32.partialorder %v1129_v34, 0.0  ;;  %v1254_v17 = vmul.f32 0.01, %v1129_v34  ;;  %v1019_v50 = vadd.f32 %v1018_v42, %v3566_v24  ;;  %v236_v24 = vld [vmem:[#allocation2 + $0x490] sm:$0xff] }
 0x204   :  { %1065 = vmatmul.f32.gmra.mxu1 %v221_v1  ;;  %1178 = vmatmul.f32.gmra.mxu2 %v222_v38  ;;  %v3671_v35 = vsel %vm1222_vm1, %v1129_v34, %v1254_v17 }
 0x205   :  { %1322 = vadd.xlane.f32.xlu0 %v3671_v35 }
 0x207   :  { %v1131_v28 = vpop.f32.mrf.mxu2 }
 0x208   :  { %v1132_v11 = vadd.f32 %v1131_v28, %v1019_v50  ;;  %v256_v50 = vld [vmem:[#allocation2 + $0x530] sm:$0xff]  ;;  %v257_v28 = vld [vmem:[#allocation2 + $0x538] sm:$0xff] }
 0x209   :  { %v1021_v29 = vpop.f32.mrf.mxu1 }
 0x20a   :  { %vm1223_vm2 = vcmp.ge.f32.partialorder %v1132_v11, 0.0  ;;  %v1255_v62 = vmul.f32 0.01, %v1132_v11  ;;  %v1022_v23 = vadd.f32 %v1021_v29, %v3570_v52  ;;  %v243_v52 = vld [vmem:[#allocation2 + $0x4c8] sm:$0xff] }
 0x20b   :  { %v263_v29 = vld [vmem:[#allocation2 + $0x568] sm:$0xff] }
 0x20c   :  { %1068 = vmatmul.f32.gmra.mxu1 %v228_v60  ;;  %1181 = vmatmul.f32.gmra.mxu2 %v229_v2  ;;  %v3675_v7 = vsel %vm1223_vm2, %v1132_v11, %v1255_v62  ;;  %v264_v60 = vld [vmem:[#allocation2 + $0x570] sm:$0xff]  ;;  %v270_v2 = vld [vmem:[#allocation2 + $0x5a0] sm:$0xff]  ;;  %v271_v62 = vld [vmem:[#allocation2 + $0x5a8] sm:$0xff] }
 0x20d   :  { %1324 = vadd.xlane.f32.xlu1 %v3675_v7 }
 0x20f   :  { %v1134_v46 = vpop.f32.mrf.mxu2 }
 0x210   :  { %v1135_v5 = vadd.f32 %v1134_v46, %v1022_v23  ;;  %v278_v23 = vld [vmem:[#allocation2 + $0x5e0] sm:$0xff]  ;;  %v284_v46 = vld [vmem:[#allocation2 + $0x610] sm:$0xff] }
 0x211   :  { %v1024_v39 = vpop.f32.mrf.mxu1 }
 0x212   :  { %vm1224_vm3 = vcmp.ge.f32.partialorder %v1135_v5, 0.0  ;;  %v1256_v36 = vmul.f32 0.01, %v1135_v5  ;;  %v1025_v19 = vadd.f32 %v1024_v39, %v3574_v16  ;;  %v291_v39 = vld [vmem:[#allocation2 + $0x648] sm:$0xff] }
 0x214   :  { %1071 = vmatmul.f32.gmra.mxu1 %v235_v10  ;;  %1184 = vmatmul.f32.gmra.mxu2 %v236_v24  ;;  %v3679_v0 = vsel %vm1224_vm3, %v1135_v5, %v1256_v36  ;;  %v285_v5 = vld [vmem:[#allocation2 + $0x618] sm:$0xff]  ;;  %v292_v10 = vld [vmem:[#allocation2 + $0x650] sm:$0xff]  ;;  %v298_v24 = vld [vmem:[#allocation2 + $0x680] sm:$0xff] }
 0x215   :  { %1326 = vadd.xlane.f32.xlu1 %v3679_v0  ;;  %v299_v36 = vld [vmem:[#allocation2 + $0x688] sm:$0xff] }
 0x217   :  { %v1137_v13 = vpop.f32.mrf.mxu2 }
 0x218   :  { %v1138_v33 = vadd.f32 %v1137_v13, %v1025_v19  ;;  %v305_v19 = vld [vmem:[#allocation2 + $0x6b8] sm:$0xff]  ;;  %v306_v13 = vld [vmem:[#allocation2 + $0x6c0] sm:$0xff] }
 0x219   :  { %v1027_v55 = vpop.f32.mrf.mxu1 }
 0x21a   :  { %vm1225_vm4 = vcmp.ge.f32.partialorder %v1138_v33, 0.0  ;;  %v1257_v59 = vmul.f32 0.01, %v1138_v33  ;;  %v1028_v25 = vadd.f32 %v1027_v55, %v3578_v40 }
 0x21c   :  { %1074 = vmatmul.f32.gmra.mxu1 %v242_v43  ;;  %1187 = vmatmul.f32.gmra.mxu2 %v243_v52  ;;  %v3683_v20 = vsel %vm1225_vm4, %v1138_v33, %v1257_v59  ;;  %v312_v43 = vld [vmem:[#allocation2 + $0x6f0] sm:$0xff]  ;;  %v313_v52 = vld [vmem:[#allocation2 + $0x6f8] sm:$0xff]  ;;  %v810_v59 = vpop.f32.mrf.mxu3 }
 0x21d   :  { %1328 = vadd.xlane.f32.xlu2 %v3683_v20 }
 0x21f   :  { %v1140_v21 = vpop.f32.mrf.mxu2 }
 0x220   :  { %v1141_v53 = vadd.f32 %v1140_v21, %v1028_v25  ;;  %v1317_v25 = vlaneseq  ;;  %v923_v21 = vpop.f32.mrf.mxu0 }
 0x221   :  { %v1030_v34 = vpop.f32.mrf.mxu1 }
 0x222   :  { %vm1226_vm5 = vcmp.ge.f32.partialorder %v1141_v53, 0.0  ;;  %v1258_v16 = vmul.f32 0.01, %v1141_v53  ;;  %v1031_v1 = vadd.f32 %v1030_v34, %v3582_v8  ;;  %v277_v8 = vld [vmem:[#allocation2 + $0x5d8] sm:$0xff] }
 0x224   :  { %1077 = vmatmul.f32.gmra.mxu1 %v249_v6  ;;  %1190 = vmatmul.f32.gmra.mxu2 %v250_v3  ;;  %v3687_v42 = vsel %vm1226_vm5, %v1141_v53, %v1258_v16  ;;  %v3694_v53 = vand.u32 127, %v1317_v25 }
 0x225   :  { %1330 = vadd.xlane.f32.xlu2 %v3687_v42 }
 0x226   :  { %vm1319_vm7 = vcmp.lt.s32.totalorder %v3694_v53, 32 }
 0x227   :  { %v1143_v38 = vpop.f32.mrf.mxu2 }
 0x228   :  { %v1144_v17 = vadd.f32 %v1143_v38, %v1031_v1  ;;  %v813_v38 = vpop.f32.mrf.mxu3 }
 0x229   :  { %v1033_v33 = vpop.f32.mrf.mxu1 }
 0x22a   :  { %vm1227_vm6 = vcmp.ge.f32.partialorder %v1144_v17, 0.0  ;;  %v1259_v40 = vmul.f32 0.01, %v1144_v17 }
 0x22c   :  { %1080 = vmatmul.f32.gmra.mxu1 %v256_v50  ;;  %1193 = vmatmul.f32.gmra.mxu2 %v257_v28  ;;  %v3691_v11 = vsel %vm1227_vm6, %v1144_v17, %v1259_v40  ;;  %v1034_v17 = vadd.f32 %v1033_v33, %v3586_v22  ;;  %v811_v40 = vadd.f32 %v810_v59, %v3588_v32 }
 0x22d   :  { %1332 = vadd.xlane.f32.xlu1 %v3691_v11 }
 0x22f   :  { %v1146_v55 = vpop.f32.mrf.mxu2 }
 0x230   :  { %v816_v32 = vpop.f32.mrf.mxu3 }
 0x231   :  { %v1036_v6 = vpop.f32.mrf.mxu1 }
 0x234   :  { %1083 = vmatmul.f32.gmra.mxu1 %v263_v29  ;;  %1196 = vmatmul.f32.gmra.mxu2 %v264_v60  ;;  %v1147_v29 = vadd.f32 %v1146_v55, %v1034_v17  ;;  %v926_v60 = vpop.f32.mrf.mxu0  ;;  %v2008_v17 = vld [vmem:[#allocation7 + $0x70] sm:$0xff] }
 0x236   :  { %vm1228_vm8 = vcmp.ge.f32.partialorder %v1147_v29, 0.0 }
 0x237   :  { %v1149_v34 = vpop.f32.mrf.mxu2 }
 0x23c   :  { %1086 = vmatmul.f32.gmra.mxu1 %v270_v2  ;;  %1199 = vmatmul.f32.gmra.mxu2 %v271_v62  ;;  %v2009_v62 = vld [vmem:[#allocation7 + $0x78] sm:$0xff]  ;;  %v929_v55 = vpop.f32.mrf.mxu0 }
 0x23d   :  { %2014 = vmatpush.msra.mxu3 %v2009_v62 }
 0x23f   :  { %2015 = vmatpush.msra.mxu3 %v2008_v17 }
 0x244   :  { %1089 = vmatmul.f32.gmra.mxu1 %v277_v8  ;;  %1202 = vmatmul.f32.gmra.mxu2 %v278_v23  ;;  %v924_v23 = vadd.f32 %v923_v21, %v811_v40 }
 0x24c   :  { %1092 = vmatmul.f32.gmra.mxu1 %v284_v46  ;;  %1205 = vmatmul.f32.gmra.mxu2 %v285_v5  ;;  %v1260_v46 = vmul.f32 0.01, %v1147_v29  ;;  %v1152_v5 = vpop.f32.mrf.mxu2 }
 0x254   :  { %1095 = vmatmul.f32.gmra.mxu1 %v291_v39  ;;  %1208 = vmatmul.f32.gmra.mxu2 %v292_v10  ;;  %v1037_v39 = vadd.f32 %v1036_v6, %v924_v23 }
 0x25c   :  { %1098 = vmatmul.f32.gmra.mxu1 %v298_v24  ;;  %1211 = vmatmul.f32.gmra.mxu2 %v299_v36  ;;  %v814_v36 = vadd.f32 %v813_v38, %v3592_v57  ;;  %v1155_v57 = vpop.f32.mrf.mxu2  ;;  %v819_v38 = vpop.f32.mrf.mxu3 }
 0x25d   :  { %v820_v23 = vadd.f32 %v819_v38, %v3600_v26 }
 0x264   :  { %1101 = vmatmul.f32.gmra.mxu1 %v305_v19  ;;  %1214 = vmatmul.f32.gmra.mxu2 %v306_v13  ;;  %v1150_v19 = vadd.f32 %v1149_v34, %v1037_v39  ;;  %v3714_v13 = vsel %vm1228_vm8, %v1147_v29, %v1260_v46 }
 0x266   :  { %v1261_v59 = vmul.f32 0.01, %v1150_v19  ;;  %vm1229_vm9 = vcmp.ge.f32.partialorder %v1150_v19, 0.0 }
 0x26c   :  { %1104 = vmatmul.f32.gmra.mxu1 %v312_v43  ;;  %1217 = vmatmul.f32.gmra.mxu2 %v313_v52  ;;  %v927_v43 = vadd.f32 %v926_v60, %v814_v36 }
 0x270   :  { %v1321_v3 = vpop.xlane.xlu0 %1320 }
 0x271   :  { %v1384_v16 = vmul.f32 0.03125, %v1321_v3 }
 0x273   :  { %v1416_v1 = vsub.f32 %v3667_v9, %v1384_v16  ;;  %v1039_v9 = vpop.f32.mrf.mxu1  ;;  %v817_v16 = vadd.f32 %v816_v32, %v3596_v12  ;;  %v822_v32 = vpop.f32.mrf.mxu3 }
 0x274   :  { %v1040_v21 = vadd.f32 %v1039_v9, %v927_v43  ;;  %v823_v43 = vadd.f32 %v822_v32, %v3604_v47 }
 0x275   :  { %v3701_v50 = vsel %vm1319_vm7, %v1416_v1, 0.0  ;;  %v3725_v1 = vsel %vm1229_vm9, %v1150_v19, %v1261_v59  ;;  %v930_v40 = vadd.f32 %v929_v55, %v817_v16 }
 0x276   :  { %v1482_v28 = vmul.f32 %v3701_v50, %v3701_v50  ;;  %v1153_v34 = vadd.f32 %v1152_v5, %v1040_v21  ;;  %v1158_v5 = vpop.f32.mrf.mxu2 }
 0x278   :  { %1514 = vadd.xlane.f32.xlu0 %v1482_v28  ;;  %v1323_v2 = vpop.xlane.xlu0 %1322  ;;  %v1262_v60 = vmul.f32 0.01, %v1153_v34  ;;  %vm1230_vm10 = vcmp.ge.f32.partialorder %v1153_v34, 0.0 }
 0x279   :  { %v1385_v8 = vmul.f32 0.03125, %v1323_v2  ;;  %v932_v2 = vpop.f32.mrf.mxu0 }
 0x27a   :  { %v3736_v46 = vsel %vm1230_vm10, %v1153_v34, %v1262_v60 }
 0x27b   :  { %v1417_v22 = vsub.f32 %v3671_v35, %v1385_v8  ;;  %v1042_v25 = vpop.f32.mrf.mxu1 }
 0x27c   :  { %v1043_v62 = vadd.f32 %v1042_v25, %v930_v40 }
 0x27d   :  { %v3709_v10 = vsel %vm1319_vm7, %v1417_v22, 0.0 }
 0x27e   :  { %v1483_v24 = vmul.f32 %v3709_v10, %v3709_v10  ;;  %v1156_v22 = vadd.f32 %v1155_v57, %v1043_v62 }
 0x280   :  { %v1325_v33 = vpop.xlane.xlu1 %1324  ;;  %1334 = vadd.xlane.f32.xlu0 %v3714_v13  ;;  %1516 = vadd.xlane.f32.xlu2 %v1483_v24  ;;  %v933_v24 = vadd.f32 %v932_v2, %v820_v23  ;;  %v1263_v19 = vmul.f32 0.01, %v1156_v22  ;;  %vm1231_vm11 = vcmp.ge.f32.partialorder %v1156_v22, 0.0 }
 0x281   :  { %v1386_v35 = vmul.f32 0.03125, %v1325_v33  ;;  %v935_v26 = vpop.f32.mrf.mxu0 }
 0x282   :  { %v3747_v59 = vsel %vm1231_vm11, %v1156_v22, %v1263_v19  ;;  %v936_v16 = vadd.f32 %v935_v26, %v823_v43  ;;  %v2004_v26 = vld [vmem:[#allocation7 + $0x50] sm:$0xff]  ;;  %v2002_v43 = vld [vmem:[#allocation7 + $0x40] sm:$0xff] }
 0x283   :  { %v1418_v52 = vsub.f32 %v3675_v7, %v1386_v35  ;;  %v1045_v8 = vpop.f32.mrf.mxu1 }
 0x284   :  { %v1046_v33 = vadd.f32 %v1045_v8, %v933_v24 }
 0x285   :  { %v3720_v6 = vsel %vm1319_vm7, %v1418_v52, 0.0 }
 0x286   :  { %v1484_v3 = vmul.f32 %v3720_v6, %v3720_v6  ;;  %v1159_v52 = vadd.f32 %v1158_v5, %v1046_v33  ;;  %v2005_v33 = vld [vmem:[#allocation7 + $0x58] sm:$0xff] }
 0x288   :  { %1518 = vadd.xlane.f32.xlu1 %v1484_v3  ;;  %v1327_v7 = vpop.xlane.xlu1 %1326  ;;  %1336 = vadd.xlane.f32.xlu2 %v3725_v1  ;;  %v1161_v3 = vpop.f32.mrf.mxu2  ;;  %v1264_v38 = vmul.f32 0.01, %v1159_v52  ;;  %vm1232_vm12 = vcmp.ge.f32.partialorder %v1159_v52, 0.0 }
 0x289   :  { %v1387_v28 = vmul.f32 0.03125, %v1327_v7  ;;  %v825_v7 = vpop.f32.mrf.mxu3  ;;  %v938_v2 = vpop.f32.mrf.mxu0 }
 0x28a   :  { %v826_v40 = vadd.f32 %v825_v7, %v3608_v63  ;;  %v3758_v60 = vsel %vm1232_vm12, %v1159_v52, %v1264_v38  ;;  %v2001_v52 = vld [vmem:[#allocation7 + $0x38] sm:$0xff]  ;;  %v1994_v38 = vld [vmem:[#allocation7] sm:$0xff] }
 0x28b   :  { %v1419_v29 = vsub.f32 %v3679_v0, %v1387_v28  ;;  %v1048_v25 = vpop.f32.mrf.mxu1 }
 0x28c   :  { %v1049_v17 = vadd.f32 %v1048_v25, %v936_v16  ;;  %v2000_v25 = vld [vmem:[#allocation7 + $0x30] sm:$0xff]  ;;  %v1995_v16 = vld [vmem:[#allocation7 + $0x8] sm:$0xff] }
 0x28d   :  { %v3731_v12 = vsel %vm1319_vm7, %v1419_v29, 0.0 }
 0x28e   :  { %v1485_v9 = vmul.f32 %v3731_v12, %v3731_v12  ;;  %v1162_v29 = vadd.f32 %v1161_v3, %v1049_v17  ;;  %v1996_v3 = vld [vmem:[#allocation7 + $0x10] sm:$0xff] }
 0x290   :  { %v1329_v39 = vpop.xlane.xlu2 %1328  ;;  %1338 = vadd.xlane.f32.xlu1 %v3736_v46  ;;  %1520 = vadd.xlane.f32.xlu0 %v1485_v9  ;;  %v939_v9 = vadd.f32 %v938_v2, %v826_v40  ;;  %v1265_v22 = vmul.f32 0.01, %v1162_v29  ;;  %v1164_v5 = vpop.f32.mrf.mxu2  ;;  %vm1233_vm13 = vcmp.ge.f32.partialorder %v1162_v29, 0.0 }
 0x291   :  { %v1388_v0 = vmul.f32 0.03125, %v1329_v39  ;;  %v941_v7 = vpop.f32.mrf.mxu0 }
 0x292   :  { %v3768_v24 = vsel %vm1233_vm13, %v1162_v29, %v1265_v22 }
 0x293   :  { %v1420_v36 = vsub.f32 %v3683_v20, %v1388_v0  ;;  %v2007_v20 = vld [vmem:[#allocation7 + $0x68] sm:$0xff]  ;;  %v1051_v8 = vpop.f32.mrf.mxu1 }
 0x294   :  { %2016 = vmatpush.msra.mxu3 %v2007_v20  ;;  %v1052_v39 = vadd.f32 %v1051_v8, %v939_v9  ;;  %v1998_v20 = vld [vmem:[#allocation7 + $0x20] sm:$0xff] }
 0x295   :  { %v3742_v35 = vsel %vm1319_vm7, %v1420_v36, 0.0  ;;  %v2006_v36 = vld [vmem:[#allocation7 + $0x60] sm:$0xff] }
 0x296   :  { %v1486_v55 = vmul.f32 %v3742_v35, %v3742_v35  ;;  %v1165_v32 = vadd.f32 %v1164_v5, %v1052_v39  ;;  %2017 = vmatpush.msra.mxu3 %v2006_v36 }
 0x298   :  { %v1331_v21 = vpop.xlane.xlu2 %1330  ;;  %1340 = vadd.xlane.f32.xlu0 %v3747_v59  ;;  %1522 = vadd.xlane.f32.xlu2 %v1486_v55  ;;  %vm1234_vm14 = vcmp.ge.f32.partialorder %v1165_v32, 0.0  ;;  %v2003_v55 = vld [vmem:[#allocation7 + $0x48] sm:$0xff] }
 0x299   :  { %v1389_v57 = vmul.f32 0.03125, %v1331_v21  ;;  %2018 = vmatpush.msra.mxu3 %v2005_v33  ;;  %v1999_v21 = vld [vmem:[#allocation7 + $0x28] sm:$0xff] }
 0x29b   :  { %v1421_v34 = vsub.f32 %v3687_v42, %v1389_v57  ;;  %2019 = vmatpush.msra.mxu3 %v2004_v26  ;;  %v1997_v57 = vld [vmem:[#allocation7 + $0x18] sm:$0xff]  ;;  %v1054_v17 = vpop.f32.mrf.mxu1 }
 0x29d   :  { %v3753_v47 = vsel %vm1319_vm7, %v1421_v34, 0.0  ;;  %2020 = vmatpush.msra.mxu3 %v2003_v55  ;;  %v828_v34 = vpop.f32.mrf.mxu3 }
 0x29e   :  { %v1487_v28 = vmul.f32 %v3753_v47, %v3753_v47  ;;  %v829_v8 = vadd.f32 %v828_v34, %v3612_v15 }
 0x29f   :  { %2021 = vmatpush.msra.mxu3 %v2002_v43 }
 0x2a0   :  { %1524 = vadd.xlane.f32.xlu1 %v1487_v28  ;;  %v1333_v62 = vpop.xlane.xlu1 %1332  ;;  %1342 = vadd.xlane.f32.xlu2 %v3758_v60  ;;  %v1167_v28 = vpop.f32.mrf.mxu2  ;;  %v942_v36 = vadd.f32 %v941_v7, %v829_v8 }
 0x2a1   :  { %v1390_v42 = vmul.f32 0.03125, %v1333_v62  ;;  %2022 = vmatpush.msra.mxu3 %v2001_v52 }
 0x2a2   :  { %v1055_v43 = vadd.f32 %v1054_v17, %v942_v36 }
 0x2a3   :  { %v1422_v23 = vsub.f32 %v3691_v11, %v1390_v42  ;;  %v1266_v11 = vmul.f32 0.01, %v1165_v32  ;;  %2023 = vmatpush.msra.mxu3 %v2000_v25  ;;  %v944_v42 = vpop.f32.mrf.mxu0  ;;  %v1057_v9 = vpop.f32.mrf.mxu1 }
 0x2a5   :  { %v3764_v63 = vsel %vm1319_vm7, %v1422_v23, 0.0  ;;  %v3771_v19 = vsel %vm1234_vm14, %v1165_v32, %v1266_v11  ;;  %2024 = vmatpush.msra.mxu3 %v1999_v21  ;;  %v831_v29 = vpop.f32.mrf.mxu3 }
 0x2a6   :  { %v1488_v0 = vmul.f32 %v3764_v63, %v3764_v63  ;;  %v832_v21 = vadd.f32 %v831_v29, %v3616_v31 }
 0x2a7   :  { %2025 = vmatpush.msra.mxu3 %v1998_v20 }
 0x2a8   :  { %1344 = vadd.xlane.f32.xlu1 %v3768_v24  ;;  %1526 = vadd.xlane.f32.xlu0 %v1488_v0  ;;  %v1170_v5 = vpop.f32.mrf.mxu2 }
 0x2a9   :  { %2026 = vmatpush.msra.mxu3 %v1997_v57  ;;  %v1168_v57 = vadd.f32 %v1167_v28, %v1055_v43 }
 0x2ab   :  { %2027 = vmatpush.msra.mxu3 %v1996_v3  ;;  %v947_v20 = vpop.f32.mrf.mxu0  ;;  %vm1235_vm1 = vcmp.ge.f32.partialorder %v1168_v57, 0.0 }
 0x2ad   :  { %2028 = vmatpush.msra.mxu3 %v1995_v16  ;;  %v834_v11 = vpop.f32.mrf.mxu3 }
 0x2af   :  { %2029 = vmatpush.msra.mxu3 %v1994_v38 }
 0x2b0   :  { %1346 = vadd.xlane.f32.xlu0 %v3771_v19  ;;  %v1173_v8 = vpop.f32.mrf.mxu2 }
 0x2b5   :  { %v837_v29 = vpop.f32.mrf.mxu3 }
 0x2eb   :  { %v1515_v40 = vpop.xlane.xlu0 %1514 }
 0x2ec   :  { %v1578_v2 = vmul.f32 0.03125, %v1515_v40 }
 0x2ee   :  { %v1610_v62 = vadd.f32 1e-05, %v1578_v2  ;;  %v945_v2 = vadd.f32 %v944_v42, %v832_v21 }
 0x2f0   :  { %3141 = vrsqrt.f32 %v1610_v62  ;;  %vm1648_vm0 = vweird.f32 %v1610_v62 }
 0x2f3   :  { %v1517_v23 = vpop.xlane.xlu2 %1516  ;;  %v1335_v22 = vpop.xlane.xlu0 %1334 }
 0x2f4   :  { %v1579_v39 = vmul.f32 0.03125, %v1517_v23  ;;  %v1391_v0 = vmul.f32 0.03125, %v1335_v22 }
 0x2f6   :  { %v3142_v32 = vpop.eup %3141  ;;  %v3775_v33 = vadd.f32 1e-05, %v1579_v39  ;;  %v1423_v26 = vsub.f32 %v3714_v13, %v1391_v0  ;;  %v1060_v13 = vpop.f32.mrf.mxu1  ;;  %v1267_v39 = vmul.f32 0.01, %v1168_v57  ;;  %v1058_v0 = vadd.f32 %v1057_v9, %v945_v2 }
 0x2f7   :  { %v1643_v55 = vmul.f32 %v3142_v32, %v1610_v62  ;;  %vm1649_vm15 = vweird.f32 %v3142_v32 }
 0x2f8   :  { %3143 = vrsqrt.f32 %v3775_v33  ;;  %v3781_v15 = vsel %vm1319_vm7, %v1423_v26, 0.0  ;;  %vm1650_vm2 = vmor %vm1648_vm0, %vm1649_vm15  ;;  %v1171_v62 = vadd.f32 %v1170_v5, %v1058_v0  ;;  %vm1658_vm4 = vweird.f32 %v3775_v33 }
 0x2f9   :  { %v1644_v52 = vmul.f32 %v3142_v32, %v1643_v55  ;;  %v1489_v25 = vmul.f32 %v3781_v15, %v3781_v15  ;;  %v835_v55 = vadd.f32 %v834_v11, %v3619_v45 }
 0x2fa   :  { %v1268_v11 = vmul.f32 0.01, %v1171_v62  ;;  %vm1236_vm5 = vcmp.ge.f32.partialorder %v1171_v62, 0.0 }
 0x2fb   :  { %v1645_v3 = vmul.f32 0.5, %v1644_v52  ;;  %v1519_v16 = vpop.xlane.xlu1 %1518  ;;  %v1337_v34 = vpop.xlane.xlu2 %1336  ;;  %1528 = vadd.xlane.f32.xlu2 %v1489_v25  ;;  %v3799_v52 = vsel %vm1235_vm1, %v1168_v57, %v1267_v39 }
 0x2fc   :  { %v1580_v38 = vmul.f32 0.03125, %v1519_v16  ;;  %v1392_v7 = vmul.f32 0.03125, %v1337_v34 }
 0x2fd   :  { %v1646_v17 = vsub.f32 1.5, %v1645_v3 }
 0x2fe   :  { %v3144_v40 = vpop.eup %3143  ;;  %v3786_v23 = vadd.f32 1e-05, %v1580_v38  ;;  %v1424_v22 = vsub.f32 %v3725_v1, %v1392_v7  ;;  %v948_v7 = vadd.f32 %v947_v20, %v835_v55  ;;  %v1063_v45 = vpop.f32.mrf.mxu1 }
 0x2ff   :  { %v1647_v31 = vmul.f32 %v3142_v32, %v1646_v17  ;;  %v1653_v28 = vmul.f32 %v3144_v40, %v3775_v33  ;;  %vm1659_vm3 = vweird.f32 %v3144_v40  ;;  %v838_v33 = vadd.f32 %v837_v29, %v3622_v54 }
 0x300   :  { %3145 = vrsqrt.f32 %v3786_v23  ;;  %v3793_v36 = vsel %vm1319_vm7, %v1424_v22, 0.0  ;;  %v1061_v2 = vadd.f32 %v1060_v13, %v948_v7  ;;  %v1176_v22 = vpop.f32.mrf.mxu2  ;;  %vm1660_vm6 = vmor %vm1658_vm4, %vm1659_vm3  ;;  %vm1668_vm9 = vweird.f32 %v3786_v23 }
 0x301   :  { %v1651_v42 = vsel %vm1650_vm2, %v3142_v32, %v1647_v31  ;;  %v1654_v26 = vmul.f32 %v3144_v40, %v1653_v28  ;;  %v1490_v1 = vmul.f32 %v3793_v36, %v3793_v36  ;;  %v950_v32 = vpop.f32.mrf.mxu0  ;;  %v840_v28 = vpop.f32.mrf.mxu3 }
 0x302   :  { %v1962_v43 = vmul.f32 %v1651_v42, %v3701_v50  ;;  %v1174_v0 = vadd.f32 %v1173_v8, %v1061_v2  ;;  %v3815_v42 = vsel %vm1236_vm5, %v1171_v62, %v1268_v11 }
 0x303   :  { %v1655_v9 = vmul.f32 0.5, %v1654_v26  ;;  %v1339_v25 = vpop.xlane.xlu1 %1338  ;;  %1530 = vadd.xlane.f32.xlu1 %v1490_v1  ;;  %1348 = vadd.xlane.f32.xlu2 %v3799_v52  ;;  %v1521_v21 = vpop.xlane.xlu0 %1520 }
 0x304   :  { %v1393_v3 = vmul.f32 0.03125, %v1339_v25  ;;  %v1581_v16 = vmul.f32 0.03125, %v1521_v21  ;;  %2030 = vmatmul.f32.vlgmr.msra.gmra.mxu3 %v1962_v43  ;;  %v951_v21 = vadd.f32 %v950_v32, %v838_v33  ;;  %v1269_v29 = vmul.f32 0.01, %v1174_v0 }
 0x305   :  { %v1656_v34 = vsub.f32 1.5, %v1655_v9  ;;  %vm1237_vm10 = vcmp.ge.f32.partialorder %v1174_v0, 0.0 }
 0x306   :  { %v3146_v38 = vpop.eup %3145  ;;  %v1425_v5 = vsub.f32 %v3736_v46, %v1393_v3  ;;  %v3803_v50 = vadd.f32 1e-05, %v1581_v16  ;;  %v1064_v16 = vadd.f32 %v1063_v45, %v951_v21 }
 0x307   :  { %v1663_v57 = vmul.f32 %v3146_v38, %v3786_v23  ;;  %v1657_v17 = vmul.f32 %v3144_v40, %v1656_v34  ;;  %vm1669_vm8 = vweird.f32 %v3146_v38  ;;  %v1066_v34 = vpop.f32.mrf.mxu1  ;;  %v841_v23 = vadd.f32 %v840_v28, %v3625_v4 }
 0x308   :  { %3147 = vrsqrt.f32 %v3803_v50  ;;  %v3810_v20 = vsel %vm1319_vm7, %v1425_v5, 0.0  ;;  %vm1670_vm11 = vmor %vm1668_vm9, %vm1669_vm8  ;;  %v1177_v11 = vadd.f32 %v1176_v22, %v1064_v16  ;;  %vm1678_vm13 = vweird.f32 %v3803_v50 }
 0x309   :  { %v1664_v39 = vmul.f32 %v3146_v38, %v1663_v57  ;;  %v1491_v46 = vmul.f32 %v3810_v20, %v3810_v20  ;;  %v1661_v31 = vsel %vm1660_vm6, %v3144_v40, %v1657_v17  ;;  %v953_v62 = vpop.f32.mrf.mxu0  ;;  %v1179_v57 = vpop.f32.mrf.mxu2  ;;  %v3832_v17 = vsel %vm1237_vm10, %v1174_v0, %v1269_v29 }
 0x30a   :  { %v1963_v13 = vmul.f32 %v1661_v31, %v3709_v10  ;;  %v954_v4 = vadd.f32 %v953_v62, %v841_v23  ;;  %v1270_v0 = vmul.f32 0.01, %v1177_v11  ;;  %vm1238_vm14 = vcmp.ge.f32.partialorder %v1177_v11, 0.0 }
 0x30b   :  { %v1665_v26 = vmul.f32 0.5, %v1664_v39  ;;  %1532 = vadd.xlane.f32.xlu0 %v1491_v46  ;;  %1350 = vadd.xlane.f32.xlu1 %v3815_v42  ;;  %v1523_v1 = vpop.xlane.xlu2 %1522  ;;  %v1341_v55 = vpop.xlane.xlu0 %1340 }
 0x30c   :  { %v1582_v43 = vmul.f32 0.03125, %v1523_v1  ;;  %v1394_v9 = vmul.f32 0.03125, %v1341_v55  ;;  %2033 = vmatmul.f32.gmra.mxu3 %v1963_v13  ;;  %v843_v13 = vpop.f32.mrf.mxu3  ;;  %v1067_v55 = vadd.f32 %v1066_v34, %v954_v4  ;;  %v3849_v62 = vsel %vm1238_vm14, %v1177_v11, %v1270_v0 }
 0x30d   :  { %v1666_v25 = vsub.f32 1.5, %v1665_v26 }
 0x30e   :  { %v3148_v40 = vpop.eup %3147  ;;  %v3819_v54 = vadd.f32 1e-05, %v1582_v43  ;;  %v1426_v8 = vsub.f32 %v3747_v59, %v1394_v9 }
 0x30f   :  { %v1673_v10 = vmul.f32 %v3148_v40, %v3803_v50  ;;  %v1667_v3 = vmul.f32 %v3146_v38, %v1666_v25  ;;  %vm1679_vm12 = vweird.f32 %v3148_v40  ;;  %v844_v50 = vadd.f32 %v843_v13, %v3628_v58  ;;  %v1069_v29 = vpop.f32.mrf.mxu1 }
 0x310   :  { %3149 = vrsqrt.f32 %v3819_v54  ;;  %v3827_v32 = vsel %vm1319_vm7, %v1426_v8, 0.0  ;;  %vm1680_vm15 = vmor %vm1678_vm13, %vm1679_vm12  ;;  %v1180_v8 = vadd.f32 %v1179_v57, %v1067_v55  ;;  %vm1688_vm1 = vweird.f32 %v3819_v54 }
 0x311   :  { %v1674_v7 = vmul.f32 %v3148_v40, %v1673_v10  ;;  %v1492_v59 = vmul.f32 %v3827_v32, %v3827_v32  ;;  %v1671_v5 = vsel %vm1670_vm11, %v3146_v38, %v1667_v3  ;;  %v956_v9 = vpop.f32.mrf.mxu0 }
 0x312   :  { %v1964_v45 = vmul.f32 %v1671_v5, %v3720_v6  ;;  %v1182_v5 = vpop.f32.mrf.mxu2  ;;  %v957_v58 = vadd.f32 %v956_v9, %v844_v50  ;;  %vm1239_vm2 = vcmp.ge.f32.partialorder %v1180_v8, 0.0 }
 0x313   :  { %v1675_v2 = vmul.f32 0.5, %v1674_v7  ;;  %v1525_v39 = vpop.xlane.xlu1 %1524  ;;  %1352 = vadd.xlane.f32.xlu0 %v3832_v17  ;;  %v1343_v46 = vpop.xlane.xlu2 %1342  ;;  %1534 = vadd.xlane.f32.xlu2 %v1492_v59 }
 0x314   :  { %v1583_v31 = vmul.f32 0.03125, %v1525_v39  ;;  %v1395_v33 = vmul.f32 0.03125, %v1343_v46  ;;  %2036 = vmatmul.f32.gmra.mxu3 %v1964_v45  ;;  %v1271_v45 = vmul.f32 0.01, %v1180_v8  ;;  %v1070_v46 = vadd.f32 %v1069_v29, %v957_v58 }
 0x315   :  { %v1676_v26 = vsub.f32 1.5, %v1675_v2  ;;  %v846_v2 = vpop.f32.mrf.mxu3 }
 0x316   :  { %v3150_v38 = vpop.eup %3149  ;;  %v3836_v22 = vadd.f32 1e-05, %v1583_v31  ;;  %v1427_v28 = vsub.f32 %v3758_v60, %v1395_v33  ;;  %v1183_v4 = vadd.f32 %v1182_v5, %v1070_v46 }
 0x317   :  { %v1683_v6 = vmul.f32 %v3150_v38, %v3819_v54  ;;  %v1677_v1 = vmul.f32 %v3148_v40, %v1676_v26  ;;  %vm1689_vm0 = vweird.f32 %v3150_v38  ;;  %v847_v26 = vadd.f32 %v846_v2, %v3631_v49  ;;  %v1072_v9 = vpop.f32.mrf.mxu1 }
 0x318   :  { %3151 = vrsqrt.f32 %v3836_v22  ;;  %v3844_v43 = vsel %vm1319_vm7, %v1427_v28, 0.0  ;;  %vm1690_vm3 = vmor %vm1688_vm1, %vm1689_vm0  ;;  %v3863_v54 = vsel %vm1239_vm2, %v1180_v8, %v1271_v45  ;;  %vm1698_vm5 = vweird.f32 %v3836_v22 }
 0x319   :  { %v1684_v25 = vmul.f32 %v3150_v38, %v1683_v6  ;;  %v1493_v60 = vmul.f32 %v3844_v43, %v3844_v43  ;;  %v1681_v21 = vsel %vm1680_vm15, %v3148_v40, %v1677_v1  ;;  %v959_v0 = vpop.f32.mrf.mxu0  ;;  %vm1240_vm6 = vcmp.ge.f32.partialorder %v1183_v4, 0.0 }
 0x31a   :  { %v1965_v10 = vmul.f32 %v1681_v21, %v3731_v12  ;;  %v1272_v21 = vmul.f32 0.01, %v1183_v4  ;;  %v1185_v50 = vpop.f32.mrf.mxu2 }
 0x31b   :  { %v1685_v3 = vmul.f32 0.5, %v1684_v25  ;;  %v1345_v16 = vpop.xlane.xlu1 %1344  ;;  %1536 = vadd.xlane.f32.xlu1 %v1493_v60  ;;  %1354 = vadd.xlane.f32.xlu2 %v3849_v62  ;;  %v1527_v34 = vpop.xlane.xlu0 %1526 }
 0x31c   :  { %v1396_v7 = vmul.f32 0.03125, %v1345_v16  ;;  %v1584_v59 = vmul.f32 0.03125, %v1527_v34  ;;  %2039 = vmatmul.f32.gmra.mxu3 %v1965_v10 }
 0x31d   :  { %v1686_v23 = vsub.f32 1.5, %v1685_v3 }
 0x31e   :  { %v3152_v40 = vpop.eup %3151  ;;  %v1428_v57 = vsub.f32 %v3768_v24, %v1396_v7  ;;  %v1616_v11 = vadd.f32 1e-05, %v1584_v59 }
 0x31f   :  { %v1693_v12 = vmul.f32 %v3152_v40, %v3836_v22  ;;  %v1687_v39 = vmul.f32 %v3150_v38, %v1686_v23  ;;  %vm1699_vm4 = vweird.f32 %v3152_v40 }
 0x320   :  { %3153 = vrsqrt.f32 %v1616_v11  ;;  %v3858_v31 = vsel %vm1319_vm7, %v1428_v57, 0.0  ;;  %vm1700_vm8 = vmor %vm1698_vm5, %vm1699_vm4  ;;  %vm1708_vm10 = vweird.f32 %v1616_v11 }
 0x321   :  { %v1694_v33 = vmul.f32 %v3152_v40, %v1693_v12  ;;  %v1494_v24 = vmul.f32 %v3858_v31, %v3858_v31  ;;  %v1691_v13 = vsel %vm1690_vm3, %v3150_v38, %v1687_v39  ;;  %v960_v38 = vadd.f32 %v959_v0, %v847_v26  ;;  %v962_v2 = vpop.f32.mrf.mxu0  ;;  %v1075_v12 = vpop.f32.mrf.mxu1 }
 0x322   :  { %v1966_v28 = vmul.f32 %v1691_v13, %v3742_v35  ;;  %v1188_v39 = vpop.f32.mrf.mxu2 }
 0x323   :  { %v1695_v6 = vmul.f32 0.5, %v1694_v33  ;;  %1538 = vadd.xlane.f32.xlu0 %v1494_v24  ;;  %1356 = vadd.xlane.f32.xlu1 %v3863_v54  ;;  %v1347_v1 = vpop.xlane.xlu0 %1346  ;;  %v1073_v29 = vadd.f32 %v1072_v9, %v960_v38 }
 0x324   :  { %v1397_v55 = vmul.f32 0.03125, %v1347_v1  ;;  %2042 = vmatmul.f32.gmra.mxu3 %v1966_v28 }
 0x325   :  { %v1696_v25 = vsub.f32 1.5, %v1695_v6  ;;  %v1186_v7 = vadd.f32 %v1185_v50, %v1073_v29 }
 0x326   :  { %v3154_v60 = vpop.eup %3153  ;;  %v1429_v49 = vsub.f32 %v3771_v19, %v1397_v55  ;;  %v3875_v19 = vsel %vm1240_vm6, %v1183_v4, %v1272_v21 }
 0x327   :  { %v1703_v35 = vmul.f32 %v3154_v60, %v1616_v11  ;;  %v1697_v8 = vmul.f32 %v3152_v40, %v1696_v25  ;;  %vm1709_vm9 = vweird.f32 %v3154_v60  ;;  %v1273_v23 = vmul.f32 0.01, %v1186_v7 }
 0x328   :  { %v3871_v10 = vsel %vm1319_vm7, %v1429_v49, 0.0  ;;  %vm1241_vm11 = vcmp.ge.f32.partialorder %v1186_v7, 0.0  ;;  %vm1710_vm12 = vmor %vm1708_vm10, %vm1709_vm9 }
 0x329   :  { %v1704_v3 = vmul.f32 %v3154_v60, %v1703_v35  ;;  %v1495_v16 = vmul.f32 %v3871_v10, %v3871_v10  ;;  %v1701_v34 = vsel %vm1700_vm8, %v3152_v40, %v1697_v8  ;;  %v3879_v45 = vsel %vm1241_vm11, %v1186_v7, %v1273_v23  ;;  %v965_v11 = vpop.f32.mrf.mxu0  ;;  %v1078_v4 = vpop.f32.mrf.mxu1 }
 0x32a   :  { %v1967_v59 = vmul.f32 %v1701_v34, %v3753_v47  ;;  %v849_v47 = vpop.f32.mrf.mxu3  ;;  %v1191_v6 = vpop.f32.mrf.mxu2 }
 0x32b   :  { %v1705_v22 = vmul.f32 0.5, %v1704_v3  ;;  %1358 = vadd.xlane.f32.xlu0 %v3875_v19  ;;  %1540 = vadd.xlane.f32.xlu2 %v1495_v16  ;;  %v850_v26 = vadd.f32 %v849_v47, %v3634_v27 }
 0x32c   :  { %2045 = vmatmul.f32.gmra.mxu3 %v1967_v59 }
 0x32d   :  { %v1706_v5 = vsub.f32 1.5, %v1705_v22  ;;  %v963_v9 = vadd.f32 %v962_v2, %v850_v26 }
 0x32f   :  { %v1707_v58 = vmul.f32 %v3154_v60, %v1706_v5  ;;  %v1076_v21 = vadd.f32 %v1075_v12, %v963_v9 }
 0x331   :  { %v1711_v57 = vsel %vm1710_vm12, %v3154_v60, %v1707_v58  ;;  %v968_v29 = vpop.f32.mrf.mxu0  ;;  %v1189_v3 = vadd.f32 %v1188_v39, %v1076_v21  ;;  %v1081_v7 = vpop.f32.mrf.mxu1 }
 0x332   :  { %v1968_v40 = vmul.f32 %v1711_v57, %v3764_v63  ;;  %v852_v33 = vpop.f32.mrf.mxu3  ;;  %v1194_v57 = vpop.f32.mrf.mxu2 }
 0x333   :  { %1360 = vadd.xlane.f32.xlu2 %v3879_v45  ;;  %v853_v8 = vadd.f32 %v852_v33, %v3637_v61  ;;  %v1274_v2 = vmul.f32 0.01, %v1189_v3  ;;  %vm1242_vm15 = vcmp.ge.f32.partialorder %v1189_v3, 0.0 }
 0x334   :  { %2048 = vmatmul.f32.gmra.mxu3 %v1968_v40 }
 0x335   :  { %v966_v58 = vadd.f32 %v965_v11, %v853_v8 }
 0x33a   :  { %v855_v25 = vpop.f32.mrf.mxu3 }
 0x342   :  { %v858_v39 = vpop.f32.mrf.mxu3 }
 0x36e   :  { %v1529_v46 = vpop.xlane.xlu2 %1528 }
 0x36f   :  { %v1585_v24 = vmul.f32 0.03125, %v1529_v46  ;;  %v1079_v46 = vadd.f32 %v1078_v4, %v966_v58 }
 0x371   :  { %v1617_v13 = vadd.f32 1e-05, %v1585_v24  ;;  %v1192_v26 = vadd.f32 %v1191_v6, %v1079_v46 }
 0x373   :  { %3155 = vrsqrt.f32 %v1617_v13  ;;  %vm1718_vm14 = vweird.f32 %v1617_v13  ;;  %vm1243_vm3 = vcmp.ge.f32.partialorder %v1192_v26, 0.0 }
 0x376   :  { %v1531_v28 = vpop.xlane.xlu1 %1530  ;;  %v1349_v0 = vpop.xlane.xlu2 %1348 }
 0x377   :  { %v1586_v63 = vmul.f32 0.03125, %v1531_v28  ;;  %v1398_v1 = vmul.f32 0.03125, %v1349_v0  ;;  %v3907_v28 = vsel %vm1242_vm15, %v1189_v3, %v1274_v2 }
 0x379   :  { %v3156_v55 = vpop.eup %3155  ;;  %v3884_v60 = vadd.f32 1e-05, %v1586_v63  ;;  %v1430_v38 = vsub.f32 %v3799_v52, %v1398_v1 }
 0x37a   :  { %v1713_v49 = vmul.f32 %v3156_v55, %v1617_v13  ;;  %vm1719_vm13 = vweird.f32 %v3156_v55  ;;  %v856_v13 = vadd.f32 %v855_v25, %v3640_v51  ;;  %v1084_v51 = vpop.f32.mrf.mxu1 }
 0x37b   :  { %3157 = vrsqrt.f32 %v3884_v60  ;;  %v3890_v27 = vsel %vm1319_vm7, %v1430_v38, 0.0  ;;  %vm1720_vm0 = vmor %vm1718_vm14, %vm1719_vm13  ;;  %vm1728_vm2 = vweird.f32 %v3884_v60 }
 0x37c   :  { %v1714_v50 = vmul.f32 %v3156_v55, %v1713_v49  ;;  %v1496_v35 = vmul.f32 %v3890_v27, %v3890_v27  ;;  %v971_v49 = vpop.f32.mrf.mxu0 }
 0x37e   :  { %v1715_v16 = vmul.f32 0.5, %v1714_v50  ;;  %v1351_v34 = vpop.xlane.xlu1 %1350  ;;  %1542 = vadd.xlane.f32.xlu1 %v1496_v35  ;;  %v1533_v52 = vpop.xlane.xlu0 %1532  ;;  %v969_v50 = vadd.f32 %v968_v29, %v856_v13 }
 0x37f   :  { %v1399_v59 = vmul.f32 0.03125, %v1351_v34  ;;  %v1587_v22 = vmul.f32 0.03125, %v1533_v52 }
 0x380   :  { %v1716_v5 = vsub.f32 1.5, %v1715_v16  ;;  %v1082_v3 = vadd.f32 %v1081_v7, %v969_v50  ;;  %v1197_v16 = vpop.f32.mrf.mxu2 }
 0x381   :  { %v3158_v23 = vpop.eup %3157  ;;  %v1431_v40 = vsub.f32 %v3815_v42, %v1399_v59  ;;  %v3896_v47 = vadd.f32 1e-05, %v1587_v22  ;;  %v861_v59 = vpop.f32.mrf.mxu3 }
 0x382   :  { %v1723_v61 = vmul.f32 %v3158_v23, %v3884_v60  ;;  %v1717_v12 = vmul.f32 %v3156_v55, %v1716_v5  ;;  %vm1729_vm1 = vweird.f32 %v3158_v23  ;;  %v859_v60 = vadd.f32 %v858_v39, %v3643_v14 }
 0x383   :  { %3159 = vrsqrt.f32 %v3896_v47  ;;  %v3902_v33 = vsel %vm1319_vm7, %v1431_v40, 0.0  ;;  %vm1730_vm4 = vmor %vm1728_vm2, %vm1729_vm1  ;;  %v1195_v22 = vadd.f32 %v1194_v57, %v1082_v3  ;;  %vm1738_vm6 = vweird.f32 %v3896_v47 }
 0x384   :  { %v1724_v24 = vmul.f32 %v3158_v23, %v1723_v61  ;;  %v1497_v42 = vmul.f32 %v3902_v33, %v3902_v33  ;;  %v1721_v11 = vsel %vm1720_vm0, %v3156_v55, %v1717_v12 }
 0x385   :  { %v1969_v0 = vmul.f32 %v1721_v11, %v3781_v15  ;;  %v1275_v15 = vmul.f32 0.01, %v1192_v26  ;;  %v1276_v39 = vmul.f32 0.01, %v1195_v22  ;;  %vm1244_vm8 = vcmp.ge.f32.partialorder %v1195_v22, 0.0 }
 0x386   :  { %v1725_v4 = vmul.f32 0.5, %v1724_v24  ;;  %1544 = vadd.xlane.f32.xlu0 %v1497_v42  ;;  %1362 = vadd.xlane.f32.xlu1 %v3907_v28  ;;  %v1535_v63 = vpop.xlane.xlu2 %1534  ;;  %v1353_v1 = vpop.xlane.xlu0 %1352  ;;  %v972_v24 = vadd.f32 %v971_v49, %v859_v60 }
 0x387   :  { %v1588_v9 = vmul.f32 0.03125, %v1535_v63  ;;  %v1400_v38 = vmul.f32 0.03125, %v1353_v1  ;;  %2051 = vmatmul.f32.gmra.mxu3 %v1969_v0  ;;  %v3924_v5 = vsel %vm1243_vm3, %v1192_v26, %v1275_v15  ;;  %v974_v42 = vpop.f32.mrf.mxu0  ;;  %v1087_v26 = vpop.f32.mrf.mxu1 }
 0x388   :  { %v1726_v21 = vsub.f32 1.5, %v1725_v4  ;;  %v1085_v13 = vadd.f32 %v1084_v51, %v972_v24 }
 0x389   :  { %v3160_v55 = vpop.eup %3159  ;;  %v3911_v6 = vadd.f32 1e-05, %v1588_v9  ;;  %v1432_v25 = vsub.f32 %v3832_v17, %v1400_v38  ;;  %v1200_v9 = vpop.f32.mrf.mxu2  ;;  %v3941_v38 = vsel %vm1244_vm8, %v1195_v22, %v1276_v39 }
 0x38a   :  { %v1733_v35 = vmul.f32 %v3160_v55, %v3896_v47  ;;  %v1727_v8 = vmul.f32 %v3158_v23, %v1726_v21  ;;  %vm1739_vm5 = vweird.f32 %v3160_v55  ;;  %v862_v47 = vadd.f32 %v861_v59, %v3646_v56 }
 0x38b   :  { %3161 = vrsqrt.f32 %v3911_v6  ;;  %v3919_v29 = vsel %vm1319_vm7, %v1432_v25, 0.0  ;;  %vm1740_vm9 = vmor %vm1738_vm6, %vm1739_vm5  ;;  %v1198_v1 = vadd.f32 %v1197_v16, %v1085_v13  ;;  %vm1748_vm11 = vweird.f32 %v3911_v6 }
 0x38c   :  { %v1734_v34 = vmul.f32 %v3160_v55, %v1733_v35  ;;  %v1498_v17 = vmul.f32 %v3919_v29, %v3919_v29  ;;  %v1731_v52 = vsel %vm1730_vm4, %v3158_v23, %v1727_v8  ;;  %v864_v35 = vpop.f32.mrf.mxu3  ;;  %v975_v56 = vadd.f32 %v974_v42, %v862_v47 }
 0x38d   :  { %v1970_v7 = vmul.f32 %v1731_v52, %v3793_v36  ;;  %vm1245_vm12 = vcmp.ge.f32.partialorder %v1198_v1, 0.0 }
 0x38e   :  { %v1735_v58 = vmul.f32 0.5, %v1734_v34  ;;  %1364 = vadd.xlane.f32.xlu0 %v3924_v5  ;;  %v1537_v40 = vpop.xlane.xlu1 %1536  ;;  %v1355_v2 = vpop.xlane.xlu2 %1354  ;;  %1546 = vadd.xlane.f32.xlu2 %v1498_v17  ;;  %v1277_v34 = vmul.f32 0.01, %v1198_v1  ;;  %v1088_v52 = vadd.f32 %v1087_v26, %v975_v56 }
 0x38f   :  { %v1589_v61 = vmul.f32 0.03125, %v1537_v40  ;;  %v1401_v12 = vmul.f32 0.03125, %v1355_v2  ;;  %2054 = vmatmul.f32.gmra.mxu3 %v1970_v7  ;;  %v977_v59 = vpop.f32.mrf.mxu0  ;;  %v1090_v40 = vpop.f32.mrf.mxu1 }
 0x390   :  { %v1736_v46 = vsub.f32 1.5, %v1735_v58  ;;  %v1201_v58 = vadd.f32 %v1200_v9, %v1088_v52  ;;  %v3958_v2 = vsel %vm1245_vm12, %v1198_v1, %v1277_v34 }
 0x391   :  { %v3162_v23 = vpop.eup %3161  ;;  %v3928_v14 = vadd.f32 1e-05, %v1589_v61  ;;  %v1433_v57 = vsub.f32 %v3849_v62, %v1401_v12  ;;  %v1203_v42 = vpop.f32.mrf.mxu2 }
 0x392   :  { %v1743_v36 = vmul.f32 %v3162_v23, %v3911_v6  ;;  %v1737_v11 = vmul.f32 %v3160_v55, %v1736_v46  ;;  %vm1749_vm10 = vweird.f32 %v3162_v23  ;;  %v865_v6 = vadd.f32 %v864_v35, %v3649_v18 }
 0x393   :  { %3163 = vrsqrt.f32 %v3928_v14  ;;  %v3936_v0 = vsel %vm1319_vm7, %v1433_v57, 0.0  ;;  %vm1750_vm13 = vmor %vm1748_vm11, %vm1749_vm10  ;;  %v1278_v26 = vmul.f32 0.01, %v1201_v58  ;;  %vm1758_vm15 = vweird.f32 %v3928_v14 }
 0x394   :  { %v1744_v4 = vmul.f32 %v3162_v23, %v1743_v36  ;;  %v1499_v62 = vmul.f32 %v3936_v0, %v3936_v0  ;;  %v1741_v63 = vsel %vm1740_vm9, %v3160_v55, %v1737_v11  ;;  %v978_v18 = vadd.f32 %v977_v59, %v865_v6 }
 0x395   :  { %v1971_v49 = vmul.f32 %v1741_v63, %v3810_v20  ;;  %vm1246_vm0 = vcmp.ge.f32.partialorder %v1201_v58, 0.0 }
 0x396   :  { %v1745_v21 = vmul.f32 0.5, %v1744_v4  ;;  %v1357_v50 = vpop.xlane.xlu1 %1356  ;;  %1548 = vadd.xlane.f32.xlu1 %v1499_v62  ;;  %1366 = vadd.xlane.f32.xlu2 %v3941_v38  ;;  %v1539_v51 = vpop.xlane.xlu0 %1538  ;;  %v1091_v63 = vadd.f32 %v1090_v40, %v978_v18 }
 0x397   :  { %v1402_v25 = vmul.f32 0.03125, %v1357_v50  ;;  %v1590_v15 = vmul.f32 0.03125, %v1539_v51  ;;  %2057 = vmatmul.f32.gmra.mxu3 %v1971_v49  ;;  %v867_v4 = vpop.f32.mrf.mxu3  ;;  %v980_v51 = vpop.f32.mrf.mxu0 }
 0x398   :  { %v1746_v8 = vsub.f32 1.5, %v1745_v21  ;;  %v868_v49 = vadd.f32 %v867_v4, %v3652_v30  ;;  %v1204_v21 = vadd.f32 %v1203_v42, %v1091_v63 }
 0x399   :  { %v3164_v55 = vpop.eup %3163  ;;  %v1434_v3 = vsub.f32 %v3863_v54, %v1402_v25  ;;  %v3946_v16 = vadd.f32 1e-05, %v1590_v15 }
 0x39a   :  { %v1753_v20 = vmul.f32 %v3164_v55, %v3928_v14  ;;  %v1747_v17 = vmul.f32 %v3162_v23, %v1746_v8  ;;  %vm1759_vm14 = vweird.f32 %v3164_v55  ;;  %v3972_v14 = vsel %vm1246_vm0, %v1201_v58, %v1278_v26  ;;  %v1093_v8 = vpop.f32.mrf.mxu1 }
 0x39b   :  { %3165 = vrsqrt.f32 %v3946_v16  ;;  %v3953_v60 = vsel %vm1319_vm7, %v1434_v3, 0.0  ;;  %vm1760_vm1 = vmor %vm1758_vm15, %vm1759_vm14  ;;  %v1279_v34 = vmul.f32 0.01, %v1204_v21  ;;  %vm1768_vm3 = vweird.f32 %v3946_v16 }
 0x39c   :  { %v1754_v22 = vmul.f32 %v3164_v55, %v1753_v20  ;;  %v1500_v54 = vmul.f32 %v3953_v60, %v3953_v60  ;;  %v1751_v7 = vsel %vm1750_vm13, %v3162_v23, %v1747_v17  ;;  %v1206_v20 = vpop.f32.mrf.mxu2  ;;  %vm1247_vm4 = vcmp.ge.f32.partialorder %v1204_v21, 0.0 }
 0x39d   :  { %v1972_v61 = vmul.f32 %v1751_v7, %v3827_v32 }
 0x39e   :  { %v1755_v12 = vmul.f32 0.5, %v1754_v22  ;;  %1550 = vadd.xlane.f32.xlu0 %v1500_v54  ;;  %1368 = vadd.xlane.f32.xlu1 %v3958_v2  ;;  %v1541_v46 = vpop.xlane.xlu2 %1540  ;;  %v1359_v24 = vpop.xlane.xlu0 %1358 }
 0x39f   :  { %v1591_v57 = vmul.f32 0.03125, %v1541_v46  ;;  %v1403_v39 = vmul.f32 0.03125, %v1359_v24  ;;  %2060 = vmatmul.f32.gmra.mxu3 %v1972_v61 }
 0x3a0   :  { %v1756_v36 = vsub.f32 1.5, %v1755_v12 }
 0x3a1   :  { %v3166_v23 = vpop.eup %3165  ;;  %v1623_v11 = vadd.f32 1e-05, %v1591_v57  ;;  %v1435_v13 = vsub.f32 %v3875_v19, %v1403_v39  ;;  %v983_v39 = vpop.f32.mrf.mxu0 }
 0x3a2   :  { %v1763_v32 = vmul.f32 %v3166_v23, %v3946_v16  ;;  %v1757_v62 = vmul.f32 %v3164_v55, %v1756_v36  ;;  %vm1769_vm2 = vweird.f32 %v3166_v23 }
 0x3a3   :  { %3167 = vrsqrt.f32 %v1623_v11  ;;  %v3967_v47 = vsel %vm1319_vm7, %v1435_v13, 0.0  ;;  %vm1770_vm5 = vmor %vm1768_vm3, %vm1769_vm2  ;;  %vm1778_vm8 = vweird.f32 %v1623_v11 }
 0x3a4   :  { %v1764_v1 = vmul.f32 %v3166_v23, %v1763_v32  ;;  %v1501_v9 = vmul.f32 %v3967_v47, %v3967_v47  ;;  %v1761_v19 = vsel %vm1760_vm1, %v3164_v55, %v1757_v62  ;;  %v981_v55 = vadd.f32 %v980_v51, %v868_v49  ;;  %v1209_v26 = vpop.f32.mrf.mxu2 }
 0x3a5   :  { %v1973_v50 = vmul.f32 %v1761_v19, %v3844_v43 }
 0x3a6   :  { %v1765_v25 = vmul.f32 0.5, %v1764_v1  ;;  %1370 = vadd.xlane.f32.xlu0 %v3972_v14  ;;  %v1361_v15 = vpop.xlane.xlu2 %1360  ;;  %1552 = vadd.xlane.f32.xlu2 %v1501_v9  ;;  %v1094_v52 = vadd.f32 %v1093_v8, %v981_v55 }
 0x3a7   :  { %v1404_v35 = vmul.f32 0.03125, %v1361_v15  ;;  %2063 = vmatmul.f32.gmra.mxu3 %v1973_v50 }
 0x3a8   :  { %v1766_v56 = vsub.f32 1.5, %v1765_v25  ;;  %v1207_v6 = vadd.f32 %v1206_v20, %v1094_v52 }
 0x3a9   :  { %v3168_v3 = vpop.eup %3167  ;;  %v1436_v30 = vsub.f32 %v3879_v45, %v1404_v35  ;;  %v3984_v45 = vsel %vm1247_vm4, %v1204_v21, %v1279_v34  ;;  %v986_v1 = vpop.f32.mrf.mxu0 }
 0x3aa   :  { %v1773_v43 = vmul.f32 %v3168_v3, %v1623_v11  ;;  %v1767_v17 = vmul.f32 %v3166_v23, %v1766_v56  ;;  %vm1779_vm6 = vweird.f32 %v3168_v3  ;;  %v1280_v61 = vmul.f32 0.01, %v1207_v6 }
 0x3ab   :  { %v3980_v59 = vsel %vm1319_vm7, %v1436_v30, 0.0  ;;  %vm1248_vm9 = vcmp.ge.f32.partialorder %v1207_v6, 0.0  ;;  %vm1780_vm10 = vmor %vm1778_vm8, %vm1779_vm6 }
 0x3ac   :  { %v1774_v22 = vmul.f32 %v3168_v3, %v1773_v43  ;;  %v1502_v54 = vmul.f32 %v3980_v59, %v3980_v59  ;;  %v1771_v7 = vsel %vm1770_vm5, %v3166_v23, %v1767_v17  ;;  %v3988_v24 = vsel %vm1248_vm9, %v1207_v6, %v1280_v61  ;;  %v1096_v23 = vpop.f32.mrf.mxu1 }
 0x3ad   :  { %v1974_v58 = vmul.f32 %v1771_v7, %v3858_v31  ;;  %v870_v31 = vpop.f32.mrf.mxu3 }
 0x3ae   :  { %v1775_v16 = vmul.f32 0.5, %v1774_v22  ;;  %1554 = vadd.xlane.f32.xlu1 %v1502_v54  ;;  %1372 = vadd.xlane.f32.xlu2 %v3984_v45  ;;  %v871_v11 = vadd.f32 %v870_v31, %v3655_v44 }
 0x3af   :  { %2066 = vmatmul.f32.gmra.mxu3 %v1974_v58 }
 0x3b0   :  { %v1776_v40 = vsub.f32 1.5, %v1775_v16  ;;  %v984_v9 = vadd.f32 %v983_v39, %v871_v11 }
 0x3b1   :  { %v989_v6 = vpop.f32.mrf.mxu0 }
 0x3b2   :  { %v1777_v12 = vmul.f32 %v3168_v3, %v1776_v40  ;;  %v1097_v25 = vadd.f32 %v1096_v23, %v984_v9 }
 0x3b4   :  { %v1781_v46 = vsel %vm1780_vm10, %v3168_v3, %v1777_v12  ;;  %v1099_v49 = vpop.f32.mrf.mxu1  ;;  %v1210_v56 = vadd.f32 %v1209_v26, %v1097_v25  ;;  %v1212_v3 = vpop.f32.mrf.mxu2 }
 0x3b5   :  { %v1975_v57 = vmul.f32 %v1781_v46, %v3871_v10  ;;  %v873_v36 = vpop.f32.mrf.mxu3 }
 0x3b6   :  { %1374 = vadd.xlane.f32.xlu1 %v3988_v24  ;;  %v874_v8 = vadd.f32 %v873_v36, %v3658_v41  ;;  %v1281_v7 = vmul.f32 0.01, %v1210_v56  ;;  %vm1249_vm13 = vcmp.ge.f32.partialorder %v1210_v56, 0.0 }
 0x3b7   :  { %2069 = vmatmul.f32.gmra.mxu3 %v1975_v57 }
 0x3b8   :  { %v987_v52 = vadd.f32 %v986_v1, %v874_v8 }
 0x3b9   :  { %v992_v25 = vpop.f32.mrf.mxu0 }
 0x3ba   :  { %v1100_v40 = vadd.f32 %v1099_v49, %v987_v52 }
 0x3bc   :  { %v1102_v61 = vpop.f32.mrf.mxu1  ;;  %v1213_v39 = vadd.f32 %v1212_v3, %v1100_v40  ;;  %v1215_v26 = vpop.f32.mrf.mxu2 }
 0x3bd   :  { %v876_v19 = vpop.f32.mrf.mxu3 }
 0x3be   :  { %v877_v31 = vadd.f32 %v876_v19, %v3661_v37  ;;  %vm1250_vm1 = vcmp.ge.f32.partialorder %v1213_v39, 0.0 }
 0x3c4   :  { %v1105_v8 = vpop.f32.mrf.mxu1 }
 0x3c5   :  { %v879_v16 = vpop.f32.mrf.mxu3 }
 0x3c6   :  { %v880_v19 = vadd.f32 %v879_v16, %v3664_v48 }
 0x3f1   :  { %v1543_v42 = vpop.xlane.xlu1 %1542 }
 0x3f2   :  { %v1592_v18 = vmul.f32 0.03125, %v1543_v42  ;;  %v4016_v42 = vsel %vm1249_vm13, %v1210_v56, %v1281_v7  ;;  %v4040_v7 = vld [vmem:[%s4656_s4] ss:$0 sm:$0xff] }
 0x3f4   :  { %v1624_v13 = vadd.f32 1e-05, %v1592_v18 }
 0x3f6   :  { %3169 = vrsqrt.f32 %v1624_v13  ;;  %vm1788_vm12 = vweird.f32 %v1624_v13 }
 0x3f9   :  { %v1363_v4 = vpop.xlane.xlu1 %1362  ;;  %v1545_v32 = vpop.xlane.xlu0 %1544 }
 0x3fa   :  { %v1405_v62 = vmul.f32 0.03125, %v1363_v4  ;;  %v1593_v63 = vmul.f32 0.03125, %v1545_v32 }
 0x3fc   :  { %v3170_v10 = vpop.eup %3169  ;;  %v1437_v21 = vsub.f32 %v3907_v28, %v1405_v62  ;;  %v3994_v50 = vadd.f32 1e-05, %v1593_v63  ;;  %v990_v63 = vadd.f32 %v989_v6, %v877_v31 }
 0x3fd   :  { %v1783_v51 = vmul.f32 %v3170_v10, %v1624_v13  ;;  %vm1789_vm11 = vweird.f32 %v3170_v10 }
 0x3fe   :  { %3171 = vrsqrt.f32 %v3994_v50  ;;  %v3999_v44 = vsel %vm1319_vm7, %v1437_v21, 0.0  ;;  %vm1790_vm14 = vmor %vm1788_vm12, %vm1789_vm11  ;;  %vm1798_vm0 = vweird.f32 %v3994_v50  ;;  %v1103_v49 = vadd.f32 %v1102_v61, %v990_v63  ;;  %v2031_v21 = vpop.f32.mrf.mxu3 }
 0x3ff   :  { %v1784_v15 = vmul.f32 %v3170_v10, %v1783_v51  ;;  %v1503_v35 = vmul.f32 %v3999_v44, %v3999_v44 }
 0x401   :  { %v1785_v55 = vmul.f32 0.5, %v1784_v15  ;;  %1556 = vadd.xlane.f32.xlu0 %v1503_v35  ;;  %v1547_v28 = vpop.xlane.xlu2 %1546  ;;  %v1365_v30 = vpop.xlane.xlu0 %1364  ;;  %v1216_v35 = vadd.f32 %v1215_v26, %v1103_v49 }
 0x402   :  { %v1594_v34 = vmul.f32 0.03125, %v1547_v28  ;;  %v1406_v20 = vmul.f32 0.03125, %v1365_v30  ;;  %v993_v30 = vadd.f32 %v992_v25, %v880_v19 }
 0x403   :  { %v1786_v43 = vsub.f32 1.5, %v1785_v55  ;;  %vm1251_vm5 = vcmp.ge.f32.partialorder %v1216_v35, 0.0 }
 0x404   :  { %v3172_v17 = vpop.eup %3171  ;;  %v4004_v22 = vadd.f32 1e-05, %v1594_v34  ;;  %v1438_v54 = vsub.f32 %v3924_v5, %v1406_v20 }
 0x405   :  { %v1793_v41 = vmul.f32 %v3172_v17, %v3994_v50  ;;  %v1787_v58 = vmul.f32 %v3170_v10, %v1786_v43  ;;  %vm1799_vm15 = vweird.f32 %v3172_v17 }
 0x406   :  { %3173 = vrsqrt.f32 %v4004_v22  ;;  %v4011_v12 = vsel %vm1319_vm7, %v1438_v54, 0.0  ;;  %vm1800_vm2 = vmor %vm1798_vm0, %vm1799_vm15  ;;  %v1218_v54 = vpop.f32.mrf.mxu2  ;;  %vm1808_vm4 = vweird.f32 %v4004_v22 }
 0x407   :  { %v1794_v46 = vmul.f32 %v3172_v17, %v1793_v41  ;;  %v1504_v5 = vmul.f32 %v4011_v12, %v4011_v12  ;;  %v1791_v57 = vsel %vm1790_vm14, %v3170_v10, %v1787_v58  ;;  %v1282_v10 = vmul.f32 0.01, %v1213_v39 }
 0x408   :  { %v1976_v36 = vmul.f32 %v1791_v57, %v3890_v27  ;;  %v1283_v41 = vmul.f32 0.01, %v1216_v35  ;;  %v2032_v57 = vadd.f32 %v4040_v7, %v2031_v21 }
 0x409   :  { %v1795_v23 = vmul.f32 0.5, %v1794_v46  ;;  %1376 = vadd.xlane.f32.xlu0 %v4016_v42  ;;  %v1549_v18 = vpop.xlane.xlu1 %1548  ;;  %v1367_v13 = vpop.xlane.xlu2 %1366  ;;  %1558 = vadd.xlane.f32.xlu2 %v1504_v5  ;;  %v4033_v56 = vsel %vm1250_vm1, %v1213_v39, %v1282_v10 }
 0x40a   :  { %v1595_v11 = vmul.f32 0.03125, %v1549_v18  ;;  %v1407_v4 = vmul.f32 0.03125, %v1367_v13  ;;  %2072 = vmatmul.f32.gmra.mxu3 %v1976_v36  ;;  %v4055_v31 = vsel %vm1251_vm5, %v1216_v35, %v1283_v41  ;;  %vm2127_vm11 = vcmp.ge.f32.partialorder %v2032_v57, 0.0 }
 0x40b   :  { %v1796_v32 = vsub.f32 1.5, %v1795_v23 }
 0x40c   :  { %v3174_v62 = vpop.eup %3173  ;;  %v4020_v37 = vadd.f32 1e-05, %v1595_v11  ;;  %v1439_v1 = vsub.f32 %v3941_v38, %v1407_v4 }
 0x40d   :  { %v1803_v27 = vmul.f32 %v3174_v62, %v4004_v22  ;;  %v1797_v9 = vmul.f32 %v3172_v17, %v1796_v32  ;;  %vm1809_vm3 = vweird.f32 %v3174_v62  ;;  %v2034_v22 = vpop.f32.mrf.mxu3 }
 0x40e   :  { %3175 = vrsqrt.f32 %v4020_v37  ;;  %v4029_v51 = vsel %vm1319_vm7, %v1439_v1, 0.0  ;;  %vm1810_vm6 = vmor %vm1808_vm4, %vm1809_vm3  ;;  %v2159_v1 = vmul.f32 0.01, %v2032_v57  ;;  %vm1818_vm10 = vweird.f32 %v4020_v37 }
 0x40f   :  { %v1804_v38 = vmul.f32 %v3174_v62, %v1803_v27  ;;  %v1505_v50 = vmul.f32 %v4029_v51, %v4029_v51  ;;  %v1801_v15 = vsel %vm1800_vm2, %v3172_v17, %v1797_v9  ;;  %v1106_v17 = vadd.f32 %v1105_v8, %v993_v30 }
 0x410   :  { %v1977_v48 = vmul.f32 %v1801_v15, %v3902_v33 }
 0x411   :  { %v1805_v3 = vmul.f32 0.5, %v1804_v38  ;;  %v1369_v55 = vpop.xlane.xlu1 %1368  ;;  %1560 = vadd.xlane.f32.xlu1 %v1505_v50  ;;  %1378 = vadd.xlane.f32.xlu2 %v4033_v56  ;;  %v1551_v28 = vpop.xlane.xlu0 %1550  ;;  %v1219_v61 = vadd.f32 %v1218_v54, %v1106_v17 }
 0x412   :  { %v1408_v34 = vmul.f32 0.03125, %v1369_v55  ;;  %v1596_v20 = vmul.f32 0.03125, %v1551_v28  ;;  %2075 = vmatmul.f32.gmra.mxu3 %v1977_v48 }
 0x413   :  { %v1806_v43 = vsub.f32 1.5, %v1805_v3  ;;  %vm1252_vm9 = vcmp.ge.f32.partialorder %v1219_v61, 0.0  ;;  %v1284_v63 = vmul.f32 0.01, %v1219_v61 }
 0x414   :  { %v3176_v52 = vpop.eup %3175  ;;  %v1440_v33 = vsub.f32 %v3958_v2, %v1408_v34  ;;  %v4043_v6 = vadd.f32 1e-05, %v1596_v20 }
 0x415   :  { %v1813_v58 = vmul.f32 %v3176_v52, %v4020_v37  ;;  %v1807_v16 = vmul.f32 %v3174_v62, %v1806_v43  ;;  %vm1819_vm8 = vweird.f32 %v3176_v52  ;;  %v4070_v21 = vsel %vm1252_vm9, %v1219_v61, %v1284_v63  ;;  %v2037_v48 = vpop.f32.mrf.mxu3 }
 0x416   :  { %3177 = vrsqrt.f32 %v4043_v6  ;;  %v4050_v40 = vsel %vm1319_vm7, %v1440_v33, 0.0  ;;  %vm1820_vm12 = vmor %vm1818_vm10, %vm1819_vm8  ;;  %v4072_v37 = vsel %vm2127_vm11, %v2032_v57, %v2159_v1  ;;  %vm1828_vm14 = vweird.f32 %v4043_v6 }
 0x417   :  { %v1814_v46 = vmul.f32 %v3176_v52, %v1813_v58  ;;  %v1506_v2 = vmul.f32 %v4050_v40, %v4050_v40  ;;  %v1811_v5 = vsel %vm1810_vm6, %v3174_v62, %v1807_v16 }
 0x418   :  { %v1978_v39 = vmul.f32 %v1811_v5, %v3919_v29 }
 0x419   :  { %v1815_v36 = vmul.f32 0.5, %v1814_v46  ;;  %1562 = vadd.xlane.f32.xlu0 %v1506_v2  ;;  %1380 = vadd.xlane.f32.xlu1 %v4055_v31  ;;  %v1553_v23 = vpop.xlane.xlu2 %1552  ;;  %v1371_v18 = vpop.xlane.xlu0 %1370 }
 0x41a   :  { %v1597_v13 = vmul.f32 0.03125, %v1553_v23  ;;  %v1409_v26 = vmul.f32 0.03125, %v1371_v18  ;;  %2078 = vmatmul.f32.gmra.mxu3 %v1978_v39 }
 0x41b   :  { %v1816_v11 = vsub.f32 1.5, %v1815_v36 }
 0x41c   :  { %v3178_v4 = vpop.eup %3177  ;;  %v1629_v32 = vadd.f32 1e-05, %v1597_v13  ;;  %v1441_v62 = vsub.f32 %v3972_v14, %v1409_v26  ;;  %v2035_v14 = vadd.f32 %v4040_v7, %v2034_v22 }
 0x41d   :  { %v1823_v29 = vmul.f32 %v3178_v4, %v4043_v6  ;;  %v1817_v10 = vmul.f32 %v3176_v52, %v1816_v11  ;;  %vm1829_vm13 = vweird.f32 %v3178_v4  ;;  %v2038_v6 = vadd.f32 %v4040_v7, %v2037_v48  ;;  %v2040_v5 = vpop.f32.mrf.mxu3 }
 0x41e   :  { %3179 = vrsqrt.f32 %v1629_v32  ;;  %v4064_v27 = vsel %vm1319_vm7, %v1441_v62, 0.0  ;;  %v2160_v34 = vmul.f32 0.01, %v2035_v14  ;;  %vm2128_vm15 = vcmp.ge.f32.partialorder %v2035_v14, 0.0  ;;  %vm1830_vm0 = vmor %vm1828_vm14, %vm1829_vm13 }
 0x41f   :  { %v1824_v9 = vmul.f32 %v3178_v4, %v1823_v29  ;;  %v1507_v19 = vmul.f32 %v4064_v27, %v4064_v27  ;;  %v1821_v49 = vsel %vm1820_vm12, %v3176_v52, %v1817_v10  ;;  %vm1838_vm2 = vweird.f32 %v1629_v32 }
 0x420   :  { %v1979_v25 = vmul.f32 %v1821_v49, %v3936_v0  ;;  %v4085_v33 = vsel %vm2128_vm15, %v2035_v14, %v2160_v34  ;;  %v2161_v22 = vmul.f32 0.01, %v2038_v6  ;;  %vm2129_vm4 = vcmp.ge.f32.partialorder %v2038_v6, 0.0 }
 0x421   :  { %v1825_v38 = vmul.f32 0.5, %v1824_v9  ;;  %1382 = vadd.xlane.f32.xlu0 %v4070_v21  ;;  %v1555_v50 = vpop.xlane.xlu1 %1554  ;;  %2223 = vadd.xlane.f32.xlu1 %v4072_v37  ;;  %v1373_v15 = vpop.xlane.xlu2 %1372  ;;  %v2041_v13 = vadd.f32 %v4040_v7, %v2040_v5 }
 0x422   :  { %v1598_v35 = vmul.f32 0.03125, %v1555_v50  ;;  %v1410_v8 = vmul.f32 0.03125, %v1373_v15  ;;  %1564 = vadd.xlane.f32.xlu2 %v1507_v19  ;;  %2081 = vmatmul.f32.gmra.mxu3 %v1979_v25  ;;  %v4099_v11 = vsel %vm2129_vm4, %v2038_v6, %v2161_v22 }
 0x423   :  { %v1826_v3 = vsub.f32 1.5, %v1825_v38  ;;  %vm2130_vm8 = vcmp.ge.f32.partialorder %v2041_v13, 0.0 }
 0x424   :  { %v3180_v55 = vpop.eup %3179  ;;  %v1630_v28 = vadd.f32 1e-05, %v1598_v35  ;;  %v1442_v30 = vsub.f32 %v3984_v45, %v1410_v8 }
 0x425   :  { %v1833_v0 = vmul.f32 %v3180_v55, %v1629_v32  ;;  %v1827_v20 = vmul.f32 %v3178_v4, %v1826_v3  ;;  %vm1839_vm1 = vweird.f32 %v3180_v55  ;;  %v2162_v32 = vmul.f32 0.01, %v2041_v13  ;;  %v2043_v9 = vpop.f32.mrf.mxu3 }
 0x426   :  { %3181 = vrsqrt.f32 %v1630_v28  ;;  %v4081_v43 = vsel %vm1319_vm7, %v1442_v30, 0.0  ;;  %vm1840_vm3 = vmor %vm1838_vm2, %vm1839_vm1  ;;  %vm1848_vm6 = vweird.f32 %v1630_v28 }
 0x427   :  { %v1834_v52 = vmul.f32 %v3180_v55, %v1833_v0  ;;  %v1508_v17 = vmul.f32 %v4081_v43, %v4081_v43  ;;  %v1831_v54 = vsel %vm1830_vm0, %v3178_v4, %v1827_v20  ;;  %v4102_v1 = vsel %vm2130_vm8, %v2041_v13, %v2162_v32 }
 0x428   :  { %v1980_v45 = vmul.f32 %v1831_v54, %v3953_v60 }
 0x429   :  { %v1835_v41 = vmul.f32 0.5, %v1834_v52  ;;  %2225 = vadd.xlane.f32.xlu0 %v4085_v33  ;;  %v1375_v58 = vpop.xlane.xlu1 %1374 }
 0x42a   :  { %v1411_v16 = vmul.f32 0.03125, %v1375_v58  ;;  %1566 = vadd.xlane.f32.xlu2 %v1508_v17  ;;  %2084 = vmatmul.f32.gmra.mxu3 %v1980_v45 }
 0x42b   :  { %v1836_v61 = vsub.f32 1.5, %v1835_v41 }
 0x42c   :  { %v3182_v46 = vpop.eup %3181  ;;  %v1443_v2 = vsub.f32 %v3988_v24, %v1411_v16 }
 0x42d   :  { %v1843_v57 = vmul.f32 %v3182_v46, %v1630_v28  ;;  %v1837_v39 = vmul.f32 %v3180_v55, %v1836_v61  ;;  %vm1849_vm5 = vweird.f32 %v3182_v46  ;;  %v2046_v8 = vpop.f32.mrf.mxu3  ;;  %v2044_v28 = vadd.f32 %v4040_v7, %v2043_v9 }
 0x42e   :  { %v4093_v60 = vsel %vm1319_vm7, %v1443_v2, 0.0  ;;  %vm1850_vm9 = vmor %vm1848_vm6, %vm1849_vm5 }
 0x42f   :  { %v1844_v36 = vmul.f32 %v3182_v46, %v1843_v57  ;;  %v1509_v23 = vmul.f32 %v4093_v60, %v4093_v60  ;;  %v1841_v18 = vsel %vm1840_vm3, %v3180_v55, %v1837_v39  ;;  %v2163_v6 = vmul.f32 0.01, %v2044_v28 }
 0x430   :  { %v1981_v24 = vmul.f32 %v1841_v18, %v3967_v47  ;;  %vm2131_vm12 = vcmp.ge.f32.partialorder %v2044_v28, 0.0 }
 0x431   :  { %v1845_v26 = vmul.f32 0.5, %v1844_v36  ;;  %1568 = vadd.xlane.f32.xlu1 %v1509_v23  ;;  %v4125_v57 = vsel %vm2131_vm12, %v2044_v28, %v2163_v6 }
 0x432   :  { %2227 = vadd.xlane.f32.xlu2 %v4099_v11  ;;  %2087 = vmatmul.f32.gmra.mxu3 %v1981_v24 }
 0x433   :  { %v1846_v4 = vsub.f32 1.5, %v1845_v26 }
 0x435   :  { %v1847_v62 = vmul.f32 %v3182_v46, %v1846_v4  ;;  %v2049_v61 = vpop.f32.mrf.mxu3 }
 0x437   :  { %v1851_v63 = vsel %vm1850_vm9, %v3182_v46, %v1847_v62 }
 0x438   :  { %v1982_v29 = vmul.f32 %v1851_v63, %v3980_v59 }
 0x439   :  { %2229 = vadd.xlane.f32.xlu1 %v4102_v1 }
 0x43a   :  { %2090 = vmatmul.f32.gmra.mxu3 %v1982_v29 }
 0x474   :  { %v1557_v47 = vpop.xlane.xlu0 %1556 }
 0x475   :  { %v1599_v10 = vmul.f32 0.03125, %v1557_v47  ;;  %v2052_v47 = vpop.f32.mrf.mxu3 }
 0x477   :  { %v1631_v19 = vadd.f32 1e-05, %v1599_v10 }
 0x479   :  { %3183 = vrsqrt.f32 %v1631_v19  ;;  %vm1858_vm11 = vweird.f32 %v1631_v19 }
 0x47c   :  { %v1559_v49 = vpop.xlane.xlu2 %1558  ;;  %v1377_v14 = vpop.xlane.xlu0 %1376 }
 0x47d   :  { %v1600_v25 = vmul.f32 0.03125, %v1559_v49  ;;  %v1412_v38 = vmul.f32 0.03125, %v1377_v14 }
 0x47f   :  { %v3184_v50 = vpop.eup %3183  ;;  %v1632_v15 = vadd.f32 1e-05, %v1600_v25  ;;  %v1444_v35 = vsub.f32 %v4016_v42, %v1412_v38 }
 0x480   :  { %v1853_v48 = vmul.f32 %v3184_v50, %v1631_v19  ;;  %vm1859_vm10 = vweird.f32 %v3184_v50  ;;  %v2050_v19 = vadd.f32 %v4040_v7, %v2049_v61 }
 0x481   :  { %3185 = vrsqrt.f32 %v1632_v15  ;;  %v4109_v59 = vsel %vm1319_vm7, %v1444_v35, 0.0  ;;  %vm1860_vm13 = vmor %vm1858_vm11, %vm1859_vm10  ;;  %vm1868_vm15 = vweird.f32 %v1632_v15 }
 0x482   :  { %v1854_v3 = vmul.f32 %v3184_v50, %v1853_v48  ;;  %v1510_v55 = vmul.f32 %v4109_v59, %v4109_v59  ;;  %vm2133_vm3 = vcmp.ge.f32.partialorder %v2050_v19, 0.0 }
 0x484   :  { %v1855_v30 = vmul.f32 0.5, %v1854_v3  ;;  %v1561_v34 = vpop.xlane.xlu1 %1560  ;;  %v1379_v0 = vpop.xlane.xlu2 %1378  ;;  %1570 = vadd.xlane.f32.xlu0 %v1510_v55 }
 0x485   :  { %v1601_v20 = vmul.f32 0.03125, %v1561_v34  ;;  %v1413_v52 = vmul.f32 0.03125, %v1379_v0  ;;  %v2165_v34 = vmul.f32 0.01, %v2050_v19 }
 0x486   :  { %v1856_v42 = vsub.f32 1.5, %v1855_v30 }
 0x487   :  { %v3186_v17 = vpop.eup %3185  ;;  %v4114_v54 = vadd.f32 1e-05, %v1601_v20  ;;  %v1445_v45 = vsub.f32 %v4033_v56, %v1413_v52  ;;  %v2047_v56 = vadd.f32 %v4040_v7, %v2046_v8 }
 0x488   :  { %v1863_v41 = vmul.f32 %v3186_v17, %v1632_v15  ;;  %v1857_v58 = vmul.f32 %v3184_v50, %v1856_v42  ;;  %vm1869_vm14 = vweird.f32 %v3186_v17 }
 0x489   :  { %3187 = vrsqrt.f32 %v4114_v54  ;;  %v4120_v16 = vsel %vm1319_vm7, %v1445_v45, 0.0  ;;  %v2164_v62 = vmul.f32 0.01, %v2047_v56  ;;  %vm2132_vm0 = vcmp.ge.f32.partialorder %v2047_v56, 0.0  ;;  %vm1870_vm1 = vmor %vm1868_vm15, %vm1869_vm14 }
 0x48a   :  { %v1864_v46 = vmul.f32 %v3186_v17, %v1863_v41  ;;  %v1511_v2 = vmul.f32 %v4120_v16, %v4120_v16  ;;  %v1861_v5 = vsel %vm1860_vm13, %v3184_v50, %v1857_v58  ;;  %vm1878_vm4 = vweird.f32 %v4114_v54  ;;  %v2055_v41 = vpop.f32.mrf.mxu3 }
 0x48b   :  { %v1983_v22 = vmul.f32 %v1861_v5, %v3999_v44  ;;  %v4141_v49 = vsel %vm2132_vm0, %v2047_v56, %v2164_v62  ;;  %v4163_v45 = vsel %vm2133_vm3, %v2050_v19, %v2165_v34 }
 0x48c   :  { %v1865_v39 = vmul.f32 0.5, %v1864_v46  ;;  %v1381_v36 = vpop.xlane.xlu1 %1380  ;;  %1572 = vadd.xlane.f32.xlu2 %v1511_v2  ;;  %2231 = vadd.xlane.f32.xlu0 %v4125_v57  ;;  %v1563_v23 = vpop.xlane.xlu0 %1562 }
 0x48d   :  { %v1414_v18 = vmul.f32 0.03125, %v1381_v36  ;;  %v1602_v13 = vmul.f32 0.03125, %v1563_v23  ;;  %2093 = vmatmul.f32.gmra.mxu3 %v1983_v22 }
 0x48e   :  { %v1866_v24 = vsub.f32 1.5, %v1865_v39 }
 0x48f   :  { %v3188_v26 = vpop.eup %3187  ;;  %v1446_v4 = vsub.f32 %v4055_v31, %v1414_v18  ;;  %v4130_v32 = vadd.f32 1e-05, %v1602_v13 }
 0x490   :  { %v1873_v44 = vmul.f32 %v3188_v26, %v4114_v54  ;;  %v1867_v63 = vmul.f32 %v3186_v17, %v1866_v24  ;;  %vm1879_vm2 = vweird.f32 %v3188_v26 }
 0x491   :  { %3189 = vrsqrt.f32 %v4130_v32  ;;  %v4136_v29 = vsel %vm1319_vm7, %v1446_v4, 0.0  ;;  %vm1880_vm5 = vmor %vm1878_vm4, %vm1879_vm2  ;;  %vm1888_vm8 = vweird.f32 %v4130_v32 }
 0x492   :  { %v1874_v10 = vmul.f32 %v3188_v26, %v1873_v44  ;;  %v1512_v31 = vmul.f32 %v4136_v29, %v4136_v29  ;;  %v1871_v9 = vsel %vm1870_vm1, %v3186_v17, %v1867_v63  ;;  %v2053_v17 = vadd.f32 %v4040_v7, %v2052_v47 }
 0x493   :  { %v1984_v14 = vmul.f32 %v1871_v9, %v4011_v12  ;;  %v2056_v44 = vadd.f32 %v4040_v7, %v2055_v41  ;;  %v2058_v9 = vpop.f32.mrf.mxu3 }
 0x494   :  { %v1875_v25 = vmul.f32 0.5, %v1874_v10  ;;  %1574 = vadd.xlane.f32.xlu1 %v1512_v31  ;;  %v2224_v38 = vpop.xlane.xlu1 %2223  ;;  %2233 = vadd.xlane.f32.xlu2 %v4141_v49  ;;  %v1383_v50 = vpop.xlane.xlu0 %1382  ;;  %v2166_v36 = vmul.f32 0.01, %v2053_v17  ;;  %vm2134_vm9 = vcmp.ge.f32.partialorder %v2053_v17, 0.0 }
 0x495   :  { %v2287_v15 = vmul.f32 0.03125, %v2224_v38  ;;  %v1565_v35 = vpop.xlane.xlu2 %1564  ;;  %v1415_v8 = vmul.f32 0.03125, %v1383_v50  ;;  %2096 = vmatmul.f32.gmra.mxu3 %v1984_v14  ;;  %vm2135_vm12 = vcmp.ge.f32.partialorder %v2056_v44, 0.0 }
 0x496   :  { %v1876_v48 = vsub.f32 1.5, %v1875_v25  ;;  %v1603_v3 = vmul.f32 0.03125, %v1565_v35  ;;  %v4178_v62 = vsel %vm2134_vm9, %v2053_v17, %v2166_v36 }
 0x497   :  { %v3190_v55 = vpop.eup %3189  ;;  %v2319_v28 = vsub.f32 %v4072_v37, %v2287_v15  ;;  %v1447_v30 = vsub.f32 %v4070_v21, %v1415_v8  ;;  %v2167_v15 = vmul.f32 0.01, %v2056_v44 }
 0x498   :  { %v1883_v12 = vmul.f32 %v3190_v55, %v4130_v32  ;;  %v4148_v0 = vadd.f32 1e-05, %v1603_v3  ;;  %v1877_v20 = vmul.f32 %v3188_v26, %v1876_v48  ;;  %vm1889_vm6 = vweird.f32 %v3190_v55 }
 0x499   :  { %v4153_v52 = vsel %vm1319_vm7, %v2319_v28, 0.0  ;;  %v4157_v42 = vsel %vm1319_vm7, %v1447_v30, 0.0  ;;  %vm1890_vm10 = vmor %vm1888_vm8, %vm1889_vm6 }
 0x49a   :  { %v1884_v37 = vmul.f32 %v3190_v55, %v1883_v12  ;;  %3191 = vrsqrt.f32 %v4148_v0  ;;  %v2383_v21 = vmul.f32 %v4153_v52, %v4153_v52  ;;  %v1513_v54 = vmul.f32 %v4157_v42, %v4157_v42 }
 0x49b   :  { %v1881_v6 = vsel %vm1880_vm5, %v3188_v26, %v1877_v20  ;;  %vm1898_vm13 = vweird.f32 %v4148_v0  ;;  %v2061_v17 = vpop.f32.mrf.mxu3 }
 0x49c   :  { %v1885_v58 = vmul.f32 0.5, %v1884_v37  ;;  %2415 = vadd.xlane.f32.xlu1 %v2383_v21  ;;  %2235 = vadd.xlane.f32.xlu2 %v4163_v45  ;;  %v2226_v61 = vpop.xlane.xlu0 %2225  ;;  %v1985_v46 = vmul.f32 %v1881_v6, %v4029_v51 }
 0x49d   :  { %v1567_v2 = vpop.xlane.xlu2 %1566  ;;  %1576 = vadd.xlane.f32.xlu0 %v1513_v54  ;;  %v2288_v5 = vmul.f32 0.03125, %v2226_v61 }
 0x49e   :  { %v1886_v56 = vsub.f32 1.5, %v1885_v58  ;;  %v1604_v22 = vmul.f32 0.03125, %v1567_v2  ;;  %2099 = vmatmul.f32.gmra.mxu3 %v1985_v46  ;;  %v2062_v46 = vadd.f32 %v4040_v7, %v2061_v17 }
 0x49f   :  { %v2320_v39 = vsub.f32 %v4085_v33, %v2288_v5 }
 0x4a0   :  { %v3192_v23 = vpop.eup %3191  ;;  %v1636_v18 = vadd.f32 1e-05, %v1604_v22  ;;  %v1887_v13 = vmul.f32 %v3190_v55, %v1886_v56  ;;  %vm2137_vm5 = vcmp.ge.f32.partialorder %v2062_v46, 0.0 }
 0x4a1   :  { %v1893_v24 = vmul.f32 %v3192_v23, %v4148_v0  ;;  %v4174_v51 = vsel %vm1319_vm7, %v2320_v39, 0.0  ;;  %vm1899_vm11 = vweird.f32 %v3192_v23  ;;  %v2169_v39 = vmul.f32 0.01, %v2062_v46 }
 0x4a2   :  { %3193 = vrsqrt.f32 %v1636_v18  ;;  %v2384_v26 = vmul.f32 %v4174_v51, %v4174_v51  ;;  %v1891_v4 = vsel %vm1890_vm10, %v3190_v55, %v1887_v13  ;;  %vm1900_vm14 = vmor %vm1898_vm13, %vm1899_vm11  ;;  %v2059_v55 = vadd.f32 %v4040_v7, %v2058_v9  ;;  %v2902_v9 = vld [vmem:[#allocation8 + $0x38] sm:$0xff] }
 0x4a3   :  { %v1894_v33 = vmul.f32 %v3192_v23, %v1893_v24  ;;  %v1986_v32 = vmul.f32 %v1891_v4, %v4050_v40  ;;  %vm1908_vm0 = vweird.f32 %v1636_v18  ;;  %v2910_v24 = vld [vmem:[#allocation8 + $0x78] sm:$0xff]  ;;  %v2907_v4 = vld [vmem:[#allocation8 + $0x60] sm:$0xff] }
 0x4a4   :  { %2237 = vadd.xlane.f32.xlu1 %v4178_v62  ;;  %v1569_v63 = vpop.xlane.xlu1 %1568  ;;  %v2168_v6 = vmul.f32 0.01, %v2059_v55  ;;  %vm2136_vm1 = vcmp.ge.f32.partialorder %v2059_v55, 0.0  ;;  %2915 = vmatpush.msra.mxu0 %v2910_v24 }
 0x4a5   :  { %v1895_v47 = vmul.f32 0.5, %v1894_v33  ;;  %v1605_v10 = vmul.f32 0.03125, %v1569_v63  ;;  %v2228_v31 = vpop.xlane.xlu2 %2227  ;;  %2417 = vadd.xlane.f32.xlu0 %v2384_v26  ;;  %v2908_v26 = vld [vmem:[#allocation8 + $0x68] sm:$0xff]  ;;  %v2906_v33 = vld [vmem:[#allocation8 + $0x58] sm:$0xff] }
 0x4a6   :  { %v2289_v19 = vmul.f32 0.03125, %v2228_v31  ;;  %2102 = vmatmul.f32.gmra.mxu3 %v1986_v32  ;;  %v4204_v5 = vsel %vm2136_vm1, %v2059_v55, %v2168_v6  ;;  %v2905_v32 = vld [vmem:[#allocation8 + $0x50] sm:$0xff]  ;;  %v2898_v55 = vld [vmem:[#allocation8 + $0x18] sm:$0xff] }
 0x4a7   :  { %v1896_v14 = vsub.f32 1.5, %v1895_v47  ;;  %v1637_v25 = vadd.f32 1e-05, %v1605_v10  ;;  %v2064_v10 = vpop.f32.mrf.mxu3 }
 0x4a8   :  { %v3194_v38 = vpop.eup %3193  ;;  %v2321_v50 = vsub.f32 %v4099_v11, %v2289_v19  ;;  %v4192_v11 = vsel %vm2135_vm12, %v2056_v44, %v2167_v15  ;;  %v2904_v44 = vld [vmem:[#allocation8 + $0x48] sm:$0xff]  ;;  %v2901_v19 = vld [vmem:[#allocation8 + $0x30] sm:$0xff] }
 0x4a9   :  { %v1903_v40 = vmul.f32 %v3194_v38, %v1636_v18  ;;  %3195 = vrsqrt.f32 %v1637_v25  ;;  %v1897_v8 = vmul.f32 %v3192_v23, %v1896_v14  ;;  %vm1909_vm15 = vweird.f32 %v3194_v38  ;;  %v2900_v14 = vld [vmem:[#allocation8 + $0x28] sm:$0xff] }
 0x4aa   :  { %v4187_v35 = vsel %vm1319_vm7, %v2321_v50, 0.0  ;;  %vm1910_vm2 = vmor %vm1908_vm0, %vm1909_vm15  ;;  %vm1918_vm4 = vweird.f32 %v1637_v25  ;;  %v4208_v18 = vsel %vm2137_vm5, %v2062_v46, %v2169_v39 }
 0x4ab   :  { %v1904_v48 = vmul.f32 %v3194_v38, %v1903_v40  ;;  %v2385_v3 = vmul.f32 %v4187_v35, %v4187_v35  ;;  %v1901_v30 = vsel %vm1900_vm14, %v3192_v23, %v1897_v8  ;;  %v2899_v40 = vld [vmem:[#allocation8 + $0x20] sm:$0xff] }
 0x4ac   :  { %v2230_v28 = vpop.xlane.xlu1 %2229  ;;  %v1987_v0 = vmul.f32 %v1901_v30, %v4064_v27 }
 0x4ad   :  { %v1905_v34 = vmul.f32 0.5, %v1904_v48  ;;  %v2290_v12 = vmul.f32 0.03125, %v2230_v28  ;;  %2419 = vadd.xlane.f32.xlu2 %v2385_v3  ;;  %2239 = vadd.xlane.f32.xlu0 %v4192_v11 }
 0x4ae   :  { %2105 = vmatmul.f32.gmra.mxu3 %v1987_v0 }
 0x4af   :  { %v3196_v20 = vpop.eup %3195  ;;  %v1906_v37 = vsub.f32 1.5, %v1905_v34  ;;  %v2322_v21 = vsub.f32 %v4102_v1, %v2290_v12  ;;  %v2067_v28 = vpop.f32.mrf.mxu3  ;;  %v2897_v12 = vld [vmem:[#allocation8 + $0x10] sm:$0xff] }
 0x4b0   :  { %v1913_v54 = vmul.f32 %v3196_v20, %v1637_v25  ;;  %vm1919_vm3 = vweird.f32 %v3196_v20 }
 0x4b1   :  { %v4199_v41 = vsel %vm1319_vm7, %v2322_v21, 0.0  ;;  %v1907_v58 = vmul.f32 %v3194_v38, %v1906_v37  ;;  %vm1920_vm6 = vmor %vm1918_vm4, %vm1919_vm3  ;;  %v2065_v37 = vadd.f32 %v4040_v7, %v2064_v10  ;;  %v2896_v21 = vld [vmem:[#allocation8 + $0x8] sm:$0xff] }
 0x4b2   :  { %v1914_v61 = vmul.f32 %v3196_v20, %v1913_v54  ;;  %v2386_v27 = vmul.f32 %v4199_v41, %v4199_v41 }
 0x4b3   :  { %v1911_v2 = vsel %vm1910_vm2, %v3194_v38, %v1907_v58  ;;  %vm2138_vm10 = vcmp.ge.f32.partialorder %v2065_v37, 0.0 }
 0x4b4   :  { %v1915_v1 = vmul.f32 0.5, %v1914_v61  ;;  %2421 = vadd.xlane.f32.xlu1 %v2386_v27  ;;  %v1988_v56 = vmul.f32 %v1911_v2, %v4081_v43  ;;  %v2909_v43 = vld [vmem:[#allocation8 + $0x70] sm:$0xff]  ;;  %v2895_v61 = vld [vmem:[#allocation8] sm:$0xff] }
 0x4b5   :  { %2241 = vadd.xlane.f32.xlu2 %v4204_v5  ;;  %2916 = vmatpush.msra.mxu0 %v2909_v43 }
 0x4b6   :  { %v1916_v22 = vsub.f32 1.5, %v1915_v1  ;;  %2108 = vmatmul.f32.gmra.mxu3 %v1988_v56  ;;  %v2170_v56 = vmul.f32 0.01, %v2065_v37 }
 0x4b7   :  { %2917 = vmatpush.msra.mxu0 %v2908_v26 }
 0x4b8   :  { %v1917_v36 = vmul.f32 %v3196_v20, %v1916_v22  ;;  %v4235_v26 = vsel %vm2138_vm10, %v2065_v37, %v2170_v56 }
 0x4b9   :  { %2918 = vmatpush.msra.mxu0 %v2907_v4 }
 0x4ba   :  { %v1921_v23 = vsel %vm1920_vm6, %v3196_v20, %v1917_v36 }
 0x4bb   :  { %v1989_v13 = vmul.f32 %v1921_v23, %v4093_v60  ;;  %2919 = vmatpush.msra.mxu0 %v2906_v33  ;;  %v2903_v60 = vld [vmem:[#allocation8 + $0x40] sm:$0xff]  ;;  %v2070_v23 = vpop.f32.mrf.mxu3 }
 0x4bc   :  { %2243 = vadd.xlane.f32.xlu1 %v4208_v18 }
 0x4bd   :  { %2920 = vmatpush.msra.mxu0 %v2905_v32 }
 0x4be   :  { %2111 = vmatmul.f32.gmra.mxu3 %v1989_v13 }
 0x4bf   :  { %2921 = vmatpush.msra.mxu0 %v2904_v44 }
 0x4c1   :  { %2922 = vmatpush.msra.mxu0 %v2903_v60 }
 0x4c3   :  { %2923 = vmatpush.msra.mxu0 %v2902_v9 }
 0x4c5   :  { %2924 = vmatpush.msra.mxu0 %v2901_v19 }
 0x4c7   :  { %2925 = vmatpush.msra.mxu0 %v2900_v14 }
 0x4c9   :  { %2926 = vmatpush.msra.mxu0 %v2899_v40  ;;  %v2073_v40 = vpop.f32.mrf.mxu3 }
 0x4cb   :  { %2927 = vmatpush.msra.mxu0 %v2898_v55 }
 0x4cd   :  { %2928 = vmatpush.msra.mxu0 %v2897_v12 }
 0x4cf   :  { %2929 = vmatpush.msra.mxu0 %v2896_v21 }
 0x4d1   :  { %2930 = vmatpush.msra.mxu0 %v2895_v61 }
 0x4f7   :  { %v1571_v63 = vpop.xlane.xlu0 %1570 }
 0x4f8   :  { %v1606_v47 = vmul.f32 0.03125, %v1571_v63 }
 0x4fa   :  { %v1638_v31 = vadd.f32 1e-05, %v1606_v47 }
 0x4fc   :  { %3197 = vrsqrt.f32 %v1638_v31  ;;  %vm1928_vm9 = vweird.f32 %v1638_v31 }
 0x4ff   :  { %v1573_v25 = vpop.xlane.xlu2 %1572  ;;  %v2232_v38 = vpop.xlane.xlu0 %2231 }
 0x500   :  { %v1607_v50 = vmul.f32 0.03125, %v1573_v25  ;;  %v2291_v15 = vmul.f32 0.03125, %v2232_v38 }
 0x502   :  { %v3198_v8 = vpop.eup %3197  ;;  %v4212_v48 = vadd.f32 1e-05, %v1607_v50  ;;  %v2323_v3 = vsub.f32 %v4125_v57, %v2291_v15 }
 0x503   :  { %v1923_v30 = vmul.f32 %v3198_v8, %v1638_v31  ;;  %vm1929_vm8 = vweird.f32 %v3198_v8 }
 0x504   :  { %3199 = vrsqrt.f32 %v4212_v48  ;;  %v4218_v34 = vsel %vm1319_vm7, %v2323_v3, 0.0  ;;  %vm1930_vm11 = vmor %vm1928_vm9, %vm1929_vm8  ;;  %vm1938_vm14 = vweird.f32 %v4212_v48  ;;  %v2071_v3 = vadd.f32 %v4040_v7, %v2070_v23 }
 0x505   :  { %v1924_v0 = vmul.f32 %v3198_v8, %v1923_v30  ;;  %v2387_v20 = vmul.f32 %v4218_v34, %v4218_v34 }
 0x506   :  { %vm2140_vm1 = vcmp.ge.f32.partialorder %v2071_v3, 0.0 }
 0x507   :  { %v1925_v57 = vmul.f32 0.5, %v1924_v0  ;;  %v1575_v17 = vpop.xlane.xlu1 %1574  ;;  %v2234_v54 = vpop.xlane.xlu2 %2233  ;;  %2423 = vadd.xlane.f32.xlu0 %v2387_v20 }
 0x508   :  { %v1608_v6 = vmul.f32 0.03125, %v1575_v17  ;;  %v2292_v58 = vmul.f32 0.03125, %v2234_v54  ;;  %v2172_v54 = vmul.f32 0.01, %v2071_v3 }
 0x509   :  { %v1926_v27 = vsub.f32 1.5, %v1925_v57 }
 0x50a   :  { %v3200_v46 = vpop.eup %3199  ;;  %v4223_v2 = vadd.f32 1e-05, %v1608_v6  ;;  %v2324_v1 = vsub.f32 %v4141_v49, %v2292_v58  ;;  %v2068_v49 = vadd.f32 %v4040_v7, %v2067_v28 }
 0x50b   :  { %v1933_v22 = vmul.f32 %v3200_v46, %v4212_v48  ;;  %v1927_v39 = vmul.f32 %v3198_v8, %v1926_v27  ;;  %vm1939_vm12 = vweird.f32 %v3200_v46 }
 0x50c   :  { %3201 = vrsqrt.f32 %v4223_v2  ;;  %v4230_v36 = vsel %vm1319_vm7, %v2324_v1, 0.0  ;;  %v2171_v25 = vmul.f32 0.01, %v2068_v49  ;;  %vm2139_vm13 = vcmp.ge.f32.partialorder %v2068_v49, 0.0  ;;  %vm1940_vm15 = vmor %vm1938_vm14, %vm1939_vm12 }
 0x50d   :  { %v1934_v13 = vmul.f32 %v3200_v46, %v1933_v22  ;;  %v2388_v24 = vmul.f32 %v4230_v36, %v4230_v36  ;;  %v1931_v43 = vsel %vm1930_vm11, %v3198_v8, %v1927_v39  ;;  %vm1948_vm2 = vweird.f32 %v4223_v2 }
 0x50e   :  { %v1990_v4 = vmul.f32 %v1931_v43, %v4109_v59  ;;  %v4255_v55 = vsel %vm2139_vm13, %v2068_v49, %v2171_v25  ;;  %v4273_v39 = vsel %vm2140_vm1, %v2071_v3, %v2172_v54 }
 0x50f   :  { %v1935_v33 = vmul.f32 0.5, %v1934_v13  ;;  %v2416_v32 = vpop.xlane.xlu1 %2415  ;;  %2425 = vadd.xlane.f32.xlu2 %v2388_v24  ;;  %v2236_v44 = vpop.xlane.xlu2 %2235  ;;  %2245 = vadd.xlane.f32.xlu0 %v4235_v26 }
 0x510   :  { %v2479_v63 = vmul.f32 0.03125, %v2416_v32  ;;  %v2293_v47 = vmul.f32 0.03125, %v2236_v44  ;;  %v1577_v60 = vpop.xlane.xlu0 %1576  ;;  %2114 = vmatmul.f32.gmra.mxu3 %v1990_v4  ;;  %v2076_v13 = vpop.f32.mrf.mxu3 }
 0x511   :  { %v1936_v10 = vsub.f32 1.5, %v1935_v33  ;;  %v1609_v31 = vmul.f32 0.03125, %v1577_v60 }
 0x512   :  { %v3202_v9 = vpop.eup %3201  ;;  %v4239_v19 = vadd.f32 1e-05, %v2479_v63  ;;  %v2325_v14 = vsub.f32 %v4163_v45, %v2293_v47 }
 0x513   :  { %v1943_v59 = vmul.f32 %v3202_v9, %v4223_v2  ;;  %v4243_v38 = vadd.f32 1e-05, %v1609_v31  ;;  %v1937_v50 = vmul.f32 %v3200_v46, %v1936_v10  ;;  %vm1949_vm0 = vweird.f32 %v3202_v9 }
 0x514   :  { %3203 = vrsqrt.f32 %v4239_v19  ;;  %v4249_v15 = vsel %vm1319_vm7, %v2325_v14, 0.0  ;;  %vm1950_vm3 = vmor %vm1948_vm2, %vm1949_vm0  ;;  %vm2549_vm8 = vweird.f32 %v4239_v19 }
 0x515   :  { %v1944_v8 = vmul.f32 %v3202_v9, %v1943_v59  ;;  %3205 = vrsqrt.f32 %v4243_v38  ;;  %v2389_v45 = vmul.f32 %v4249_v15, %v4249_v15  ;;  %v1941_v28 = vsel %vm1940_vm15, %v3200_v46, %v1937_v50 }
 0x516   :  { %v1991_v12 = vmul.f32 %v1941_v28, %v4120_v16  ;;  %v2074_v46 = vadd.f32 %v4040_v7, %v2073_v40  ;;  %vm1958_vm10 = vweird.f32 %v4243_v38 }
 0x517   :  { %v1945_v48 = vmul.f32 0.5, %v1944_v8  ;;  %v2238_v30 = vpop.xlane.xlu1 %2237  ;;  %2247 = vadd.xlane.f32.xlu2 %v4255_v55  ;;  %2427 = vadd.xlane.f32.xlu1 %v2389_v45  ;;  %v2077_v8 = vadd.f32 %v4040_v7, %v2076_v13 }
 0x518   :  { %v2294_v0 = vmul.f32 0.03125, %v2238_v30  ;;  %v2418_v20 = vpop.xlane.xlu0 %2417  ;;  %2117 = vmatmul.f32.gmra.mxu3 %v1991_v12  ;;  %v2173_v33 = vmul.f32 0.01, %v2074_v46  ;;  %vm2141_vm6 = vcmp.ge.f32.partialorder %v2074_v46, 0.0  ;;  %v2079_v12 = vpop.f32.mrf.mxu3 }
 0x519   :  { %v1946_v37 = vsub.f32 1.5, %v1945_v48  ;;  %v2480_v21 = vmul.f32 0.03125, %v2418_v20  ;;  %v2174_v7 = vmul.f32 0.01, %v2077_v8  ;;  %vm2142_vm13 = vcmp.ge.f32.partialorder %v2077_v8, 0.0 }
 0x51a   :  { %v3204_v57 = vpop.eup %3203  ;;  %v2326_v17 = vsub.f32 %v4178_v62, %v2294_v0  ;;  %v4284_v59 = vsel %vm2141_vm6, %v2074_v46, %v2173_v33 }
 0x51b   :  { %v3206_v6 = vpop.eup %3205  ;;  %v2544_v58 = vmul.f32 %v3204_v57, %v4239_v19  ;;  %v4261_v61 = vadd.f32 1e-05, %v2480_v21  ;;  %v1947_v27 = vmul.f32 %v3202_v9, %v1946_v37  ;;  %vm2550_vm4 = vweird.f32 %v3204_v57 }
 0x51c   :  { %v1953_v16 = vmul.f32 %v3206_v6, %v4243_v38  ;;  %v4268_v1 = vsel %vm1319_vm7, %v2326_v17, 0.0  ;;  %vm1959_vm5 = vweird.f32 %v3206_v6  ;;  %vm2551_vm9 = vmor %vm2549_vm8, %vm2550_vm4  ;;  %v4311_v46 = vsel %vm2142_vm13, %v2077_v8, %v2174_v7 }
 0x51d   :  { %v2545_v62 = vmul.f32 %v3204_v57, %v2544_v58  ;;  %3207 = vrsqrt.f32 %v4261_v61  ;;  %v2390_v56 = vmul.f32 %v4268_v1, %v4268_v1  ;;  %v1951_v23 = vsel %vm1950_vm3, %v3202_v9, %v1947_v27  ;;  %vm1960_vm11 = vmor %vm1958_vm10, %vm1959_vm5 }
 0x51e   :  { %v1954_v22 = vmul.f32 %v3206_v6, %v1953_v16  ;;  %v1992_v2 = vmul.f32 %v1951_v23, %v4136_v29  ;;  %vm2559_vm14 = vweird.f32 %v4261_v61 }
 0x51f   :  { %v2546_v24 = vmul.f32 0.5, %v2545_v62  ;;  %2249 = vadd.xlane.f32.xlu1 %v4273_v39  ;;  %2429 = vadd.xlane.f32.xlu0 %v2390_v56 }
 0x520   :  { %v1955_v43 = vmul.f32 0.5, %v1954_v22  ;;  %v2420_v49 = vpop.xlane.xlu2 %2419  ;;  %v2240_v4 = vpop.xlane.xlu0 %2239  ;;  %2120 = vmatmul.f32.gmra.mxu3 %v1992_v2 }
 0x521   :  { %v2547_v32 = vsub.f32 1.5, %v2546_v24  ;;  %v2481_v44 = vmul.f32 0.03125, %v2420_v49  ;;  %v2295_v63 = vmul.f32 0.03125, %v2240_v4  ;;  %v2082_v24 = vpop.f32.mrf.mxu3 }
 0x522   :  { %v1956_v47 = vsub.f32 1.5, %v1955_v43 }
 0x523   :  { %v3208_v60 = vpop.eup %3207  ;;  %v2548_v10 = vmul.f32 %v3204_v57, %v2547_v32  ;;  %v4278_v31 = vadd.f32 1e-05, %v2481_v44  ;;  %v2327_v29 = vsub.f32 %v4192_v11, %v2295_v63 }
 0x524   :  { %v2554_v9 = vmul.f32 %v3208_v60, %v4261_v61  ;;  %v1957_v14 = vmul.f32 %v3206_v6, %v1956_v47  ;;  %vm2560_vm12 = vweird.f32 %v3208_v60 }
 0x525   :  { %v2552_v25 = vsel %vm2551_vm9, %v3204_v57, %v2548_v10  ;;  %3209 = vrsqrt.f32 %v4278_v31  ;;  %v4288_v50 = vsel %vm1319_vm7, %v2327_v29, 0.0  ;;  %vm2561_vm15 = vmor %vm2559_vm14, %vm2560_vm12  ;;  %vm2569_vm1 = vweird.f32 %v4278_v31 }
 0x526   :  { %v2863_v19 = vmul.f32 %v2552_v25, %v4153_v52  ;;  %v2555_v40 = vmul.f32 %v3208_v60, %v2554_v9  ;;  %v2391_v11 = vmul.f32 %v4288_v50, %v4288_v50  ;;  %v1961_v38 = vsel %vm1960_vm11, %v3206_v6, %v1957_v14 }
 0x527   :  { %v2422_v45 = vpop.xlane.xlu1 %2421  ;;  %2251 = vadd.xlane.f32.xlu0 %v4284_v59  ;;  %v1993_v3 = vmul.f32 %v1961_v38, %v4157_v42 }
 0x528   :  { %v2556_v28 = vmul.f32 0.5, %v2555_v40  ;;  %v2482_v48 = vmul.f32 0.03125, %v2422_v45  ;;  %v2242_v30 = vpop.xlane.xlu2 %2241  ;;  %2431 = vadd.xlane.f32.xlu2 %v2391_v11  ;;  %2931 = vmatmul.f32.vlgmr.msra.gmra.mxu0 %v2863_v19 }
 0x529   :  { %v2296_v0 = vmul.f32 0.03125, %v2242_v30  ;;  %2123 = vmatmul.f32.gmra.mxu3 %v1993_v3  ;;  %v2085_v19 = vpop.f32.mrf.mxu3 }
 0x52a   :  { %v2557_v52 = vsub.f32 1.5, %v2556_v28  ;;  %v2514_v20 = vadd.f32 1e-05, %v2482_v48 }
 0x52b   :  { %v3210_v37 = vpop.eup %3209  ;;  %v2328_v21 = vsub.f32 %v4204_v5, %v2296_v0  ;;  %v4308_v5 = vld [vmem:[%s4656_s4] ss:$0 sm:$0xff] }
 0x52c   :  { %v2564_v57 = vmul.f32 %v3210_v37, %v4278_v31  ;;  %3211 = vrsqrt.f32 %v2514_v20  ;;  %v2558_v17 = vmul.f32 %v3208_v60, %v2557_v52  ;;  %v2080_v58 = vadd.f32 %v4308_v5, %v2079_v12 }
 0x52d   :  { %v4301_v42 = vsel %vm1319_vm7, %v2328_v21, 0.0  ;;  %vm2570_vm0 = vweird.f32 %v3210_v37  ;;  %v2083_v32 = vadd.f32 %v4308_v5, %v2082_v24  ;;  %vm2579_vm5 = vweird.f32 %v2514_v20 }
 0x52e   :  { %v2565_v54 = vmul.f32 %v3210_v37, %v2564_v57  ;;  %v2392_v6 = vmul.f32 %v4301_v42, %v4301_v42  ;;  %v2562_v61 = vsel %vm2561_vm15, %v3208_v60, %v2558_v17  ;;  %v2175_v43 = vmul.f32 0.01, %v2080_v58  ;;  %vm2571_vm3 = vmor %vm2569_vm1, %vm2570_vm0 }
 0x52f   :  { %v2244_v27 = vpop.xlane.xlu1 %2243  ;;  %v2864_v56 = vmul.f32 %v2562_v61, %v4174_v51  ;;  %vm2143_vm2 = vcmp.ge.f32.partialorder %v2080_v58, 0.0  ;;  %v2176_v10 = vmul.f32 0.01, %v2083_v32  ;;  %vm2144_vm6 = vcmp.ge.f32.partialorder %v2083_v32, 0.0 }
 0x530   :  { %v2566_v16 = vmul.f32 0.5, %v2565_v54  ;;  %v2297_v62 = vmul.f32 0.03125, %v2244_v27  ;;  %2433 = vadd.xlane.f32.xlu1 %v2392_v6  ;;  %2253 = vadd.xlane.f32.xlu2 %v4311_v46  ;;  %v4324_v63 = vsel %vm2143_vm2, %v2080_v58, %v2175_v43 }
 0x531   :  { %2934 = vmatmul.f32.gmra.mxu0 %v2864_v56  ;;  %v4328_v9 = vsel %vm2144_vm6, %v2083_v32, %v2176_v10  ;;  %v2088_v30 = vpop.f32.mrf.mxu3 }
 0x532   :  { %v3212_v22 = vpop.eup %3211  ;;  %v2567_v23 = vsub.f32 1.5, %v2566_v16  ;;  %v2329_v13 = vsub.f32 %v4208_v18, %v2297_v62 }
 0x533   :  { %v2574_v2 = vmul.f32 %v3212_v22, %v2514_v20  ;;  %vm2580_vm4 = vweird.f32 %v3212_v22  ;;  %v2086_v20 = vadd.f32 %v4308_v5, %v2085_v19 }
 0x534   :  { %v4319_v49 = vsel %vm1319_vm7, %v2329_v13, 0.0  ;;  %v2568_v4 = vmul.f32 %v3210_v37, %v2567_v23  ;;  %vm2581_vm8 = vmor %vm2579_vm5, %vm2580_vm4 }
 0x535   :  { %v2575_v33 = vmul.f32 %v3212_v22, %v2574_v2  ;;  %v2393_v51 = vmul.f32 %v4319_v49, %v4319_v49  ;;  %v2177_v27 = vmul.f32 0.01, %v2086_v20  ;;  %vm2145_vm11 = vcmp.ge.f32.partialorder %v2086_v20, 0.0 }
 0x536   :  { %v2572_v18 = vsel %vm2571_vm3, %v3210_v37, %v2568_v4 }
 0x537   :  { %v2576_v44 = vmul.f32 0.5, %v2575_v33  ;;  %2435 = vadd.xlane.f32.xlu0 %v2393_v51  ;;  %v2865_v47 = vmul.f32 %v2572_v18, %v4187_v35  ;;  %v4351_v24 = vsel %vm2145_vm11, %v2086_v20, %v2177_v27 }
 0x538   :  { %2255 = vadd.xlane.f32.xlu1 %v4324_v63 }
 0x539   :  { %v2577_v60 = vsub.f32 1.5, %v2576_v44  ;;  %2937 = vmatmul.f32.gmra.mxu0 %v2865_v47  ;;  %v2091_v56 = vpop.f32.mrf.mxu3 }
 0x53a   :  { %v2092_v19 = vadd.f32 %v4308_v5, %v2091_v56 }
 0x53b   :  { %v2578_v31 = vmul.f32 %v3212_v22, %v2577_v60 }
 0x53c   :  { %vm2147_vm2 = vcmp.ge.f32.partialorder %v2092_v19, 0.0 }
 0x53d   :  { %v2582_v29 = vsel %vm2581_vm8, %v3212_v22, %v2578_v31 }
 0x53e   :  { %v2866_v14 = vmul.f32 %v2582_v29, %v4199_v41 }
 0x53f   :  { %2257 = vadd.xlane.f32.xlu0 %v4328_v9 }
 0x541   :  { %2940 = vmatmul.f32.gmra.mxu0 %v2866_v14  ;;  %v2094_v14 = vpop.f32.mrf.mxu3 }
 0x57a   :  { %v2424_v25 = vpop.xlane.xlu0 %2423 }
 0x57b   :  { %v2483_v35 = vmul.f32 0.03125, %v2424_v25 }
 0x57d   :  { %v2515_v40 = vadd.f32 1e-05, %v2483_v35 }
 0x57f   :  { %3213 = vrsqrt.f32 %v2515_v40  ;;  %vm2589_vm10 = vweird.f32 %v2515_v40 }
 0x582   :  { %v2426_v11 = vpop.xlane.xlu2 %2425  ;;  %v2246_v38 = vpop.xlane.xlu0 %2245 }
 0x583   :  { %v2484_v8 = vmul.f32 0.03125, %v2426_v11  ;;  %v2298_v45 = vmul.f32 0.03125, %v2246_v38 }
 0x585   :  { %v3214_v3 = vpop.eup %3213  ;;  %v2516_v28 = vadd.f32 1e-05, %v2484_v8  ;;  %v2330_v48 = vsub.f32 %v4235_v26, %v2298_v45 }
 0x586   :  { %v2584_v12 = vmul.f32 %v3214_v3, %v2515_v40  ;;  %vm2590_vm9 = vweird.f32 %v3214_v3 }
 0x587   :  { %3215 = vrsqrt.f32 %v2516_v28  ;;  %v4335_v41 = vsel %vm1319_vm7, %v2330_v48, 0.0  ;;  %vm2591_vm12 = vmor %vm2589_vm10, %vm2590_vm9  ;;  %vm2599_vm14 = vweird.f32 %v2516_v28 }
 0x588   :  { %v2585_v0 = vmul.f32 %v3214_v3, %v2584_v12  ;;  %v2394_v52 = vmul.f32 %v4335_v41, %v4335_v41 }
 0x58a   :  { %v2586_v37 = vmul.f32 0.5, %v2585_v0  ;;  %v2428_v21 = vpop.xlane.xlu1 %2427  ;;  %v2248_v7 = vpop.xlane.xlu2 %2247  ;;  %2437 = vadd.xlane.f32.xlu2 %v2394_v52  ;;  %v2179_v0 = vmul.f32 0.01, %v2092_v19 }
 0x58b   :  { %v2485_v57 = vmul.f32 0.03125, %v2428_v21  ;;  %v2299_v17 = vmul.f32 0.03125, %v2248_v7  ;;  %v2095_v7 = vadd.f32 %v4308_v5, %v2094_v14 }
 0x58c   :  { %v2587_v26 = vsub.f32 1.5, %v2586_v37 }
 0x58d   :  { %v3216_v54 = vpop.eup %3215  ;;  %v4340_v6 = vadd.f32 1e-05, %v2485_v57  ;;  %v2331_v58 = vsub.f32 %v4255_v55, %v2299_v17  ;;  %v2089_v55 = vadd.f32 %v4308_v5, %v2088_v30  ;;  %v4384_v57 = vsel %vm2147_vm2, %v2092_v19, %v2179_v0 }
 0x58e   :  { %v2594_v61 = vmul.f32 %v3216_v54, %v2516_v28  ;;  %v2588_v16 = vmul.f32 %v3214_v3, %v2587_v26  ;;  %vm2600_vm13 = vweird.f32 %v3216_v54  ;;  %v2097_v26 = vpop.f32.mrf.mxu3  ;;  %vm2148_vm8 = vcmp.ge.f32.partialorder %v2095_v7, 0.0 }
 0x58f   :  { %3217 = vrsqrt.f32 %v4340_v6  ;;  %v4346_v62 = vsel %vm1319_vm7, %v2331_v58, 0.0  ;;  %v2178_v10 = vmul.f32 0.01, %v2089_v55  ;;  %vm2146_vm15 = vcmp.ge.f32.partialorder %v2089_v55, 0.0  ;;  %vm2601_vm0 = vmor %vm2599_vm14, %vm2600_vm13  ;;  %v4391_v58 = vld [vmem:[%s4658_s6] ss:$0 sm:$0xff] }
 0x590   :  { %v2595_v22 = vmul.f32 %v3216_v54, %v2594_v61  ;;  %v2395_v23 = vmul.f32 %v4346_v62, %v4346_v62  ;;  %v2592_v13 = vsel %vm2591_vm12, %v3214_v3, %v2588_v16  ;;  %vm2609_vm3 = vweird.f32 %v4340_v6 }
 0x591   :  { %v2867_v2 = vmul.f32 %v2592_v13, %v4218_v34  ;;  %v4367_v40 = vsel %vm2146_vm15, %v2089_v55, %v2178_v10  ;;  %v2180_v13 = vmul.f32 0.01, %v2095_v7 }
 0x592   :  { %v2596_v43 = vmul.f32 0.5, %v2595_v22  ;;  %v2250_v4 = vpop.xlane.xlu1 %2249  ;;  %2439 = vadd.xlane.f32.xlu1 %v2395_v23  ;;  %2259 = vadd.xlane.f32.xlu2 %v4351_v24  ;;  %v2430_v33 = vpop.xlane.xlu0 %2429 }
 0x593   :  { %v2300_v51 = vmul.f32 0.03125, %v2250_v4  ;;  %v2486_v32 = vmul.f32 0.03125, %v2430_v33  ;;  %2943 = vmatmul.f32.gmra.mxu0 %v2867_v2 }
 0x594   :  { %v2597_v18 = vsub.f32 1.5, %v2596_v43 }
 0x595   :  { %v3218_v44 = vpop.eup %3217  ;;  %v2332_v47 = vsub.f32 %v4273_v39, %v2300_v51  ;;  %v4356_v60 = vadd.f32 1e-05, %v2486_v32 }
 0x596   :  { %v2604_v34 = vmul.f32 %v3218_v44, %v4340_v6  ;;  %v2598_v31 = vmul.f32 %v3216_v54, %v2597_v18  ;;  %vm2610_vm1 = vweird.f32 %v3218_v44 }
 0x597   :  { %3219 = vrsqrt.f32 %v4356_v60  ;;  %v4362_v29 = vsel %vm1319_vm7, %v2332_v47, 0.0  ;;  %vm2611_vm4 = vmor %vm2609_vm3, %vm2610_vm1  ;;  %vm2619_vm6 = vweird.f32 %v4356_v60  ;;  %v4406_v47 = vsel %vm2148_vm8, %v2095_v7, %v2180_v13 }
 0x598   :  { %v2605_v25 = vmul.f32 %v3218_v44, %v2604_v34  ;;  %v2396_v39 = vmul.f32 %v4362_v29, %v4362_v29  ;;  %v2602_v35 = vsel %vm2601_vm0, %v3216_v54, %v2598_v31 }
 0x599   :  { %v2868_v11 = vmul.f32 %v2602_v35, %v4230_v36 }
 0x59a   :  { %v2606_v38 = vmul.f32 0.5, %v2605_v25  ;;  %2261 = vadd.xlane.f32.xlu1 %v4367_v40  ;;  %2441 = vadd.xlane.f32.xlu0 %v2396_v39  ;;  %v2252_v8 = vpop.xlane.xlu0 %2251  ;;  %v2100_v25 = vpop.f32.mrf.mxu3 }
 0x59b   :  { %v2432_v45 = vpop.xlane.xlu2 %2431  ;;  %v2301_v3 = vmul.f32 0.03125, %v2252_v8  ;;  %2946 = vmatmul.f32.gmra.mxu0 %v2868_v11 }
 0x59c   :  { %v2607_v28 = vsub.f32 1.5, %v2606_v38  ;;  %v2487_v48 = vmul.f32 0.03125, %v2432_v45 }
 0x59d   :  { %v3220_v30 = vpop.eup %3219  ;;  %v2333_v12 = vsub.f32 %v4284_v59, %v2301_v3 }
 0x59e   :  { %v2614_v52 = vmul.f32 %v3220_v30, %v4356_v60  ;;  %v4373_v20 = vadd.f32 1e-05, %v2487_v48  ;;  %v2608_v36 = vmul.f32 %v3218_v44, %v2607_v28  ;;  %vm2620_vm5 = vweird.f32 %v3220_v30 }
 0x59f   :  { %v4378_v37 = vsel %vm1319_vm7, %v2333_v12, 0.0  ;;  %vm2621_vm9 = vmor %vm2619_vm6, %vm2620_vm5  ;;  %v2098_v60 = vadd.f32 %v4308_v5, %v2097_v26  ;;  %v2101_v12 = vadd.f32 %v4308_v5, %v2100_v25 }
 0x5a0   :  { %v2615_v21 = vmul.f32 %v3220_v30, %v2614_v52  ;;  %3221 = vrsqrt.f32 %v4373_v20  ;;  %v2397_v59 = vmul.f32 %v4378_v37, %v4378_v37  ;;  %v2612_v17 = vsel %vm2611_vm4, %v3218_v44, %v2608_v36 }
 0x5a1   :  { %v2869_v6 = vmul.f32 %v2612_v17, %v4249_v15  ;;  %v2181_v8 = vmul.f32 0.01, %v2098_v60  ;;  %vm2149_vm11 = vcmp.ge.f32.partialorder %v2098_v60, 0.0  ;;  %vm2629_vm12 = vweird.f32 %v4373_v20 }
 0x5a2   :  { %v2616_v54 = vmul.f32 0.5, %v2615_v21  ;;  %2263 = vadd.xlane.f32.xlu0 %v4384_v57  ;;  %2443 = vadd.xlane.f32.xlu2 %v2397_v59  ;;  %vm2150_vm0 = vcmp.ge.f32.partialorder %v2101_v12, 0.0 }
 0x5a3   :  { %v2434_v27 = vpop.xlane.xlu1 %2433  ;;  %v2254_v61 = vpop.xlane.xlu2 %2253  ;;  %2949 = vmatmul.f32.gmra.mxu0 %v2869_v6  ;;  %v4422_v0 = vsel %vm2149_vm11, %v2098_v60, %v2181_v8 }
 0x5a4   :  { %v2617_v16 = vsub.f32 1.5, %v2616_v54  ;;  %v2488_v56 = vmul.f32 0.03125, %v2434_v27  ;;  %v2302_v22 = vmul.f32 0.03125, %v2254_v61  ;;  %v2103_v54 = vpop.f32.mrf.mxu3  ;;  %v2182_v27 = vmul.f32 0.01, %v2101_v12 }
 0x5a5   :  { %v2932_v23 = vpop.f32.mrf.mxu0 }
 0x5a6   :  { %v3222_v55 = vpop.eup %3221  ;;  %v4394_v2 = vadd.f32 1e-05, %v2488_v56  ;;  %v2334_v15 = vsub.f32 %v4311_v46, %v2302_v22  ;;  %v2933_v43 = vadd.f32 %v4391_v58, %v2932_v23  ;;  %v2618_v4 = vmul.f32 %v3220_v30, %v2617_v16 }
 0x5a7   :  { %v2624_v33 = vmul.f32 %v3222_v55, %v4373_v20  ;;  %vm2630_vm10 = vweird.f32 %v3222_v55  ;;  %v2104_v23 = vadd.f32 %v4308_v5, %v2103_v54 }
 0x5a8   :  { %3223 = vrsqrt.f32 %v4394_v2  ;;  %3028 = vst [vmem:[#allocation10] sm:$0xff] %v2933_v43  ;;  %v4402_v51 = vsel %vm1319_vm7, %v2334_v15, 0.0  ;;  %v2622_v32 = vsel %vm2621_vm9, %v3220_v30, %v2618_v4  ;;  %vm2631_vm13 = vmor %vm2629_vm12, %vm2630_vm10  ;;  %vm2639_vm15 = vweird.f32 %v4394_v2 }
 0x5a9   :  { %v2625_v18 = vmul.f32 %v3222_v55, %v2624_v33  ;;  %v2398_v44 = vmul.f32 %v4402_v51, %v4402_v51  ;;  %v2870_v46 = vmul.f32 %v2622_v32, %v4268_v1  ;;  %v2183_v4 = vmul.f32 0.01, %v2104_v23 }
 0x5aa   :  { %2265 = vadd.xlane.f32.xlu2 %v4406_v47  ;;  %v2436_v10 = vpop.xlane.xlu0 %2435  ;;  %vm2151_vm4 = vcmp.ge.f32.partialorder %v2104_v23, 0.0 }
 0x5ab   :  { %v2626_v34 = vmul.f32 0.5, %v2625_v18  ;;  %v2256_v31 = vpop.xlane.xlu1 %2255  ;;  %2445 = vadd.xlane.f32.xlu1 %v2398_v44  ;;  %v2489_v14 = vmul.f32 0.03125, %v2436_v10  ;;  %2952 = vmatmul.f32.gmra.mxu0 %v2870_v46  ;;  %v4441_v46 = vsel %vm2151_vm4, %v2104_v23, %v2183_v4 }
 0x5ac   :  { %v2303_v39 = vmul.f32 0.03125, %v2256_v31 }
 0x5ad   :  { %v2627_v35 = vsub.f32 1.5, %v2626_v34  ;;  %v2521_v19 = vadd.f32 1e-05, %v2489_v14  ;;  %v2106_v34 = vpop.f32.mrf.mxu3 }
 0x5ae   :  { %v3224_v11 = vpop.eup %3223  ;;  %v2335_v38 = vsub.f32 %v4324_v63, %v2303_v39  ;;  %v2935_v45 = vpop.f32.mrf.mxu0 }
 0x5af   :  { %v2634_v1 = vmul.f32 %v3224_v11, %v4394_v2  ;;  %3225 = vrsqrt.f32 %v2521_v19  ;;  %v2936_v3 = vadd.f32 %v4391_v58, %v2935_v45  ;;  %v2628_v48 = vmul.f32 %v3222_v55, %v2627_v35 }
 0x5b0   :  { %v4417_v28 = vsel %vm1319_vm7, %v2335_v38, 0.0  ;;  %vm2640_vm14 = vweird.f32 %v3224_v11  ;;  %v4436_v2 = vsel %vm2150_vm0, %v2101_v12, %v2182_v27  ;;  %vm2649_vm3 = vweird.f32 %v2521_v19 }
 0x5b1   :  { %v2635_v30 = vmul.f32 %v3224_v11, %v2634_v1  ;;  %v2399_v63 = vmul.f32 %v4417_v28, %v4417_v28  ;;  %3029 = vst [vmem:[#allocation10 + $0x8] sm:$0xff] %v2936_v3  ;;  %v2632_v36 = vsel %vm2631_vm13, %v3222_v55, %v2628_v48  ;;  %vm2641_vm1 = vmor %vm2639_vm15, %vm2640_vm14  ;;  %v2107_v48 = vadd.f32 %v4308_v5, %v2106_v34 }
 0x5b2   :  { %v2258_v52 = vpop.xlane.xlu0 %2257  ;;  %v2871_v59 = vmul.f32 %v2632_v36, %v4288_v50 }
 0x5b3   :  { %v2636_v20 = vmul.f32 0.5, %v2635_v30  ;;  %2447 = vadd.xlane.f32.xlu0 %v2399_v63  ;;  %2267 = vadd.xlane.f32.xlu1 %v4422_v0  ;;  %v2304_v21 = vmul.f32 0.03125, %v2258_v52  ;;  %vm2152_vm8 = vcmp.ge.f32.partialorder %v2107_v48, 0.0 }
 0x5b4   :  { %2955 = vmatmul.f32.gmra.mxu0 %v2871_v59 }
 0x5b5   :  { %v3226_v7 = vpop.eup %3225  ;;  %v2637_v17 = vsub.f32 1.5, %v2636_v20  ;;  %v2336_v26 = vsub.f32 %v4328_v9, %v2304_v21  ;;  %v2109_v8 = vpop.f32.mrf.mxu3 }
 0x5b6   :  { %v2644_v6 = vmul.f32 %v3226_v7, %v2521_v19  ;;  %v2938_v61 = vpop.f32.mrf.mxu0  ;;  %vm2650_vm2 = vweird.f32 %v3226_v7 }
 0x5b7   :  { %v4430_v16 = vsel %vm1319_vm7, %v2336_v26, 0.0  ;;  %v2638_v56 = vmul.f32 %v3224_v11, %v2637_v17  ;;  %v2939_v22 = vadd.f32 %v4391_v58, %v2938_v61  ;;  %vm2651_vm5 = vmor %vm2649_vm3, %vm2650_vm2  ;;  %v2184_v17 = vmul.f32 0.01, %v2107_v48 }
 0x5b8   :  { %v2645_v50 = vmul.f32 %v3226_v7, %v2644_v6  ;;  %v2400_v9 = vmul.f32 %v4430_v16, %v4430_v16 }
 0x5b9   :  { %v2642_v13 = vsel %vm2641_vm1, %v3224_v11, %v2638_v56  ;;  %3030 = vst [vmem:[#allocation10 + $0x10] sm:$0xff] %v2939_v22  ;;  %v2110_v22 = vadd.f32 %v4308_v5, %v2109_v8 }
 0x5ba   :  { %v2646_v55 = vmul.f32 0.5, %v2645_v50  ;;  %2449 = vadd.xlane.f32.xlu2 %v2400_v9  ;;  %v2872_v15 = vmul.f32 %v2642_v13, %v4301_v42  ;;  %v4465_v9 = vsel %vm2152_vm8, %v2107_v48, %v2184_v17 }
 0x5bb   :  { %2269 = vadd.xlane.f32.xlu0 %v4436_v2  ;;  %vm2153_vm12 = vcmp.ge.f32.partialorder %v2110_v22, 0.0 }
 0x5bc   :  { %v2647_v43 = vsub.f32 1.5, %v2646_v55  ;;  %2958 = vmatmul.f32.gmra.mxu0 %v2872_v15 }
 0x5bd   :  { %v2112_v61 = vpop.f32.mrf.mxu3 }
 0x5be   :  { %v2648_v33 = vmul.f32 %v3226_v7, %v2647_v43  ;;  %v2941_v32 = vpop.f32.mrf.mxu0 }
 0x5bf   :  { %v2942_v18 = vadd.f32 %v4391_v58, %v2941_v32 }
 0x5c0   :  { %v2652_v44 = vsel %vm2651_vm5, %v3226_v7, %v2648_v33 }
 0x5c1   :  { %v2873_v60 = vmul.f32 %v2652_v44, %v4319_v49  ;;  %3031 = vst [vmem:[#allocation10 + $0x18] sm:$0xff] %v2942_v18 }
 0x5c2   :  { %2271 = vadd.xlane.f32.xlu2 %v4441_v46 }
 0x5c4   :  { %2961 = vmatmul.f32.gmra.mxu0 %v2873_v60 }
 0x5fd   :  { %v2438_v42 = vpop.xlane.xlu2 %2437 }
 0x5fe   :  { %v2490_v10 = vmul.f32 0.03125, %v2438_v42  ;;  %v2185_v42 = vmul.f32 0.01, %v2110_v22 }
 0x600   :  { %v2522_v31 = vadd.f32 1e-05, %v2490_v10 }
 0x602   :  { %3227 = vrsqrt.f32 %v2522_v31  ;;  %vm2659_vm9 = vweird.f32 %v2522_v31 }
 0x605   :  { %v2440_v14 = vpop.xlane.xlu1 %2439  ;;  %v2260_v25 = vpop.xlane.xlu2 %2259 }
 0x606   :  { %v2491_v39 = vmul.f32 0.03125, %v2440_v14  ;;  %v2305_v35 = vmul.f32 0.03125, %v2260_v25  ;;  %v2115_v14 = vpop.f32.mrf.mxu3 }
 0x607   :  { %v2116_v17 = vadd.f32 %v4308_v5, %v2115_v14 }
 0x608   :  { %v3228_v19 = vpop.eup %3227  ;;  %v2523_v11 = vadd.f32 1e-05, %v2491_v39  ;;  %v2337_v38 = vsub.f32 %v4351_v24, %v2305_v35  ;;  %v2113_v35 = vadd.f32 %v4308_v5, %v2112_v61 }
 0x609   :  { %v2654_v1 = vmul.f32 %v3228_v19, %v2522_v31  ;;  %vm2660_vm6 = vweird.f32 %v3228_v19  ;;  %vm2155_vm4 = vcmp.ge.f32.partialorder %v2116_v17, 0.0 }
 0x60a   :  { %3229 = vrsqrt.f32 %v2523_v11  ;;  %v4448_v49 = vsel %vm1319_vm7, %v2337_v38, 0.0  ;;  %vm2661_vm10 = vmor %vm2659_vm9, %vm2660_vm6  ;;  %vm2669_vm13 = vweird.f32 %v2523_v11  ;;  %vm2154_vm0 = vcmp.ge.f32.partialorder %v2113_v35, 0.0 }
 0x60b   :  { %v2655_v45 = vmul.f32 %v3228_v19, %v2654_v1  ;;  %v2401_v3 = vmul.f32 %v4448_v49, %v4448_v49 }
 0x60d   :  { %v2656_v30 = vmul.f32 0.5, %v2655_v45  ;;  %v2262_v63 = vpop.xlane.xlu1 %2261  ;;  %2451 = vadd.xlane.f32.xlu1 %v2401_v3  ;;  %v2442_v12 = vpop.xlane.xlu0 %2441 }
 0x60e   :  { %v2306_v52 = vmul.f32 0.03125, %v2262_v63  ;;  %v2492_v36 = vmul.f32 0.03125, %v2442_v12  ;;  %v2186_v12 = vmul.f32 0.01, %v2113_v35 }
 0x60f   :  { %v2657_v24 = vsub.f32 1.5, %v2656_v30 }
 0x610   :  { %v3230_v20 = vpop.eup %3229  ;;  %v2338_v21 = vsub.f32 %v4367_v40, %v2306_v52  ;;  %v4454_v59 = vadd.f32 1e-05, %v2492_v36  ;;  %v2944_v7 = vpop.f32.mrf.mxu0 }
 0x611   :  { %v2664_v26 = vmul.f32 %v3230_v20, %v2523_v11  ;;  %v2945_v54 = vadd.f32 %v4391_v58, %v2944_v7  ;;  %v2658_v6 = vmul.f32 %v3228_v19, %v2657_v24  ;;  %vm2670_vm11 = vweird.f32 %v3230_v20 }
 0x612   :  { %3231 = vrsqrt.f32 %v4454_v59  ;;  %v4460_v27 = vsel %vm1319_vm7, %v2338_v21, 0.0  ;;  %vm2671_vm14 = vmor %vm2669_vm13, %vm2670_vm11  ;;  %vm2679_vm1 = vweird.f32 %v4454_v59 }
 0x613   :  { %v2665_v56 = vmul.f32 %v3230_v20, %v2664_v26  ;;  %3032 = vst [vmem:[#allocation10 + $0x20] sm:$0xff] %v2945_v54  ;;  %v2402_v40 = vmul.f32 %v4460_v27, %v4460_v27  ;;  %v2662_v50 = vsel %vm2661_vm10, %v3228_v19, %v2658_v6  ;;  %v4482_v19 = vsel %vm2153_vm12, %v2110_v22, %v2185_v42 }
 0x614   :  { %v2874_v23 = vmul.f32 %v2662_v50, %v4335_v41  ;;  %v4500_v26 = vsel %vm2154_vm0, %v2113_v35, %v2186_v12 }
 0x615   :  { %v2666_v13 = vmul.f32 0.5, %v2665_v56  ;;  %2453 = vadd.xlane.f32.xlu0 %v2402_v40  ;;  %2273 = vadd.xlane.f32.xlu1 %v4465_v9  ;;  %v2444_v55 = vpop.xlane.xlu2 %2443  ;;  %v2264_v15 = vpop.xlane.xlu0 %2263 }
 0x616   :  { %v2493_v43 = vmul.f32 0.03125, %v2444_v55  ;;  %v2307_v4 = vmul.f32 0.03125, %v2264_v15  ;;  %2964 = vmatmul.f32.gmra.mxu0 %v2874_v23 }
 0x617   :  { %v2667_v33 = vsub.f32 1.5, %v2666_v13  ;;  %v2187_v13 = vmul.f32 0.01, %v2116_v17 }
 0x618   :  { %v3232_v32 = vpop.eup %3231  ;;  %v4469_v18 = vadd.f32 1e-05, %v2493_v43  ;;  %v2339_v44 = vsub.f32 %v4384_v57, %v2307_v4  ;;  %v2947_v60 = vpop.f32.mrf.mxu0 }
 0x619   :  { %v2674_v41 = vmul.f32 %v3232_v32, %v4454_v59  ;;  %v2948_v10 = vadd.f32 %v4391_v58, %v2947_v60  ;;  %v2668_v34 = vmul.f32 %v3230_v20, %v2667_v33  ;;  %vm2680_vm15 = vweird.f32 %v3232_v32  ;;  %v2118_v59 = vpop.f32.mrf.mxu3 }
 0x61a   :  { %3233 = vrsqrt.f32 %v4469_v18  ;;  %v4477_v31 = vsel %vm1319_vm7, %v2339_v44, 0.0  ;;  %vm2681_vm2 = vmor %vm2679_vm1, %vm2680_vm15  ;;  %vm2689_vm5 = vweird.f32 %v4469_v18 }
 0x61b   :  { %v2675_v25 = vmul.f32 %v3232_v32, %v2674_v41  ;;  %3033 = vst [vmem:[#allocation10 + $0x28] sm:$0xff] %v2948_v10  ;;  %v2403_v57 = vmul.f32 %v4477_v31, %v4477_v31  ;;  %v2672_v39 = vsel %vm2671_vm14, %v3230_v20, %v2668_v34  ;;  %v2119_v10 = vadd.f32 %v4308_v5, %v2118_v59 }
 0x61c   :  { %v2875_v11 = vmul.f32 %v2672_v39, %v4346_v62 }
 0x61d   :  { %v2676_v38 = vmul.f32 0.5, %v2675_v25  ;;  %2275 = vadd.xlane.f32.xlu0 %v4482_v19  ;;  %v2266_v8 = vpop.xlane.xlu2 %2265  ;;  %2455 = vadd.xlane.f32.xlu2 %v2403_v57  ;;  %vm2156_vm9 = vcmp.ge.f32.partialorder %v2119_v10, 0.0 }
 0x61e   :  { %v2446_v1 = vpop.xlane.xlu1 %2445  ;;  %v2308_v45 = vmul.f32 0.03125, %v2266_v8  ;;  %2967 = vmatmul.f32.gmra.mxu0 %v2875_v11 }
 0x61f   :  { %v2677_v3 = vsub.f32 1.5, %v2676_v38  ;;  %v2494_v48 = vmul.f32 0.03125, %v2446_v1 }
 0x620   :  { %v3234_v30 = vpop.eup %3233  ;;  %v2340_v63 = vsub.f32 %v4406_v47, %v2308_v45  ;;  %v2950_v62 = vpop.f32.mrf.mxu0  ;;  %v2188_v45 = vmul.f32 0.01, %v2119_v10 }
 0x621   :  { %v2684_v52 = vmul.f32 %v3234_v30, %v4469_v18  ;;  %v4488_v36 = vadd.f32 1e-05, %v2494_v48  ;;  %v2678_v24 = vmul.f32 %v3232_v32, %v2677_v3  ;;  %v2951_v20 = vadd.f32 %v4391_v58, %v2950_v62  ;;  %v2121_v39 = vpop.f32.mrf.mxu3 }
 0x622   :  { %v4494_v21 = vsel %vm1319_vm7, %v2340_v63, 0.0  ;;  %vm2690_vm3 = vweird.f32 %v3234_v30  ;;  %v4518_v18 = vsel %vm2155_vm4, %v2116_v17, %v2187_v13  ;;  %v4534_v62 = vsel %vm2156_vm9, %v2119_v10, %v2188_v45 }
 0x623   :  { %v2685_v7 = vmul.f32 %v3234_v30, %v2684_v52  ;;  %3235 = vrsqrt.f32 %v4488_v36  ;;  %v2404_v47 = vmul.f32 %v4494_v21, %v4494_v21  ;;  %3034 = vst [vmem:[#allocation10 + $0x30] sm:$0xff] %v2951_v20  ;;  %v2682_v54 = vsel %vm2681_vm2, %v3232_v32, %v2678_v24  ;;  %vm2691_vm6 = vmor %vm2689_vm5, %vm2690_vm3 }
 0x624   :  { %v2876_v61 = vmul.f32 %v2682_v54, %v4362_v29  ;;  %vm2699_vm10 = vweird.f32 %v4488_v36  ;;  %v2122_v52 = vadd.f32 %v4308_v5, %v2121_v39 }
 0x625   :  { %v2686_v6 = vmul.f32 0.5, %v2685_v7  ;;  %2457 = vadd.xlane.f32.xlu1 %v2404_v47  ;;  %2277 = vadd.xlane.f32.xlu2 %v4500_v26 }
 0x626   :  { %v2268_v56 = vpop.xlane.xlu1 %2267  ;;  %v2448_v40 = vpop.xlane.xlu0 %2447  ;;  %2970 = vmatmul.f32.gmra.mxu0 %v2876_v61  ;;  %vm2157_vm14 = vcmp.ge.f32.partialorder %v2122_v52, 0.0 }
 0x627   :  { %v2687_v50 = vsub.f32 1.5, %v2686_v6  ;;  %v2309_v22 = vmul.f32 0.03125, %v2268_v56  ;;  %v2495_v23 = vmul.f32 0.03125, %v2448_v40  ;;  %v2189_v56 = vmul.f32 0.01, %v2122_v52 }
 0x628   :  { %v2953_v4 = vpop.f32.mrf.mxu0 }
 0x629   :  { %v3236_v55 = vpop.eup %3235  ;;  %v2341_v15 = vsub.f32 %v4422_v0, %v2309_v22  ;;  %v4506_v43 = vadd.f32 1e-05, %v2495_v23  ;;  %v2688_v33 = vmul.f32 %v3234_v30, %v2687_v50  ;;  %v2954_v32 = vadd.f32 %v4391_v58, %v2953_v4  ;;  %v2124_v6 = vpop.f32.mrf.mxu3 }
 0x62a   :  { %v2694_v29 = vmul.f32 %v3236_v55, %v4488_v36  ;;  %vm2700_vm8 = vweird.f32 %v3236_v55  ;;  %v2125_v13 = vadd.f32 %v4308_v5, %v2124_v6 }
 0x62b   :  { %3237 = vrsqrt.f32 %v4506_v43  ;;  %v4513_v44 = vsel %vm1319_vm7, %v2341_v15, 0.0  ;;  %v2692_v60 = vsel %vm2691_vm6, %v3234_v30, %v2688_v33  ;;  %3035 = vst [vmem:[#allocation10 + $0x38] sm:$0xff] %v2954_v32  ;;  %vm2701_vm11 = vmor %vm2699_vm10, %vm2700_vm8  ;;  %vm2709_vm13 = vweird.f32 %v4506_v43 }
 0x62c   :  { %v2695_v42 = vmul.f32 %v3236_v55, %v2694_v29  ;;  %v2405_v0 = vmul.f32 %v4513_v44, %v4513_v44  ;;  %v2877_v41 = vmul.f32 %v2692_v60, %v4378_v37  ;;  %v2190_v29 = vmul.f32 0.01, %v2125_v13 }
 0x62d   :  { %2279 = vadd.xlane.f32.xlu1 %v4518_v18  ;;  %v2450_v34 = vpop.xlane.xlu2 %2449  ;;  %vm2158_vm2 = vcmp.ge.f32.partialorder %v2125_v13, 0.0 }
 0x62e   :  { %v2696_v14 = vmul.f32 0.5, %v2695_v42  ;;  %2459 = vadd.xlane.f32.xlu0 %v2405_v0  ;;  %v2496_v25 = vmul.f32 0.03125, %v2450_v34  ;;  %v2270_v57 = vpop.xlane.xlu0 %2269  ;;  %2973 = vmatmul.f32.gmra.mxu0 %v2877_v41  ;;  %v4553_v0 = vsel %vm2158_vm2, %v2125_v13, %v2190_v29 }
 0x62f   :  { %v2310_v35 = vmul.f32 0.03125, %v2270_v57 }
 0x630   :  { %v2697_v11 = vsub.f32 1.5, %v2696_v14  ;;  %v2528_v38 = vadd.f32 1e-05, %v2496_v25 }
 0x631   :  { %v3238_v8 = vpop.eup %3237  ;;  %v2342_v1 = vsub.f32 %v4436_v2, %v2310_v35  ;;  %v2956_v3 = vpop.f32.mrf.mxu0 }
 0x632   :  { %v2704_v37 = vmul.f32 %v3238_v8, %v4506_v43  ;;  %3239 = vrsqrt.f32 %v2528_v38  ;;  %v2957_v48 = vadd.f32 %v4391_v58, %v2956_v3  ;;  %v2698_v63 = vmul.f32 %v3236_v55, %v2697_v11 }
 0x633   :  { %v4529_v30 = vsel %vm1319_vm7, %v2342_v1, 0.0  ;;  %vm2710_vm12 = vweird.f32 %v3238_v8  ;;  %v4548_v43 = vsel %vm2157_vm14, %v2122_v52, %v2189_v56  ;;  %vm2719_vm1 = vweird.f32 %v2528_v38 }
 0x634   :  { %v2705_v12 = vmul.f32 %v3238_v8, %v2704_v37  ;;  %v2406_v2 = vmul.f32 %v4529_v30, %v4529_v30  ;;  %3036 = vst [vmem:[#allocation10 + $0x40] sm:$0xff] %v2957_v48  ;;  %v2702_v20 = vsel %vm2701_vm11, %v3236_v55, %v2698_v63  ;;  %vm2711_vm15 = vmor %vm2709_vm13, %vm2710_vm12 }
 0x635   :  { %v2272_v24 = vpop.xlane.xlu2 %2271  ;;  %v2878_v47 = vmul.f32 %v2702_v20, %v4402_v51 }
 0x636   :  { %v2706_v36 = vmul.f32 0.5, %v2705_v12  ;;  %2281 = vadd.xlane.f32.xlu0 %v4534_v62  ;;  %v2311_v7 = vmul.f32 0.03125, %v2272_v24  ;;  %2461 = vadd.xlane.f32.xlu2 %v2406_v2 }
 0x637   :  { %2976 = vmatmul.f32.gmra.mxu0 %v2878_v47 }
 0x638   :  { %v3240_v17 = vpop.eup %3239  ;;  %v2707_v54 = vsub.f32 1.5, %v2706_v36  ;;  %v2343_v59 = vsub.f32 %v4441_v46, %v2311_v7 }
 0x639   :  { %v2714_v61 = vmul.f32 %v3240_v17, %v2528_v38  ;;  %v2959_v40 = vpop.f32.mrf.mxu0  ;;  %vm2720_vm0 = vweird.f32 %v3240_v17 }
 0x63a   :  { %v4542_v50 = vsel %vm1319_vm7, %v2343_v59, 0.0  ;;  %v2708_v22 = vmul.f32 %v3238_v8, %v2707_v54  ;;  %v2960_v23 = vadd.f32 %v4391_v58, %v2959_v40  ;;  %vm2721_vm3 = vmor %vm2719_vm1, %vm2720_vm0 }
 0x63b   :  { %v2715_v51 = vmul.f32 %v3240_v17, %v2714_v61  ;;  %v2407_v46 = vmul.f32 %v4542_v50, %v4542_v50 }
 0x63c   :  { %v2712_v55 = vsel %vm2711_vm15, %v3238_v8, %v2708_v22  ;;  %3037 = vst [vmem:[#allocation10 + $0x48] sm:$0xff] %v2960_v23 }
 0x63d   :  { %v2716_v15 = vmul.f32 0.5, %v2715_v51  ;;  %2463 = vadd.xlane.f32.xlu1 %v2407_v46  ;;  %v2879_v4 = vmul.f32 %v2712_v55, %v4417_v28 }
 0x63e   :  { %2283 = vadd.xlane.f32.xlu2 %v4548_v43 }
 0x63f   :  { %v2717_v33 = vsub.f32 1.5, %v2716_v15  ;;  %2979 = vmatmul.f32.gmra.mxu0 %v2879_v4 }
 0x641   :  { %v2718_v32 = vmul.f32 %v3240_v17, %v2717_v33  ;;  %v2962_v60 = vpop.f32.mrf.mxu0 }
 0x642   :  { %v2963_v5 = vadd.f32 %v4391_v58, %v2962_v60 }
 0x643   :  { %v2722_v42 = vsel %vm2721_vm3, %v3240_v17, %v2718_v32 }
 0x644   :  { %v2880_v41 = vmul.f32 %v2722_v42, %v4430_v16  ;;  %3038 = vst [vmem:[#allocation10 + $0x50] sm:$0xff] %v2963_v5 }
 0x645   :  { %2285 = vadd.xlane.f32.xlu1 %v4553_v0 }
 0x647   :  { %2982 = vmatmul.f32.gmra.mxu0 %v2880_v41 }
 0x680   :  { %v2452_v28 = vpop.xlane.xlu1 %2451 }
 0x681   :  { %v2497_v10 = vmul.f32 0.03125, %v2452_v28 }
 0x683   :  { %v2529_v34 = vadd.f32 1e-05, %v2497_v10 }
 0x685   :  { %3241 = vrsqrt.f32 %v2529_v34  ;;  %vm2729_vm5 = vweird.f32 %v2529_v34 }
 0x688   :  { %v2274_v14 = vpop.xlane.xlu1 %2273  ;;  %v2454_v25 = vpop.xlane.xlu0 %2453 }
 0x689   :  { %v2312_v57 = vmul.f32 0.03125, %v2274_v14  ;;  %v2498_v39 = vmul.f32 0.03125, %v2454_v25 }
 0x68b   :  { %v3242_v35 = vpop.eup %3241  ;;  %v2344_v11 = vsub.f32 %v4465_v9, %v2312_v57  ;;  %v2530_v38 = vadd.f32 1e-05, %v2498_v39 }
 0x68c   :  { %v2724_v8 = vmul.f32 %v3242_v35, %v2529_v34  ;;  %vm2730_vm4 = vweird.f32 %v3242_v35 }
 0x68d   :  { %3243 = vrsqrt.f32 %v2530_v38  ;;  %v4560_v16 = vsel %vm1319_vm7, %v2344_v11, 0.0  ;;  %vm2731_vm6 = vmor %vm2729_vm5, %vm2730_vm4  ;;  %vm2739_vm9 = vweird.f32 %v2530_v38 }
 0x68e   :  { %v2725_v1 = vmul.f32 %v3242_v35, %v2724_v8  ;;  %v2408_v45 = vmul.f32 %v4560_v16, %v4560_v16 }
 0x690   :  { %v2726_v37 = vmul.f32 0.5, %v2725_v1  ;;  %2465 = vadd.xlane.f32.xlu0 %v2408_v45  ;;  %v2456_v3 = vpop.xlane.xlu2 %2455  ;;  %v2276_v48 = vpop.xlane.xlu0 %2275 }
 0x691   :  { %v2499_v63 = vmul.f32 0.03125, %v2456_v3  ;;  %v2313_v12 = vmul.f32 0.03125, %v2276_v48 }
 0x692   :  { %v2727_v2 = vsub.f32 1.5, %v2726_v37 }
 0x693   :  { %v3244_v9 = vpop.eup %3243  ;;  %v2531_v52 = vadd.f32 1e-05, %v2499_v63  ;;  %v2345_v24 = vsub.f32 %v4482_v19, %v2313_v12  ;;  %v2965_v20 = vpop.f32.mrf.mxu0 }
 0x694   :  { %v2734_v36 = vmul.f32 %v3244_v9, %v2530_v38  ;;  %v2966_v7 = vadd.f32 %v4391_v58, %v2965_v20  ;;  %v2728_v47 = vmul.f32 %v3242_v35, %v2727_v2  ;;  %vm2740_vm8 = vweird.f32 %v3244_v9 }
 0x695   :  { %3245 = vrsqrt.f32 %v2531_v52  ;;  %v4568_v17 = vsel %vm1319_vm7, %v2345_v24, 0.0  ;;  %vm2741_vm10 = vmor %vm2739_vm9, %vm2740_vm8  ;;  %vm2749_vm12 = vweird.f32 %v2531_v52 }
 0x696   :  { %v2735_v54 = vmul.f32 %v3244_v9, %v2734_v36  ;;  %3039 = vst [vmem:[#allocation10 + $0x58] sm:$0xff] %v2966_v7  ;;  %v2409_v59 = vmul.f32 %v4568_v17, %v4568_v17  ;;  %v2732_v6 = vsel %vm2731_vm6, %v3242_v35, %v2728_v47 }
 0x697   :  { %v2881_v19 = vmul.f32 %v2732_v6, %v4448_v49 }
 0x698   :  { %v2736_v61 = vmul.f32 0.5, %v2735_v54  ;;  %v2458_v56 = vpop.xlane.xlu1 %2457  ;;  %v2278_v40 = vpop.xlane.xlu2 %2277  ;;  %2467 = vadd.xlane.f32.xlu2 %v2409_v59 }
 0x699   :  { %v2500_v22 = vmul.f32 0.03125, %v2458_v56  ;;  %v2314_v51 = vmul.f32 0.03125, %v2278_v40  ;;  %2985 = vmatmul.f32.gmra.mxu0 %v2881_v19 }
 0x69a   :  { %v2737_v23 = vsub.f32 1.5, %v2736_v61 }
 0x69b   :  { %v3246_v46 = vpop.eup %3245  ;;  %v2532_v13 = vadd.f32 1e-05, %v2500_v22  ;;  %v2346_v55 = vsub.f32 %v4500_v26, %v2314_v51  ;;  %v2968_v15 = vpop.f32.mrf.mxu0 }
 0x69c   :  { %v2744_v4 = vmul.f32 %v3246_v46, %v2531_v52  ;;  %v2969_v33 = vadd.f32 %v4391_v58, %v2968_v15  ;;  %v2738_v29 = vmul.f32 %v3244_v9, %v2737_v23  ;;  %vm2750_vm11 = vweird.f32 %v3246_v46 }
 0x69d   :  { %3247 = vrsqrt.f32 %v2532_v13  ;;  %v4577_v49 = vsel %vm1319_vm7, %v2346_v55, 0.0  ;;  %vm2751_vm13 = vmor %vm2749_vm12, %vm2750_vm11  ;;  %vm2759_vm15 = vweird.f32 %v2532_v13 }
 0x69e   :  { %v2745_v32 = vmul.f32 %v3246_v46, %v2744_v4  ;;  %3040 = vst [vmem:[#allocation10 + $0x60] sm:$0xff] %v2969_v33  ;;  %v2410_v60 = vmul.f32 %v4577_v49, %v4577_v49  ;;  %v2742_v5 = vsel %vm2741_vm10, %v3244_v9, %v2738_v29 }
 0x69f   :  { %v2882_v26 = vmul.f32 %v2742_v5, %v4460_v27 }
 0x6a0   :  { %v2746_v42 = vmul.f32 0.5, %v2745_v32  ;;  %v2280_v41 = vpop.xlane.xlu1 %2279  ;;  %2469 = vadd.xlane.f32.xlu0 %v2410_v60 }
 0x6a1   :  { %v2315_v28 = vmul.f32 0.03125, %v2280_v41  ;;  %v2460_v10 = vpop.xlane.xlu0 %2459  ;;  %2988 = vmatmul.f32.gmra.mxu0 %v2882_v26 }
 0x6a2   :  { %v2747_v34 = vsub.f32 1.5, %v2746_v42  ;;  %v2501_v14 = vmul.f32 0.03125, %v2460_v10 }
 0x6a3   :  { %v3248_v25 = vpop.eup %3247  ;;  %v2347_v57 = vsub.f32 %v4518_v18, %v2315_v28  ;;  %v2971_v11 = vpop.f32.mrf.mxu0 }
 0x6a4   :  { %v2754_v39 = vmul.f32 %v3248_v25, %v2532_v13  ;;  %v2533_v35 = vadd.f32 1e-05, %v2501_v14  ;;  %v2748_v38 = vmul.f32 %v3246_v46, %v2747_v34  ;;  %v2972_v8 = vadd.f32 %v4391_v58, %v2971_v11 }
 0x6a5   :  { %v4586_v27 = vsel %vm1319_vm7, %v2347_v57, 0.0  ;;  %vm2760_vm14 = vweird.f32 %v3248_v25 }
 0x6a6   :  { %v2755_v1 = vmul.f32 %v3248_v25, %v2754_v39  ;;  %3249 = vrsqrt.f32 %v2533_v35  ;;  %v2411_v45 = vmul.f32 %v4586_v27, %v4586_v27  ;;  %3041 = vst [vmem:[#allocation10 + $0x68] sm:$0xff] %v2972_v8  ;;  %v2752_v37 = vsel %vm2751_vm13, %v3246_v46, %v2748_v38  ;;  %vm2761_vm0 = vmor %vm2759_vm15, %vm2760_vm14 }
 0x6a7   :  { %v2883_v3 = vmul.f32 %v2752_v37, %v4477_v31  ;;  %vm2769_vm2 = vweird.f32 %v2533_v35 }
 0x6a8   :  { %v2756_v18 = vmul.f32 0.5, %v2755_v1  ;;  %2471 = vadd.xlane.f32.xlu1 %v2411_v45 }
 0x6a9   :  { %v2462_v48 = vpop.xlane.xlu2 %2461  ;;  %v2282_v63 = vpop.xlane.xlu0 %2281  ;;  %2991 = vmatmul.f32.gmra.mxu0 %v2883_v3 }
 0x6aa   :  { %v2757_v12 = vsub.f32 1.5, %v2756_v18  ;;  %v2502_v2 = vmul.f32 0.03125, %v2462_v48  ;;  %v2316_v9 = vmul.f32 0.03125, %v2282_v63 }
 0x6ab   :  { %v2974_v36 = vpop.f32.mrf.mxu0 }
 0x6ac   :  { %v3250_v52 = vpop.eup %3249  ;;  %v2534_v24 = vadd.f32 1e-05, %v2502_v2  ;;  %v2348_v20 = vsub.f32 %v4534_v62, %v2316_v9  ;;  %v2758_v7 = vmul.f32 %v3248_v25, %v2757_v12  ;;  %v2975_v54 = vadd.f32 %v4391_v58, %v2974_v36 }
 0x6ad   :  { %v2764_v47 = vmul.f32 %v3250_v52, %v2533_v35  ;;  %vm2770_vm1 = vweird.f32 %v3250_v52 }
 0x6ae   :  { %3251 = vrsqrt.f32 %v2534_v24  ;;  %v4595_v31 = vsel %vm1319_vm7, %v2348_v20, 0.0  ;;  %v2762_v59 = vsel %vm2761_vm0, %v3248_v25, %v2758_v7  ;;  %3042 = vst [vmem:[#allocation10 + $0x70] sm:$0xff] %v2975_v54  ;;  %vm2771_vm3 = vmor %vm2769_vm2, %vm2770_vm1  ;;  %vm2779_vm5 = vweird.f32 %v2534_v24 }
 0x6af   :  { %v2765_v6 = vmul.f32 %v3250_v52, %v2764_v47  ;;  %v2412_v19 = vmul.f32 %v4595_v31, %v4595_v31  ;;  %v2884_v61 = vmul.f32 %v2762_v59, %v4494_v21 }
 0x6b0   :  { %v2464_v62 = vpop.xlane.xlu1 %2463 }
 0x6b1   :  { %v2766_v56 = vmul.f32 0.5, %v2765_v6  ;;  %v2503_v40 = vmul.f32 0.03125, %v2464_v62  ;;  %v2284_v22 = vpop.xlane.xlu2 %2283  ;;  %2473 = vadd.xlane.f32.xlu2 %v2412_v19  ;;  %2994 = vmatmul.f32.gmra.mxu0 %v2884_v61  ;;  %v4623_v19 = vld [vmem:[%s4658_s6] ss:$0 sm:$0xff]  ;;  %s3407_s6 = smov [#allocation10]  }
 0x6b2   :  { %v2317_v51 = vmul.f32 0.03125, %v2284_v22  ;;  %s3064_s29 = sshll.u32 %s3407_s6, 4  ;;  %s3065_s29 = int_to_ptr.vmem [resolvable:$true] %s3064_s29 }
 0x6b3   :  { %v2767_v23 = vsub.f32 1.5, %v2766_v56  ;;  %v2535_v46 = vadd.f32 1e-05, %v2503_v40 }
 0x6b4   :  { %v3252_v13 = vpop.eup %3251  ;;  %v2349_v55 = vsub.f32 %v4548_v43, %v2317_v51  ;;  %v2977_v4 = vpop.f32.mrf.mxu0 }
 0x6b5   :  { %v2774_v15 = vmul.f32 %v3252_v13, %v2534_v24  ;;  %3253 = vrsqrt.f32 %v2535_v46  ;;  %v2978_v33 = vadd.f32 %v4391_v58, %v2977_v4  ;;  %v2768_v29 = vmul.f32 %v3250_v52, %v2767_v23 }
 0x6b6   :  { %v4604_v21 = vsel %vm1319_vm7, %v2349_v55, 0.0  ;;  %vm2780_vm4 = vweird.f32 %v3252_v13  ;;  %vm2789_vm9 = vweird.f32 %v2535_v46 }
 0x6b7   :  { %v2775_v32 = vmul.f32 %v3252_v13, %v2774_v15  ;;  %v2413_v60 = vmul.f32 %v4604_v21, %v4604_v21  ;;  %3043 = vst [vmem:[#allocation10 + $0x78] sm:$0xff] %v2978_v33  ;;  %v2772_v26 = vsel %vm2771_vm3, %v3250_v52, %v2768_v29  ;;  %vm2781_vm6 = vmor %vm2779_vm5, %vm2780_vm4 }
 0x6b8   :  { %v2286_v5 = vpop.xlane.xlu1 %2285  ;;  %v2885_v41 = vmul.f32 %v2772_v26, %v4513_v44 }
 0x6b9   :  { %v2776_v43 = vmul.f32 0.5, %v2775_v32  ;;  %v2318_v42 = vmul.f32 0.03125, %v2286_v5  ;;  %2475 = vadd.xlane.f32.xlu0 %v2413_v60 }
 0x6ba   :  { %2997 = vmatmul.f32.gmra.mxu0 %v2885_v41 }
 0x6bb   :  { %v3254_v28 = vpop.eup %3253  ;;  %v2777_v10 = vsub.f32 1.5, %v2776_v43  ;;  %v2350_v34 = vsub.f32 %v4553_v0, %v2318_v42 }
 0x6bc   :  { %v2784_v14 = vmul.f32 %v3254_v28, %v2535_v46  ;;  %v2980_v25 = vpop.f32.mrf.mxu0  ;;  %vm2790_vm8 = vweird.f32 %v3254_v28 }
 0x6bd   :  { %v4612_v57 = vsel %vm1319_vm7, %v2350_v34, 0.0  ;;  %v2778_v39 = vmul.f32 %v3252_v13, %v2777_v10  ;;  %v2981_v11 = vadd.f32 %v4391_v58, %v2980_v25  ;;  %vm2791_vm7 = vmor %vm2789_vm9, %vm2790_vm8 }
 0x6be   :  { %v2785_v35 = vmul.f32 %v3254_v28, %v2784_v14  ;;  %v2414_v44 = vmul.f32 %v4612_v57, %v4612_v57 }
 0x6bf   :  { %v2782_v38 = vsel %vm2781_vm6, %v3252_v13, %v2778_v39  ;;  %3044 = vst [vmem:[#allocation10 + $0x80] sm:$0xff] %v2981_v11 }
 0x6c0   :  { %v2786_v8 = vmul.f32 0.5, %v2785_v35  ;;  %2477 = vadd.xlane.f32.xlu1 %v2414_v44  ;;  %v2886_v0 = vmul.f32 %v2782_v38, %v4529_v30 }
 0x6c2   :  { %v2787_v1 = vsub.f32 1.5, %v2786_v8  ;;  %3000 = vmatmul.f32.gmra.mxu0 %v2886_v0 }
 0x6c4   :  { %v2788_v53 = vmul.f32 %v3254_v28, %v2787_v1  ;;  %v2983_v45 = vpop.f32.mrf.mxu0 }
 0x6c5   :  { %v2984_v37 = vadd.f32 %v4391_v58, %v2983_v45 }
 0x6c6   :  { %v2792_v18 = vsel %vm2791_vm7, %v3254_v28, %v2788_v53 }
 0x6c7   :  { %v2887_v3 = vmul.f32 %v2792_v18, %v4542_v50  ;;  %3045 = vst [vmem:[#allocation10 + $0x88] sm:$0xff] %v2984_v37 }
 0x6ca   :  { %3003 = vmatmul.f32.gmra.mxu0 %v2887_v3 }
 0x703   :  { %v2466_v48 = vpop.xlane.xlu0 %2465 }
 0x704   :  { %v2504_v63 = vmul.f32 0.03125, %v2466_v48 }
 0x706   :  { %v2536_v12 = vadd.f32 1e-05, %v2504_v63 }
 0x708   :  { %3255 = vrsqrt.f32 %v2536_v12  ;;  %vm2799_vm11 = vweird.f32 %v2536_v12 }
 0x70b   :  { %v2468_v2 = vpop.xlane.xlu2 %2467 }
 0x70c   :  { %v2505_v30 = vmul.f32 0.03125, %v2468_v2 }
 0x70e   :  { %v3256_v9 = vpop.eup %3255  ;;  %v2537_v52 = vadd.f32 1e-05, %v2505_v30 }
 0x70f   :  { %v2794_v24 = vmul.f32 %v3256_v9, %v2536_v12  ;;  %vm2800_vm10 = vweird.f32 %v3256_v9 }
 0x710   :  { %3257 = vrsqrt.f32 %v2537_v52  ;;  %vm2801_vm12 = vmor %vm2799_vm11, %vm2800_vm10  ;;  %vm2809_vm14 = vweird.f32 %v2537_v52 }
 0x711   :  { %v2795_v20 = vmul.f32 %v3256_v9, %v2794_v24 }
 0x713   :  { %v2796_v36 = vmul.f32 0.5, %v2795_v20  ;;  %v2470_v7 = vpop.xlane.xlu0 %2469 }
 0x714   :  { %v2506_v47 = vmul.f32 0.03125, %v2470_v7 }
 0x715   :  { %v2797_v58 = vsub.f32 1.5, %v2796_v36 }
 0x716   :  { %v3258_v54 = vpop.eup %3257  ;;  %v2538_v50 = vadd.f32 1e-05, %v2506_v47  ;;  %v2986_v59 = vpop.f32.mrf.mxu0 }
 0x717   :  { %v2804_v6 = vmul.f32 %v3258_v54, %v2537_v52  ;;  %v2987_v61 = vadd.f32 %v4623_v19, %v2986_v59  ;;  %v2798_v62 = vmul.f32 %v3256_v9, %v2797_v58  ;;  %vm2810_vm13 = vweird.f32 %v3258_v54 }
 0x718   :  { %3259 = vrsqrt.f32 %v2538_v50  ;;  %vm2811_vm15 = vmor %vm2809_vm14, %vm2810_vm13  ;;  %vm2819_vm1 = vweird.f32 %v2538_v50 }
 0x719   :  { %v2805_v56 = vmul.f32 %v3258_v54, %v2804_v6  ;;  %3046 = vst [vmem:[#allocation10 + $0x90] sm:$0xff] %v2987_v61  ;;  %v2802_v40 = vsel %vm2801_vm12, %v3256_v9, %v2798_v62 }
 0x71a   :  { %v2888_v22 = vmul.f32 %v2802_v40, %v4560_v16 }
 0x71b   :  { %v2806_v51 = vmul.f32 0.5, %v2805_v56  ;;  %v2472_v23 = vpop.xlane.xlu1 %2471 }
 0x71c   :  { %v2507_v46 = vmul.f32 0.03125, %v2472_v23  ;;  %3006 = vmatmul.f32.gmra.mxu0 %v2888_v22 }
 0x71d   :  { %v2807_v13 = vsub.f32 1.5, %v2806_v51 }
 0x71e   :  { %v3260_v55 = vpop.eup %3259  ;;  %v2539_v15 = vadd.f32 1e-05, %v2507_v46  ;;  %v2989_v4 = vpop.f32.mrf.mxu0 }
 0x71f   :  { %v2814_v33 = vmul.f32 %v3260_v55, %v2538_v50  ;;  %v2990_v29 = vadd.f32 %v4623_v19, %v2989_v4  ;;  %v2808_v32 = vmul.f32 %v3258_v54, %v2807_v13  ;;  %vm2820_vm0 = vweird.f32 %v3260_v55 }
 0x720   :  { %3261 = vrsqrt.f32 %v2539_v15  ;;  %vm2821_vm2 = vmor %vm2819_vm1, %vm2820_vm0  ;;  %vm2829_vm4 = vweird.f32 %v2539_v15 }
 0x721   :  { %v2815_v60 = vmul.f32 %v3260_v55, %v2814_v33  ;;  %3047 = vst [vmem:[#allocation10 + $0x98] sm:$0xff] %v2990_v29  ;;  %v2812_v5 = vsel %vm2811_vm15, %v3258_v54, %v2808_v32 }
 0x722   :  { %v2889_v16 = vmul.f32 %v2812_v5, %v4568_v17 }
 0x723   :  { %v2816_v26 = vmul.f32 0.5, %v2815_v60 }
 0x724   :  { %v2474_v43 = vpop.xlane.xlu2 %2473  ;;  %3009 = vmatmul.f32.gmra.mxu0 %v2889_v16 }
 0x725   :  { %v2817_v42 = vsub.f32 1.5, %v2816_v26  ;;  %v2508_v41 = vmul.f32 0.03125, %v2474_v43 }
 0x726   :  { %v3262_v28 = vpop.eup %3261  ;;  %v2992_v14 = vpop.f32.mrf.mxu0 }
 0x727   :  { %v2824_v10 = vmul.f32 %v3262_v28, %v2539_v15  ;;  %v2540_v34 = vadd.f32 1e-05, %v2508_v41  ;;  %v2818_v25 = vmul.f32 %v3260_v55, %v2817_v42  ;;  %v2993_v39 = vadd.f32 %v4623_v19, %v2992_v14 }
 0x728   :  { %vm2830_vm3 = vweird.f32 %v3262_v28 }
 0x729   :  { %v2825_v35 = vmul.f32 %v3262_v28, %v2824_v10  ;;  %3263 = vrsqrt.f32 %v2540_v34  ;;  %v2822_v11 = vsel %vm2821_vm2, %v3260_v55, %v2818_v25  ;;  %3048 = vst [vmem:[#allocation10 + $0xa0] sm:$0xff] %v2993_v39  ;;  %vm2831_vm5 = vmor %vm2829_vm4, %vm2830_vm3  ;;  %vm2839_vm8 = vweird.f32 %v2540_v34 }
 0x72a   :  { %v2890_v17 = vmul.f32 %v2822_v11, %v4577_v49 }
 0x72b   :  { %v2826_v44 = vmul.f32 0.5, %v2825_v35 }
 0x72c   :  { %v2476_v38 = vpop.xlane.xlu0 %2475  ;;  %3012 = vmatmul.f32.gmra.mxu0 %v2890_v17 }
 0x72d   :  { %v2827_v8 = vsub.f32 1.5, %v2826_v44  ;;  %v2509_v0 = vmul.f32 0.03125, %v2476_v38 }
 0x72e   :  { %v2995_v45 = vpop.f32.mrf.mxu0 }
 0x72f   :  { %v3264_v1 = vpop.eup %3263  ;;  %v2541_v53 = vadd.f32 1e-05, %v2509_v0  ;;  %v2828_v37 = vmul.f32 %v3262_v28, %v2827_v8  ;;  %v2996_v3 = vadd.f32 %v4623_v19, %v2995_v45 }
 0x730   :  { %v2834_v18 = vmul.f32 %v3264_v1, %v2540_v34  ;;  %vm2840_vm6 = vweird.f32 %v3264_v1 }
 0x731   :  { %3265 = vrsqrt.f32 %v2541_v53  ;;  %v2832_v48 = vsel %vm2831_vm5, %v3262_v28, %v2828_v37  ;;  %3049 = vst [vmem:[#allocation10 + $0xa8] sm:$0xff] %v2996_v3  ;;  %vm2841_vm9 = vmor %vm2839_vm8, %vm2840_vm6  ;;  %vm2849_vm10 = vweird.f32 %v2541_v53 }
 0x732   :  { %v2835_v63 = vmul.f32 %v3264_v1, %v2834_v18  ;;  %v2891_v49 = vmul.f32 %v2832_v48, %v4586_v27 }
 0x733   :  { %v2478_v12 = vpop.xlane.xlu1 %2477 }
 0x734   :  { %v2836_v2 = vmul.f32 0.5, %v2835_v63  ;;  %v2510_v30 = vmul.f32 0.03125, %v2478_v12  ;;  %3015 = vmatmul.f32.gmra.mxu0 %v2891_v49 }
 0x736   :  { %v2837_v9 = vsub.f32 1.5, %v2836_v2  ;;  %v2542_v52 = vadd.f32 1e-05, %v2510_v30 }
 0x737   :  { %v3266_v24 = vpop.eup %3265  ;;  %v2998_v36 = vpop.f32.mrf.mxu0 }
 0x738   :  { %v2844_v20 = vmul.f32 %v3266_v24, %v2541_v53  ;;  %3267 = vrsqrt.f32 %v2542_v52  ;;  %v2999_v7 = vadd.f32 %v4623_v19, %v2998_v36  ;;  %v2838_v47 = vmul.f32 %v3264_v1, %v2837_v9 }
 0x739   :  { %vm2850_vm7 = vweird.f32 %v3266_v24  ;;  %vm2859_vm13 = vweird.f32 %v2542_v52 }
 0x73a   :  { %v2845_v58 = vmul.f32 %v3266_v24, %v2844_v20  ;;  %3050 = vst [vmem:[#allocation10 + $0xb0] sm:$0xff] %v2999_v7  ;;  %v2842_v54 = vsel %vm2841_vm9, %v3264_v1, %v2838_v47  ;;  %vm2851_vm11 = vmor %vm2849_vm10, %vm2850_vm7 }
 0x73b   :  { %v2892_v50 = vmul.f32 %v2842_v54, %v4595_v31 }
 0x73c   :  { %v2846_v27 = vmul.f32 0.5, %v2845_v58 }
 0x73d   :  { %3018 = vmatmul.f32.gmra.mxu0 %v2892_v50 }
 0x73e   :  { %v3268_v59 = vpop.eup %3267  ;;  %v2847_v6 = vsub.f32 1.5, %v2846_v27 }
 0x73f   :  { %v2854_v61 = vmul.f32 %v3268_v59, %v2542_v52  ;;  %v3001_v62 = vpop.f32.mrf.mxu0  ;;  %vm2860_vm12 = vweird.f32 %v3268_v59 }
 0x740   :  { %v2848_v56 = vmul.f32 %v3266_v24, %v2847_v6  ;;  %v3002_v22 = vadd.f32 %v4623_v19, %v3001_v62  ;;  %vm2861_vm14 = vmor %vm2859_vm13, %vm2860_vm12 }
 0x741   :  { %v2855_v40 = vmul.f32 %v3268_v59, %v2854_v61 }
 0x742   :  { %v2852_v51 = vsel %vm2851_vm11, %v3266_v24, %v2848_v56  ;;  %3051 = vst [vmem:[#allocation10 + $0xb8] sm:$0xff] %v3002_v22 }
 0x743   :  { %v2856_v23 = vmul.f32 0.5, %v2855_v40  ;;  %v2893_v46 = vmul.f32 %v2852_v51, %v4604_v21 }
 0x745   :  { %v2857_v13 = vsub.f32 1.5, %v2856_v23  ;;  %3021 = vmatmul.f32.gmra.mxu0 %v2893_v46 }
 0x747   :  { %v2858_v31 = vmul.f32 %v3268_v59, %v2857_v13  ;;  %v3004_v55 = vpop.f32.mrf.mxu0 }
 0x748   :  { %v3005_v15 = vadd.f32 %v4623_v19, %v3004_v55 }
 0x749   :  { %v2862_v4 = vsel %vm2861_vm14, %v3268_v59, %v2858_v31 }
 0x74a   :  { %v2894_v33 = vmul.f32 %v2862_v4, %v4612_v57  ;;  %3052 = vst [vmem:[#allocation10 + $0xc0] sm:$0xff] %v3005_v15 }
 0x74d   :  { %3024 = vmatmul.f32.gmra.mxu0 %v2894_v33 }
 0x799   :  { %v3007_v29 = vpop.f32.mrf.mxu0 }
 0x79a   :  { %v3008_v32 = vadd.f32 %v4623_v19, %v3007_v29 }
 0x79c   :  { %3053 = vst [vmem:[#allocation10 + $0xc8] sm:$0xff] %v3008_v32 }
 0x7a1   :  { %v3010_v60 = vpop.f32.mrf.mxu0 }
 0x7a2   :  { %v3011_v21 = vadd.f32 %v4623_v19, %v3010_v60 }
 0x7a4   :  { %3054 = vst [vmem:[#allocation10 + $0xd0] sm:$0xff] %v3011_v21 }
 0x7a9   :  { %v3013_v5 = vpop.f32.mrf.mxu0 }
 0x7aa   :  { %v3014_v16 = vadd.f32 %v4623_v19, %v3013_v5 }
 0x7ac   :  { %3055 = vst [vmem:[#allocation10 + $0xd8] sm:$0xff] %v3014_v16 }
 0x7b1   :  { %v3016_v26 = vpop.f32.mrf.mxu0 }
 0x7b2   :  { %v3017_v43 = vadd.f32 %v4623_v19, %v3016_v26 }
 0x7b4   :  { %3056 = vst [vmem:[#allocation10 + $0xe0] sm:$0xff] %v3017_v43 }
 0x7ba   :  { %v3019_v42 = vpop.f32.mrf.mxu0 }
 0x7bb   :  { %v3020_v57 = vadd.f32 %v4623_v19, %v3019_v42 }
 0x7bd   :  { %3057 = vst [vmem:[#allocation10 + $0xe8] sm:$0xff] %v3020_v57 }
 0x7c2   :  { %v3022_v41 = vpop.f32.mrf.mxu0 }
 0x7c3   :  { %v3023_v28 = vadd.f32 %v4623_v19, %v3022_v41 }
 0x7c5   :  { %3058 = vst [vmem:[#allocation10 + $0xf0] sm:$0xff] %v3023_v28 }
 0x7ca   :  { %v3025_v10 = vpop.f32.mrf.mxu0 }
 0x7cb   :  { %v3026_v34 = vadd.f32 %v4623_v19, %v3025_v10 }
 0x7cd   :  { %3059 = vst [vmem:[#allocation10 + $0xf8] sm:$0xff] %v3026_v34 }
 0x7ce   :  { %3072 = dma.vmem_to_hbm [thread:$0]  %s3065_s29, 4096, %s3067_s11, [#allocation4], %s3400_s9, %s3400_s9, %s3401_s10  }
 0x7cf   :  { %3397 = dma.done.wait [#allocation4], 4096  }
 0x7d0   :  { %3398 = vsyncadd [#allocation4], 4294963200 }
 0x7d1   :  { %3077 = vsyncpa [#allocation3], 1 }
 0x7d2   :  { %3078 = vsyncpa [#allocation6], 1 }
 0x7d3   :  { %3079 = vsyncpa [#allocation9], 1 }
 0x7d4   :  { %3080 = vsyncpa [#allocation4], 1 }

</bundles_post_ra>
